<compile_context>
chip_gen: v7x
topology: tpu7x:2x2x1
jax: 0.10.0
libtpu: 0.0.40
codegen_flags: <defaults>
</compile_context>

<pallas_src>
import functools

import jax
import jax.numpy as jnp
import numpy as np
from jax.experimental import pallas as pl
from jax.experimental.pallas import tpu as pltpu

LN_EPS = 1e-5  # PyTorch nn.LayerNorm default
_INV_SQRT2 = 0.7071067811865476


# ---------------------------- erf capability probe ----------------------------
# nn.GELU() is the exact (erf) GELU.  Prefer the native lax.erf lowering inside the
# kernel; if Mosaic rejects it, fall back to a |err|<1.5e-7 polynomial built only
# from ops guaranteed to lower (exp / mul / add / where).

def _erf_supported():
    def k(x_ref, o_ref):
        o_ref[...] = jax.lax.erf(x_ref[...])
    try:
        x = jnp.ones((8, 128), jnp.float32)
        jax.block_until_ready(
            pl.pallas_call(k, out_shape=jax.ShapeDtypeStruct((8, 128), jnp.float32))(x))
        return True
    except Exception:
        return False


_NATIVE_ERF = _erf_supported()


def _erf(x):
    if _NATIVE_ERF:
        return jax.lax.erf(x)
    # Abramowitz & Stegun 7.1.26 (max abs error 1.5e-7).
    a1, a2, a3, a4, a5 = 0.254829592, -0.284496736, 1.421413741, -1.453152027, 1.061405429
    p = 0.3275911
    sgn = jnp.where(x >= 0.0, 1.0, -1.0)
    ax = jnp.abs(x)
    t = 1.0 / (1.0 + p * ax)
    poly = ((((a5 * t + a4) * t + a3) * t + a2) * t + a1) * t
    return sgn * (1.0 - poly * jnp.exp(-ax * ax))


# ---------------------------- Pallas kernels ----------------------------

def _ln_matmul_kernel(x_ref, g_ref, b_ref, w_ref, bias_ref, o_ref, *, act):
    """LayerNorm(x) @ W + b, optional exact-GELU epilogue."""
    x = x_ref[...].astype(jnp.float32)
    mean = jnp.mean(x, axis=-1, keepdims=True)
    xc = x - mean
    var = jnp.mean(xc * xc, axis=-1, keepdims=True)
    xn = xc * jax.lax.rsqrt(var + LN_EPS) * g_ref[...] + b_ref[...]
    y = jnp.dot(xn.astype(jnp.bfloat16), w_ref[...],
                preferred_element_type=jnp.float32) + bias_ref[...]
    if act == "gelu":
        y = 0.5 * y * (1.0 + _erf(y * _INV_SQRT2))
    o_ref[...] = y.astype(o_ref.dtype)


def _matmul_bias_res_kernel(x_ref, w_ref, b_ref, r_ref, o_ref):
    """x @ W + b + residual (proj / fc2 epilogue with fused residual add)."""
    y = jnp.dot(x_ref[...], w_ref[...], preferred_element_type=jnp.float32) + b_ref[...]
    o_ref[...] = (y + r_ref[...].astype(jnp.float32)).astype(o_ref.dtype)


def _matmul_ln_kernel(x_ref, w_ref, g_ref, b_ref, o_ref):
    """(im2col patches) @ W  followed by LayerNorm over the output channels."""
    y = jnp.dot(x_ref[...], w_ref[...], preferred_element_type=jnp.float32)
    mean = jnp.mean(y, axis=-1, keepdims=True)
    yc = y - mean
    var = jnp.mean(yc * yc, axis=-1, keepdims=True)
    o_ref[...] = (yc * jax.lax.rsqrt(var + LN_EPS) * g_ref[...] + b_ref[...]).astype(o_ref.dtype)


def _na_attn_kernel(qkv_ref, bias_ref, o_ref, *, num_heads, head_dim):
    """Neighborhood attention core for one batch element, all heads packed.

    qkv_ref: (1, N, 3*C) bf16 (q-scale already folded into the qkv weights)
    bias_ref: (heads, N, N) f32 — rpb inside the k*k window, -1e30 outside
    o_ref:   (1, N, C) bf16 — lane-dense packed-heads output
    """
    C = num_heads * head_dim
    qkv = qkv_ref[0]                                        # (N, 3C)
    outs = []
    for h in range(num_heads):                              # static unroll over heads
        q = qkv[:, h * head_dim:(h + 1) * head_dim]
        k = qkv[:, C + h * head_dim:C + (h + 1) * head_dim]
        v = qkv[:, 2 * C + h * head_dim:2 * C + (h + 1) * head_dim]
        s = jax.lax.dot_general(q, k, (((1,), (1,)), ((), ())),
                                preferred_element_type=jnp.float32)      # (N, N)
        s = s + bias_ref[h]
        m = jnp.max(s, axis=-1, keepdims=True)
        p = jnp.exp(s - m)
        p = p * pl.reciprocal(jnp.sum(p, axis=-1, keepdims=True), approx=True)
        outs.append(jnp.dot(p.astype(v.dtype), v, preferred_element_type=jnp.float32))
    o_ref[0] = jnp.concatenate(outs, axis=-1).astype(o_ref.dtype)


# ---------------------------- wrappers ----------------------------

def _row_tile(M, target=256):
    """Largest row tile <= target, preferring one that divides M (no pad round trip)."""
    if M <= target:
        return M
    for tm in (target, target // 2, target // 4, 64, 32, 16, 8):
        if M % tm == 0:
            return tm
    return target  # padded fallback


def _pad_rows(x2d, tm):
    M = x2d.shape[0]
    Mp = ((M + tm - 1) // tm) * tm
    if Mp != M:
        x2d = jnp.pad(x2d, ((0, Mp - M), (0, 0)))
    return x2d, M, Mp


def ln_matmul(x2d, g, b, w, bias, act=None):
    M, K = x2d.shape
    N = w.shape[1]
    tm = _row_tile(M)
    xpad, M0, Mp = _pad_rows(x2d, tm)
    out = pl.pallas_call(
        functools.partial(_ln_matmul_kernel, act=act),
        out_shape=jax.ShapeDtypeStruct((Mp, N), jnp.bfloat16),
        grid=(Mp // tm,),
        in_specs=[
            pl.BlockSpec((tm, K), lambda i: (i, 0)),
            pl.BlockSpec((1, K), lambda i: (0, 0)),
            pl.BlockSpec((1, K), lambda i: (0, 0)),
            pl.BlockSpec((K, N), lambda i: (0, 0)),
            pl.BlockSpec((1, N), lambda i: (0, 0)),
        ],
        out_specs=pl.BlockSpec((tm, N), lambda i: (i, 0)),
        compiler_params=pltpu.CompilerParams(dimension_semantics=("parallel",)),
    )(xpad, g, b, w, bias)
    return out if Mp == M0 else out[:M0]


def matmul_bias_res(x2d, w, bias, res2d):
    M, K = x2d.shape
    N = w.shape[1]
    tm = _row_tile(M)
    xpad, M0, Mp = _pad_rows(x2d, tm)
    rpad, _, _ = _pad_rows(res2d, tm)
    out = pl.pallas_call(
        _matmul_bias_res_kernel,
        out_shape=jax.ShapeDtypeStruct((Mp, N), jnp.bfloat16),
        grid=(Mp // tm,),
        in_specs=[
            pl.BlockSpec((tm, K), lambda i: (i, 0)),
            pl.BlockSpec((K, N), lambda i: (0, 0)),
            pl.BlockSpec((1, N), lambda i: (0, 0)),
            pl.BlockSpec((tm, N), lambda i: (i, 0)),
        ],
        out_specs=pl.BlockSpec((tm, N), lambda i: (i, 0)),
        compiler_params=pltpu.CompilerParams(dimension_semantics=("parallel",)),
    )(xpad, w, bias, rpad)
    return out if Mp == M0 else out[:M0]


def matmul_ln(x2d, w, g, b):
    M, K = x2d.shape
    N = w.shape[1]
    tm = _row_tile(M)
    xpad, M0, Mp = _pad_rows(x2d, tm)
    out = pl.pallas_call(
        _matmul_ln_kernel,
        out_shape=jax.ShapeDtypeStruct((Mp, N), jnp.bfloat16),
        grid=(Mp // tm,),
        in_specs=[
            pl.BlockSpec((tm, K), lambda i: (i, 0)),
            pl.BlockSpec((K, N), lambda i: (0, 0)),
            pl.BlockSpec((1, N), lambda i: (0, 0)),
            pl.BlockSpec((1, N), lambda i: (0, 0)),
        ],
        out_specs=pl.BlockSpec((tm, N), lambda i: (i, 0)),
        compiler_params=pltpu.CompilerParams(dimension_semantics=("parallel",)),
    )(xpad, w, g, b)
    return out if Mp == M0 else out[:M0]


def na_attention_core(qkv, bias, num_heads, head_dim):
    # qkv: (B, N, 3C) bf16;  bias: (heads, N, N) f32 — shared across the batch grid.
    B, N, threeC = qkv.shape
    C = num_heads * head_dim
    heads = bias.shape[0]
    kern = functools.partial(_na_attn_kernel, num_heads=num_heads, head_dim=head_dim)
    return pl.pallas_call(
        kern,
        out_shape=jax.ShapeDtypeStruct((B, N, C), jnp.bfloat16),
        grid=(B,),
        in_specs=[
            pl.BlockSpec((1, N, threeC), lambda b: (b, 0, 0)),
            pl.BlockSpec((heads, N, N), lambda b: (0, 0, 0)),   # reused, not replicated per batch
        ],
        out_specs=pl.BlockSpec((1, N, C), lambda b: (b, 0, 0)),
        compiler_params=pltpu.CompilerParams(dimension_semantics=("parallel",)),
    )(qkv, bias)


# ---------------------------- NAT building blocks ----------------------------

def build_na_bias(H, W, kernel_size, rpb):
    """Additive (heads, H*W, H*W) bias encoding NATTEN's clamped k*k window +
    relative position bias.  Outside the window: -1e30 (masked)."""
    k = kernel_size
    r = k // 2
    ih = np.arange(H)
    iw = np.arange(W)
    start_h = np.clip(ih - r, 0, H - k)
    start_w = np.clip(iw - r, 0, W - k)
    a = np.arange(H)
    b = np.arange(W)
    valid_h = (a[None, :] >= start_h[:, None]) & (a[None, :] < start_h[:, None] + k)
    valid_w = (b[None, :] >= start_w[:, None]) & (b[None, :] < start_w[:, None] + k)
    rel_h = np.clip(a[None, :] - ih[:, None] + (k - 1), 0, 2 * k - 2)   # (H, H)
    rel_w = np.clip(b[None, :] - iw[:, None] + (k - 1), 0, 2 * k - 2)   # (W, W)
    idx = rel_h[:, None, :, None] * (2 * k - 1) + rel_w[None, :, None, :]  # (H,W,H,W)
    heads = rpb.shape[0]
    rpb_flat = rpb.reshape(heads, -1)
    bias = jnp.take(rpb_flat, jnp.asarray(idx.reshape(-1)), axis=1)
    bias = bias.reshape(heads, H, W, H, W)
    mask = jnp.asarray(valid_h[:, None, :, None] & valid_w[None, :, None, :])
    bias = jnp.where(mask[None], bias, jnp.float32(-1e30))
    return bias.reshape(heads, H * W, H * W).astype(jnp.float32)


def nat_layer(x, p, num_heads, head_dim):
    B, H, W, C = x.shape
    N = H * W
    x2d = x.reshape(B * N, C)
    # norm1 + qkv (q-scale folded into the weights at init)
    qkv = ln_matmul(x2d, p["norm1_g"], p["norm1_b"], p["qkv_w"], p["qkv_b"])     # (B*N, 3C)
    # neighborhood attention core (heads packed, lane-dense output)
    o = na_attention_core(qkv.reshape(B, N, 3 * C), p["na_bias"], num_heads, head_dim)
    # proj + residual
    x2d = matmul_bias_res(o.reshape(B * N, C), p["proj_w"], p["proj_b"], x2d)
    # norm2 + fc1 + exact GELU
    h = ln_matmul(x2d, p["norm2_g"], p["norm2_b"], p["fc1_w"], p["fc1_b"], act="gelu")
    # fc2 + residual
    x2d = matmul_bias_res(h, p["fc2_w"], p["fc2_b"], x2d)
    return x2d.reshape(B, H, W, C)


def conv_downsampler(x, p):
    # Conv2d(dim, 2*dim, k=3, s=2, pad=1, bias=False) + LayerNorm(2*dim), NHWC.
    # im2col stays as XLA glue feeding one fused Pallas matmul+LN kernel.
    B, H, W, C = x.shape
    Ho = (H - 1) // 2 + 1
    Wo = (W - 1) // 2 + 1
    xp = jnp.pad(x, ((0, 0), (1, 1), (1, 1), (0, 0)))
    patches = [xp[:, kh:kh + 2 * Ho:2, kw:kw + 2 * Wo:2, :]
               for kh in range(3) for kw in range(3)]
    patches = jnp.concatenate(patches, axis=-1).reshape(B * Ho * Wo, 9 * C)     # (B*Ho*Wo, 9C)
    y = matmul_ln(patches, p["conv_w_mat"], p["ds_norm_g"], p["ds_norm_b"])
    return y.reshape(B, Ho, Wo, 2 * C)


def nat_block(x, params, num_heads, kernel_size):
    del kernel_size  # window encoded in the precomputed na_bias
    head_dim = x.shape[-1] // num_heads
    x = x.astype(jnp.bfloat16)
    for p in params["layers"]:
        x = nat_layer(x, p, num_heads, head_dim)
    down = conv_downsampler(x, params["down"])
    # matches NATBlock: (self.downsample(x), x)
    return down.astype(jnp.float32), x.astype(jnp.float32)


# ---------------------------- parameter init ----------------------------

def init_params(key, dim, depth, num_heads, kernel_size, mlp_ratio, H, W):
    hidden = int(dim * mlp_ratio)
    head_dim = dim // num_heads
    scale = float(head_dim) ** -0.5

    def w(k_, shape, s=0.02):
        return s * jax.random.normal(k_, shape, jnp.float32)

    keys = iter(jax.random.split(key, depth * 6 + 2))
    layers = []
    for _ in range(depth):
        rpb = w(next(keys), (num_heads, 2 * kernel_size - 1, 2 * kernel_size - 1))
        qkv_w = w(next(keys), (dim, 3 * dim))
        qkv_b = jnp.zeros((3 * dim,), jnp.float32)
        # fold the q scale into W_q / b_q (removes per-step q*scale multiplies in-kernel)
        qkv_w = qkv_w.at[:, :dim].multiply(scale)
        qkv_b = qkv_b.at[:dim].multiply(scale)
        layers.append(dict(
            norm1_g=jnp.ones((1, dim), jnp.float32),
            norm1_b=jnp.zeros((1, dim), jnp.float32),
            qkv_w=qkv_w.astype(jnp.bfloat16),
            qkv_b=qkv_b.reshape(1, 3 * dim),
            proj_w=w(next(keys), (dim, dim)).astype(jnp.bfloat16),
            proj_b=jnp.zeros((1, dim), jnp.float32),
            na_bias=build_na_bias(H, W, kernel_size, rpb),
            norm2_g=jnp.ones((1, dim), jnp.float32),
            norm2_b=jnp.zeros((1, dim), jnp.float32),
            fc1_w=w(next(keys), (dim, hidden)).astype(jnp.bfloat16),
            fc1_b=jnp.zeros((1, hidden), jnp.float32),
            fc2_w=w(next(keys), (hidden, dim)).astype(jnp.bfloat16),
            fc2_b=jnp.zeros((1, dim), jnp.float32),
        ))
    conv_w = w(next(keys), (2 * dim, dim, 3, 3))               # (out, in, kh, kw) — PyTorch layout
    conv_w_mat = jnp.transpose(conv_w, (2, 3, 1, 0)).reshape(9 * dim, 2 * dim).astype(jnp.bfloat16)
    down = dict(
        conv_w_mat=conv_w_mat,
        ds_norm_g=jnp.ones((1, 2 * dim), jnp.float32),
        ds_norm_b=jnp.zeros((1, 2 * dim), jnp.float32),
    )
    return dict(layers=layers, down=down)


# ---------------------------- main ----------------------------

if __name__ == "__main__":
    B, H, W = 2, 16, 16
    dim, depth, num_heads, kernel_size, mlp_ratio = 32, 2, 2, 7, 4.0

    key = jax.random.PRNGKey(0)
    kx, kp = jax.random.split(key)
    x = jax.random.normal(kx, (B, H, W, dim), jnp.float32)
    params = init_params(kp, dim, depth, num_heads, kernel_size, mlp_ratio, H, W)

    fwd = jax.jit(functools.partial(nat_block, num_heads=num_heads, kernel_size=kernel_size))
    down, out = fwd(x, params)
    jax.block_until_ready((down, out))
    assert out.shape == (B, H, W, dim)
    assert down.shape == (B, H // 2, W // 2, 2 * dim)
    print("KERNEL_OK")
</pallas_src>

<mosaic_0001>
module attributes {stable_mosaic.version = 11 : i64} {
  func.func @k(%arg0: memref<8x128xf32, #tpu.memory_space<vmem>>, %arg1: memref<8x128xf32, #tpu.memory_space<vmem>>) attributes {dimension_semantics = [], scalar_prefetch = 0 : i64, scratch_operands = 0 : i64, tpu.core_type = #tpu.core_type<tc>} {
    %c0 = arith.constant 0 : index
    %c0_0 = arith.constant 0 : index
    %0 = vector.load %arg0[%c0, %c0_0] : memref<8x128xf32, #tpu.memory_space<vmem>>, vector<8x128xf32>
    %1 = math.erf %0 : vector<8x128xf32>
    %c0_1 = arith.constant 0 : index
    %c0_2 = arith.constant 0 : index
    %2 = vector.load %arg1[%c0_1, %c0_2] : memref<8x128xf32, #tpu.memory_space<vmem>>, vector<8x128xf32>
    tpu.vector_store %arg1[%c0_1, %c0_2], %1 {strides = array<i32>} : memref<8x128xf32, #tpu.memory_space<vmem>>, vector<8x128xf32>,
    return
  }
}

module attributes {stable_mosaic.version = 11 : i64} {
  func.func @_matmul_bias_res_kernel(%arg0: i32, %arg1: memref<256x32xbf16, #tpu.memory_space<vmem>>, %arg2: memref<32x32xbf16, #tpu.memory_space<vmem>>, %arg3: memref<1x32xf32, #tpu.memory_space<vmem>>, %arg4: memref<256x32xbf16, #tpu.memory_space<vmem>>, %arg5: memref<256x32xbf16, #tpu.memory_space<vmem>>) attributes {dimension_semantics = [#tpu.dimension_semantics<parallel>], iteration_bounds = array<i64: 2>, scalar_prefetch = 0 : i64, scratch_operands = 0 : i64, tpu.core_type = #tpu.core_type<tc>, window_params = [{transform_indices = @transform_0, window_bounds = array<i64: 256, 32>}, {pipeline_mode = #tpu.pipeline_mode<synchronous>, transform_indices = @transform_1, window_bounds = array<i64: 32, 32>}, {pipeline_mode = #tpu.pipeline_mode<synchronous>, transform_indices = @transform_2, window_bounds = array<i64: 1, 32>}, {transform_indices = @transform_3, window_bounds = array<i64: 256, 32>}, {transform_indices = @transform_4, window_bounds = array<i64: 256, 32>}]} {
    %c0 = arith.constant 0 : index
    %c0_0 = arith.constant 0 : index
    %0 = vector.load %arg1[%c0, %c0_0] : memref<256x32xbf16, #tpu.memory_space<vmem>>, vector<256x32xbf16>
    %c0_1 = arith.constant 0 : index
    %c0_2 = arith.constant 0 : index
    %1 = vector.load %arg2[%c0_1, %c0_2] : memref<32x32xbf16, #tpu.memory_space<vmem>>, vector<32x32xbf16>
    %cst = arith.constant dense<0.000000e+00> : vector<256x32xf32>
    %2 = tpu.matmul %0, %1, %cst {dimension_numbers = #tpu.dot_dimension_numbers<[1], [0], [0], [1], [0, 0, 1, 1], [], []>} : vector<256x32xbf16>, vector<32x32xbf16>, vector<256x32xf32> -> vector<256x32xf32>
    %c0_3 = arith.constant 0 : index
    %c0_4 = arith.constant 0 : index
    %3 = vector.load %arg3[%c0_3, %c0_4] : memref<1x32xf32, #tpu.memory_space<vmem>>, vector<1x32xf32>
    %4 = vector.broadcast %3 : vector<1x32xf32> to vector<256x32xf32>
    %5 = arith.addf %2, %4 : vector<256x32xf32>
    %c0_5 = arith.constant 0 : index
    %c0_6 = arith.constant 0 : index
    %6 = vector.load %arg4[%c0_5, %c0_6] : memref<256x32xbf16, #tpu.memory_space<vmem>>, vector<256x32xbf16>
    %7 = arith.extf %6 : vector<256x32xbf16> to vector<256x32xf32>
    %8 = arith.addf %5, %7 : vector<256x32xf32>
    %9 = arith.truncf %8 : vector<256x32xf32> to vector<256x32xbf16>
    %c0_7 = arith.constant 0 : index
    %c0_8 = arith.constant 0 : index
    %10 = vector.load %arg5[%c0_7, %c0_8] : memref<256x32xbf16, #tpu.memory_space<vmem>>, vector<256x32xbf16>
    tpu.vector_store %arg5[%c0_7, %c0_8], %9 {strides = array<i32>} : memref<256x32xbf16, #tpu.memory_space<vmem>>, vector<256x32xbf16>,
    return
  }
  func.func @transform_0(%arg0: i32) -> (i32, i32) {
    %c0_i32 = arith.constant 0 : i32
    %c0_i32_0 = arith.constant 0 : i32
    return %arg0, %c0_i32 : i32, i32
  }
  func.func @transform_1(%arg0: i32) -> (i32, i32) {
    %c0_i32 = arith.constant 0 : i32
    %c0_i32_0 = arith.constant 0 : i32
    %c0_i32_1 = arith.constant 0 : i32
    return %c0_i32, %c0_i32_0 : i32, i32
  }
  func.func @transform_2(%arg0: i32) -> (i32, i32) {
    %c0_i32 = arith.constant 0 : i32
    %c0_i32_0 = arith.constant 0 : i32
    %c0_i32_1 = arith.constant 0 : i32
    return %c0_i32, %c0_i32_0 : i32, i32
  }
  func.func @transform_3(%arg0: i32) -> (i32, i32) {
    %c0_i32 = arith.constant 0 : i32
    %c0_i32_0 = arith.constant 0 : i32
    return %arg0, %c0_i32 : i32, i32
  }
  func.func @transform_4(%arg0: i32) -> (i32, i32) {
    %c0_i32 = arith.constant 0 : i32
    %c0_i32_0 = arith.constant 0 : i32
    return %arg0, %c0_i32 : i32, i32
  }
}

module attributes {stable_mosaic.version = 11 : i64} {
  func.func @_ln_matmul_kernel(%arg0: i32, %arg1: memref<256x32xbf16, #tpu.memory_space<vmem>>, %arg2: memref<1x32xf32, #tpu.memory_space<vmem>>, %arg3: memref<1x32xf32, #tpu.memory_space<vmem>>, %arg4: memref<32x96xbf16, #tpu.memory_space<vmem>>, %arg5: memref<1x96xf32, #tpu.memory_space<vmem>>, %arg6: memref<256x96xbf16, #tpu.memory_space<vmem>>) attributes {dimension_semantics = [#tpu.dimension_semantics<parallel>], iteration_bounds = array<i64: 2>, scalar_prefetch = 0 : i64, scratch_operands = 0 : i64, tpu.core_type = #tpu.core_type<tc>, window_params = [{transform_indices = @transform_0, window_bounds = array<i64: 256, 32>}, {pipeline_mode = #tpu.pipeline_mode<synchronous>, transform_indices = @transform_1, window_bounds = array<i64: 1, 32>}, {pipeline_mode = #tpu.pipeline_mode<synchronous>, transform_indices = @transform_2, window_bounds = array<i64: 1, 32>}, {pipeline_mode = #tpu.pipeline_mode<synchronous>, transform_indices = @transform_3, window_bounds = array<i64: 32, 96>}, {pipeline_mode = #tpu.pipeline_mode<synchronous>, transform_indices = @transform_4, window_bounds = array<i64: 1, 96>}, {transform_indices = @transform_5, window_bounds = array<i64: 256, 96>}]} {
    %c0 = arith.constant 0 : index
    %c0_0 = arith.constant 0 : index
    %0 = vector.load %arg1[%c0, %c0_0] : memref<256x32xbf16, #tpu.memory_space<vmem>>, vector<256x32xbf16>
    %1 = arith.extf %0 : vector<256x32xbf16> to vector<256x32xf32>
    %cst = arith.constant dense<0.000000e+00> : vector<256xf32>
    %2 = vector.multi_reduction <add>, %1, %cst [1] : vector<256x32xf32> to vector<256xf32>
    %3 = vector.shape_cast %2 : vector<256xf32> to vector<256x1xf32>
    %cst_1 = arith.constant 3.200000e+01 : f32
    %4 = vector.broadcast %cst_1 : f32 to vector<256x1xf32>
    %5 = arith.divf %3, %4 : vector<256x1xf32>
    %6 = vector.broadcast %5 : vector<256x1xf32> to vector<256x32xf32>
    %7 = arith.subf %1, %6 : vector<256x32xf32>
    %8 = arith.mulf %7, %7 : vector<256x32xf32>
    %cst_2 = arith.constant dense<0.000000e+00> : vector<256xf32>
    %9 = vector.multi_reduction <add>, %8, %cst_2 [1] : vector<256x32xf32> to vector<256xf32>
    %10 = vector.shape_cast %9 : vector<256xf32> to vector<256x1xf32>
    %cst_3 = arith.constant 3.200000e+01 : f32
    %11 = vector.broadcast %cst_3 : f32 to vector<256x1xf32>
    %12 = arith.divf %10, %11 : vector<256x1xf32>
    %cst_4 = arith.constant 9.99999974E-6 : f32
    %13 = vector.broadcast %cst_4 : f32 to vector<256x1xf32>
    %14 = arith.addf %12, %13 : vector<256x1xf32>
    %15 = math.rsqrt %14 : vector<256x1xf32>
    %16 = vector.broadcast %15 : vector<256x1xf32> to vector<256x32xf32>
    %17 = arith.mulf %7, %16 : vector<256x32xf32>
    %c0_5 = arith.constant 0 : index
    %c0_6 = arith.constant 0 : index
    %18 = vector.load %arg2[%c0_5, %c0_6] : memref<1x32xf32, #tpu.memory_space<vmem>>, vector<1x32xf32>
    %19 = vector.broadcast %18 : vector<1x32xf32> to vector<256x32xf32>
    %20 = arith.mulf %17, %19 : vector<256x32xf32>
    %c0_7 = arith.constant 0 : index
    %c0_8 = arith.constant 0 : index
    %21 = vector.load %arg3[%c0_7, %c0_8] : memref<1x32xf32, #tpu.memory_space<vmem>>, vector<1x32xf32>
    %22 = vector.broadcast %21 : vector<1x32xf32> to vector<256x32xf32>
    %23 = arith.addf %20, %22 : vector<256x32xf32>
    %24 = arith.truncf %23 : vector<256x32xf32> to vector<256x32xbf16>
    %c0_9 = arith.constant 0 : index
    %c0_10 = arith.constant 0 : index
    %25 = vector.load %arg4[%c0_9, %c0_10] : memref<32x96xbf16, #tpu.memory_space<vmem>>, vector<32x96xbf16>
    %cst_11 = arith.constant dense<0.000000e+00> : vector<256x96xf32>
    %26 = tpu.matmul %24, %25, %cst_11 {dimension_numbers = #tpu.dot_dimension_numbers<[1], [0], [0], [1], [0, 0, 1, 1], [], []>} : vector<256x32xbf16>, vector<32x96xbf16>, vector<256x96xf32> -> vector<256x96xf32>
    %c0_12 = arith.constant 0 : index
    %c0_13 = arith.constant 0 : index
    %27 = vector.load %arg5[%c0_12, %c0_13] : memref<1x96xf32, #tpu.memory_space<vmem>>, vector<1x96xf32>
    %28 = vector.broadcast %27 : vector<1x96xf32> to vector<256x96xf32>
    %29 = arith.addf %26, %28 : vector<256x96xf32>
    %30 = arith.truncf %29 : vector<256x96xf32> to vector<256x96xbf16>
    %c0_14 = arith.constant 0 : index
    %c0_15 = arith.constant 0 : index
    %31 = vector.load %arg6[%c0_14, %c0_15] : memref<256x96xbf16, #tpu.memory_space<vmem>>, vector<256x96xbf16>
    tpu.vector_store %arg6[%c0_14, %c0_15], %30 {strides = array<i32>} : memref<256x96xbf16, #tpu.memory_space<vmem>>, vector<256x96xbf16>,
    return
  }
  func.func @transform_0(%arg0: i32) -> (i32, i32) {
    %c0_i32 = arith.constant 0 : i32
    %c0_i32_0 = arith.constant 0 : i32
    return %arg0, %c0_i32 : i32, i32
  }
  func.func @transform_1(%arg0: i32) -> (i32, i32) {
    %c0_i32 = arith.constant 0 : i32
    %c0_i32_0 = arith.constant 0 : i32
    %c0_i32_1 = arith.constant 0 : i32
    return %c0_i32, %c0_i32_0 : i32, i32
  }
  func.func @transform_2(%arg0: i32) -> (i32, i32) {
    %c0_i32 = arith.constant 0 : i32
    %c0_i32_0 = arith.constant 0 : i32
    %c0_i32_1 = arith.constant 0 : i32
    return %c0_i32, %c0_i32_0 : i32, i32
  }
  func.func @transform_3(%arg0: i32) -> (i32, i32) {
    %c0_i32 = arith.constant 0 : i32
    %c0_i32_0 = arith.constant 0 : i32
    %c0_i32_1 = arith.constant 0 : i32
    return %c0_i32, %c0_i32_0 : i32, i32
  }
  func.func @transform_4(%arg0: i32) -> (i32, i32) {
    %c0_i32 = arith.constant 0 : i32
    %c0_i32_0 = arith.constant 0 : i32
    %c0_i32_1 = arith.constant 0 : i32
    return %c0_i32, %c0_i32_0 : i32, i32
  }
  func.func @transform_5(%arg0: i32) -> (i32, i32) {
    %c0_i32 = arith.constant 0 : i32
    %c0_i32_0 = arith.constant 0 : i32
    return %arg0, %c0_i32 : i32, i32
  }
}

module attributes {stable_mosaic.version = 11 : i64} {
  func.func @_na_attn_kernel(%arg0: i32, %arg1: memref<1x256x96xbf16, #tpu.memory_space<vmem>>, %arg2: memref<2x256x256xf32, #tpu.memory_space<vmem>>, %arg3: memref<1x256x32xbf16, #tpu.memory_space<vmem>>) attributes {dimension_semantics = [#tpu.dimension_semantics<parallel>], iteration_bounds = array<i64: 2>, scalar_prefetch = 0 : i64, scratch_operands = 0 : i64, tpu.core_type = #tpu.core_type<tc>, window_params = [{transform_indices = @transform_0, window_bounds = array<i64: 1, 256, 96>}, {pipeline_mode = #tpu.pipeline_mode<synchronous>, transform_indices = @transform_1, window_bounds = array<i64: 2, 256, 256>}, {transform_indices = @transform_2, window_bounds = array<i64: 1, 256, 32>}]} {
    %c0 = arith.constant 0 : index
    %c0_0 = arith.constant 0 : index
    %c0_1 = arith.constant 0 : index
    %0 = vector.load %arg1[%c0, %c0_0, %c0_1] : memref<1x256x96xbf16, #tpu.memory_space<vmem>>, vector<1x256x96xbf16>
    %1 = vector.shape_cast %0 : vector<1x256x96xbf16> to vector<256x96xbf16>
    %2 = vector.extract_strided_slice %1 {offsets = [0, 0], sizes = [256, 16], strides = [1, 1]} : vector<256x96xbf16> to vector<256x16xbf16>
    %3 = vector.extract_strided_slice %1 {offsets = [0, 32], sizes = [256, 16], strides = [1, 1]} : vector<256x96xbf16> to vector<256x16xbf16>
    %4 = vector.extract_strided_slice %1 {offsets = [0, 64], sizes = [256, 16], strides = [1, 1]} : vector<256x96xbf16> to vector<256x16xbf16>
    %cst = arith.constant dense<0.000000e+00> : vector<256x256xf32>
    %5 = tpu.matmul %2, %3, %cst {dimension_numbers = #tpu.dot_dimension_numbers<[1], [1], [0], [0], [0, 0, 1, 0], [], []>} : vector<256x16xbf16>, vector<256x16xbf16>, vector<256x256xf32> -> vector<256x256xf32>
    %c0_2 = arith.constant 0 : index
    %c0_3 = arith.constant 0 : index
    %c0_4 = arith.constant 0 : index
    %6 = vector.load %arg2[%c0_2, %c0_3, %c0_4] : memref<2x256x256xf32, #tpu.memory_space<vmem>>, vector<1x256x256xf32>
    %7 = vector.shape_cast %6 : vector<1x256x256xf32> to vector<256x256xf32>
    %8 = arith.addf %5, %7 : vector<256x256xf32>
    %cst_5 = arith.constant dense<0xFF800000> : vector<256xf32>
    %9 = vector.multi_reduction <maximumf>, %8, %cst_5 [1] : vector<256x256xf32> to vector<256xf32>
    %10 = vector.shape_cast %9 : vector<256xf32> to vector<256x1xf32>
    %11 = vector.broadcast %10 : vector<256x1xf32> to vector<256x256xf32>
    %12 = arith.subf %8, %11 : vector<256x256xf32>
    %13 = math.exp %12 : vector<256x256xf32>
    %cst_6 = arith.constant dense<0.000000e+00> : vector<256xf32>
    %14 = vector.multi_reduction <add>, %13, %cst_6 [1] : vector<256x256xf32> to vector<256xf32>
    %15 = vector.shape_cast %14 : vector<256xf32> to vector<256x1xf32>
    %16 = tpu.reciprocal %15 {approx = true} : vector<256x1xf32> -> vector<256x1xf32>
    %17 = vector.broadcast %16 : vector<256x1xf32> to vector<256x256xf32>
    %18 = arith.mulf %13, %17 : vector<256x256xf32>
    %19 = arith.truncf %18 : vector<256x256xf32> to vector<256x256xbf16>
    %cst_7 = arith.constant dense<0.000000e+00> : vector<256x16xf32>
    %20 = tpu.matmul %19, %4, %cst_7 {dimension_numbers = #tpu.dot_dimension_numbers<[1], [0], [0], [1], [0, 0, 1, 1], [], []>} : vector<256x256xbf16>, vector<256x16xbf16>, vector<256x16xf32> -> vector<256x16xf32>
    %21 = vector.extract_strided_slice %1 {offsets = [0, 16], sizes = [256, 16], strides = [1, 1]} : vector<256x96xbf16> to vector<256x16xbf16>
    %22 = vector.extract_strided_slice %1 {offsets = [0, 48], sizes = [256, 16], strides = [1, 1]} : vector<256x96xbf16> to vector<256x16xbf16>
    %23 = vector.extract_strided_slice %1 {offsets = [0, 80], sizes = [256, 16], strides = [1, 1]} : vector<256x96xbf16> to vector<256x16xbf16>
    %cst_8 = arith.constant dense<0.000000e+00> : vector<256x256xf32>
    %24 = tpu.matmul %21, %22, %cst_8 {dimension_numbers = #tpu.dot_dimension_numbers<[1], [1], [0], [0], [0, 0, 1, 0], [], []>} : vector<256x16xbf16>, vector<256x16xbf16>, vector<256x256xf32> -> vector<256x256xf32>
    %c1 = arith.constant 1 : index
    %c0_9 = arith.constant 0 : index
    %c0_10 = arith.constant 0 : index
    %25 = vector.load %arg2[%c1, %c0_9, %c0_10] : memref<2x256x256xf32, #tpu.memory_space<vmem>>, vector<1x256x256xf32>
    %26 = vector.shape_cast %25 : vector<1x256x256xf32> to vector<256x256xf32>
    %27 = arith.addf %24, %26 : vector<256x256xf32>
    %cst_11 = arith.constant dense<0xFF800000> : vector<256xf32>
    %28 = vector.multi_reduction <maximumf>, %27, %cst_11 [1] : vector<256x256xf32> to vector<256xf32>
    %29 = vector.shape_cast %28 : vector<256xf32> to vector<256x1xf32>
    %30 = vector.broadcast %29 : vector<256x1xf32> to vector<256x256xf32>
    %31 = arith.subf %27, %30 : vector<256x256xf32>
    %32 = math.exp %31 : vector<256x256xf32>
    %cst_12 = arith.constant dense<0.000000e+00> : vector<256xf32>
    %33 = vector.multi_reduction <add>, %32, %cst_12 [1] : vector<256x256xf32> to vector<256xf32>
    %34 = vector.shape_cast %33 : vector<256xf32> to vector<256x1xf32>
    %35 = tpu.reciprocal %34 {approx = true} : vector<256x1xf32> -> vector<256x1xf32>
    %36 = vector.broadcast %35 : vector<256x1xf32> to vector<256x256xf32>
    %37 = arith.mulf %32, %36 : vector<256x256xf32>
    %38 = arith.truncf %37 : vector<256x256xf32> to vector<256x256xbf16>
    %cst_13 = arith.constant dense<0.000000e+00> : vector<256x16xf32>
    %39 = tpu.matmul %38, %23, %cst_13 {dimension_numbers = #tpu.dot_dimension_numbers<[1], [0], [0], [1], [0, 0, 1, 1], [], []>} : vector<256x256xbf16>, vector<256x16xbf16>, vector<256x16xf32> -> vector<256x16xf32>
    %40 = tpu.concatenate %20, %39 in 1 : vector<256x16xf32>, vector<256x16xf32> -> vector<256x32xf32>
    %41 = arith.truncf %40 : vector<256x32xf32> to vector<256x32xbf16>
    %c0_14 = arith.constant 0 : index
    %c0_15 = arith.constant 0 : index
    %c0_16 = arith.constant 0 : index
    %42 = vector.load %arg3[%c0_14, %c0_15, %c0_16] : memref<1x256x32xbf16, #tpu.memory_space<vmem>>, vector<1x256x32xbf16>
    %43 = vector.shape_cast %42 : vector<1x256x32xbf16> to vector<256x32xbf16>
    %44 = vector.shape_cast %41 : vector<256x32xbf16> to vector<1x256x32xbf16>
    tpu.vector_store %arg3[%c0_14, %c0_15, %c0_16], %44 {strides = array<i32>} : memref<1x256x32xbf16, #tpu.memory_space<vmem>>, vector<1x256x32xbf16>,
    return
  }
  func.func @transform_0(%arg0: i32) -> (i32, i32, i32) {
    %c0_i32 = arith.constant 0 : i32
    %c0_i32_0 = arith.constant 0 : i32
    %c0_i32_1 = arith.constant 0 : i32
    return %arg0, %c0_i32, %c0_i32_0 : i32, i32, i32
  }
  func.func @transform_1(%arg0: i32) -> (i32, i32, i32) {
    %c0_i32 = arith.constant 0 : i32
    %c0_i32_0 = arith.constant 0 : i32
    %c0_i32_1 = arith.constant 0 : i32
    %c0_i32_2 = arith.constant 0 : i32
    return %c0_i32, %c0_i32_0, %c0_i32_1 : i32, i32, i32
  }
  func.func @transform_2(%arg0: i32) -> (i32, i32, i32) {
    %c0_i32 = arith.constant 0 : i32
    %c0_i32_0 = arith.constant 0 : i32
    %c0_i32_1 = arith.constant 0 : i32
    return %arg0, %c0_i32, %c0_i32_0 : i32, i32, i32
  }
}

module attributes {stable_mosaic.version = 11 : i64} {
  func.func @_ln_matmul_kernel(%arg0: i32, %arg1: memref<256x32xbf16, #tpu.memory_space<vmem>>, %arg2: memref<1x32xf32, #tpu.memory_space<vmem>>, %arg3: memref<1x32xf32, #tpu.memory_space<vmem>>, %arg4: memref<32x128xbf16, #tpu.memory_space<vmem>>, %arg5: memref<1x128xf32, #tpu.memory_space<vmem>>, %arg6: memref<256x128xbf16, #tpu.memory_space<vmem>>) attributes {dimension_semantics = [#tpu.dimension_semantics<parallel>], iteration_bounds = array<i64: 2>, scalar_prefetch = 0 : i64, scratch_operands = 0 : i64, tpu.core_type = #tpu.core_type<tc>, window_params = [{transform_indices = @transform_0, window_bounds = array<i64: 256, 32>}, {pipeline_mode = #tpu.pipeline_mode<synchronous>, transform_indices = @transform_1, window_bounds = array<i64: 1, 32>}, {pipeline_mode = #tpu.pipeline_mode<synchronous>, transform_indices = @transform_2, window_bounds = array<i64: 1, 32>}, {pipeline_mode = #tpu.pipeline_mode<synchronous>, transform_indices = @transform_3, window_bounds = array<i64: 32, 128>}, {pipeline_mode = #tpu.pipeline_mode<synchronous>, transform_indices = @transform_4, window_bounds = array<i64: 1, 128>}, {transform_indices = @transform_5, window_bounds = array<i64: 256, 128>}]} {
    %c0 = arith.constant 0 : index
    %c0_0 = arith.constant 0 : index
    %0 = vector.load %arg1[%c0, %c0_0] : memref<256x32xbf16, #tpu.memory_space<vmem>>, vector<256x32xbf16>
    %1 = arith.extf %0 : vector<256x32xbf16> to vector<256x32xf32>
    %cst = arith.constant dense<0.000000e+00> : vector<256xf32>
    %2 = vector.multi_reduction <add>, %1, %cst [1] : vector<256x32xf32> to vector<256xf32>
    %3 = vector.shape_cast %2 : vector<256xf32> to vector<256x1xf32>
    %cst_1 = arith.constant 3.200000e+01 : f32
    %4 = vector.broadcast %cst_1 : f32 to vector<256x1xf32>
    %5 = arith.divf %3, %4 : vector<256x1xf32>
    %6 = vector.broadcast %5 : vector<256x1xf32> to vector<256x32xf32>
    %7 = arith.subf %1, %6 : vector<256x32xf32>
    %8 = arith.mulf %7, %7 : vector<256x32xf32>
    %cst_2 = arith.constant dense<0.000000e+00> : vector<256xf32>
    %9 = vector.multi_reduction <add>, %8, %cst_2 [1] : vector<256x32xf32> to vector<256xf32>
    %10 = vector.shape_cast %9 : vector<256xf32> to vector<256x1xf32>
    %cst_3 = arith.constant 3.200000e+01 : f32
    %11 = vector.broadcast %cst_3 : f32 to vector<256x1xf32>
    %12 = arith.divf %10, %11 : vector<256x1xf32>
    %cst_4 = arith.constant 9.99999974E-6 : f32
    %13 = vector.broadcast %cst_4 : f32 to vector<256x1xf32>
    %14 = arith.addf %12, %13 : vector<256x1xf32>
    %15 = math.rsqrt %14 : vector<256x1xf32>
    %16 = vector.broadcast %15 : vector<256x1xf32> to vector<256x32xf32>
    %17 = arith.mulf %7, %16 : vector<256x32xf32>
    %c0_5 = arith.constant 0 : index
    %c0_6 = arith.constant 0 : index
    %18 = vector.load %arg2[%c0_5, %c0_6] : memref<1x32xf32, #tpu.memory_space<vmem>>, vector<1x32xf32>
    %19 = vector.broadcast %18 : vector<1x32xf32> to vector<256x32xf32>
    %20 = arith.mulf %17, %19 : vector<256x32xf32>
    %c0_7 = arith.constant 0 : index
    %c0_8 = arith.constant 0 : index
    %21 = vector.load %arg3[%c0_7, %c0_8] : memref<1x32xf32, #tpu.memory_space<vmem>>, vector<1x32xf32>
    %22 = vector.broadcast %21 : vector<1x32xf32> to vector<256x32xf32>
    %23 = arith.addf %20, %22 : vector<256x32xf32>
    %24 = arith.truncf %23 : vector<256x32xf32> to vector<256x32xbf16>
    %c0_9 = arith.constant 0 : index
    %c0_10 = arith.constant 0 : index
    %25 = vector.load %arg4[%c0_9, %c0_10] : memref<32x128xbf16, #tpu.memory_space<vmem>>, vector<32x128xbf16>
    %cst_11 = arith.constant dense<0.000000e+00> : vector<256x128xf32>
    %26 = tpu.matmul %24, %25, %cst_11 {dimension_numbers = #tpu.dot_dimension_numbers<[1], [0], [0], [1], [0, 0, 1, 1], [], []>} : vector<256x32xbf16>, vector<32x128xbf16>, vector<256x128xf32> -> vector<256x128xf32>
    %c0_12 = arith.constant 0 : index
    %c0_13 = arith.constant 0 : index
    %27 = vector.load %arg5[%c0_12, %c0_13] : memref<1x128xf32, #tpu.memory_space<vmem>>, vector<1x128xf32>
    %28 = vector.broadcast %27 : vector<1x128xf32> to vector<256x128xf32>
    %29 = arith.addf %26, %28 : vector<256x128xf32>
    %cst_14 = arith.constant 5.000000e-01 : f32
    %30 = vector.broadcast %cst_14 : f32 to vector<256x128xf32>
    %31 = arith.mulf %30, %29 : vector<256x128xf32>
    %cst_15 = arith.constant 0.707106769 : f32
    %32 = vector.broadcast %cst_15 : f32 to vector<256x128xf32>
    %33 = arith.mulf %29, %32 : vector<256x128xf32>
    %cst_16 = arith.constant 0.000000e+00 : f32
    %34 = vector.broadcast %cst_16 : f32 to vector<256x128xf32>
    %35 = arith.cmpf oge, %33, %34 : vector<256x128xf32>
    %cst_17 = arith.constant 1.000000e+00 : f32
    %cst_18 = arith.constant -1.000000e+00 : f32
    %36 = vector.broadcast %cst_17 : f32 to vector<256x128xf32>
    %37 = vector.broadcast %cst_18 : f32 to vector<256x128xf32>
    %38 = arith.select %35, %36, %37 : vector<256x128xi1>, vector<256x128xf32>
    %39 = math.absf %33 : vector<256x128xf32>
    %cst_19 = arith.constant 0.327591091 : f32
    %40 = vector.broadcast %cst_19 : f32 to vector<256x128xf32>
    %41 = arith.mulf %40, %39 : vector<256x128xf32>
    %cst_20 = arith.constant 1.000000e+00 : f32
    %42 = vector.broadcast %cst_20 : f32 to vector<256x128xf32>
    %43 = arith.addf %42, %41 : vector<256x128xf32>
    %cst_21 = arith.constant 1.000000e+00 : f32
    %44 = vector.broadcast %cst_21 : f32 to vector<256x128xf32>
    %45 = arith.divf %44, %43 : vector<256x128xf32>
    %cst_22 = arith.constant 1.06140542 : f32
    %46 = vector.broadcast %cst_22 : f32 to vector<256x128xf32>
    %47 = arith.mulf %46, %45 : vector<256x128xf32>
    %cst_23 = arith.constant -1.45315206 : f32
    %48 = vector.broadcast %cst_23 : f32 to vector<256x128xf32>
    %49 = arith.addf %47, %48 : vector<256x128xf32>
    %50 = arith.mulf %49, %45 : vector<256x128xf32>
    %cst_24 = arith.constant 1.42141378 : f32
    %51 = vector.broadcast %cst_24 : f32 to vector<256x128xf32>
    %52 = arith.addf %50, %51 : vector<256x128xf32>
    %53 = arith.mulf %52, %45 : vector<256x128xf32>
    %cst_25 = arith.constant -0.284496725 : f32
    %54 = vector.broadcast %cst_25 : f32 to vector<256x128xf32>
    %55 = arith.addf %53, %54 : vector<256x128xf32>
    %56 = arith.mulf %55, %45 : vector<256x128xf32>
    %cst_26 = arith.constant 0.254829586 : f32
    %57 = vector.broadcast %cst_26 : f32 to vector<256x128xf32>
    %58 = arith.addf %56, %57 : vector<256x128xf32>
    %59 = arith.mulf %58, %45 : vector<256x128xf32>
    %cst_27 = arith.constant 0.000000e+00 : f32
    %60 = vector.broadcast %cst_27 : f32 to vector<256x128xf32>
    %61 = arith.subf %60, %39 : vector<256x128xf32>
    %62 = arith.mulf %61, %39 : vector<256x128xf32>
    %63 = math.exp %62 : vector<256x128xf32>
    %64 = arith.mulf %59, %63 : vector<256x128xf32>
    %cst_28 = arith.constant 1.000000e+00 : f32
    %65 = vector.broadcast %cst_28 : f32 to vector<256x128xf32>
    %66 = arith.subf %65, %64 : vector<256x128xf32>
    %67 = arith.mulf %38, %66 : vector<256x128xf32>
    %cst_29 = arith.constant 1.000000e+00 : f32
    %68 = vector.broadcast %cst_29 : f32 to vector<256x128xf32>
    %69 = arith.addf %68, %67 : vector<256x128xf32>
    %70 = arith.mulf %31, %69 : vector<256x128xf32>
    %71 = arith.truncf %70 : vector<256x128xf32> to vector<256x128xbf16>
    %c0_30 = arith.constant 0 : index
    %c0_31 = arith.constant 0 : index
    %72 = vector.load %arg6[%c0_30, %c0_31] : memref<256x128xbf16, #tpu.memory_space<vmem>>, vector<256x128xbf16>
    tpu.vector_store %arg6[%c0_30, %c0_31], %71 {strides = array<i32>} : memref<256x128xbf16, #tpu.memory_space<vmem>>, vector<256x128xbf16>,
    return
  }
  func.func @transform_0(%arg0: i32) -> (i32, i32) {
    %c0_i32 = arith.constant 0 : i32
    %c0_i32_0 = arith.constant 0 : i32
    return %arg0, %c0_i32 : i32, i32
  }
  func.func @transform_1(%arg0: i32) -> (i32, i32) {
    %c0_i32 = arith.constant 0 : i32
    %c0_i32_0 = arith.constant 0 : i32
    %c0_i32_1 = arith.constant 0 : i32
    return %c0_i32, %c0_i32_0 : i32, i32
  }
  func.func @transform_2(%arg0: i32) -> (i32, i32) {
    %c0_i32 = arith.constant 0 : i32
    %c0_i32_0 = arith.constant 0 : i32
    %c0_i32_1 = arith.constant 0 : i32
    return %c0_i32, %c0_i32_0 : i32, i32
  }
  func.func @transform_3(%arg0: i32) -> (i32, i32) {
    %c0_i32 = arith.constant 0 : i32
    %c0_i32_0 = arith.constant 0 : i32
    %c0_i32_1 = arith.constant 0 : i32
    return %c0_i32, %c0_i32_0 : i32, i32
  }
  func.func @transform_4(%arg0: i32) -> (i32, i32) {
    %c0_i32 = arith.constant 0 : i32
    %c0_i32_0 = arith.constant 0 : i32
    %c0_i32_1 = arith.constant 0 : i32
    return %c0_i32, %c0_i32_0 : i32, i32
  }
  func.func @transform_5(%arg0: i32) -> (i32, i32) {
    %c0_i32 = arith.constant 0 : i32
    %c0_i32_0 = arith.constant 0 : i32
    return %arg0, %c0_i32 : i32, i32
  }
}

module attributes {stable_mosaic.version = 11 : i64} {
  func.func @_matmul_bias_res_kernel(%arg0: i32, %arg1: memref<256x128xbf16, #tpu.memory_space<vmem>>, %arg2: memref<128x32xbf16, #tpu.memory_space<vmem>>, %arg3: memref<1x32xf32, #tpu.memory_space<vmem>>, %arg4: memref<256x32xbf16, #tpu.memory_space<vmem>>, %arg5: memref<256x32xbf16, #tpu.memory_space<vmem>>) attributes {dimension_semantics = [#tpu.dimension_semantics<parallel>], iteration_bounds = array<i64: 2>, scalar_prefetch = 0 : i64, scratch_operands = 0 : i64, tpu.core_type = #tpu.core_type<tc>, window_params = [{transform_indices = @transform_0, window_bounds = array<i64: 256, 128>}, {pipeline_mode = #tpu.pipeline_mode<synchronous>, transform_indices = @transform_1, window_bounds = array<i64: 128, 32>}, {pipeline_mode = #tpu.pipeline_mode<synchronous>, transform_indices = @transform_2, window_bounds = array<i64: 1, 32>}, {transform_indices = @transform_3, window_bounds = array<i64: 256, 32>}, {transform_indices = @transform_4, window_bounds = array<i64: 256, 32>}]} {
    %c0 = arith.constant 0 : index
    %c0_0 = arith.constant 0 : index
    %0 = vector.load %arg1[%c0, %c0_0] : memref<256x128xbf16, #tpu.memory_space<vmem>>, vector<256x128xbf16>
    %c0_1 = arith.constant 0 : index
    %c0_2 = arith.constant 0 : index
    %1 = vector.load %arg2[%c0_1, %c0_2] : memref<128x32xbf16, #tpu.memory_space<vmem>>, vector<128x32xbf16>
    %cst = arith.constant dense<0.000000e+00> : vector<256x32xf32>
    %2 = tpu.matmul %0, %1, %cst {dimension_numbers = #tpu.dot_dimension_numbers<[1], [0], [0], [1], [0, 0, 1, 1], [], []>} : vector<256x128xbf16>, vector<128x32xbf16>, vector<256x32xf32> -> vector<256x32xf32>
    %c0_3 = arith.constant 0 : index
    %c0_4 = arith.constant 0 : index
    %3 = vector.load %arg3[%c0_3, %c0_4] : memref<1x32xf32, #tpu.memory_space<vmem>>, vector<1x32xf32>
    %4 = vector.broadcast %3 : vector<1x32xf32> to vector<256x32xf32>
    %5 = arith.addf %2, %4 : vector<256x32xf32>
    %c0_5 = arith.constant 0 : index
    %c0_6 = arith.constant 0 : index
    %6 = vector.load %arg4[%c0_5, %c0_6] : memref<256x32xbf16, #tpu.memory_space<vmem>>, vector<256x32xbf16>
    %7 = arith.extf %6 : vector<256x32xbf16> to vector<256x32xf32>
    %8 = arith.addf %5, %7 : vector<256x32xf32>
    %9 = arith.truncf %8 : vector<256x32xf32> to vector<256x32xbf16>
    %c0_7 = arith.constant 0 : index
    %c0_8 = arith.constant 0 : index
    %10 = vector.load %arg5[%c0_7, %c0_8] : memref<256x32xbf16, #tpu.memory_space<vmem>>, vector<256x32xbf16>
    tpu.vector_store %arg5[%c0_7, %c0_8], %9 {strides = array<i32>} : memref<256x32xbf16, #tpu.memory_space<vmem>>, vector<256x32xbf16>,
    return
  }
  func.func @transform_0(%arg0: i32) -> (i32, i32) {
    %c0_i32 = arith.constant 0 : i32
    %c0_i32_0 = arith.constant 0 : i32
    return %arg0, %c0_i32 : i32, i32
  }
  func.func @transform_1(%arg0: i32) -> (i32, i32) {
    %c0_i32 = arith.constant 0 : i32
    %c0_i32_0 = arith.constant 0 : i32
    %c0_i32_1 = arith.constant 0 : i32
    return %c0_i32, %c0_i32_0 : i32, i32
  }
  func.func @transform_2(%arg0: i32) -> (i32, i32) {
    %c0_i32 = arith.constant 0 : i32
    %c0_i32_0 = arith.constant 0 : i32
    %c0_i32_1 = arith.constant 0 : i32
    return %c0_i32, %c0_i32_0 : i32, i32
  }
  func.func @transform_3(%arg0: i32) -> (i32, i32) {
    %c0_i32 = arith.constant 0 : i32
    %c0_i32_0 = arith.constant 0 : i32
    return %arg0, %c0_i32 : i32, i32
  }
  func.func @transform_4(%arg0: i32) -> (i32, i32) {
    %c0_i32 = arith.constant 0 : i32
    %c0_i32_0 = arith.constant 0 : i32
    return %arg0, %c0_i32 : i32, i32
  }
}

module attributes {stable_mosaic.version = 11 : i64} {
  func.func @_ln_matmul_kernel(%arg0: i32, %arg1: memref<256x32xbf16, #tpu.memory_space<vmem>>, %arg2: memref<1x32xf32, #tpu.memory_space<vmem>>, %arg3: memref<1x32xf32, #tpu.memory_space<vmem>>, %arg4: memref<32x96xbf16, #tpu.memory_space<vmem>>, %arg5: memref<1x96xf32, #tpu.memory_space<vmem>>, %arg6: memref<256x96xbf16, #tpu.memory_space<vmem>>) attributes {dimension_semantics = [#tpu.dimension_semantics<parallel>], iteration_bounds = array<i64: 2>, scalar_prefetch = 0 : i64, scratch_operands = 0 : i64, tpu.core_type = #tpu.core_type<tc>, window_params = [{transform_indices = @transform_0, window_bounds = array<i64: 256, 32>}, {pipeline_mode = #tpu.pipeline_mode<synchronous>, transform_indices = @transform_1, window_bounds = array<i64: 1, 32>}, {pipeline_mode = #tpu.pipeline_mode<synchronous>, transform_indices = @transform_2, window_bounds = array<i64: 1, 32>}, {pipeline_mode = #tpu.pipeline_mode<synchronous>, transform_indices = @transform_3, window_bounds = array<i64: 32, 96>}, {pipeline_mode = #tpu.pipeline_mode<synchronous>, transform_indices = @transform_4, window_bounds = array<i64: 1, 96>}, {transform_indices = @transform_5, window_bounds = array<i64: 256, 96>}]} {
    %c0 = arith.constant 0 : index
    %c0_0 = arith.constant 0 : index
    %0 = vector.load %arg1[%c0, %c0_0] : memref<256x32xbf16, #tpu.memory_space<vmem>>, vector<256x32xbf16>
    %1 = arith.extf %0 : vector<256x32xbf16> to vector<256x32xf32>
    %cst = arith.constant dense<0.000000e+00> : vector<256xf32>
    %2 = vector.multi_reduction <add>, %1, %cst [1] : vector<256x32xf32> to vector<256xf32>
    %3 = vector.shape_cast %2 : vector<256xf32> to vector<256x1xf32>
    %cst_1 = arith.constant 3.200000e+01 : f32
    %4 = vector.broadcast %cst_1 : f32 to vector<256x1xf32>
    %5 = arith.divf %3, %4 : vector<256x1xf32>
    %6 = vector.broadcast %5 : vector<256x1xf32> to vector<256x32xf32>
    %7 = arith.subf %1, %6 : vector<256x32xf32>
    %8 = arith.mulf %7, %7 : vector<256x32xf32>
    %cst_2 = arith.constant dense<0.000000e+00> : vector<256xf32>
    %9 = vector.multi_reduction <add>, %8, %cst_2 [1] : vector<256x32xf32> to vector<256xf32>
    %10 = vector.shape_cast %9 : vector<256xf32> to vector<256x1xf32>
    %cst_3 = arith.constant 3.200000e+01 : f32
    %11 = vector.broadcast %cst_3 : f32 to vector<256x1xf32>
    %12 = arith.divf %10, %11 : vector<256x1xf32>
    %cst_4 = arith.constant 9.99999974E-6 : f32
    %13 = vector.broadcast %cst_4 : f32 to vector<256x1xf32>
    %14 = arith.addf %12, %13 : vector<256x1xf32>
    %15 = math.rsqrt %14 : vector<256x1xf32>
    %16 = vector.broadcast %15 : vector<256x1xf32> to vector<256x32xf32>
    %17 = arith.mulf %7, %16 : vector<256x32xf32>
    %c0_5 = arith.constant 0 : index
    %c0_6 = arith.constant 0 : index
    %18 = vector.load %arg2[%c0_5, %c0_6] : memref<1x32xf32, #tpu.memory_space<vmem>>, vector<1x32xf32>
    %19 = vector.broadcast %18 : vector<1x32xf32> to vector<256x32xf32>
    %20 = arith.mulf %17, %19 : vector<256x32xf32>
    %c0_7 = arith.constant 0 : index
    %c0_8 = arith.constant 0 : index
    %21 = vector.load %arg3[%c0_7, %c0_8] : memref<1x32xf32, #tpu.memory_space<vmem>>, vector<1x32xf32>
    %22 = vector.broadcast %21 : vector<1x32xf32> to vector<256x32xf32>
    %23 = arith.addf %20, %22 : vector<256x32xf32>
    %24 = arith.truncf %23 : vector<256x32xf32> to vector<256x32xbf16>
    %c0_9 = arith.constant 0 : index
    %c0_10 = arith.constant 0 : index
    %25 = vector.load %arg4[%c0_9, %c0_10] : memref<32x96xbf16, #tpu.memory_space<vmem>>, vector<32x96xbf16>
    %cst_11 = arith.constant dense<0.000000e+00> : vector<256x96xf32>
    %26 = tpu.matmul %24, %25, %cst_11 {dimension_numbers = #tpu.dot_dimension_numbers<[1], [0], [0], [1], [0, 0, 1, 1], [], []>} : vector<256x32xbf16>, vector<32x96xbf16>, vector<256x96xf32> -> vector<256x96xf32>
    %c0_12 = arith.constant 0 : index
    %c0_13 = arith.constant 0 : index
    %27 = vector.load %arg5[%c0_12, %c0_13] : memref<1x96xf32, #tpu.memory_space<vmem>>, vector<1x96xf32>
    %28 = vector.broadcast %27 : vector<1x96xf32> to vector<256x96xf32>
    %29 = arith.addf %26, %28 : vector<256x96xf32>
    %30 = arith.truncf %29 : vector<256x96xf32> to vector<256x96xbf16>
    %c0_14 = arith.constant 0 : index
    %c0_15 = arith.constant 0 : index
    %31 = vector.load %arg6[%c0_14, %c0_15] : memref<256x96xbf16, #tpu.memory_space<vmem>>, vector<256x96xbf16>
    tpu.vector_store %arg6[%c0_14, %c0_15], %30 {strides = array<i32>} : memref<256x96xbf16, #tpu.memory_space<vmem>>, vector<256x96xbf16>,
    return
  }
  func.func @transform_0(%arg0: i32) -> (i32, i32) {
    %c0_i32 = arith.constant 0 : i32
    %c0_i32_0 = arith.constant 0 : i32
    return %arg0, %c0_i32 : i32, i32
  }
  func.func @transform_1(%arg0: i32) -> (i32, i32) {
    %c0_i32 = arith.constant 0 : i32
    %c0_i32_0 = arith.constant 0 : i32
    %c0_i32_1 = arith.constant 0 : i32
    return %c0_i32, %c0_i32_0 : i32, i32
  }
  func.func @transform_2(%arg0: i32) -> (i32, i32) {
    %c0_i32 = arith.constant 0 : i32
    %c0_i32_0 = arith.constant 0 : i32
    %c0_i32_1 = arith.constant 0 : i32
    return %c0_i32, %c0_i32_0 : i32, i32
  }
  func.func @transform_3(%arg0: i32) -> (i32, i32) {
    %c0_i32 = arith.constant 0 : i32
    %c0_i32_0 = arith.constant 0 : i32
    %c0_i32_1 = arith.constant 0 : i32
    return %c0_i32, %c0_i32_0 : i32, i32
  }
  func.func @transform_4(%arg0: i32) -> (i32, i32) {
    %c0_i32 = arith.constant 0 : i32
    %c0_i32_0 = arith.constant 0 : i32
    %c0_i32_1 = arith.constant 0 : i32
    return %c0_i32, %c0_i32_0 : i32, i32
  }
  func.func @transform_5(%arg0: i32) -> (i32, i32) {
    %c0_i32 = arith.constant 0 : i32
    %c0_i32_0 = arith.constant 0 : i32
    return %arg0, %c0_i32 : i32, i32
  }
}

module attributes {stable_mosaic.version = 11 : i64} {
  func.func @_matmul_ln_kernel(%arg0: i32, %arg1: memref<128x288xbf16, #tpu.memory_space<vmem>>, %arg2: memref<288x64xbf16, #tpu.memory_space<vmem>>, %arg3: memref<1x64xf32, #tpu.memory_space<vmem>>, %arg4: memref<1x64xf32, #tpu.memory_space<vmem>>, %arg5: memref<128x64xbf16, #tpu.memory_space<vmem>>) attributes {dimension_semantics = [#tpu.dimension_semantics<parallel>], iteration_bounds = array<i64: 1>, scalar_prefetch = 0 : i64, scratch_operands = 0 : i64, tpu.core_type = #tpu.core_type<tc>, window_params = [{transform_indices = @transform_0, window_bounds = array<i64: 128, 288>}, {pipeline_mode = #tpu.pipeline_mode<synchronous>, transform_indices = @transform_1, window_bounds = array<i64: 288, 64>}, {pipeline_mode = #tpu.pipeline_mode<synchronous>, transform_indices = @transform_2, window_bounds = array<i64: 1, 64>}, {pipeline_mode = #tpu.pipeline_mode<synchronous>, transform_indices = @transform_3, window_bounds = array<i64: 1, 64>}, {transform_indices = @transform_4, window_bounds = array<i64: 128, 64>}]} {
    %c0 = arith.constant 0 : index
    %c0_0 = arith.constant 0 : index
    %0 = vector.load %arg1[%c0, %c0_0] : memref<128x288xbf16, #tpu.memory_space<vmem>>, vector<128x288xbf16>
    %c0_1 = arith.constant 0 : index
    %c0_2 = arith.constant 0 : index
    %1 = vector.load %arg2[%c0_1, %c0_2] : memref<288x64xbf16, #tpu.memory_space<vmem>>, vector<288x64xbf16>
    %cst = arith.constant dense<0.000000e+00> : vector<128x64xf32>
    %2 = tpu.matmul %0, %1, %cst {dimension_numbers = #tpu.dot_dimension_numbers<[1], [0], [0], [1], [0, 0, 1, 1], [], []>} : vector<128x288xbf16>, vector<288x64xbf16>, vector<128x64xf32> -> vector<128x64xf32>
    %cst_3 = arith.constant dense<0.000000e+00> : vector<128xf32>
    %3 = vector.multi_reduction <add>, %2, %cst_3 [1] : vector<128x64xf32> to vector<128xf32>
    %4 = vector.shape_cast %3 : vector<128xf32> to vector<128x1xf32>
    %cst_4 = arith.constant 6.400000e+01 : f32
    %5 = vector.broadcast %cst_4 : f32 to vector<128x1xf32>
    %6 = arith.divf %4, %5 : vector<128x1xf32>
    %7 = vector.broadcast %6 : vector<128x1xf32> to vector<128x64xf32>
    %8 = arith.subf %2, %7 : vector<128x64xf32>
    %9 = arith.mulf %8, %8 : vector<128x64xf32>
    %cst_5 = arith.constant dense<0.000000e+00> : vector<128xf32>
    %10 = vector.multi_reduction <add>, %9, %cst_5 [1] : vector<128x64xf32> to vector<128xf32>
    %11 = vector.shape_cast %10 : vector<128xf32> to vector<128x1xf32>
    %cst_6 = arith.constant 6.400000e+01 : f32
    %12 = vector.broadcast %cst_6 : f32 to vector<128x1xf32>
    %13 = arith.divf %11, %12 : vector<128x1xf32>
    %cst_7 = arith.constant 9.99999974E-6 : f32
    %14 = vector.broadcast %cst_7 : f32 to vector<128x1xf32>
    %15 = arith.addf %13, %14 : vector<128x1xf32>
    %16 = math.rsqrt %15 : vector<128x1xf32>
    %17 = vector.broadcast %16 : vector<128x1xf32> to vector<128x64xf32>
    %18 = arith.mulf %8, %17 : vector<128x64xf32>
    %c0_8 = arith.constant 0 : index
    %c0_9 = arith.constant 0 : index
    %19 = vector.load %arg3[%c0_8, %c0_9] : memref<1x64xf32, #tpu.memory_space<vmem>>, vector<1x64xf32>
    %20 = vector.broadcast %19 : vector<1x64xf32> to vector<128x64xf32>
    %21 = arith.mulf %18, %20 : vector<128x64xf32>
    %c0_10 = arith.constant 0 : index
    %c0_11 = arith.constant 0 : index
    %22 = vector.load %arg4[%c0_10, %c0_11] : memref<1x64xf32, #tpu.memory_space<vmem>>, vector<1x64xf32>
    %23 = vector.broadcast %22 : vector<1x64xf32> to vector<128x64xf32>
    %24 = arith.addf %21, %23 : vector<128x64xf32>
    %25 = arith.truncf %24 : vector<128x64xf32> to vector<128x64xbf16>
    %c0_12 = arith.constant 0 : index
    %c0_13 = arith.constant 0 : index
    %26 = vector.load %arg5[%c0_12, %c0_13] : memref<128x64xbf16, #tpu.memory_space<vmem>>, vector<128x64xbf16>
    tpu.vector_store %arg5[%c0_12, %c0_13], %25 {strides = array<i32>} : memref<128x64xbf16, #tpu.memory_space<vmem>>, vector<128x64xbf16>,
    return
  }
  func.func @transform_0(%arg0: i32) -> (i32, i32) {
    %c0_i32 = arith.constant 0 : i32
    %c0_i32_0 = arith.constant 0 : i32
    return %arg0, %c0_i32 : i32, i32
  }
  func.func @transform_1(%arg0: i32) -> (i32, i32) {
    %c0_i32 = arith.constant 0 : i32
    %c0_i32_0 = arith.constant 0 : i32
    %c0_i32_1 = arith.constant 0 : i32
    return %c0_i32, %c0_i32_0 : i32, i32
  }
  func.func @transform_2(%arg0: i32) -> (i32, i32) {
    %c0_i32 = arith.constant 0 : i32
    %c0_i32_0 = arith.constant 0 : i32
    %c0_i32_1 = arith.constant 0 : i32
    return %c0_i32, %c0_i32_0 : i32, i32
  }
  func.func @transform_3(%arg0: i32) -> (i32, i32) {
    %c0_i32 = arith.constant 0 : i32
    %c0_i32_0 = arith.constant 0 : i32
    %c0_i32_1 = arith.constant 0 : i32
    return %c0_i32, %c0_i32_0 : i32, i32
  }
  func.func @transform_4(%arg0: i32) -> (i32, i32) {
    %c0_i32 = arith.constant 0 : i32
    %c0_i32_0 = arith.constant 0 : i32
    return %arg0, %c0_i32 : i32, i32
  }
}

</mosaic_0001>

<bundles_post_ra>
// kernel: tpu_custom_call.1
= control target key start
LH: loop header
LB: loop body
LE: loop exit
PB: predicated region body
PF: predicated region fallthrough
CT: control target
= control target key end

     0   :  { %6 = vsyncpa [#allocation3], 0  ;;  %s127_s0 = inlined_call_operand.hbm [shape: f32[8,128], index: 0, kind: input, shape index: {}]   ;;  %s128_s1 = inlined_call_operand.hbm [shape: f32[8,128], index: 1, kind: output, shape index: {}]  }
   0x1   :  { %7 = vsyncpa [#allocation4], 0  ;;  %s91_s6 = smov [#allocation2]   ;;  %s43_s10 = scalar_lea.hbm %s127_s0, 128 }
   0x2   :  { %s14_s7 = sshll.u32 %s91_s6, 4  ;;  %p44_p0 = scmp.ne.s32.totalorder %s127_s0, %s43_s10  ;;  %s15_s7 = int_to_ptr.vmem [resolvable:$true] %s14_s7 }
   0x3   :  { %p47_p1 = scmp.lt.u32.totalorder %s43_s10, %s127_s0 }
   0x5   :  { %p49_p2 = pnand %p47_p1, %p44_p0 }
   0x7   :  { %52 = shalt.err (!%p49_p2)
}
   0x8   :  { %s53_s15 = scalar_lea.vmem %s15_s7, 128  ;;  %p58_p4 = scmp.lt.s32.totalorder %s15_s7, %s15_s7 }
   0x9   :  { %p54_p3 = scmp.ne.s32.totalorder %s15_s7, %s53_s15  ;;  %p59_p5 = scmp.lt.s32.totalorder %s53_s15, %s53_s15 }
   0xb   :  { %p60_p6 = por %p59_p5, %p58_p4 }
   0xd   :  { %p61_p7 = pnand %p60_p6, %p54_p3 }
   0xf   :  { %64 = shalt.err (!%p61_p7)
}
  0x10   :  { %17 = dma.hbm_to_vmem [thread:$0]  %s127_s0, 128, %s15_s7, [#allocation3]  }
  0x11   :  { %87 = dma.done.wait [#allocation3], 128  }
  0x12   :  { %88 = vsyncadd [#allocation3], 4294967168  ;;  %v21_v0 = vld [vmem:[#allocation2] sm:$0xff]  ;;  %s92_s18 = smov [#allocation5]  }
  0x13   :  { %41 = verf.f32 %v21_v0  ;;  %s30_s19 = sshll.u32 %s92_s18, 4  ;;  %s31_s19 = int_to_ptr.vmem [resolvable:$true] %s30_s19 }
  0x14   :  { %s65_s20 = scalar_lea.vmem %s31_s19, 128  ;;  %p70_p9 = scmp.lt.s32.totalorder %s31_s19, %s31_s19 }
  0x15   :  { %p66_p8 = scmp.ne.s32.totalorder %s31_s19, %s65_s20  ;;  %p71_p10 = scmp.lt.s32.totalorder %s65_s20, %s65_s20 }
  0x17   :  { %p72_p11 = por %p71_p10, %p70_p9 }
  0x19   :  { %p73_p12 = pnand %p72_p11, %p66_p8 }
  0x1d   :  { %v42_v1 = vpop.eup %41 }
  0x1e   :  { %23 = vst [vmem:[#allocation5] sm:$0xff] %v42_v1 }
  0x1f   :  { %76 = shalt.err (!%p73_p12)
}
  0x20   :  { %s77_s0 = scalar_lea.hbm %s128_s1, 128 }
  0x21   :  { %p78_p13 = scmp.ne.s32.totalorder %s128_s1, %s77_s0  ;;  %p81_p0 = scmp.lt.u32.totalorder %s77_s0, %s128_s1 }
  0x23   :  { %p83_p1 = pnand %p81_p0, %p78_p13 }
  0x25   :  { %86 = shalt.err (!%p83_p1)
}
  0x26   :  { %33 = dma.vmem_to_hbm [thread:$0]  %s31_s19, 128, %s128_s1, [#allocation4]  }
  0x27   :  { %89 = dma.done.wait [#allocation4], 128  }
  0x28   :  { %90 = vsyncadd [#allocation4], 4294967168 }
  0x29   :  { %37 = vsyncpa [#allocation3], 1 }
  0x2a   :  { %38 = vsyncpa [#allocation4], 1 }

// kernel: nat_block.13
= control target key start
LH: loop header
LB: loop body
LE: loop exit
PB: predicated region body
PF: predicated region fallthrough
CT: control target
= control target key end

     0   :  { %s1202_s15 = smov 0   ;;  %s1388_s0 = inlined_call_operand.vmem [shape: bf16[512,32], index: 0, kind: input, shape index: {}]   ;;  %s1389_s1 = inlined_call_operand.vmem [shape: bf16[32,32], index: 1, kind: input, shape index: {}]   ;;  %s1390_s2 = inlined_call_operand.vmem [shape: f32[1,32], index: 2, kind: input, shape index: {}]   ;;  %s1391_s3 = inlined_call_operand.vmem [shape: bf16[512,32], index: 3, kind: input, shape index: {}]   ;;  %s1392_s4 = inlined_call_operand.vmem [shape: bf16[512,32], index: 4, kind: output, shape index: {}]  }
   0x1 LB: > { %s894_s16 = sadd.s32 4294967295, %s1175_s15   ;;  %p898_p0 = scmp.ge.s32.totalorder %s1175_s15, 1  ;;  %s1175_s15 = sphi %s1202_s15, %s14_s15  }
   0x2   : > { %p174_p1 = scmp.lt.s32.totalorder %s1175_s15, 3 }
   0x4   : > { %p175_p2 = pnand %p898_p0, %p174_p1 }
   0x5   : > { %v1151_v0 = vld [vmem:[%s1389_s1] sm:$0xff] (!%p175_p2)   ;;  %s899_s19 = sshll.u32 (!%p175_p2), %s894_s16, 5  ;;  %v1152_v1 = vld [vmem:[%s1389_s1 + $0x8] sm:$0xff] (!%p175_p2)   ;;  %vm359_vm0 = vcmask (!%p175_p2), 261120   ;;  %vm793_vm1 = vcmask (!%p175_p2), 257024  }
   0x6   : > { %178 = sbr.rel (%p175_p2) target bundleno = 265 (0x109), region = 36  ;;  %p206_p3 = scmp.lt.s32.totalorder (!%p175_p2), %s899_s19, 63  ;;  %1103 = vmatprep.subr.bf16.mxu0 (!%p175_p2), %v1151_v0  ;;  %1139 = vmatprep.subr.bf16.mxu1 (!%p175_p2), %v1151_v0  ;;  %v1268_v21 = vld [vmem:[%s1390_s2] ss:$0 sm:$0xff] (!%p175_p2) }
   0x7   : > { %1104 = vmatpush3.bf16.msra.mxu0 (!%p175_p2), %v1151_v0  ;;  %1141 = vmatpush3.bf16.msra.mxu1 (!%p175_p2), %v1151_v0 }
   0x8   : > { %1105 = vmatprep.subr.bf16.mxu0 (!%p175_p2), %v1152_v1  ;;  %1140 = vmatprep.subr.bf16.mxu1 (!%p175_p2), %v1152_v1 }
   0xb   : > { %1106 = vmatpush3.bf16.msra.mxu0 (!%p175_p2), %v1152_v1  ;;  %1142 = vmatpush3.bf16.msra.mxu1 (!%p175_p2), %v1152_v1 }
   0xd   : > { %s1394_s19 = smov (!%p206_p3, %s899_s19), 63 }
   0xe   : > { %s1216_s22 = sshll.u32 %s1394_s19, 2 }
   0xf   : > { %s1222_s25 = scalar_lea.vmem %s1388_s0, %s1216_s22  ;;  %s1260_s28 = scalar_lea.vmem %s1391_s3, %s1216_s22 }
  0x10   : > { %v1153_v2 = vld [vmem:[%s1222_s25] sm:$0xff]   ;;  %v1155_v4 = vld [vmem:[%s1222_s25 + $0x8] sm:$0xff]   ;;  %v1157_v6 = vld [vmem:[%s1222_s25 + $0x10] sm:$0xff]   ;;  %s1280_s7 = scalar_lea.vmem %s1392_s4, %s1216_s22 }
  0x11   : > { %v1154_v3 = vld [vmem:[%s1222_s25 + $0x40] sm:$0xff]   ;;  %1107 = vmatprep.mubr.msk.bf16.mxu0 %vm359_vm0, %v1153_v2  ;;  %v1156_v5 = vld [vmem:[%s1222_s25 + $0x48] sm:$0xff]   ;;  %v1158_v7 = vld [vmem:[%s1222_s25 + $0x50] sm:$0xff]  }
  0x12   : > { %1123 = vmatprep.mubr.msk.bf16.mxu1 %vm359_vm0, %v1154_v3  ;;  %1108 = vmatmul.mubr.msk.bf16.vlgmr.msra.gmra.mrb[0].mxu0 %vm359_vm0, %v1155_v4  ;;  %v1159_v8 = vld [vmem:[%s1222_s25 + $0x18] sm:$0xff]   ;;  %v1161_v10 = vld [vmem:[%s1222_s25 + $0x20] sm:$0xff]   ;;  %v1163_v12 = vld [vmem:[%s1222_s25 + $0x28] sm:$0xff]  }
  0x13   : > { %1124 = vmatmul.mubr.msk.bf16.vlgmr.msra.gmra.mrb[0].mxu1 %vm359_vm0, %v1156_v5  ;;  %1111 = vmatprep.mubr.msk.bf16.mxu0 %vm359_vm0, %v1157_v6  ;;  %v1160_v9 = vld [vmem:[%s1222_s25 + $0x58] sm:$0xff]   ;;  %v1162_v11 = vld [vmem:[%s1222_s25 + $0x60] sm:$0xff]   ;;  %v1164_v13 = vld [vmem:[%s1222_s25 + $0x68] sm:$0xff]  }
  0x14   : > { %1127 = vmatprep.mubr.msk.bf16.mxu1 %vm359_vm0, %v1158_v7  ;;  %v1165_v14 = vld [vmem:[%s1222_s25 + $0x30] sm:$0xff]   ;;  %v1167_v16 = vld [vmem:[%s1222_s25 + $0x38] sm:$0xff]   ;;  %v1070_v18 = vld [vmem:[%s1260_s28 + $0x8] sm:$0xff]  }
  0x15   : > { %v1166_v15 = vld [vmem:[%s1222_s25 + $0x70] sm:$0xff]   ;;  %v1168_v17 = vld [vmem:[%s1222_s25 + $0x78] sm:$0xff]   ;;  %v1078_v19 = vld [vmem:[%s1260_s28 + $0x48] sm:$0xff]   ;;  %v1012_v23 = vunpack.c.l.bf16 %v1070_v18  ;;  %v1013_v31 = vunpack.c.h.bf16 %v1070_v18 }
  0x16   : > { %v1007_v20 = vld [vmem:[%s1260_s28] sm:$0xff]   ;;  %v1044_v25 = vunpack.c.l.bf16 %v1078_v19  ;;  %v1045_v32 = vunpack.c.h.bf16 %v1078_v19  ;;  %v1072_v49 = vld [vmem:[%s1260_s28 + $0x18] sm:$0xff]   ;;  %v1071_v55 = vld [vmem:[%s1260_s28 + $0x10] sm:$0xff]  }
  0x17   : > { %v1077_v22 = vld [vmem:[%s1260_s28 + $0x40] sm:$0xff]   ;;  %v1008_v26 = vunpack.c.l.bf16 %v1007_v20  ;;  %v1009_v37 = vunpack.c.h.bf16 %v1007_v20  ;;  %v1080_v54 = vld [vmem:[%s1260_s28 + $0x58] sm:$0xff]   ;;  %v1079_v60 = vld [vmem:[%s1260_s28 + $0x50] sm:$0xff]   ;;  %v1020_v0 = vunpack.c.l.bf16 %v1072_v49  ;;  %v1016_v5 = vunpack.c.l.bf16 %v1071_v55 }
  0x18   : > { %v1040_v30 = vunpack.c.l.bf16 %v1077_v22  ;;  %v1041_v43 = vunpack.c.h.bf16 %v1077_v22  ;;  %v1052_v4 = vunpack.c.l.bf16 %v1080_v54 }
  0x1a   : > { %1112 = vmatmul.mubr.msk.bf16.gmra.mrb[4].mxu0 %vm359_vm0, %v1159_v8 }
  0x1b   : > { %1128 = vmatmul.mubr.msk.bf16.gmra.mrb[4].mxu1 %vm359_vm0, %v1160_v9  ;;  %1115 = vmatprep.mubr.msk.bf16.mxu0 %vm359_vm0, %v1161_v10  ;;  %v1048_v10 = vunpack.c.l.bf16 %v1079_v60 }
  0x1c   : > { %1131 = vmatprep.mubr.msk.bf16.mxu1 %vm359_vm0, %v1162_v11  ;;  %v1021_v11 = vunpack.c.h.bf16 %v1072_v49 }
  0x22   : > { %1116 = vmatmul.mubr.msk.bf16.gmra.mrb[8].mxu0 %vm359_vm0, %v1163_v12 }
  0x23   : > { %1132 = vmatmul.mubr.msk.bf16.gmra.mrb[8].mxu1 %vm359_vm0, %v1164_v13  ;;  %1119 = vmatprep.mubr.msk.bf16.mxu0 %vm359_vm0, %v1165_v14 }
  0x24   : > { %1135 = vmatprep.mubr.msk.bf16.mxu1 %vm359_vm0, %v1166_v15 }
  0x2a   : > { %1120 = vmatmul.mubr.msk.bf16.gmra.mrb[12].mxu0 %vm359_vm0, %v1167_v16  ;;  %v1053_v16 = vunpack.c.h.bf16 %v1080_v54 }
  0x2b   : > { %1136 = vmatmul.mubr.msk.bf16.gmra.mrb[12].mxu1 %vm359_vm0, %v1168_v17  ;;  %v1017_v17 = vunpack.c.h.bf16 %v1071_v55 }
  0xe5   : > { %v1109_v24 = vpop.f32.mrb[0].mxu0 }
  0xe6   : > { %v451_v27 = vadd.f32 %v1109_v24, %v1268_v21  ;;  %v1125_v28 = vpop.f32.mrb[0].mxu1  ;;  %v442_v29 = vpop.f32.mrb[1].mxu0  ;;  %v1049_v24 = vunpack.c.h.bf16 %v1079_v60 }
  0xe7   : > { %v515_v33 = vadd.f32 %v1125_v28, %v1268_v21  ;;  %v443_v34 = vadd.f32 %v1268_v21, %v442_v29  ;;  %v506_v35 = vpop.f32.mrb[1].mxu1  ;;  %v1110_v36 = vpop.f32.mrb[2].mxu0 }
  0xe8   : > { %v635_v38 = vadd.f32 %v1012_v23, %v451_v27  ;;  %v507_v39 = vadd.f32 %v1268_v21, %v506_v35  ;;  %v454_v40 = vadd.f32 %v1110_v36, %v1268_v21  ;;  %v1126_v41 = vpop.f32.mrb[2].mxu1  ;;  %v445_v42 = vpop.f32.mrb[3].mxu0  ;;  %v1082_v35 = vld [vmem:[%s1260_s28 + $0x68] sm:$0xff]   ;;  %v1073_v36 = vld [vmem:[%s1260_s28 + $0x20] sm:$0xff]  }
  0xe9   : > { %v651_v44 = vadd.f32 %v1044_v25, %v515_v33  ;;  %v633_v45 = vadd.f32 %v1008_v26, %v443_v34  ;;  %v518_v46 = vadd.f32 %v1126_v41, %v1268_v21  ;;  %v446_v47 = vadd.f32 %v1268_v21, %v445_v42  ;;  %v509_v48 = vpop.f32.mrb[3].mxu1  ;;  %v1081_v41 = vld [vmem:[%s1260_s28 + $0x60] sm:$0xff]  }
  0xea   : > { %v976_v50 = vpack.c.bf16 %v635_v38, %v635_v38  ;;  %v649_v51 = vadd.f32 %v1040_v30, %v507_v39  ;;  %v636_v52 = vadd.f32 %v1013_v31, %v454_v40  ;;  %v510_v53 = vadd.f32 %v1268_v21, %v509_v48  ;;  %v1074_v30 = vld [vmem:[%s1260_s28 + $0x28] sm:$0xff]  }
  0xeb   : > { %v992_v56 = vpack.c.bf16 %v651_v44, %v651_v44  ;;  %v974_v57 = vpack.c.bf16 %v633_v45, %v633_v45  ;;  %v652_v58 = vadd.f32 %v1045_v32, %v518_v46  ;;  %v634_v59 = vadd.f32 %v1009_v37, %v446_v47 }
  0xec   : > { %796 = vst.msk [vmem:[%s1280_s7 + $0x8] sm:$0xf] %vm793_vm1, %v976_v50  ;;  %v990_v61 = vpack.c.bf16 %v649_v51, %v649_v51  ;;  %v977_v62 = vpack.c.bf16 %v636_v52, %v636_v52  ;;  %v650_v63 = vadd.f32 %v1041_v43, %v510_v53  ;;  %v1028_v45 = vunpack.c.l.bf16 %v1074_v30 }
  0xed   : > { %812 = vst.msk [vmem:[%s1280_s7 + $0x48] sm:$0xf] %vm793_vm1, %v992_v56  ;;  %794 = vst.msk [vmem:[%s1280_s7] sm:$0xf] %vm793_vm1, %v974_v57  ;;  %v993_v1 = vpack.c.bf16 %v652_v58, %v652_v58  ;;  %v975_v2 = vpack.c.bf16 %v634_v59, %v634_v59  ;;  %v1113_v3 = vpop.f32.mrb[4].mxu0  ;;  %v1060_v49 = vunpack.c.l.bf16 %v1082_v35  ;;  %v1024_v50 = vunpack.c.l.bf16 %v1073_v36 }
  0xee   : > { %810 = vst.msk [vmem:[%s1280_s7 + $0x40] sm:$0xf] %vm793_vm1, %v990_v61  ;;  %797 = vst.msk [vmem:[%s1280_s7 + $0xc] sm:$0xf] %vm793_vm1, %v977_v62  ;;  %v991_v6 = vpack.c.bf16 %v650_v63, %v650_v63  ;;  %v467_v7 = vadd.f32 %v1113_v3, %v1268_v21  ;;  %v1129_v8 = vpop.f32.mrb[4].mxu1  ;;  %v458_v9 = vpop.f32.mrb[5].mxu0  ;;  %v1056_v55 = vunpack.c.l.bf16 %v1081_v41  ;;  %v1029_v56 = vunpack.c.h.bf16 %v1074_v30 }
  0xef   : > { %813 = vst.msk [vmem:[%s1280_s7 + $0x4c] sm:$0xf] %vm793_vm1, %v993_v1  ;;  %795 = vst.msk [vmem:[%s1280_s7 + $0x4] sm:$0xf] %vm793_vm1, %v975_v2  ;;  %v531_v12 = vadd.f32 %v1129_v8, %v1268_v21  ;;  %v459_v13 = vadd.f32 %v1268_v21, %v458_v9  ;;  %v522_v14 = vpop.f32.mrb[5].mxu1  ;;  %v1114_v15 = vpop.f32.mrb[6].mxu0  ;;  %v1061_v61 = vunpack.c.h.bf16 %v1082_v35  ;;  %v1025_v62 = vunpack.c.h.bf16 %v1073_v36 }
  0xf0   : > { %811 = vst.msk [vmem:[%s1280_s7 + $0x44] sm:$0xf] %vm793_vm1, %v991_v6  ;;  %v639_v18 = vadd.f32 %v1020_v0, %v467_v7  ;;  %v523_v19 = vadd.f32 %v1268_v21, %v522_v14  ;;  %v470_v20 = vadd.f32 %v1114_v15, %v1268_v21  ;;  %v1130_v22 = vpop.f32.mrb[6].mxu1  ;;  %v461_v23 = vpop.f32.mrb[7].mxu0  ;;  %v1084_v15 = vld [vmem:[%s1260_s28 + $0x78] sm:$0xff]  }
  0xf1   : > { %v655_v25 = vadd.f32 %v1052_v4, %v531_v12  ;;  %v637_v26 = vadd.f32 %v1016_v5, %v459_v13  ;;  %v534_v27 = vadd.f32 %v1130_v22, %v1268_v21  ;;  %v462_v28 = vadd.f32 %v1268_v21, %v461_v23  ;;  %v525_v29 = vpop.f32.mrb[7].mxu1  ;;  %v1083_v22 = vld [vmem:[%s1260_s28 + $0x70] sm:$0xff]  }
  0xf2   : > { %v980_v31 = vpack.c.bf16 %v639_v18, %v639_v18  ;;  %v653_v32 = vadd.f32 %v1048_v10, %v523_v19  ;;  %v640_v33 = vadd.f32 %v1021_v11, %v470_v20  ;;  %v526_v34 = vadd.f32 %v1268_v21, %v525_v29  ;;  %v1076_v10 = vld [vmem:[%s1260_s28 + $0x38] sm:$0xff]  }
  0xf3   : > { %v996_v37 = vpack.c.bf16 %v655_v25, %v655_v25  ;;  %v978_v38 = vpack.c.bf16 %v637_v26, %v637_v26  ;;  %v656_v39 = vadd.f32 %v1053_v16, %v534_v27  ;;  %v638_v40 = vadd.f32 %v1017_v17, %v462_v28  ;;  %v1075_v16 = vld [vmem:[%s1260_s28 + $0x30] sm:$0xff]  }
  0xf4   : > { %800 = vst.msk [vmem:[%s1280_s7 + $0x18] sm:$0xf] %vm793_vm1, %v980_v31  ;;  %v994_v42 = vpack.c.bf16 %v653_v32, %v653_v32  ;;  %v981_v43 = vpack.c.bf16 %v640_v33, %v640_v33  ;;  %v654_v44 = vadd.f32 %v1049_v24, %v526_v34  ;;  %v1057_v4 = vunpack.c.h.bf16 %v1081_v41 }
  0xf5   : > { %816 = vst.msk [vmem:[%s1280_s7 + $0x58] sm:$0xf] %vm793_vm1, %v996_v37  ;;  %798 = vst.msk [vmem:[%s1280_s7 + $0x10] sm:$0xf] %vm793_vm1, %v978_v38  ;;  %v997_v46 = vpack.c.bf16 %v656_v39, %v656_v39  ;;  %v979_v47 = vpack.c.bf16 %v638_v40, %v638_v40  ;;  %v1117_v48 = vpop.f32.mrb[8].mxu0  ;;  %v1036_v26 = vunpack.c.l.bf16 %v1076_v10  ;;  %v1068_v30 = vunpack.c.l.bf16 %v1084_v15 }
  0xf6   : > { %814 = vst.msk [vmem:[%s1280_s7 + $0x50] sm:$0xf] %vm793_vm1, %v994_v42  ;;  %801 = vst.msk [vmem:[%s1280_s7 + $0x1c] sm:$0xf] %vm793_vm1, %v981_v43  ;;  %v995_v51 = vpack.c.bf16 %v654_v44, %v654_v44  ;;  %v483_v52 = vadd.f32 %v1117_v48, %v1268_v21  ;;  %v1133_v53 = vpop.f32.mrb[8].mxu1  ;;  %v474_v54 = vpop.f32.mrb[9].mxu0  ;;  %v1032_v31 = vunpack.c.l.bf16 %v1075_v16  ;;  %v1064_v36 = vunpack.c.l.bf16 %v1083_v22 }
  0xf7   : > { %817 = vst.msk [vmem:[%s1280_s7 + $0x5c] sm:$0xf] %vm793_vm1, %v997_v46  ;;  %799 = vst.msk [vmem:[%s1280_s7 + $0x14] sm:$0xf] %vm793_vm1, %v979_v47  ;;  %v547_v57 = vadd.f32 %v1133_v53, %v1268_v21  ;;  %v475_v58 = vadd.f32 %v1268_v21, %v474_v54  ;;  %v538_v59 = vpop.f32.mrb[9].mxu1  ;;  %v1118_v60 = vpop.f32.mrb[10].mxu0  ;;  %v1037_v37 = vunpack.c.h.bf16 %v1076_v10  ;;  %v1069_v42 = vunpack.c.h.bf16 %v1084_v15 }
  0xf8   : > { %815 = vst.msk [vmem:[%s1280_s7 + $0x54] sm:$0xf] %vm793_vm1, %v995_v51  ;;  %v643_v63 = vadd.f32 %v1028_v45, %v483_v52  ;;  %v539_v0 = vadd.f32 %v1268_v21, %v538_v59  ;;  %v486_v1 = vadd.f32 %v1118_v60, %v1268_v21  ;;  %v1134_v2 = vpop.f32.mrb[10].mxu1  ;;  %v477_v3 = vpop.f32.mrb[11].mxu0  ;;  %v1033_v43 = vunpack.c.h.bf16 %v1075_v16 }
  0xf9   : > { %v659_v5 = vadd.f32 %v1060_v49, %v547_v57  ;;  %v641_v6 = vadd.f32 %v1024_v50, %v475_v58  ;;  %v550_v7 = vadd.f32 %v1134_v2, %v1268_v21  ;;  %v478_v8 = vadd.f32 %v1268_v21, %v477_v3  ;;  %v541_v9 = vpop.f32.mrb[11].mxu1 }
  0xfa   : > { %v984_v11 = vpack.c.bf16 %v643_v63, %v643_v63  ;;  %v657_v12 = vadd.f32 %v1056_v55, %v539_v0  ;;  %v644_v13 = vadd.f32 %v1029_v56, %v486_v1  ;;  %v542_v14 = vadd.f32 %v1268_v21, %v541_v9 }
  0xfb   : > { %v1000_v17 = vpack.c.bf16 %v659_v5, %v659_v5  ;;  %v982_v18 = vpack.c.bf16 %v641_v6, %v641_v6  ;;  %v660_v19 = vadd.f32 %v1061_v61, %v550_v7  ;;  %v642_v20 = vadd.f32 %v1025_v62, %v478_v8 }
  0xfc   : > { %804 = vst.msk [vmem:[%s1280_s7 + $0x28] sm:$0xf] %vm793_vm1, %v984_v11  ;;  %v998_v23 = vpack.c.bf16 %v657_v12, %v657_v12  ;;  %v985_v24 = vpack.c.bf16 %v644_v13, %v644_v13  ;;  %v658_v25 = vadd.f32 %v1057_v4, %v542_v14  ;;  %v1065_v49 = vunpack.c.h.bf16 %v1083_v22 }
  0xfd   : > { %820 = vst.msk [vmem:[%s1280_s7 + $0x68] sm:$0xf] %vm793_vm1, %v1000_v17  ;;  %802 = vst.msk [vmem:[%s1280_s7 + $0x20] sm:$0xf] %vm793_vm1, %v982_v18  ;;  %v1001_v27 = vpack.c.bf16 %v660_v19, %v660_v19  ;;  %v983_v28 = vpack.c.bf16 %v642_v20, %v642_v20  ;;  %v1121_v29 = vpop.f32.mrb[12].mxu0 }
  0xfe   : > { %818 = vst.msk [vmem:[%s1280_s7 + $0x60] sm:$0xf] %vm793_vm1, %v998_v23  ;;  %805 = vst.msk [vmem:[%s1280_s7 + $0x2c] sm:$0xf] %vm793_vm1, %v985_v24  ;;  %v999_v32 = vpack.c.bf16 %v658_v25, %v658_v25  ;;  %v499_v33 = vadd.f32 %v1121_v29, %v1268_v21  ;;  %v1137_v34 = vpop.f32.mrb[12].mxu1  ;;  %v490_v35 = vpop.f32.mrb[13].mxu0 }
  0xff   : > { %821 = vst.msk [vmem:[%s1280_s7 + $0x6c] sm:$0xf] %vm793_vm1, %v1001_v27  ;;  %803 = vst.msk [vmem:[%s1280_s7 + $0x24] sm:$0xf] %vm793_vm1, %v983_v28  ;;  %v563_v38 = vadd.f32 %v1137_v34, %v1268_v21  ;;  %v491_v39 = vadd.f32 %v1268_v21, %v490_v35  ;;  %v554_v40 = vpop.f32.mrb[13].mxu1  ;;  %v1122_v41 = vpop.f32.mrb[14].mxu0 }
 0x100   : > { %819 = vst.msk [vmem:[%s1280_s7 + $0x64] sm:$0xf] %vm793_vm1, %v999_v32  ;;  %v647_v44 = vadd.f32 %v1036_v26, %v499_v33  ;;  %v555_v45 = vadd.f32 %v1268_v21, %v554_v40  ;;  %v502_v46 = vadd.f32 %v1122_v41, %v1268_v21  ;;  %v1138_v47 = vpop.f32.mrb[14].mxu1  ;;  %v493_v48 = vpop.f32.mrb[15].mxu0 }
 0x101   : > { %v663_v50 = vadd.f32 %v1068_v30, %v563_v38  ;;  %v645_v51 = vadd.f32 %v1032_v31, %v491_v39  ;;  %v566_v52 = vadd.f32 %v1138_v47, %v1268_v21  ;;  %v494_v53 = vadd.f32 %v1268_v21, %v493_v48  ;;  %v557_v54 = vpop.f32.mrb[15].mxu1 }
 0x102   : > { %v988_v55 = vpack.c.bf16 %v647_v44, %v647_v44  ;;  %v661_v56 = vadd.f32 %v1064_v36, %v555_v45  ;;  %v648_v57 = vadd.f32 %v1037_v37, %v502_v46  ;;  %v558_v58 = vadd.f32 %v1268_v21, %v557_v54 }
 0x103   : > { %v1004_v59 = vpack.c.bf16 %v663_v50, %v663_v50  ;;  %v986_v60 = vpack.c.bf16 %v645_v51, %v645_v51  ;;  %v664_v61 = vadd.f32 %v1069_v42, %v566_v52  ;;  %v646_v62 = vadd.f32 %v1033_v43, %v494_v53 }
 0x104   : > { %808 = vst.msk [vmem:[%s1280_s7 + $0x38] sm:$0xf] %vm793_vm1, %v988_v55  ;;  %v1002_v63 = vpack.c.bf16 %v661_v56, %v661_v56  ;;  %v989_v0 = vpack.c.bf16 %v648_v57, %v648_v57  ;;  %v662_v1 = vadd.f32 %v1065_v49, %v558_v58 }
 0x105   : > { %824 = vst.msk [vmem:[%s1280_s7 + $0x78] sm:$0xf] %vm793_vm1, %v1004_v59  ;;  %806 = vst.msk [vmem:[%s1280_s7 + $0x30] sm:$0xf] %vm793_vm1, %v986_v60  ;;  %v1005_v2 = vpack.c.bf16 %v664_v61, %v664_v61  ;;  %v987_v3 = vpack.c.bf16 %v646_v62, %v646_v62 }
 0x106   : > { %822 = vst.msk [vmem:[%s1280_s7 + $0x70] sm:$0xf] %vm793_vm1, %v1002_v63  ;;  %809 = vst.msk [vmem:[%s1280_s7 + $0x3c] sm:$0xf] %vm793_vm1, %v989_v0  ;;  %v1003_v21 = vpack.c.bf16 %v662_v1, %v662_v1 }
 0x107   : > { %825 = vst.msk [vmem:[%s1280_s7 + $0x7c] sm:$0xf] %vm793_vm1, %v1005_v2  ;;  %807 = vst.msk [vmem:[%s1280_s7 + $0x34] sm:$0xf] %vm793_vm1, %v987_v3 }
 0x108   : > { %823 = vst.msk [vmem:[%s1280_s7 + $0x74] sm:$0xf] %vm793_vm1, %v1003_v21 }
 0x109 PF: > { %s14_s15 = sadd.s32 1, %s1175_s15  }
 0x10a   : > { %p11_p4 = scmp.ge.s32.totalorder %s14_s15, 4  }
 0x10c   :  { %13 = sbr.rel (!%p11_p4) target bundleno = 1 (0x1), region = 69 }

// kernel: nat_block.11
= control target key start
LH: loop header
LB: loop body
LE: loop exit
PB: predicated region body
PF: predicated region fallthrough
CT: control target
= control target key end

     0   :  { %10 = vsyncpa [#allocation3], 0  ;;  %s2472_s0 = inlined_call_operand.vmem [shape: bf16[512,32], index: 0, kind: input, shape index: {}]   ;;  %s2473_s1 = inlined_call_operand.vmem [shape: f32[1,32], index: 1, kind: input, shape index: {}]   ;;  %s2474_s2 = inlined_call_operand.vmem [shape: f32[1,32], index: 2, kind: input, shape index: {}]   ;;  %s2475_s3 = inlined_call_operand.hbm [shape: bf16[32,96], index: 3, kind: input, shape index: {}]   ;;  %s2476_s4 = inlined_call_operand.hbm [shape: f32[1,96], index: 4, kind: input, shape index: {}]   ;;  %s2477_s5 = inlined_call_operand.vmem [shape: bf16[512,96], index: 5, kind: output, shape index: {}]  }
   0x1   :  { %11 = vsyncpa [#allocation5], 0  ;;  %s1744_s18 = smov 0  }
   0x2 LB: > { %s1304_s19 = sadd.s32 4294967295, %s1708_s18   ;;  %p1306_p0 = scmp.ge.s32.totalorder %s1708_s18, 1  ;;  %s1708_s18 = sphi %s1744_s18, %s17_s18  }
   0x3   : > { %p158_p1 = scmp.lt.s32.totalorder %s1708_s18, 3  ;;  %s1710_s20 = smov [#allocation2]  }
   0x4   : > { %s176_s21 = sshll.u32 %s1710_s20, 4  ;;  %p1758_p3 = scmp.eq.s32.totalorder %s1304_s19, 0  ;;  %s177_s21 = int_to_ptr.vmem [resolvable:$true] %s176_s21 }
   0x5   : > { %p1752_p2 = pnand %p1306_p0, %p158_p1  ;;  %s1711_s24 = smov [#allocation4]  }
   0x6   : > { %s2482_s23 = scalar_select %p1758_p3, 1, 0 }
   0x7   : > { %s2481_s22 = scalar_select %p1752_p2, 1, 0 }
   0x8   : > { %p1549_p4 = pneg %p1752_p2  ;;  %s190_s25 = sshll.u32 %s1711_s24, 4  ;;  %s1770_s25 = int_to_ptr.vmem [resolvable:$true] %s190_s25 }
   0x9   : > { %s1638_s29 = scalar_lea.hbm %s2475_s3, 256 }
   0xa   : > { %p1766_p5 = pnand %p1758_p3, %p1549_p4  ;;  %p1639_p6 = scmp.ne.s32.totalorder %s2475_s3, %s1638_s29 }
   0xb   : > { %p1645_p10 = scmp.lt.u32.totalorder %s1638_s29, %s2475_s3 }
   0xc   : > { %p1640_p7 = pneg %p1766_p5 }
   0xe   : > { %p1641_p8 = pnand %p1640_p7, %p1639_p6 }
  0x10   : > { %p1642_p9 = pneg %p1641_p8 }
  0x12   : > { %p1647_p11 = pnand %p1645_p10, %p1642_p9 }
  0x14   : > { %1650 = shalt.err (!%p1647_p11)
}
  0x15   : > { %s1651_s9 = scalar_lea.vmem %s177_s21, 256  ;;  %p1659_p1 = scmp.lt.s32.totalorder %s177_s21, %s177_s21 }
  0x16   : > { %p1652_p12 = scmp.ne.s32.totalorder %s177_s21, %s1651_s9  ;;  %p1660_p4 = scmp.lt.s32.totalorder %s1651_s9, %s1651_s9 }
  0x18   : > { %p1654_p13 = pnand %p1652_p12, %p1640_p7  ;;  %p1661_p3 = por %p1660_p4, %p1659_p1 }
  0x1a   : > { %p1655_p0 = pneg %p1654_p13 }
  0x1c   : > { %p1662_p2 = pnand %p1661_p3, %p1655_p0 }
  0x1e   : > { %1665 = shalt.err (!%p1662_p2)
}
  0x1f   : > { %s1712_s10 = smov 64   ;;  %s1713_s11 = smov 4  }
  0x20   : > { %1552 = dma.hbm_to_vmem [thread:$0]  (!%p1766_p5), %s2475_s3, 256, %s177_s21, [#allocation3], %s1712_s10, %s1712_s10, %s1713_s11  }
  0x21   : > { %s1666_s16 = scalar_lea.hbm %s2476_s4, 16 }
  0x22   : > { %p1667_p6 = scmp.ne.s32.totalorder %s2476_s4, %s1666_s16  ;;  %p1673_p8 = scmp.lt.u32.totalorder %s1666_s16, %s2476_s4 }
  0x24   : > { %p1669_p2 = pnand %p1667_p6, %p1640_p7 }
  0x26   : > { %p1670_p3 = pneg %p1669_p2 }
  0x28   : > { %p1675_p9 = pnand %p1673_p8, %p1670_p3 }
  0x2a   : > { %1678 = shalt.err (!%p1675_p9)
}
  0x2b   : > { %s1679_s21 = scalar_lea.vmem %s1770_s25, 16  ;;  %s1686_s28 = scalar_lea.vmem %s1770_s25, 32 }
  0x2c   : > { %p1680_p10 = scmp.ne.s32.totalorder %s1770_s25, %s1679_s21  ;;  %p1687_p13 = scmp.lt.s32.totalorder %s1770_s25, %s1770_s25 }
  0x2d   : > { %p1688_p0 = scmp.lt.s32.totalorder %s1686_s28, %s1679_s21 }
  0x2e   : > { %p1682_p11 = pnand %p1680_p10, %p1640_p7 }
  0x2f   : > { %p1689_p1 = por %p1688_p0, %p1687_p13 }
  0x30   : > { %p1683_p12 = pneg %p1682_p11 }
  0x32   : > { %p1690_p4 = pnand %p1689_p1, %p1683_p12 }
  0x34   : > { %1693 = shalt.err (!%p1690_p4)
}
  0x35   : > { %1555 = dma.hbm_to_vmem [thread:$0]  (!%p1766_p5), %s2476_s4, 16, %s1770_s25, [#allocation5]  }
  0x36   : > { %p2484_p6 = scmp.ne.s32.totalorder %s2481_s22, 0 }
  0x37   : > { %p2485_p7 = scmp.ne.s32.totalorder (!%p2484_p6), %s2482_s23, 0 }
  0x38   : > { %212 = sbr.rel (%p2484_p6) target bundleno = 674 (0x2a2), region = 40 }
  0x3f   : > { %1699 = dma.done.wait (%p2485_p7), [#allocation3], 256  }
  0x40   : > { %1701 = vsyncadd (%p2485_p7), [#allocation3], 4294967040 }
  0x41   : > { %1703 = dma.done.wait (%p2485_p7), [#allocation5], 16  }
  0x42   : > { %1705 = vsyncadd (%p2485_p7), [#allocation5], 4294967280  ;;  %s1313_s26 = sshll.u32 %s1304_s19, 5  ;;  %vm321_vm0 = vcmask 261120   ;;  %vm1193_vm1 = vcmask 781312  }
  0x43   : > { %p245_p2 = scmp.lt.s32.totalorder %s1313_s26, 63 }
  0x45   : > { %s2487_s26 = smov (!%p245_p2, %s1313_s26), 63 }
  0x46   : > { %s1314_s22 = sshll.u32 %s2487_s26, 2 }
  0x47   : > { %s1840_s7 = scalar_lea.vmem %s2472_s0, %s1314_s22  ;;  %s2372_s12 = scalar_lea.vmem %s2477_s5, %s1314_s22 }
  0x48   : > { %v1843_v0 = vld [vmem:[%s1840_s7] sm:$0xff]   ;;  %v1853_v6 = vld [vmem:[%s1840_s7 + $0x8] sm:$0xff]   ;;  %v1881_v18 = vld [vmem:[%s1840_s7 + $0x10] sm:$0xff]  }
  0x49   : > { %v1846_v1 = vld [vmem:[%s1840_s7 + $0x40] sm:$0xff]   ;;  %v1406_v2 = vunpack.c.l.bf16 %v1843_v0  ;;  %v1407_v4 = vunpack.c.h.bf16 %v1843_v0  ;;  %v1410_v11 = vunpack.c.l.bf16 %v1853_v6  ;;  %v1411_v12 = vunpack.c.h.bf16 %v1853_v6  ;;  %v1870_v13 = vld [vmem:[%s1840_s7 + $0x48] sm:$0xff]   ;;  %v1892_v23 = vld [vmem:[%s1840_s7 + $0x50] sm:$0xff]  }
  0x4a   : > { %v1438_v3 = vunpack.c.l.bf16 %v1846_v1  ;;  %v1439_v5 = vunpack.c.h.bf16 %v1846_v1  ;;  %v1442_v16 = vunpack.c.l.bf16 %v1870_v13  ;;  %v1443_v17 = vunpack.c.h.bf16 %v1870_v13  ;;  %v1903_v28 = vld [vmem:[%s1840_s7 + $0x18] sm:$0xff]   ;;  %v1925_v38 = vld [vmem:[%s1840_s7 + $0x20] sm:$0xff]   ;;  %v1947_v48 = vld [vmem:[%s1840_s7 + $0x28] sm:$0xff]  }
  0x4b   : > { %v322_v7 = vsel %vm321_vm0, %v1406_v2, 0.0  ;;  %v325_v9 = vsel %vm321_vm0, %v1407_v4, 0.0  ;;  %v328_v14 = vsel %vm321_vm0, %v1410_v11, 0.0  ;;  %v331_v15 = vsel %vm321_vm0, %v1411_v12, 0.0  ;;  %v1914_v33 = vld [vmem:[%s1840_s7 + $0x58] sm:$0xff]   ;;  %v1936_v43 = vld [vmem:[%s1840_s7 + $0x60] sm:$0xff]  }
  0x4c   : > { %v370_v8 = vsel %vm321_vm0, %v1438_v3, 0.0  ;;  %323 = vadd.xlane.f32.xlu0 %v322_v7  ;;  %v373_v10 = vsel %vm321_vm0, %v1439_v5, 0.0  ;;  %v376_v19 = vsel %vm321_vm0, %v1442_v16, 0.0  ;;  %v379_v20 = vsel %vm321_vm0, %v1443_v17, 0.0  ;;  %v1958_v53 = vld [vmem:[%s1840_s7 + $0x68] sm:$0xff]   ;;  %v1969_v58 = vld [vmem:[%s1840_s7 + $0x30] sm:$0xff]  }
  0x4d   : > { %371 = vadd.xlane.f32.xlu1 %v370_v8  ;;  %v1414_v21 = vunpack.c.l.bf16 %v1881_v18  ;;  %v1415_v22 = vunpack.c.h.bf16 %v1881_v18  ;;  %v1446_v26 = vunpack.c.l.bf16 %v1892_v23  ;;  %v1447_v27 = vunpack.c.h.bf16 %v1892_v23  ;;  %v1980_v63 = vld [vmem:[%s1840_s7 + $0x70] sm:$0xff]  }
  0x4e   : > { %v1418_v31 = vunpack.c.l.bf16 %v1903_v28  ;;  %v1419_v32 = vunpack.c.h.bf16 %v1903_v28  ;;  %v1450_v36 = vunpack.c.l.bf16 %v1914_v33  ;;  %v1451_v37 = vunpack.c.h.bf16 %v1914_v33 }
  0x4f   : > { %v334_v24 = vsel %vm321_vm0, %v1414_v21, 0.0  ;;  %v337_v25 = vsel %vm321_vm0, %v1415_v22, 0.0  ;;  %v382_v29 = vsel %vm321_vm0, %v1446_v26, 0.0  ;;  %v385_v30 = vsel %vm321_vm0, %v1447_v27, 0.0 }
  0x50   : > { %326 = vadd.xlane.f32.xlu0 %v325_v9  ;;  %v340_v34 = vsel %vm321_vm0, %v1418_v31, 0.0  ;;  %v343_v35 = vsel %vm321_vm0, %v1419_v32, 0.0  ;;  %v388_v39 = vsel %vm321_vm0, %v1450_v36, 0.0  ;;  %v391_v40 = vsel %vm321_vm0, %v1451_v37, 0.0 }
  0x51   : > { %374 = vadd.xlane.f32.xlu1 %v373_v10  ;;  %v1422_v41 = vunpack.c.l.bf16 %v1925_v38  ;;  %v1423_v42 = vunpack.c.h.bf16 %v1925_v38  ;;  %v1454_v46 = vunpack.c.l.bf16 %v1936_v43  ;;  %v1455_v47 = vunpack.c.h.bf16 %v1936_v43 }
  0x52   : > { %v1426_v51 = vunpack.c.l.bf16 %v1947_v48  ;;  %v1427_v52 = vunpack.c.h.bf16 %v1947_v48  ;;  %v1458_v56 = vunpack.c.l.bf16 %v1958_v53  ;;  %v1459_v57 = vunpack.c.h.bf16 %v1958_v53 }
  0x53   : > { %v346_v44 = vsel %vm321_vm0, %v1422_v41, 0.0  ;;  %v349_v45 = vsel %vm321_vm0, %v1423_v42, 0.0  ;;  %v394_v49 = vsel %vm321_vm0, %v1454_v46, 0.0  ;;  %v397_v50 = vsel %vm321_vm0, %v1455_v47, 0.0 }
  0x54   : > { %329 = vadd.xlane.f32.xlu0 %v328_v14  ;;  %v352_v54 = vsel %vm321_vm0, %v1426_v51, 0.0  ;;  %v355_v55 = vsel %vm321_vm0, %v1427_v52, 0.0  ;;  %v400_v59 = vsel %vm321_vm0, %v1458_v56, 0.0  ;;  %v403_v60 = vsel %vm321_vm0, %v1459_v57, 0.0  ;;  %v1991_v14 = vld [vmem:[%s1840_s7 + $0x38] sm:$0xff]  }
  0x55   : > { %332 = vadd.xlane.f32.xlu1 %v331_v15  ;;  %v1430_v61 = vunpack.c.l.bf16 %v1969_v58  ;;  %v1431_v62 = vunpack.c.h.bf16 %v1969_v58  ;;  %v1462_v9 = vunpack.c.l.bf16 %v1980_v63  ;;  %v1463_v10 = vunpack.c.h.bf16 %v1980_v63 }
  0x57   : > { %v358_v7 = vsel %vm321_vm0, %v1430_v61, 0.0  ;;  %v361_v8 = vsel %vm321_vm0, %v1431_v62, 0.0  ;;  %v406_v15 = vsel %vm321_vm0, %v1462_v9, 0.0 }
  0x58   : > { %377 = vadd.xlane.f32.xlu0 %v376_v19  ;;  %v409_v19 = vsel %vm321_vm0, %v1463_v10, 0.0 }
  0x59   : > { %380 = vadd.xlane.f32.xlu1 %v379_v20  ;;  %v1434_v20 = vunpack.c.l.bf16 %v1991_v14 }
  0x5c   : > { %335 = vadd.xlane.f32.xlu0 %v334_v24  ;;  %v1435_v24 = vunpack.c.h.bf16 %v1991_v14 }
  0x5d   : > { %338 = vadd.xlane.f32.xlu1 %v337_v25  ;;  %v2002_v25 = vld [vmem:[%s1840_s7 + $0x78] sm:$0xff]  }
  0x60   : > { %383 = vadd.xlane.f32.xlu0 %v382_v29  ;;  %v364_v29 = vsel %vm321_vm0, %v1434_v20, 0.0 }
  0x61   : > { %386 = vadd.xlane.f32.xlu1 %v385_v30  ;;  %v367_v30 = vsel %vm321_vm0, %v1435_v24, 0.0 }
  0x64   : > { %341 = vadd.xlane.f32.xlu0 %v340_v34  ;;  %v1466_v34 = vunpack.c.l.bf16 %v2002_v25 }
  0x65   : > { %344 = vadd.xlane.f32.xlu1 %v343_v35  ;;  %v1467_v35 = vunpack.c.h.bf16 %v2002_v25 }
  0x68   : > { %389 = vadd.xlane.f32.xlu0 %v388_v39  ;;  %v412_v39 = vsel %vm321_vm0, %v1466_v34, 0.0 }
  0x69   : > { %392 = vadd.xlane.f32.xlu1 %v391_v40  ;;  %v415_v40 = vsel %vm321_vm0, %v1467_v35, 0.0 }
  0x6c   : > { %347 = vadd.xlane.f32.xlu0 %v346_v44 }
  0x6d   : > { %350 = vadd.xlane.f32.xlu1 %v349_v45 }
  0x70   : > { %395 = vadd.xlane.f32.xlu0 %v394_v49 }
  0x71   : > { %398 = vadd.xlane.f32.xlu1 %v397_v50 }
  0x74   : > { %353 = vadd.xlane.f32.xlu0 %v352_v54 }
  0x75   : > { %356 = vadd.xlane.f32.xlu1 %v355_v55 }
  0x78   : > { %401 = vadd.xlane.f32.xlu0 %v400_v59 }
  0x79   : > { %404 = vadd.xlane.f32.xlu1 %v403_v60 }
  0x7c   : > { %359 = vadd.xlane.f32.xlu0 %v358_v7 }
  0x7d   : > { %362 = vadd.xlane.f32.xlu1 %v361_v8 }
  0x80   : > { %407 = vadd.xlane.f32.xlu0 %v406_v15 }
  0x81   : > { %410 = vadd.xlane.f32.xlu1 %v409_v19 }
  0x84   : > { %365 = vadd.xlane.f32.xlu0 %v364_v29 }
  0x85   : > { %368 = vadd.xlane.f32.xlu1 %v367_v30 }
  0x88   : > { %413 = vadd.xlane.f32.xlu0 %v412_v39 }
  0x89   : > { %416 = vadd.xlane.f32.xlu1 %v415_v40 }
  0xd9   : > { %v324_v44 = vpop.xlane.xlu0 %323 }
  0xda   : > { %v372_v45 = vpop.xlane.xlu1 %371  ;;  %v419_v49 = vmul.f32 0.03125, %v324_v44 }
  0xdb   : > { %v435_v50 = vmul.f32 0.03125, %v372_v45 }
  0xdc   : > { %v2020_v54 = vsub.f32 %v1406_v2, %v419_v49 }
  0xdd   : > { %v2024_v55 = vsub.f32 %v1438_v3, %v435_v50  ;;  %v327_v59 = vpop.xlane.xlu0 %326 }
  0xde   : > { %v375_v60 = vpop.xlane.xlu1 %374  ;;  %v420_v7 = vmul.f32 0.03125, %v327_v59  ;;  %v483_v15 = vmul.f32 %v2020_v54, %v2020_v54 }
  0xdf   : > { %v436_v8 = vmul.f32 0.03125, %v375_v60  ;;  %v499_v19 = vmul.f32 %v2024_v55, %v2024_v55 }
  0xe0   : > { %v2032_v29 = vsub.f32 %v1407_v4, %v420_v7  ;;  %v515_v3 = vsel %vm321_vm0, %v483_v15, 0.0 }
  0xe1   : > { %v2036_v2 = vsub.f32 %v1439_v5, %v436_v8  ;;  %516 = vadd.xlane.f32.xlu0 %v515_v3  ;;  %v330_v30 = vpop.xlane.xlu0 %329  ;;  %v563_v40 = vsel %vm321_vm0, %v499_v19, 0.0 }
  0xe2   : > { %v333_v39 = vpop.xlane.xlu1 %332  ;;  %v421_v44 = vmul.f32 0.03125, %v330_v30  ;;  %v484_v49 = vmul.f32 %v2032_v29, %v2032_v29 }
  0xe3   : > { %v422_v45 = vmul.f32 0.03125, %v333_v39  ;;  %v500_v0 = vmul.f32 %v2036_v2, %v2036_v2 }
  0xe4   : > { %v2046_v1 = vsub.f32 %v1410_v11, %v421_v44  ;;  %v518_v5 = vsel %vm321_vm0, %v484_v49, 0.0 }
  0xe5   : > { %v2050_v4 = vsub.f32 %v1411_v12, %v422_v45  ;;  %564 = vadd.xlane.f32.xlu0 %v563_v40  ;;  %519 = vadd.xlane.f32.xlu1 %v518_v5  ;;  %v378_v50 = vpop.xlane.xlu0 %377  ;;  %v566_v60 = vsel %vm321_vm0, %v500_v0, 0.0 }
  0xe6   : > { %v381_v59 = vpop.xlane.xlu1 %380  ;;  %v437_v7 = vmul.f32 0.03125, %v378_v50  ;;  %v485_v15 = vmul.f32 %v2046_v1, %v2046_v1 }
  0xe7   : > { %v438_v8 = vmul.f32 0.03125, %v381_v59  ;;  %v486_v11 = vmul.f32 %v2050_v4, %v2050_v4 }
  0xe8   : > { %v2060_v6 = vsub.f32 %v1442_v16, %v437_v7  ;;  %v521_v19 = vsel %vm321_vm0, %v485_v15, 0.0 }
  0xe9   : > { %v2064_v12 = vsub.f32 %v1443_v17, %v438_v8  ;;  %567 = vadd.xlane.f32.xlu1 %v566_v60  ;;  %522 = vadd.xlane.f32.xlu0 %v521_v19  ;;  %v336_v3 = vpop.xlane.xlu0 %335  ;;  %v524_v39 = vsel %vm321_vm0, %v486_v11, 0.0 }
  0xea   : > { %v339_v30 = vpop.xlane.xlu1 %338  ;;  %v423_v40 = vmul.f32 0.03125, %v336_v3  ;;  %v501_v45 = vmul.f32 %v2060_v6, %v2060_v6 }
  0xeb   : > { %v424_v44 = vmul.f32 0.03125, %v339_v30  ;;  %v502_v16 = vmul.f32 %v2064_v12, %v2064_v12 }
  0xec   : > { %v2074_v13 = vsub.f32 %v1414_v21, %v423_v40  ;;  %v569_v49 = vsel %vm321_vm0, %v501_v45, 0.0 }
  0xed   : > { %v2078_v17 = vsub.f32 %v1415_v22, %v424_v44  ;;  %525 = vadd.xlane.f32.xlu1 %v524_v39  ;;  %570 = vadd.xlane.f32.xlu0 %v569_v49  ;;  %v384_v0 = vpop.xlane.xlu0 %383  ;;  %v572_v50 = vsel %vm321_vm0, %v502_v16, 0.0 }
  0xee   : > { %v387_v5 = vpop.xlane.xlu1 %386  ;;  %v439_v59 = vmul.f32 0.03125, %v384_v0  ;;  %v487_v7 = vmul.f32 %v2074_v13, %v2074_v13 }
  0xef   : > { %v440_v60 = vmul.f32 0.03125, %v387_v5  ;;  %v488_v21 = vmul.f32 %v2078_v17, %v2078_v17 }
  0xf0   : > { %v2088_v18 = vsub.f32 %v1446_v26, %v439_v59  ;;  %v527_v8 = vsel %vm321_vm0, %v487_v7, 0.0 }
  0xf1   : > { %v2092_v22 = vsub.f32 %v1447_v27, %v440_v60  ;;  %573 = vadd.xlane.f32.xlu1 %v572_v50  ;;  %528 = vadd.xlane.f32.xlu0 %v527_v8  ;;  %v342_v15 = vpop.xlane.xlu0 %341  ;;  %v530_v19 = vsel %vm321_vm0, %v488_v21, 0.0 }
  0xf2   : > { %v345_v11 = vpop.xlane.xlu1 %344  ;;  %v425_v3 = vmul.f32 0.03125, %v342_v15  ;;  %v503_v39 = vmul.f32 %v2088_v18, %v2088_v18 }
  0xf3   : > { %v426_v30 = vmul.f32 0.03125, %v345_v11  ;;  %v504_v26 = vmul.f32 %v2092_v22, %v2092_v22 }
  0xf4   : > { %v2102_v23 = vsub.f32 %v1418_v31, %v425_v3  ;;  %v575_v40 = vsel %vm321_vm0, %v503_v39, 0.0 }
  0xf5   : > { %v2106_v27 = vsub.f32 %v1419_v32, %v426_v30  ;;  %531 = vadd.xlane.f32.xlu1 %v530_v19  ;;  %576 = vadd.xlane.f32.xlu0 %v575_v40  ;;  %v390_v44 = vpop.xlane.xlu0 %389  ;;  %v578_v16 = vsel %vm321_vm0, %v504_v26, 0.0 }
  0xf6   : > { %v393_v45 = vpop.xlane.xlu1 %392  ;;  %v441_v49 = vmul.f32 0.03125, %v390_v44  ;;  %v489_v5 = vmul.f32 %v2102_v23, %v2102_v23 }
  0xf7   : > { %v442_v0 = vmul.f32 0.03125, %v393_v45  ;;  %v490_v31 = vmul.f32 %v2106_v27, %v2106_v27 }
  0xf8   : > { %v2116_v28 = vsub.f32 %v1450_v36, %v441_v49  ;;  %v533_v50 = vsel %vm321_vm0, %v489_v5, 0.0 }
  0xf9   : > { %v2120_v32 = vsub.f32 %v1451_v37, %v442_v0  ;;  %579 = vadd.xlane.f32.xlu1 %v578_v16  ;;  %534 = vadd.xlane.f32.xlu0 %v533_v50  ;;  %v348_v59 = vpop.xlane.xlu0 %347  ;;  %v536_v7 = vsel %vm321_vm0, %v490_v31, 0.0 }
  0xfa   : > { %v351_v60 = vpop.xlane.xlu1 %350  ;;  %v427_v21 = vmul.f32 0.03125, %v348_v59  ;;  %v505_v15 = vmul.f32 %v2116_v28, %v2116_v28 }
  0xfb   : > { %v428_v8 = vmul.f32 0.03125, %v351_v60  ;;  %v506_v36 = vmul.f32 %v2120_v32, %v2120_v32 }
  0xfc   : > { %v2130_v33 = vsub.f32 %v1422_v41, %v427_v21  ;;  %v581_v11 = vsel %vm321_vm0, %v505_v15, 0.0 }
  0xfd   : > { %v2134_v37 = vsub.f32 %v1423_v42, %v428_v8  ;;  %537 = vadd.xlane.f32.xlu1 %v536_v7  ;;  %582 = vadd.xlane.f32.xlu0 %v581_v11  ;;  %v396_v19 = vpop.xlane.xlu0 %395  ;;  %v584_v30 = vsel %vm321_vm0, %v506_v36, 0.0 }
  0xfe   : > { %v399_v3 = vpop.xlane.xlu1 %398  ;;  %v443_v39 = vmul.f32 0.03125, %v396_v19  ;;  %v491_v40 = vmul.f32 %v2130_v33, %v2130_v33 }
  0xff   : > { %v444_v26 = vmul.f32 0.03125, %v399_v3  ;;  %v492_v41 = vmul.f32 %v2134_v37, %v2134_v37 }
 0x100   : > { %v2144_v38 = vsub.f32 %v1454_v46, %v443_v39  ;;  %v539_v44 = vsel %vm321_vm0, %v491_v40, 0.0 }
 0x101   : > { %v2148_v42 = vsub.f32 %v1455_v47, %v444_v26  ;;  %585 = vadd.xlane.f32.xlu1 %v584_v30  ;;  %540 = vadd.xlane.f32.xlu0 %v539_v44  ;;  %v354_v45 = vpop.xlane.xlu0 %353  ;;  %v542_v49 = vsel %vm321_vm0, %v492_v41, 0.0  ;;  %v1572_v30 = vld [vmem:[#allocation2] sm:$0xff]  }
 0x102   : > { %v357_v16 = vpop.xlane.xlu1 %356  ;;  %v429_v0 = vmul.f32 0.03125, %v354_v45  ;;  %v507_v31 = vmul.f32 %v2144_v38, %v2144_v38  ;;  %1501 = vmatprep.subr.bf16.mxu0 %v1572_v30  ;;  %1537 = vmatprep.subr.bf16.mxu1 %v1572_v30 }
 0x103   : > { %v430_v5 = vmul.f32 0.03125, %v357_v16  ;;  %v508_v46 = vmul.f32 %v2148_v42, %v2148_v42  ;;  %1502 = vmatpush3.bf16.msra.mxu0 %v1572_v30  ;;  %1539 = vmatpush3.bf16.msra.mxu1 %v1572_v30 }
 0x104   : > { %v2158_v43 = vsub.f32 %v1426_v51, %v429_v0  ;;  %v587_v50 = vsel %vm321_vm0, %v507_v31, 0.0 }
 0x105   : > { %v2162_v47 = vsub.f32 %v1427_v52, %v430_v5  ;;  %543 = vadd.xlane.f32.xlu1 %v542_v49  ;;  %588 = vadd.xlane.f32.xlu0 %v587_v50  ;;  %v402_v59 = vpop.xlane.xlu0 %401  ;;  %v590_v7 = vsel %vm321_vm0, %v508_v46, 0.0  ;;  %v1573_v49 = vld [vmem:[#allocation2 + $0x8] sm:$0xff]  }
 0x106   : > { %v405_v60 = vpop.xlane.xlu1 %404  ;;  %v445_v21 = vmul.f32 0.03125, %v402_v59  ;;  %v493_v15 = vmul.f32 %v2158_v43, %v2158_v43  ;;  %1503 = vmatprep.subr.bf16.mxu0 %v1573_v49  ;;  %1538 = vmatprep.subr.bf16.mxu1 %v1573_v49 }
 0x107   : > { %v446_v8 = vmul.f32 0.03125, %v405_v60  ;;  %v494_v51 = vmul.f32 %v2162_v47, %v2162_v47  ;;  %1504 = vmatpush3.bf16.msra.mxu0 %v1573_v49  ;;  %1540 = vmatpush3.bf16.msra.mxu1 %v1573_v49 }
 0x108   : > { %v2172_v48 = vsub.f32 %v1458_v56, %v445_v21  ;;  %v545_v36 = vsel %vm321_vm0, %v493_v15, 0.0 }
 0x109   : > { %v2176_v52 = vsub.f32 %v1459_v57, %v446_v8  ;;  %591 = vadd.xlane.f32.xlu1 %v590_v7  ;;  %546 = vadd.xlane.f32.xlu0 %v545_v36  ;;  %v360_v11 = vpop.xlane.xlu0 %359  ;;  %v548_v3 = vsel %vm321_vm0, %v494_v51, 0.0 }
 0x10a   : > { %v363_v19 = vpop.xlane.xlu1 %362  ;;  %v431_v39 = vmul.f32 0.03125, %v360_v11  ;;  %v509_v40 = vmul.f32 %v2172_v48, %v2172_v48 }
 0x10b   : > { %v432_v26 = vmul.f32 0.03125, %v363_v19  ;;  %v510_v56 = vmul.f32 %v2176_v52, %v2176_v52 }
 0x10c   : > { %v2186_v53 = vsub.f32 %v1430_v61, %v431_v39  ;;  %v593_v41 = vsel %vm321_vm0, %v509_v40, 0.0 }
 0x10d   : > { %v2190_v57 = vsub.f32 %v1431_v62, %v432_v26  ;;  %549 = vadd.xlane.f32.xlu1 %v548_v3  ;;  %594 = vadd.xlane.f32.xlu0 %v593_v41  ;;  %v408_v44 = vpop.xlane.xlu0 %407  ;;  %v596_v16 = vsel %vm321_vm0, %v510_v56, 0.0 }
 0x10e   : > { %v411_v45 = vpop.xlane.xlu1 %410  ;;  %v447_v0 = vmul.f32 0.03125, %v408_v44  ;;  %v495_v61 = vmul.f32 %v2186_v53, %v2186_v53 }
 0x10f   : > { %v448_v5 = vmul.f32 0.03125, %v411_v45  ;;  %v496_v58 = vmul.f32 %v2190_v57, %v2190_v57 }
 0x110   : > { %v2200_v62 = vsub.f32 %v1462_v9, %v447_v0  ;;  %v551_v46 = vsel %vm321_vm0, %v495_v61, 0.0 }
 0x111   : > { %v2204_v31 = vsub.f32 %v1463_v10, %v448_v5  ;;  %597 = vadd.xlane.f32.xlu1 %v596_v16  ;;  %552 = vadd.xlane.f32.xlu0 %v551_v46  ;;  %v366_v50 = vpop.xlane.xlu0 %365  ;;  %v554_v60 = vsel %vm321_vm0, %v496_v58, 0.0 }
 0x112   : > { %v369_v59 = vpop.xlane.xlu1 %368  ;;  %v433_v7 = vmul.f32 0.03125, %v366_v50  ;;  %v511_v9 = vmul.f32 %v2200_v62, %v2200_v62 }
 0x113   : > { %v434_v21 = vmul.f32 0.03125, %v369_v59  ;;  %v512_v63 = vmul.f32 %v2204_v31, %v2204_v31 }
 0x114   : > { %v2214_v10 = vsub.f32 %v1434_v20, %v433_v7  ;;  %v599_v15 = vsel %vm321_vm0, %v511_v9, 0.0 }
 0x115   : > { %v2218_v8 = vsub.f32 %v1435_v24, %v434_v21  ;;  %555 = vadd.xlane.f32.xlu1 %v554_v60  ;;  %600 = vadd.xlane.f32.xlu0 %v599_v15  ;;  %v414_v51 = vpop.xlane.xlu0 %413  ;;  %v602_v11 = vsel %vm321_vm0, %v512_v63, 0.0 }
 0x116   : > { %v417_v36 = vpop.xlane.xlu1 %416  ;;  %v449_v19 = vmul.f32 0.03125, %v414_v51  ;;  %v497_v30 = vmul.f32 %v2214_v10, %v2214_v10 }
 0x117   : > { %v450_v3 = vmul.f32 0.03125, %v417_v36  ;;  %v498_v20 = vmul.f32 %v2218_v8, %v2218_v8 }
 0x118   : > { %v2228_v14 = vsub.f32 %v1466_v34, %v449_v19  ;;  %v557_v39 = vsel %vm321_vm0, %v497_v30, 0.0 }
 0x119   : > { %v2232_v24 = vsub.f32 %v1467_v35, %v450_v3  ;;  %603 = vadd.xlane.f32.xlu1 %v602_v11  ;;  %558 = vadd.xlane.f32.xlu0 %v557_v39  ;;  %v560_v26 = vsel %vm321_vm0, %v498_v20, 0.0 }
 0x11a   : > { %v513_v40 = vmul.f32 %v2228_v14, %v2228_v14 }
 0x11b   : > { %v514_v56 = vmul.f32 %v2232_v24, %v2232_v24 }
 0x11c   : > { %v605_v41 = vsel %vm321_vm0, %v513_v40, 0.0 }
 0x11d   : > { %561 = vadd.xlane.f32.xlu1 %v560_v26  ;;  %606 = vadd.xlane.f32.xlu0 %v605_v41  ;;  %v608_v25 = vsel %vm321_vm0, %v514_v56, 0.0  ;;  %v2246_v26 = vld [vmem:[%s2473_s1] ss:$0 sm:$0xff] }
 0x121   : > { %609 = vadd.xlane.f32.xlu1 %v608_v25 }
 0x16e   : > { %v517_v34 = vpop.xlane.xlu0 %516 }
 0x16f   : > { %v611_v35 = vmul.f32 0.03125, %v517_v34 }
 0x171   : > { %v643_v44 = vadd.f32 1e-05, %v611_v35 }
 0x172   : > { %v520_v45 = vpop.xlane.xlu1 %519  ;;  %v565_v16 = vpop.xlane.xlu0 %564 }
 0x173   : > { %1574 = vrsqrt.f32 %v643_v44  ;;  %v612_v49 = vmul.f32 0.03125, %v520_v45  ;;  %v627_v0 = vmul.f32 0.03125, %v565_v16 }
 0x175   : > { %v644_v5 = vadd.f32 1e-05, %v612_v49  ;;  %v659_v61 = vadd.f32 1e-05, %v627_v0  ;;  %v2253_v49 = vld [vmem:[%s2474_s2] ss:$0 sm:$0xff] }
 0x176   : > { %v568_v58 = vpop.xlane.xlu1 %567  ;;  %v523_v46 = vpop.xlane.xlu0 %522 }
 0x177   : > { %1576 = vrsqrt.f32 %v644_v5  ;;  %v628_v50 = vmul.f32 0.03125, %v568_v58  ;;  %v613_v59 = vmul.f32 0.03125, %v523_v46 }
 0x178   : > { %1578 = vrsqrt.f32 %v659_v61 }
 0x179   : > { %v660_v60 = vadd.f32 1e-05, %v628_v50  ;;  %v645_v7 = vadd.f32 1e-05, %v613_v59 }
 0x17a   : > { %v526_v21 = vpop.xlane.xlu1 %525  ;;  %v571_v9 = vpop.xlane.xlu0 %570 }
 0x17b   : > { %1580 = vrsqrt.f32 %v660_v60  ;;  %v614_v63 = vmul.f32 0.03125, %v526_v21  ;;  %v629_v15 = vmul.f32 0.03125, %v571_v9 }
 0x17c   : > { %1582 = vrsqrt.f32 %v645_v7 }
 0x17d   : > { %v1575_v51 = vpop.eup %1574  ;;  %v646_v36 = vadd.f32 1e-05, %v614_v63  ;;  %v661_v11 = vadd.f32 1e-05, %v629_v15 }
 0x17e   : > { %v574_v19 = vpop.xlane.xlu1 %573  ;;  %v529_v3 = vpop.xlane.xlu0 %528  ;;  %v707_v30 = vmul.f32 %v1575_v51, %v2020_v54 }
 0x17f   : > { %1584 = vrsqrt.f32 %v646_v36  ;;  %v630_v20 = vmul.f32 0.03125, %v574_v19  ;;  %v615_v39 = vmul.f32 0.03125, %v529_v3 }
 0x180   : > { %1586 = vrsqrt.f32 %v661_v11  ;;  %v746_v45 = vmul.f32 %v2246_v26, %v707_v30 }
 0x181   : > { %v1577_v40 = vpop.eup %1576  ;;  %v662_v56 = vadd.f32 1e-05, %v630_v20  ;;  %v647_v41 = vadd.f32 1e-05, %v615_v39 }
 0x182   : > { %v1579_v25 = vpop.eup %1578  ;;  %v532_v34 = vpop.xlane.xlu1 %531  ;;  %v708_v44 = vmul.f32 %v1577_v40, %v2032_v29  ;;  %v785_v60 = vadd.f32 %v2253_v49, %v746_v45 }
 0x183   : > { %v577_v35 = vpop.xlane.xlu0 %576  ;;  %1588 = vrsqrt.f32 %v662_v56  ;;  %v616_v54 = vmul.f32 0.03125, %v532_v34  ;;  %v723_v0 = vmul.f32 %v1579_v25, %v2024_v55 }
 0x184   : > { %v631_v16 = vmul.f32 0.03125, %v577_v35  ;;  %1590 = vrsqrt.f32 %v647_v41  ;;  %v747_v5 = vmul.f32 %v2246_v26, %v708_v44 }
 0x185   : > { %v1581_v61 = vpop.eup %1580  ;;  %v648_v58 = vadd.f32 1e-05, %v616_v54  ;;  %v762_v9 = vmul.f32 %v2246_v26, %v723_v0 }
 0x186   : > { %v663_v46 = vadd.f32 1e-05, %v631_v16  ;;  %v1583_v50 = vpop.eup %1582  ;;  %v580_v29 = vpop.xlane.xlu1 %579  ;;  %v786_v7 = vadd.f32 %v2253_v49, %v747_v5  ;;  %v724_v21 = vmul.f32 %v1581_v61, %v2036_v2 }
 0x187   : > { %v535_v59 = vpop.xlane.xlu0 %534  ;;  %v709_v63 = vmul.f32 %v1583_v50, %v2046_v1  ;;  %1592 = vrsqrt.f32 %v648_v58  ;;  %v632_v55 = vmul.f32 0.03125, %v580_v29  ;;  %v801_v40 = vadd.f32 %v2253_v49, %v762_v9 }
 0x188   : > { %v617_v15 = vmul.f32 0.03125, %v535_v59  ;;  %1594 = vrsqrt.f32 %v663_v46  ;;  %v817_v51 = vpack.c.bf16 %v786_v7, %v785_v60  ;;  %v763_v36 = vmul.f32 %v2246_v26, %v724_v21 }
 0x189   : > { %v1585_v11 = vpop.eup %1584  ;;  %v664_v19 = vadd.f32 1e-05, %v632_v55  ;;  %v748_v56 = vmul.f32 %v2246_v26, %v709_v63 }
 0x18a   : > { %v649_v3 = vadd.f32 1e-05, %v617_v15  ;;  %v1587_v30 = vpop.eup %1586  ;;  %v710_v20 = vmul.f32 %v1585_v11, %v2050_v4  ;;  %v538_v39 = vpop.xlane.xlu1 %537  ;;  %1505 = vmatprep.mubr.msk.bf16.mxu0 %vm321_vm0, %v817_v51  ;;  %v802_v1 = vadd.f32 %v2253_v49, %v763_v36 }
 0x18b   : > { %v583_v2 = vpop.xlane.xlu0 %582  ;;  %v725_v41 = vmul.f32 %v1587_v30, %v2060_v6  ;;  %1596 = vrsqrt.f32 %v664_v19  ;;  %v618_v25 = vmul.f32 0.03125, %v538_v39  ;;  %v787_v58 = vadd.f32 %v2253_v49, %v748_v56 }
 0x18c   : > { %v633_v34 = vmul.f32 0.03125, %v583_v2  ;;  %1598 = vrsqrt.f32 %v649_v3  ;;  %v825_v35 = vpack.c.bf16 %v802_v1, %v801_v40  ;;  %v749_v44 = vmul.f32 %v2246_v26, %v710_v20 }
 0x18d   : > { %v1589_v4 = vpop.eup %1588  ;;  %v650_v45 = vadd.f32 1e-05, %v618_v25  ;;  %v764_v46 = vmul.f32 %v2246_v26, %v725_v41 }
 0x18e   : > { %v665_v54 = vadd.f32 1e-05, %v633_v34  ;;  %v1591_v16 = vpop.eup %1590  ;;  %v726_v0 = vmul.f32 %v1589_v4, %v2064_v12  ;;  %v586_v5 = vpop.xlane.xlu1 %585  ;;  %1521 = vmatprep.mubr.msk.bf16.mxu1 %vm321_vm0, %v825_v35  ;;  %v788_v6 = vadd.f32 %v2253_v49, %v749_v44 }
 0x18f   : > { %v541_v61 = vpop.xlane.xlu0 %540  ;;  %v711_v50 = vmul.f32 %v1591_v16, %v2074_v13  ;;  %1600 = vrsqrt.f32 %v650_v45  ;;  %v634_v29 = vmul.f32 0.03125, %v586_v5  ;;  %v803_v36 = vadd.f32 %v2253_v49, %v764_v46 }
 0x190   : > { %v619_v59 = vmul.f32 0.03125, %v541_v61  ;;  %1602 = vrsqrt.f32 %v665_v54  ;;  %v818_v60 = vpack.c.bf16 %v788_v6, %v787_v58  ;;  %v765_v7 = vmul.f32 %v2246_v26, %v726_v0 }
 0x191   : > { %v1593_v12 = vpop.eup %1592  ;;  %v666_v21 = vadd.f32 1e-05, %v634_v29  ;;  %v750_v11 = vmul.f32 %v2246_v26, %v711_v50 }
 0x192   : > { %v651_v9 = vadd.f32 1e-05, %v619_v59  ;;  %v1595_v63 = vpop.eup %1594  ;;  %v712_v55 = vmul.f32 %v1593_v12, %v2078_v17  ;;  %v544_v15 = vpop.xlane.xlu1 %543  ;;  %1506 = vmatmul.mubr.msk.bf16.vlgmr.msra.gmra.mrb[0].mxu0 %vm321_vm0, %v818_v60  ;;  %v804_v13 = vadd.f32 %v2253_v49, %v765_v7 }
 0x193   : > { %v589_v51 = vpop.xlane.xlu0 %588  ;;  %v727_v19 = vmul.f32 %v1595_v63, %v2088_v18  ;;  %1604 = vrsqrt.f32 %v666_v21  ;;  %v620_v3 = vmul.f32 0.03125, %v544_v15  ;;  %v789_v34 = vadd.f32 %v2253_v49, %v750_v11 }
 0x194   : > { %v635_v30 = vmul.f32 0.03125, %v589_v51  ;;  %1606 = vrsqrt.f32 %v651_v9  ;;  %v826_v20 = vpack.c.bf16 %v804_v13, %v803_v36  ;;  %v751_v39 = vmul.f32 %v2246_v26, %v712_v55 }
 0x195   : > { %v1597_v17 = vpop.eup %1596  ;;  %v652_v2 = vadd.f32 1e-05, %v620_v3  ;;  %v766_v35 = vmul.f32 %v2246_v26, %v727_v19 }
 0x196   : > { %v667_v40 = vadd.f32 1e-05, %v635_v30  ;;  %v1599_v1 = vpop.eup %1598  ;;  %v728_v56 = vmul.f32 %v1597_v17, %v2092_v22  ;;  %v592_v41 = vpop.xlane.xlu1 %591  ;;  %1522 = vmatmul.mubr.msk.bf16.vlgmr.msra.gmra.mrb[0].mxu1 %vm321_vm0, %v826_v20  ;;  %v790_v18 = vadd.f32 %v2253_v49, %v751_v39 }
 0x197   : > { %v547_v25 = vpop.xlane.xlu0 %546  ;;  %v713_v44 = vmul.f32 %v1599_v1, %v2102_v23  ;;  %1608 = vrsqrt.f32 %v652_v2  ;;  %v636_v4 = vmul.f32 0.03125, %v592_v41  ;;  %v805_v50 = vadd.f32 %v2253_v49, %v766_v35 }
 0x198   : > { %v621_v45 = vmul.f32 0.03125, %v547_v25  ;;  %1610 = vrsqrt.f32 %v667_v40  ;;  %v819_v54 = vpack.c.bf16 %v790_v18, %v789_v34  ;;  %v767_v16 = vmul.f32 %v2246_v26, %v728_v56 }
 0x199   : > { %v1601_v22 = vpop.eup %1600  ;;  %v668_v0 = vadd.f32 1e-05, %v636_v4  ;;  %v752_v29 = vmul.f32 %v2246_v26, %v713_v44 }
 0x19a   : > { %v653_v5 = vadd.f32 1e-05, %v621_v45  ;;  %v1603_v61 = vpop.eup %1602  ;;  %v714_v58 = vmul.f32 %v1601_v22, %v2106_v27  ;;  %v550_v6 = vpop.xlane.xlu1 %549  ;;  %1509 = vmatprep.mubr.msk.bf16.mxu0 %vm321_vm0, %v819_v54  ;;  %v806_v23 = vadd.f32 %v2253_v49, %v767_v16 }
 0x19b   : > { %v595_v46 = vpop.xlane.xlu0 %594  ;;  %v729_v59 = vmul.f32 %v1603_v61, %v2116_v28  ;;  %1612 = vrsqrt.f32 %v668_v0  ;;  %v622_v60 = vmul.f32 0.03125, %v550_v6  ;;  %v791_v13 = vadd.f32 %v2253_v49, %v752_v29 }
 0x19c   : > { %v637_v7 = vmul.f32 0.03125, %v595_v46  ;;  %1614 = vrsqrt.f32 %v653_v5  ;;  %v827_v12 = vpack.c.bf16 %v806_v23, %v805_v50  ;;  %v753_v21 = vmul.f32 %v2246_v26, %v714_v58 }
 0x19d   : > { %v1605_v27 = vpop.eup %1604  ;;  %v654_v9 = vadd.f32 1e-05, %v622_v60  ;;  %v768_v11 = vmul.f32 %v2246_v26, %v729_v59 }
 0x19e   : > { %v669_v63 = vadd.f32 1e-05, %v637_v7  ;;  %v1607_v55 = vpop.eup %1606  ;;  %v730_v15 = vmul.f32 %v1605_v27, %v2120_v32  ;;  %v598_v51 = vpop.xlane.xlu1 %597  ;;  %1525 = vmatprep.mubr.msk.bf16.mxu1 %vm321_vm0, %v827_v12  ;;  %v792_v28 = vadd.f32 %v2253_v49, %v753_v21 }
 0x19f   : > { %v553_v36 = vpop.xlane.xlu0 %552  ;;  %v715_v19 = vmul.f32 %v1607_v55, %v2130_v33  ;;  %1616 = vrsqrt.f32 %v654_v9  ;;  %v638_v3 = vmul.f32 0.03125, %v598_v51  ;;  %v807_v25 = vadd.f32 %v2253_v49, %v768_v11 }
 0x1a0   : > { %v623_v30 = vmul.f32 0.03125, %v553_v36  ;;  %1618 = vrsqrt.f32 %v669_v63  ;;  %v820_v20 = vpack.c.bf16 %v792_v28, %v791_v13  ;;  %v769_v39 = vmul.f32 %v2246_v26, %v730_v15 }
 0x1a1   : > { %v1609_v32 = vpop.eup %1608  ;;  %v670_v17 = vadd.f32 1e-05, %v638_v3  ;;  %v754_v34 = vmul.f32 %v2246_v26, %v715_v19 }
 0x1a2   : > { %v655_v2 = vadd.f32 1e-05, %v623_v30  ;;  %v1611_v40 = vpop.eup %1610  ;;  %v716_v1 = vmul.f32 %v1609_v32, %v2134_v37  ;;  %v556_v56 = vpop.xlane.xlu1 %555  ;;  %1510 = vmatmul.mubr.msk.bf16.gmra.mrb[4].mxu0 %vm321_vm0, %v820_v20  ;;  %v808_v33 = vadd.f32 %v2253_v49, %v769_v39 }
 0x1a3   : > { %v601_v41 = vpop.xlane.xlu0 %600  ;;  %v731_v18 = vmul.f32 %v1611_v40, %v2144_v38  ;;  %1620 = vrsqrt.f32 %v670_v17  ;;  %v624_v35 = vmul.f32 0.03125, %v556_v56  ;;  %v793_v58 = vadd.f32 %v2253_v49, %v754_v34 }
 0x1a4   : > { %v639_v44 = vmul.f32 0.03125, %v601_v41  ;;  %1622 = vrsqrt.f32 %v655_v2  ;;  %v828_v4 = vpack.c.bf16 %v808_v33, %v807_v25  ;;  %v755_v45 = vmul.f32 %v2246_v26, %v716_v1 }
 0x1a5   : > { %v1613_v37 = vpop.eup %1612  ;;  %v656_v54 = vadd.f32 1e-05, %v624_v35  ;;  %v770_v6 = vmul.f32 %v2246_v26, %v731_v18 }
 0x1a6   : > { %v671_v16 = vadd.f32 1e-05, %v639_v44  ;;  %v1615_v22 = vpop.eup %1614  ;;  %v732_v0 = vmul.f32 %v1613_v37, %v2148_v42  ;;  %v604_v5 = vpop.xlane.xlu1 %603  ;;  %1526 = vmatmul.mubr.msk.bf16.gmra.mrb[4].mxu1 %vm321_vm0, %v828_v4  ;;  %v794_v38 = vadd.f32 %v2253_v49, %v755_v45 }
 0x1a7   : > { %v559_v61 = vpop.xlane.xlu0 %558  ;;  %v717_v46 = vmul.f32 %v1615_v22, %v2158_v43  ;;  %1624 = vrsqrt.f32 %v656_v54  ;;  %v640_v50 = vmul.f32 0.03125, %v604_v5  ;;  %v809_v63 = vadd.f32 %v2253_v49, %v770_v6 }
 0x1a8   : > { %v625_v23 = vmul.f32 0.03125, %v559_v61  ;;  %1626 = vrsqrt.f32 %v671_v16  ;;  %v821_v29 = vpack.c.bf16 %v794_v38, %v793_v58  ;;  %v771_v59 = vmul.f32 %v2246_v26, %v732_v0 }
 0x1a9   : > { %v1617_v42 = vpop.eup %1616  ;;  %v672_v60 = vadd.f32 1e-05, %v640_v50  ;;  %v756_v55 = vmul.f32 %v2246_v26, %v717_v46 }
 0x1aa   : > { %v657_v7 = vadd.f32 1e-05, %v625_v23  ;;  %v1619_v12 = vpop.eup %1618  ;;  %v718_v21 = vmul.f32 %v1617_v42, %v2162_v47  ;;  %v562_v27 = vpop.xlane.xlu1 %561  ;;  %1513 = vmatprep.mubr.msk.bf16.mxu0 %vm321_vm0, %v821_v29  ;;  %v810_v43 = vadd.f32 %v2253_v49, %v771_v59 }
 0x1ab   : > { %v607_v9 = vpop.xlane.xlu0 %606  ;;  %v733_v15 = vmul.f32 %v1619_v12, %v2172_v48  ;;  %1628 = vrsqrt.f32 %v672_v60  ;;  %v626_v51 = vmul.f32 0.03125, %v562_v27  ;;  %v795_v39 = vadd.f32 %v2253_v49, %v756_v55 }
 0x1ac   : > { %v641_v36 = vmul.f32 0.03125, %v607_v9  ;;  %1630 = vrsqrt.f32 %v657_v7  ;;  %v829_v13 = vpack.c.bf16 %v810_v43, %v809_v63  ;;  %v757_v28 = vmul.f32 %v2246_v26, %v718_v21 }
 0x1ad   : > { %v1621_v47 = vpop.eup %1620  ;;  %v658_v11 = vadd.f32 1e-05, %v626_v51  ;;  %v772_v32 = vmul.f32 %v2246_v26, %v733_v15 }
 0x1ae   : > { %v673_v19 = vadd.f32 1e-05, %v641_v36  ;;  %v1623_v3 = vpop.eup %1622  ;;  %v734_v30 = vmul.f32 %v1621_v47, %v2176_v52  ;;  %v610_v20 = vpop.xlane.xlu1 %609  ;;  %1529 = vmatprep.mubr.msk.bf16.mxu1 %vm321_vm0, %v829_v13  ;;  %v796_v48 = vadd.f32 %v2253_v49, %v757_v28 }
 0x1af   : > { %v719_v17 = vmul.f32 %v1623_v3, %v2186_v53  ;;  %1632 = vrsqrt.f32 %v658_v11  ;;  %v642_v2 = vmul.f32 0.03125, %v610_v20  ;;  %v811_v33 = vadd.f32 %v2253_v49, %v772_v32 }
 0x1b0   : > { %1634 = vrsqrt.f32 %v673_v19  ;;  %v822_v40 = vpack.c.bf16 %v796_v48, %v795_v39  ;;  %v773_v1 = vmul.f32 %v2246_v26, %v734_v30 }
 0x1b1   : > { %v1625_v56 = vpop.eup %1624  ;;  %v674_v41 = vadd.f32 1e-05, %v642_v2  ;;  %v758_v18 = vmul.f32 %v2246_v26, %v719_v17 }
 0x1b2   : > { %v1627_v52 = vpop.eup %1626  ;;  %v720_v25 = vmul.f32 %v1625_v56, %v2190_v57  ;;  %1514 = vmatmul.mubr.msk.bf16.gmra.mrb[8].mxu0 %vm321_vm0, %v822_v40  ;;  %v812_v34 = vadd.f32 %v2253_v49, %v773_v1 }
 0x1b3   : > { %v735_v53 = vmul.f32 %v1627_v52, %v2200_v62  ;;  %1636 = vrsqrt.f32 %v674_v41  ;;  %v797_v57 = vadd.f32 %v2253_v49, %v758_v18 }
 0x1b4   : > { %v830_v35 = vpack.c.bf16 %v812_v34, %v811_v33  ;;  %v759_v44 = vmul.f32 %v2246_v26, %v720_v25 }
 0x1b5   : > { %v1629_v4 = vpop.eup %1628  ;;  %v774_v16 = vmul.f32 %v2246_v26, %v735_v53 }
 0x1b6   : > { %v1631_v45 = vpop.eup %1630  ;;  %v736_v37 = vmul.f32 %v1629_v4, %v2204_v31  ;;  %1530 = vmatmul.mubr.msk.bf16.gmra.mrb[8].mxu1 %vm321_vm0, %v830_v35  ;;  %v798_v54 = vadd.f32 %v2253_v49, %v759_v44 }
 0x1b7   : > { %v721_v22 = vmul.f32 %v1631_v45, %v2214_v10  ;;  %v813_v31 = vadd.f32 %v2253_v49, %v774_v16 }
 0x1b8   : > { %v823_v0 = vpack.c.bf16 %v798_v54, %v797_v57  ;;  %v775_v62 = vmul.f32 %v2246_v26, %v736_v37 }
 0x1b9   : > { %v1633_v5 = vpop.eup %1632  ;;  %v760_v6 = vmul.f32 %v2246_v26, %v721_v22 }
 0x1ba   : > { %v1635_v61 = vpop.eup %1634  ;;  %v722_v58 = vmul.f32 %v1633_v5, %v2218_v8  ;;  %1517 = vmatprep.mubr.msk.bf16.mxu0 %vm321_vm0, %v823_v0  ;;  %v814_v38 = vadd.f32 %v2253_v49, %v775_v62 }
 0x1bb   : > { %v737_v46 = vmul.f32 %v1635_v61, %v2228_v14  ;;  %v799_v8 = vadd.f32 %v2253_v49, %v760_v6 }
 0x1bc   : > { %v831_v50 = vpack.c.bf16 %v814_v38, %v813_v31  ;;  %v761_v10 = vmul.f32 %v2246_v26, %v722_v58 }
 0x1bd   : > { %v1637_v23 = vpop.eup %1636  ;;  %v776_v42 = vmul.f32 %v2246_v26, %v737_v46 }
 0x1be   : > { %v738_v29 = vmul.f32 %v1637_v23, %v2232_v24  ;;  %1533 = vmatprep.mubr.msk.bf16.mxu1 %vm321_vm0, %v831_v50  ;;  %v800_v59 = vadd.f32 %v2253_v49, %v761_v10  ;;  %v2364_v24 = vld [vmem:[#allocation4] ss:$0 sm:$0xff] }
 0x1bf   : > { %v815_v14 = vadd.f32 %v2253_v49, %v776_v42 }
 0x1c0   : > { %v824_v60 = vpack.c.bf16 %v800_v59, %v799_v8  ;;  %v777_v7 = vmul.f32 %v2246_v26, %v738_v29 }
 0x1c2   : > { %1518 = vmatmul.mubr.msk.bf16.gmra.mrb[12].mxu0 %vm321_vm0, %v824_v60  ;;  %v816_v12 = vadd.f32 %v2253_v49, %v777_v7 }
 0x1c4   : > { %v832_v21 = vpack.c.bf16 %v816_v12, %v815_v14 }
 0x1c6   : > { %1534 = vmatmul.mubr.msk.bf16.gmra.mrb[12].mxu1 %vm321_vm0, %v832_v21 }
 0x265   : > { %v1507_v27 = vpop.f32.mrb[0].mxu0 }
 0x266   : > { %v947_v9 = vadd.f32 %v1507_v27, %v2364_v24  ;;  %v938_v63 = vpop.f32.mrb[1].mxu0 }
 0x267   : > { %v939_v26 = vadd.f32 %v2364_v24, %v938_v63  ;;  %v1508_v49 = vpop.f32.mrb[2].mxu0 }
 0x268   : > { %v1374_v43 = vpack.c.bf16 %v947_v9, %v947_v9  ;;  %v950_v55 = vadd.f32 %v1508_v49, %v2364_v24  ;;  %v941_v15 = vpop.f32.mrb[3].mxu0 }
 0x269   : > { %v1372_v51 = vpack.c.bf16 %v939_v26, %v939_v26  ;;  %v942_v36 = vadd.f32 %v2364_v24, %v941_v15  ;;  %v1523_v13 = vpop.f32.mrb[0].mxu1 }
 0x26a   : > { %1196 = vst.msk [vmem:[%s2372_s12 + $0x8] sm:$0xf] %vm1193_vm1, %v1374_v43  ;;  %v1375_v28 = vpack.c.bf16 %v950_v55, %v950_v55  ;;  %v1011_v47 = vadd.f32 %v1523_v13, %v2364_v24  ;;  %v1002_v11 = vpop.f32.mrb[1].mxu1 }
 0x26b   : > { %1194 = vst.msk [vmem:[%s2372_s12] sm:$0xf] %vm1193_vm1, %v1372_v51  ;;  %v1373_v19 = vpack.c.bf16 %v942_v36, %v942_v36  ;;  %v1003_v3 = vadd.f32 %v2364_v24, %v1002_v11  ;;  %v1524_v30 = vpop.f32.mrb[2].mxu1 }
 0x26c   : > { %1197 = vst.msk [vmem:[%s2372_s12 + $0xc] sm:$0xf] %vm1193_vm1, %v1375_v28  ;;  %v1390_v20 = vpack.c.bf16 %v1011_v47, %v1011_v47  ;;  %v1014_v39 = vadd.f32 %v1524_v30, %v2364_v24  ;;  %v1005_v48 = vpop.f32.mrb[3].mxu1 }
 0x26d   : > { %1195 = vst.msk [vmem:[%s2372_s12 + $0x4] sm:$0xf] %vm1193_vm1, %v1373_v19  ;;  %v1388_v32 = vpack.c.bf16 %v1003_v3, %v1003_v3  ;;  %v1006_v17 = vadd.f32 %v2364_v24, %v1005_v48 }
 0x26e   : > { %1212 = vst.msk [vmem:[%s2372_s12 + $0x48] sm:$0xf] %vm1193_vm1, %v1390_v20  ;;  %v1391_v2 = vpack.c.bf16 %v1014_v39, %v1014_v39 }
 0x26f   : > { %1210 = vst.msk [vmem:[%s2372_s12 + $0x40] sm:$0xf] %vm1193_vm1, %v1388_v32  ;;  %v1389_v40 = vpack.c.bf16 %v1006_v17, %v1006_v17 }
 0x270   : > { %1213 = vst.msk [vmem:[%s2372_s12 + $0x4c] sm:$0xf] %vm1193_vm1, %v1391_v2 }
 0x271   : > { %1211 = vst.msk [vmem:[%s2372_s12 + $0x44] sm:$0xf] %vm1193_vm1, %v1389_v40 }
 0x275   : > { %v1511_v1 = vpop.f32.mrb[4].mxu0 }
 0x276   : > { %v963_v56 = vadd.f32 %v1511_v1, %v2364_v24  ;;  %v954_v41 = vpop.f32.mrb[5].mxu0 }
 0x277   : > { %v955_v52 = vadd.f32 %v2364_v24, %v954_v41  ;;  %v1512_v25 = vpop.f32.mrb[6].mxu0 }
 0x278   : > { %v1378_v33 = vpack.c.bf16 %v963_v56, %v963_v56  ;;  %v966_v34 = vadd.f32 %v1512_v25, %v2364_v24  ;;  %v957_v18 = vpop.f32.mrb[7].mxu0 }
 0x279   : > { %v1376_v53 = vpack.c.bf16 %v955_v52, %v955_v52  ;;  %v958_v35 = vadd.f32 %v2364_v24, %v957_v18  ;;  %v1527_v44 = vpop.f32.mrb[4].mxu1 }
 0x27a   : > { %1200 = vst.msk [vmem:[%s2372_s12 + $0x18] sm:$0xf] %vm1193_vm1, %v1378_v33  ;;  %v1379_v4 = vpack.c.bf16 %v966_v34, %v966_v34  ;;  %v1027_v45 = vadd.f32 %v1527_v44, %v2364_v24  ;;  %v1018_v37 = vpop.f32.mrb[5].mxu1 }
 0x27b   : > { %1198 = vst.msk [vmem:[%s2372_s12 + $0x10] sm:$0xf] %vm1193_vm1, %v1376_v53  ;;  %v1377_v57 = vpack.c.bf16 %v958_v35, %v958_v35  ;;  %v1019_v54 = vadd.f32 %v2364_v24, %v1018_v37  ;;  %v1528_v16 = vpop.f32.mrb[6].mxu1 }
 0x27c   : > { %1201 = vst.msk [vmem:[%s2372_s12 + $0x1c] sm:$0xf] %vm1193_vm1, %v1379_v4  ;;  %v1394_v22 = vpack.c.bf16 %v1027_v45, %v1027_v45  ;;  %v1030_v0 = vadd.f32 %v1528_v16, %v2364_v24  ;;  %v1021_v62 = vpop.f32.mrb[7].mxu1 }
 0x27d   : > { %1199 = vst.msk [vmem:[%s2372_s12 + $0x14] sm:$0xf] %vm1193_vm1, %v1377_v57  ;;  %v1392_v5 = vpack.c.bf16 %v1019_v54, %v1019_v54  ;;  %v1022_v61 = vadd.f32 %v2364_v24, %v1021_v62 }
 0x27e   : > { %1216 = vst.msk [vmem:[%s2372_s12 + $0x58] sm:$0xf] %vm1193_vm1, %v1394_v22  ;;  %v1395_v58 = vpack.c.bf16 %v1030_v0, %v1030_v0 }
 0x27f   : > { %1214 = vst.msk [vmem:[%s2372_s12 + $0x50] sm:$0xf] %vm1193_vm1, %v1392_v5  ;;  %v1393_v31 = vpack.c.bf16 %v1022_v61, %v1022_v61 }
 0x280   : > { %1217 = vst.msk [vmem:[%s2372_s12 + $0x5c] sm:$0xf] %vm1193_vm1, %v1395_v58 }
 0x281   : > { %1215 = vst.msk [vmem:[%s2372_s12 + $0x54] sm:$0xf] %vm1193_vm1, %v1393_v31 }
 0x285   : > { %v1515_v38 = vpop.f32.mrb[8].mxu0 }
 0x286   : > { %v979_v6 = vadd.f32 %v1515_v38, %v2364_v24  ;;  %v970_v46 = vpop.f32.mrb[9].mxu0 }
 0x287   : > { %v971_v50 = vadd.f32 %v2364_v24, %v970_v46  ;;  %v1516_v10 = vpop.f32.mrb[10].mxu0 }
 0x288   : > { %v1382_v23 = vpack.c.bf16 %v979_v6, %v979_v6  ;;  %v982_v29 = vadd.f32 %v1516_v10, %v2364_v24  ;;  %v973_v8 = vpop.f32.mrb[11].mxu0 }
 0x289   : > { %v1380_v59 = vpack.c.bf16 %v971_v50, %v971_v50  ;;  %v974_v42 = vadd.f32 %v2364_v24, %v973_v8  ;;  %v1531_v60 = vpop.f32.mrb[8].mxu1 }
 0x28a   : > { %1204 = vst.msk [vmem:[%s2372_s12 + $0x28] sm:$0xf] %vm1193_vm1, %v1382_v23  ;;  %v1383_v7 = vpack.c.bf16 %v982_v29, %v982_v29  ;;  %v1043_v14 = vadd.f32 %v1531_v60, %v2364_v24  ;;  %v1034_v12 = vpop.f32.mrb[9].mxu1 }
 0x28b   : > { %1202 = vst.msk [vmem:[%s2372_s12 + $0x20] sm:$0xf] %vm1193_vm1, %v1380_v59  ;;  %v1381_v21 = vpack.c.bf16 %v974_v42, %v974_v42  ;;  %v1035_v27 = vadd.f32 %v2364_v24, %v1034_v12  ;;  %v1532_v9 = vpop.f32.mrb[10].mxu1 }
 0x28c   : > { %1205 = vst.msk [vmem:[%s2372_s12 + $0x2c] sm:$0xf] %vm1193_vm1, %v1383_v7  ;;  %v1398_v63 = vpack.c.bf16 %v1043_v14, %v1043_v14  ;;  %v1046_v26 = vadd.f32 %v1532_v9, %v2364_v24  ;;  %v1037_v49 = vpop.f32.mrb[11].mxu1 }
 0x28d   : > { %1203 = vst.msk [vmem:[%s2372_s12 + $0x24] sm:$0xf] %vm1193_vm1, %v1381_v21  ;;  %v1396_v43 = vpack.c.bf16 %v1035_v27, %v1035_v27  ;;  %v1038_v55 = vadd.f32 %v2364_v24, %v1037_v49 }
 0x28e   : > { %1220 = vst.msk [vmem:[%s2372_s12 + $0x68] sm:$0xf] %vm1193_vm1, %v1398_v63  ;;  %v1399_v15 = vpack.c.bf16 %v1046_v26, %v1046_v26 }
 0x28f   : > { %1218 = vst.msk [vmem:[%s2372_s12 + $0x60] sm:$0xf] %vm1193_vm1, %v1396_v43  ;;  %v1397_v51 = vpack.c.bf16 %v1038_v55, %v1038_v55 }
 0x290   : > { %1221 = vst.msk [vmem:[%s2372_s12 + $0x6c] sm:$0xf] %vm1193_vm1, %v1399_v15 }
 0x291   : > { %1219 = vst.msk [vmem:[%s2372_s12 + $0x64] sm:$0xf] %vm1193_vm1, %v1397_v51 }
 0x295   : > { %v1519_v36 = vpop.f32.mrb[12].mxu0 }
 0x296   : > { %v995_v13 = vadd.f32 %v1519_v36, %v2364_v24  ;;  %v986_v28 = vpop.f32.mrb[13].mxu0 }
 0x297   : > { %v987_v47 = vadd.f32 %v2364_v24, %v986_v28  ;;  %v1520_v11 = vpop.f32.mrb[14].mxu0 }
 0x298   : > { %v1386_v19 = vpack.c.bf16 %v995_v13, %v995_v13  ;;  %v998_v3 = vadd.f32 %v1520_v11, %v2364_v24  ;;  %v989_v30 = vpop.f32.mrb[15].mxu0 }
 0x299   : > { %v1384_v20 = vpack.c.bf16 %v987_v47, %v987_v47  ;;  %v990_v39 = vadd.f32 %v2364_v24, %v989_v30  ;;  %v1535_v48 = vpop.f32.mrb[12].mxu1 }
 0x29a   : > { %1208 = vst.msk [vmem:[%s2372_s12 + $0x38] sm:$0xf] %vm1193_vm1, %v1386_v19  ;;  %v1387_v32 = vpack.c.bf16 %v998_v3, %v998_v3  ;;  %v1059_v17 = vadd.f32 %v1535_v48, %v2364_v24  ;;  %v1050_v2 = vpop.f32.mrb[13].mxu1 }
 0x29b   : > { %1206 = vst.msk [vmem:[%s2372_s12 + $0x30] sm:$0xf] %vm1193_vm1, %v1384_v20  ;;  %v1385_v40 = vpack.c.bf16 %v990_v39, %v990_v39  ;;  %v1051_v1 = vadd.f32 %v2364_v24, %v1050_v2  ;;  %v1536_v56 = vpop.f32.mrb[14].mxu1 }
 0x29c   : > { %1209 = vst.msk [vmem:[%s2372_s12 + $0x3c] sm:$0xf] %vm1193_vm1, %v1387_v32  ;;  %v1402_v41 = vpack.c.bf16 %v1059_v17, %v1059_v17  ;;  %v1062_v52 = vadd.f32 %v1536_v56, %v2364_v24  ;;  %v1053_v25 = vpop.f32.mrb[15].mxu1 }
 0x29d   : > { %1207 = vst.msk [vmem:[%s2372_s12 + $0x34] sm:$0xf] %vm1193_vm1, %v1385_v40  ;;  %v1400_v33 = vpack.c.bf16 %v1051_v1, %v1051_v1  ;;  %v1054_v34 = vadd.f32 %v2364_v24, %v1053_v25 }
 0x29e   : > { %1224 = vst.msk [vmem:[%s2372_s12 + $0x78] sm:$0xf] %vm1193_vm1, %v1402_v41  ;;  %v1403_v18 = vpack.c.bf16 %v1062_v52, %v1062_v52 }
 0x29f   : > { %1222 = vst.msk [vmem:[%s2372_s12 + $0x70] sm:$0xf] %vm1193_vm1, %v1400_v33  ;;  %v1401_v53 = vpack.c.bf16 %v1054_v34, %v1054_v34 }
 0x2a0   : > { %1225 = vst.msk [vmem:[%s2372_s12 + $0x7c] sm:$0xf] %vm1193_vm1, %v1403_v18 }
 0x2a1   : > { %1223 = vst.msk [vmem:[%s2372_s12 + $0x74] sm:$0xf] %vm1193_vm1, %v1401_v53 }
 0x2a2 PF: > { %s17_s18 = sadd.s32 1, %s1708_s18  }
 0x2a3   : > { %p14_p5 = scmp.ge.s32.totalorder %s17_s18, 4  }
 0x2a5   :  { %16 = sbr.rel (!%p14_p5) target bundleno = 2 (0x2), region = 79 }
 0x2ac   :  { %1248 = vsyncpa [#allocation3], 1 }
 0x2ad   :  { %1250 = vsyncpa [#allocation3 + $0x1], 1 }
 0x2ae   :  { %1251 = vsyncpa [#allocation5], 1 }

// kernel: nat_block.12
= control target key start
LH: loop header
LB: loop body
LE: loop exit
PB: predicated region body
PF: predicated region fallthrough
CT: control target
= control target key end

     0   :  { %s3962_s9 = smov 0   ;;  %s6040_s0 = inlined_call_operand.vmem [shape: bf16[2,256,96], index: 0, kind: input, shape index: {}]   ;;  %s6041_s1 = inlined_call_operand.vmem [shape: f32[2,256,256], index: 1, kind: input, shape index: {}]   ;;  %s6042_s2 = inlined_call_operand.vmem [shape: bf16[2,256,32], index: 2, kind: output, shape index: {}]  }
   0x1 LB: > { %s2879_s10 = sadd.s32 4294967295, %s3939_s9   ;;  %p2883_p0 = scmp.ge.s32.totalorder %s3939_s9, 1  ;;  %s3939_s9 = sphi %s3962_s9, %s12_s9  }
   0x2   : > { %p112_p1 = scmp.lt.s32.totalorder %s3939_s9, 3 }
   0x4   : > { %p113_p2 = pnand %p2883_p0, %p112_p1 }
   0x6   : > { %116 = sbr.rel (%p113_p2) target bundleno = 1945 (0x799), region = 28 }
   0xd   : > { %p134_p3 = scmp.lt.s32.totalorder %s2879_s10, 1  ;;  %vm353_vm0 = vcmask 130048   ;;  %s3941_s15 = smov 96   ;;  %v177_v57 = vld [vmem:[%s6041_s1] sm:$0xff]  ;;  %v178_v58 = vld [vmem:[%s6041_s1 + $0x8] sm:$0xff]  ;;  %v179_v60 = vld [vmem:[%s6041_s1 + $0x10] sm:$0xff] }
   0xe   : > { %s3942_s16 = smov 64   ;;  %s3943_s17 = smov 80   ;;  %v180_v63 = vld [vmem:[%s6041_s1 + $0x18] sm:$0xff]  ;;  %vm2791_vm1 = vcmask 257024  }
   0xf   : > { %s6304_s10 = smov (!%p134_p3, %s2879_s10), 1  ;;  %s3944_s3 = smov 112  }
  0x10   : > { %s3034_s11 = sshll.u32 %s6304_s10, 7 }
  0x11   : > { %s3978_s14 = scalar_lea.vmem %s6040_s0, %s3034_s11  ;;  %s5902_s23 = scalar_lea.vmem %s6042_s2, %s3034_s11 }
  0x12   : > { %v3981_v0 = vld [vmem:[%s3978_s14] sm:$0xff]   ;;  %v3989_v2 = vld [vmem:[%s3978_s14 + $0x8] sm:$0xff]   ;;  %v4001_v4 = vld [vmem:[%s3978_s14 + $0x10] sm:$0xff]  }
  0x13   : > { %v3984_v1 = vld [vmem:[%s3978_s14 + $0x40] sm:$0xff]   ;;  %321 = vrot.lane.b32.xlu0 %v3981_v0, %s3941_s15  ;;  %3084 = vmatprep.mubr.msk.bf16.mxu0 %vm353_vm0, %v3981_v0  ;;  %v3996_v3 = vld [vmem:[%s3978_s14 + $0x48] sm:$0xff]   ;;  %v4006_v5 = vld [vmem:[%s3978_s14 + $0x50] sm:$0xff]  }
  0x14   : > { %323 = vrot.lane.b32.xlu1 %v3989_v2, %s3941_s15  ;;  %v4011_v6 = vld [vmem:[%s3978_s14 + $0x18] sm:$0xff]   ;;  %v4021_v8 = vld [vmem:[%s3978_s14 + $0x20] sm:$0xff]   ;;  %v4031_v10 = vld [vmem:[%s3978_s14 + $0x28] sm:$0xff]  }
  0x15   : > { %v4016_v7 = vld [vmem:[%s3978_s14 + $0x58] sm:$0xff]   ;;  %v4026_v9 = vld [vmem:[%s3978_s14 + $0x60] sm:$0xff]   ;;  %v4036_v11 = vld [vmem:[%s3978_s14 + $0x68] sm:$0xff]  }
  0x16   : > { %v4041_v12 = vld [vmem:[%s3978_s14 + $0x30] sm:$0xff]   ;;  %v4051_v14 = vld [vmem:[%s3978_s14 + $0x38] sm:$0xff]  }
  0x17   : > { %337 = vrot.lane.b32.xlu0 %v3984_v1, %s3941_s15  ;;  %v4046_v13 = vld [vmem:[%s3978_s14 + $0x70] sm:$0xff]   ;;  %v4056_v15 = vld [vmem:[%s3978_s14 + $0x78] sm:$0xff]  }
  0x18   : > { %339 = vrot.lane.b32.xlu1 %v3996_v3, %s3941_s15 }
  0x1b   : > { %325 = vrot.lane.b32.xlu0 %v4001_v4, %s3941_s15 }
  0x1c   : > { %341 = vrot.lane.b32.xlu1 %v4006_v5, %s3941_s15 }
  0x1f   : > { %327 = vrot.lane.b32.xlu0 %v4011_v6, %s3941_s15 }
  0x20   : > { %343 = vrot.lane.b32.xlu1 %v4016_v7, %s3941_s15 }
  0x23   : > { %329 = vrot.lane.b32.xlu0 %v4021_v8, %s3941_s15 }
  0x24   : > { %345 = vrot.lane.b32.xlu1 %v4026_v9, %s3941_s15 }
  0x27   : > { %331 = vrot.lane.b32.xlu0 %v4031_v10, %s3941_s15 }
  0x28   : > { %347 = vrot.lane.b32.xlu1 %v4036_v11, %s3941_s15 }
  0x2b   : > { %333 = vrot.lane.b32.xlu0 %v4041_v12, %s3941_s15 }
  0x2c   : > { %349 = vrot.lane.b32.xlu1 %v4046_v13, %s3941_s15 }
  0x2f   : > { %335 = vrot.lane.b32.xlu0 %v4051_v14, %s3941_s15 }
  0x30   : > { %351 = vrot.lane.b32.xlu1 %v4056_v15, %s3941_s15 }
  0x33   : > { %1155 = vrot.lane.b32.xlu0 %v3981_v0, %s3942_s16 }
  0x34   : > { %1171 = vrot.lane.b32.xlu1 %v3984_v1, %s3942_s16 }
  0x37   : > { %1157 = vrot.lane.b32.xlu0 %v3989_v2, %s3942_s16 }
  0x38   : > { %1173 = vrot.lane.b32.xlu1 %v3996_v3, %s3942_s16 }
  0x3b   : > { %1177 = vrot.lane.b32.xlu0 %v4016_v7, %s3942_s16 }
  0x3c   : > { %1175 = vrot.lane.b32.xlu1 %v4006_v5, %s3942_s16 }
  0x3f   : > { %1181 = vrot.lane.b32.xlu0 %v4036_v11, %s3942_s16 }
  0x40   : > { %1159 = vrot.lane.b32.xlu1 %v4001_v4, %s3942_s16 }
  0x43   : > { %1185 = vrot.lane.b32.xlu0 %v4056_v15, %s3942_s16 }
  0x44   : > { %1161 = vrot.lane.b32.xlu1 %v4011_v6, %s3942_s16 }
  0x47   : > { %1477 = vrot.lane.b32.xlu0 %v3984_v1, %s3943_s17 }
  0x48   : > { %1179 = vrot.lane.b32.xlu1 %v4026_v9, %s3942_s16 }
  0x4b   : > { %1479 = vrot.lane.b32.xlu0 %v3996_v3, %s3943_s17 }
  0x4c   : > { %1163 = vrot.lane.b32.xlu1 %v4021_v8, %s3942_s16 }
  0x4f   : > { %1481 = vrot.lane.b32.xlu0 %v4006_v5, %s3943_s17 }
  0x50   : > { %1165 = vrot.lane.b32.xlu1 %v4031_v10, %s3942_s16 }
  0x53   : > { %1483 = vrot.lane.b32.xlu0 %v4016_v7, %s3943_s17 }
  0x54   : > { %1183 = vrot.lane.b32.xlu1 %v4046_v13, %s3942_s16 }
  0x58   : > { %1167 = vrot.lane.b32.xlu1 %v4041_v12, %s3942_s16 }
  0x5c   : > { %1169 = vrot.lane.b32.xlu1 %v4051_v14, %s3942_s16 }
  0x60   : > { %1461 = vrot.lane.b32.xlu1 %v3981_v0, %s3943_s17 }
  0x64   : > { %1463 = vrot.lane.b32.xlu1 %v3989_v2, %s3943_s17 }
  0x68   : > { %1465 = vrot.lane.b32.xlu1 %v4001_v4, %s3943_s17 }
  0x6c   : > { %1467 = vrot.lane.b32.xlu1 %v4011_v6, %s3943_s17 }
  0x70   : > { %1469 = vrot.lane.b32.xlu1 %v4021_v8, %s3943_s17 }
  0x85   : > { %v322_v16 = vpop.permute.xlu0 %321 }
  0x86   : > { %v324_v17 = vpop.permute.xlu1 %323  ;;  %v403_v19 = vsel %vm353_vm0, %v322_v16, 0 }
  0x87   : > { %v406_v22 = vsel %vm353_vm0, %v324_v17, 0 }
  0x89   : > { %v338_v18 = vpop.permute.xlu0 %337 }
  0x8a   : > { %3404 = vmatprep.subr.msk.bf16.mxu0 %vm353_vm0, %v338_v18  ;;  %v340_v20 = vpop.permute.xlu1 %339 }
  0x8b   : > { %3069 = vmatpush3.bf16.xpose.msra.mxu0 %v403_v19 }
  0x8c   : > { %3405 = vmatprep.subr.msk.bf16.mxu0 %vm353_vm0, %v340_v20 }
  0x8d   : > { %v326_v23 = vpop.permute.xlu0 %325 }
  0x8e   : > { %v342_v21 = vpop.permute.xlu1 %341  ;;  %v409_v24 = vsel %vm353_vm0, %v326_v23, 0  ;;  %v186_v23 = vld [vmem:[%s6041_s1 + $0x48] sm:$0xff] }
  0x91   : > { %v328_v26 = vpop.permute.xlu0 %327 }
  0x92   : > { %v344_v25 = vpop.permute.xlu1 %343  ;;  %v412_v27 = vsel %vm353_vm0, %v328_v26, 0 }
  0x93   : > { %3071 = vmatpush3.bf16.xpose.msra.mxu0 %v406_v22  ;;  %v185_v22 = vld [vmem:[%s6041_s1 + $0x40] sm:$0xff] }
  0x94   : > { %3406 = vmatprep.subr.msk.bf16.mxu0 %vm353_vm0, %v342_v21 }
  0x95   : > { %v330_v29 = vpop.permute.xlu0 %329 }
  0x96   : > { %v346_v28 = vpop.permute.xlu1 %345  ;;  %v415_v30 = vsel %vm353_vm0, %v330_v29, 0  ;;  %v188_v29 = vld [vmem:[%s6041_s1 + $0x58] sm:$0xff] }
  0x99   : > { %v332_v32 = vpop.permute.xlu0 %331 }
  0x9a   : > { %v348_v31 = vpop.permute.xlu1 %347  ;;  %v418_v33 = vsel %vm353_vm0, %v332_v32, 0 }
  0x9b   : > { %3073 = vmatpush3.bf16.xpose.msra.mxu0 %v409_v24 }
  0x9c   : > { %3407 = vmatprep.subr.msk.bf16.mxu0 %vm353_vm0, %v344_v25  ;;  %v187_v25 = vld [vmem:[%s6041_s1 + $0x50] sm:$0xff] }
  0x9d   : > { %v334_v35 = vpop.permute.xlu0 %333 }
  0x9e   : > { %v350_v34 = vpop.permute.xlu1 %349  ;;  %v421_v36 = vsel %vm353_vm0, %v334_v35, 0 }
  0xa1   : > { %v336_v38 = vpop.permute.xlu0 %335 }
  0xa2   : > { %v352_v37 = vpop.permute.xlu1 %351  ;;  %v424_v39 = vsel %vm353_vm0, %v336_v38, 0  ;;  %v190_v38 = vld [vmem:[%s6041_s1 + $0x68] sm:$0xff] }
  0xa3   : > { %3075 = vmatpush3.bf16.xpose.msra.mxu0 %v412_v27 }
  0xa4   : > { %3408 = vmatprep.subr.msk.bf16.mxu0 %vm353_vm0, %v346_v28 }
  0xa5   : > { %v1156_v41 = vpop.permute.xlu0 %1155 }
  0xa6   : > { %v1172_v40 = vpop.permute.xlu1 %1171 }
  0xa7   : > { %3116 = vmatprep.subr.bf16.mxu1 %v1172_v40  ;;  %v191_v40 = vld [vmem:[%s6041_s1 + $0x70] sm:$0xff] }
  0xa8   : > { %3117 = vmatpush3.bf16.msra.mxu1 %v1156_v41 }
  0xa9   : > { %v1158_v43 = vpop.permute.xlu0 %1157 }
  0xaa   : > { %v1174_v42 = vpop.permute.xlu1 %1173 }
  0xab   : > { %3077 = vmatpush3.bf16.xpose.msra.mxu0 %v415_v30  ;;  %3118 = vmatprep.subr.bf16.mxu1 %v1174_v42 }
  0xac   : > { %3409 = vmatprep.subr.msk.bf16.mxu0 %vm353_vm0, %v348_v31  ;;  %3119 = vmatpush3.bf16.msra.mxu1 %v1158_v43  ;;  %v192_v43 = vld [vmem:[%s6041_s1 + $0x78] sm:$0xff] }
  0xad   : > { %v1178_v46 = vpop.permute.xlu0 %1177 }
  0xae   : > { %v1176_v44 = vpop.permute.xlu1 %1175 }
  0xaf   : > { %3120 = vmatprep.subr.bf16.mxu1 %v1176_v44 }
  0xb1   : > { %v1182_v50 = vpop.permute.xlu0 %1181 }
  0xb2   : > { %v1160_v45 = vpop.permute.xlu1 %1159 }
  0xb3   : > { %3079 = vmatpush3.bf16.xpose.msra.mxu0 %v418_v33  ;;  %3121 = vmatpush3.bf16.msra.mxu1 %v1160_v45 }
  0xb4   : > { %3410 = vmatprep.subr.msk.bf16.mxu0 %vm353_vm0, %v350_v34  ;;  %3122 = vmatprep.subr.bf16.mxu1 %v1178_v46 }
  0xb5   : > { %v1186_v54 = vpop.permute.xlu0 %1185 }
  0xb6   : > { %v1162_v47 = vpop.permute.xlu1 %1161 }
  0xb7   : > { %3123 = vmatpush3.bf16.msra.mxu1 %v1162_v47 }
  0xb9   : > { %v1478_v56 = vpop.permute.xlu0 %1477 }
  0xba   : > { %v1180_v48 = vpop.permute.xlu1 %1179 }
  0xbb   : > { %3081 = vmatpush3.bf16.xpose.msra.mxu0 %v421_v36  ;;  %3124 = vmatprep.subr.bf16.mxu1 %v1180_v48  ;;  %v189_v36 = vld [vmem:[%s6041_s1 + $0x60] sm:$0xff] }
  0xbc   : > { %3411 = vmatprep.subr.msk.bf16.mxu0 %vm353_vm0, %v352_v37 }
  0xbe   : > { %v1164_v49 = vpop.permute.xlu1 %1163 }
  0xbf   : > { %3125 = vmatpush3.bf16.msra.mxu1 %v1164_v49 }
  0xc0   : > { %3126 = vmatprep.subr.bf16.mxu1 %v1182_v50  ;;  %v193_v50 = vld [vmem:[%s6041_s1 + $0x80] sm:$0xff] }
  0xc2   : > { %v1166_v51 = vpop.permute.xlu1 %1165 }
  0xc3   : > { %3083 = vmatpush3.bf16.xpose.msra.mxu0 %v424_v39  ;;  %3127 = vmatpush3.bf16.msra.mxu1 %v1166_v51 }
  0xc6   : > { %v1184_v52 = vpop.permute.xlu1 %1183 }
  0xc7   : > { %3128 = vmatprep.subr.bf16.mxu1 %v1184_v52  ;;  %v194_v52 = vld [vmem:[%s6041_s1 + $0x88] sm:$0xff] }
  0xca   : > { %3085 = vmatmul.mubr.msk.bf16.vlgmr.msra.gmra.mrb[0].mxu0 %vm353_vm0, %v3981_v0  ;;  %v1168_v53 = vpop.permute.xlu1 %1167 }
  0xcb   : > { %3086 = vmatprep.mubr.msk.bf16.mxu0 %vm353_vm0, %v3989_v2  ;;  %3129 = vmatpush3.bf16.msra.mxu1 %v1168_v53 }
  0xcc   : > { %3130 = vmatprep.subr.bf16.mxu1 %v1186_v54  ;;  %v195_v54 = vld [vmem:[%s6041_s1 + $0x90] sm:$0xff] }
  0xce   : > { %v1170_v55 = vpop.permute.xlu1 %1169 }
  0xcf   : > { %3131 = vmatpush3.bf16.msra.mxu1 %v1170_v55 }
  0xd0   : > { %3412 = vmatprep.subr.msk.bf16.mxu1 %vm353_vm0, %v1478_v56 }
  0xd2   : > { %3087 = vmatmul.mubr.msk.bf16.gmra.mrb[4].mxu0 %vm353_vm0, %v3989_v2 }
  0xd3   : > { %3088 = vmatprep.mubr.msk.bf16.mxu0 %vm353_vm0, %v4001_v4 }
  0xda   : > { %3089 = vmatmul.mubr.msk.bf16.gmra.mrb[8].mxu0 %vm353_vm0, %v4001_v4 }
  0xdb   : > { %3090 = vmatprep.mubr.msk.bf16.mxu0 %vm353_vm0, %v4011_v6 }
  0xe2   : > { %3091 = vmatmul.mubr.msk.bf16.gmra.mrb[12].mxu0 %vm353_vm0, %v4011_v6  ;;  %v181_v6 = vld [vmem:[%s6041_s1 + $0x20] sm:$0xff] }
  0xe3   : > { %3092 = vmatprep.mubr.msk.bf16.mxu0 %vm353_vm0, %v4021_v8 }
  0xea   : > { %3093 = vmatmul.mubr.msk.bf16.gmra.mrb[16].mxu0 %vm353_vm0, %v4021_v8  ;;  %v182_v8 = vld [vmem:[%s6041_s1 + $0x28] sm:$0xff] }
  0xeb   : > { %3094 = vmatprep.mubr.msk.bf16.mxu0 %vm353_vm0, %v4031_v10 }
  0xf2   : > { %3095 = vmatmul.mubr.msk.bf16.gmra.mrb[20].mxu0 %vm353_vm0, %v4031_v10 }
  0xf3   : > { %3096 = vmatprep.mubr.msk.bf16.mxu0 %vm353_vm0, %v4041_v12 }
  0xfa   : > { %3097 = vmatmul.mubr.msk.bf16.gmra.mrb[24].mxu0 %vm353_vm0, %v4041_v12 }
  0xfb   : > { %3098 = vmatprep.mubr.msk.bf16.mxu0 %vm353_vm0, %v4051_v14 }
 0x102   : > { %3099 = vmatmul.mubr.msk.bf16.gmra.mrb[28].mxu0 %vm353_vm0, %v4051_v14  ;;  %v183_v14 = vld [vmem:[%s6041_s1 + $0x30] sm:$0xff] }
 0x103   : > { %3100 = vmatprep.mubr.msk.bf16.mxu0 %vm353_vm0, %v3984_v1 }
 0x10a   : > { %3101 = vmatmul.mubr.msk.bf16.gmra.mrb[32].mxu0 %vm353_vm0, %v3984_v1 }
 0x10b   : > { %3102 = vmatprep.mubr.msk.bf16.mxu0 %vm353_vm0, %v3996_v3 }
 0x112   : > { %3103 = vmatmul.mubr.msk.bf16.gmra.mrb[36].mxu0 %vm353_vm0, %v3996_v3 }
 0x113   : > { %3104 = vmatprep.mubr.msk.bf16.mxu0 %vm353_vm0, %v4006_v5 }
 0x11a   : > { %3105 = vmatmul.mubr.msk.bf16.gmra.mrb[40].mxu0 %vm353_vm0, %v4006_v5 }
 0x11b   : > { %3106 = vmatprep.mubr.msk.bf16.mxu0 %vm353_vm0, %v4016_v7 }
 0x122   : > { %3107 = vmatmul.mubr.msk.bf16.gmra.mrb[44].mxu0 %vm353_vm0, %v4016_v7 }
 0x123   : > { %3108 = vmatprep.mubr.msk.bf16.mxu0 %vm353_vm0, %v4026_v9 }
 0x12a   : > { %3109 = vmatmul.mubr.msk.bf16.gmra.mrb[48].mxu0 %vm353_vm0, %v4026_v9 }
 0x12b   : > { %3110 = vmatprep.mubr.msk.bf16.mxu0 %vm353_vm0, %v4036_v11 }
 0x132   : > { %3111 = vmatmul.mubr.msk.bf16.gmra.mrb[52].mxu0 %vm353_vm0, %v4036_v11 }
 0x133   : > { %3112 = vmatprep.mubr.msk.bf16.mxu0 %vm353_vm0, %v4046_v13 }
 0x13a   : > { %3113 = vmatmul.mubr.msk.bf16.gmra.mrb[56].mxu0 %vm353_vm0, %v4046_v13 }
 0x13b   : > { %3114 = vmatprep.mubr.msk.bf16.mxu0 %vm353_vm0, %v4056_v15 }
 0x142   : > { %3115 = vmatmul.mubr.msk.bf16.gmra.mrb[60].mxu0 %vm353_vm0, %v4056_v15  ;;  %v184_v15 = vld [vmem:[%s6041_s1 + $0x38] sm:$0xff] }
 0x19d   : > { %v484_v59 = vpop.f32.mrb[0].mxu0 }
 0x19e   : > { %v4200_v61 = vadd.f32 %v484_v59, %v177_v57  ;;  %v486_v62 = vpop.f32.mrb[1].mxu0  ;;  %v196_v57 = vld [vmem:[%s6041_s1 + $0x98] sm:$0xff] }
 0x19f   : > { %v4205_v0 = vadd.f32 %v486_v62, %v178_v58  ;;  %v488_v1 = vpop.f32.mrb[2].mxu0 }
 0x1a0   : > { %v4207_v2 = vadd.f32 %v488_v1, %v179_v60  ;;  %v490_v3 = vpop.f32.mrb[3].mxu0 }
 0x1a1   : > { %v4209_v4 = vadd.f32 %v490_v3, %v180_v63  ;;  %v643_v5 = vmax.f32 %v4200_v61, %v4205_v0  ;;  %v197_v3 = vld [vmem:[%s6041_s1 + $0xa0] sm:$0xff] }
 0x1a3   : > { %644 = vmax.xlane.f32.xlu0 %v643_v5  ;;  %v646_v7 = vmax.f32 %v4207_v2, %v4209_v4 }
 0x1a5   : > { %v494_v9 = vpop.f32.mrb[4].mxu0  ;;  %647 = vmax.xlane.f32.xlu1 %v646_v7 }
 0x1a6   : > { %v4221_v12 = vadd.f32 %v494_v9, %v181_v6  ;;  %v496_v13 = vpop.f32.mrb[5].mxu0  ;;  %v198_v6 = vld [vmem:[%s6041_s1 + $0xa8] sm:$0xff] }
 0x1a7   : > { %v4229_v16 = vadd.f32 %v496_v13, %v182_v8  ;;  %v498_v17 = vpop.f32.mrb[6].mxu0  ;;  %v199_v8 = vld [vmem:[%s6041_s1 + $0xb0] sm:$0xff] }
 0x1a8   : > { %v500_v18 = vpop.f32.mrb[7].mxu0  ;;  %v4231_v19 = vadd.f32 %v498_v17, %v183_v14  ;;  %v200_v14 = vld [vmem:[%s6041_s1 + $0xb8] sm:$0xff] }
 0x1a9   : > { %v4233_v20 = vadd.f32 %v500_v18, %v184_v15  ;;  %v649_v21 = vmax.f32 %v4221_v12, %v4229_v16 }
 0x1ab   : > { %650 = vmax.xlane.f32.xlu0 %v649_v21  ;;  %v652_v26 = vmax.f32 %v4231_v19, %v4233_v20 }
 0x1ad   : > { %v504_v24 = vpop.f32.mrb[8].mxu0 }
 0x1ae   : > { %v4248_v27 = vadd.f32 %v504_v24, %v185_v22  ;;  %v506_v28 = vpop.f32.mrb[9].mxu0  ;;  %v201_v24 = vld [vmem:[%s6041_s1 + $0xc0] sm:$0xff] }
 0x1af   : > { %v4253_v30 = vadd.f32 %v506_v28, %v186_v23  ;;  %v508_v31 = vpop.f32.mrb[10].mxu0  ;;  %653 = vmax.xlane.f32.xlu0 %v652_v26  ;;  %v202_v26 = vld [vmem:[%s6041_s1 + $0xc8] sm:$0xff] }
 0x1b0   : > { %v4255_v32 = vadd.f32 %v508_v31, %v187_v25  ;;  %v510_v33 = vpop.f32.mrb[11].mxu0 }
 0x1b1   : > { %v4257_v34 = vadd.f32 %v510_v33, %v188_v29  ;;  %v655_v35 = vmax.f32 %v4248_v27, %v4253_v30  ;;  %v203_v29 = vld [vmem:[%s6041_s1 + $0xd0] sm:$0xff] }
 0x1b3   : > { %656 = vmax.xlane.f32.xlu1 %v655_v35  ;;  %v658_v37 = vmax.f32 %v4255_v32, %v4257_v34  ;;  %v204_v35 = vld [vmem:[%s6041_s1 + $0xd8] sm:$0xff] }
 0x1b5   : > { %v514_v39 = vpop.f32.mrb[12].mxu0  ;;  %659 = vmax.xlane.f32.xlu0 %v658_v37 }
 0x1b6   : > { %v4272_v41 = vadd.f32 %v514_v39, %v189_v36  ;;  %v516_v42 = vpop.f32.mrb[13].mxu0 }
 0x1b7   : > { %v4277_v44 = vadd.f32 %v516_v42, %v190_v38  ;;  %v518_v45 = vpop.f32.mrb[14].mxu0 }
 0x1b8   : > { %v4279_v46 = vadd.f32 %v518_v45, %v191_v40  ;;  %v520_v47 = vpop.f32.mrb[15].mxu0 }
 0x1b9   : > { %v4281_v48 = vadd.f32 %v520_v47, %v192_v43  ;;  %v661_v49 = vmax.f32 %v4272_v41, %v4277_v44  ;;  %v205_v43 = vld [vmem:[%s6041_s1 + $0xe0] sm:$0xff]  ;;  %v206_v47 = vld [vmem:[%s6041_s1 + $0xe8] sm:$0xff] }
 0x1bb   : > { %662 = vmax.xlane.f32.xlu1 %v661_v49  ;;  %v664_v51 = vmax.f32 %v4279_v46, %v4281_v48 }
 0x1bd   : > { %v524_v53 = vpop.f32.mrb[16].mxu0  ;;  %665 = vmax.xlane.f32.xlu0 %v664_v51 }
 0x1be   : > { %v4296_v55 = vadd.f32 %v524_v53, %v193_v50  ;;  %v526_v56 = vpop.f32.mrb[17].mxu0  ;;  %v207_v50 = vld [vmem:[%s6041_s1 + $0xf0] sm:$0xff]  ;;  %v208_v53 = vld [vmem:[%s6041_s1 + $0xf8] sm:$0xff] }
 0x1bf   : > { %v4301_v58 = vadd.f32 %v526_v56, %v194_v52  ;;  %v528_v59 = vpop.f32.mrb[18].mxu0 }
 0x1c0   : > { %v4303_v60 = vadd.f32 %v528_v59, %v195_v54  ;;  %v530_v62 = vpop.f32.mrb[19].mxu0 }
 0x1c1   : > { %v4305_v63 = vadd.f32 %v530_v62, %v196_v57  ;;  %v667_v1 = vmax.f32 %v4296_v55, %v4301_v58 }
 0x1c3   : > { %668 = vmax.xlane.f32.xlu1 %v667_v1  ;;  %v670_v5 = vmax.f32 %v4303_v60, %v4305_v63 }
 0x1c5   : > { %v534_v7 = vpop.f32.mrb[20].mxu0  ;;  %671 = vmax.xlane.f32.xlu0 %v670_v5 }
 0x1c6   : > { %v4320_v9 = vadd.f32 %v534_v7, %v197_v3  ;;  %v536_v13 = vpop.f32.mrb[21].mxu0  ;;  %v209_v3 = vld [vmem:[%s6041_s1 + $0x100] sm:$0xff] }
 0x1c7   : > { %v4325_v15 = vadd.f32 %v536_v13, %v198_v6  ;;  %v538_v17 = vpop.f32.mrb[22].mxu0  ;;  %v210_v6 = vld [vmem:[%s6041_s1 + $0x108] sm:$0xff] }
 0x1c8   : > { %v4327_v18 = vadd.f32 %v538_v17, %v199_v8  ;;  %v540_v21 = vpop.f32.mrb[23].mxu0  ;;  %v211_v8 = vld [vmem:[%s6041_s1 + $0x110] sm:$0xff]  ;;  %v212_v17 = vld [vmem:[%s6041_s1 + $0x118] sm:$0xff] }
 0x1c9   : > { %v4329_v22 = vadd.f32 %v540_v21, %v200_v14  ;;  %v673_v23 = vmax.f32 %v4320_v9, %v4325_v15 }
 0x1cb   : > { %674 = vmax.xlane.f32.xlu1 %v673_v23  ;;  %v676_v25 = vmax.f32 %v4327_v18, %v4329_v22 }
 0x1cd   : > { %v544_v28 = vpop.f32.mrb[24].mxu0  ;;  %677 = vmax.xlane.f32.xlu0 %v676_v25 }
 0x1ce   : > { %v4344_v31 = vadd.f32 %v544_v28, %v201_v24  ;;  %v546_v33 = vpop.f32.mrb[25].mxu0 }
 0x1cf   : > { %v4349_v36 = vadd.f32 %v546_v33, %v202_v26  ;;  %v548_v37 = vpop.f32.mrb[26].mxu0 }
 0x1d0   : > { %v4351_v38 = vadd.f32 %v548_v37, %v203_v29  ;;  %v550_v39 = vpop.f32.mrb[27].mxu0  ;;  %v213_v29 = vld [vmem:[%s6041_s1 + $0x120] sm:$0xff] }
 0x1d1   : > { %v4353_v40 = vadd.f32 %v550_v39, %v204_v35  ;;  %v679_v42 = vmax.f32 %v4344_v31, %v4349_v36  ;;  %v214_v35 = vld [vmem:[%s6041_s1 + $0x128] sm:$0xff]  ;;  %v215_v39 = vld [vmem:[%s6041_s1 + $0x130] sm:$0xff] }
 0x1d3   : > { %680 = vmax.xlane.f32.xlu1 %v679_v42  ;;  %v682_v45 = vmax.f32 %v4351_v38, %v4353_v40 }
 0x1d5   : > { %v554_v49 = vpop.f32.mrb[28].mxu0  ;;  %683 = vmax.xlane.f32.xlu0 %v682_v45  ;;  %v216_v45 = vld [vmem:[%s6041_s1 + $0x138] sm:$0xff] }
 0x1d6   : > { %v4368_v51 = vadd.f32 %v554_v49, %v205_v43  ;;  %v556_v52 = vpop.f32.mrb[29].mxu0 }
 0x1d7   : > { %v4373_v54 = vadd.f32 %v556_v52, %v206_v47  ;;  %v558_v56 = vpop.f32.mrb[30].mxu0 }
 0x1d8   : > { %v4375_v57 = vadd.f32 %v558_v56, %v207_v50  ;;  %v560_v59 = vpop.f32.mrb[31].mxu0 }
 0x1d9   : > { %v4377_v62 = vadd.f32 %v560_v59, %v208_v53  ;;  %v685_v1 = vmax.f32 %v4368_v51, %v4373_v54  ;;  %v217_v59 = vld [vmem:[%s6041_s1 + $0x140] sm:$0xff] }
 0x1db   : > { %686 = vmax.xlane.f32.xlu1 %v685_v1  ;;  %v688_v5 = vmax.f32 %v4375_v57, %v4377_v62 }
 0x1dd   : > { %v564_v7 = vpop.f32.mrb[32].mxu0  ;;  %689 = vmax.xlane.f32.xlu0 %v688_v5 }
 0x1de   : > { %v4392_v13 = vadd.f32 %v564_v7, %v209_v3  ;;  %v566_v14 = vpop.f32.mrb[33].mxu0  ;;  %v218_v3 = vld [vmem:[%s6041_s1 + $0x148] sm:$0xff] }
 0x1df   : > { %v4397_v21 = vadd.f32 %v566_v14, %v210_v6  ;;  %v568_v23 = vpop.f32.mrb[34].mxu0  ;;  %v219_v6 = vld [vmem:[%s6041_s1 + $0x150] sm:$0xff]  ;;  %v220_v14 = vld [vmem:[%s6041_s1 + $0x158] sm:$0xff] }
 0x1e0   : > { %v4399_v24 = vadd.f32 %v568_v23, %v211_v8  ;;  %v570_v25 = vpop.f32.mrb[35].mxu0 }
 0x1e1   : > { %v4401_v26 = vadd.f32 %v570_v25, %v212_v17  ;;  %v691_v28 = vmax.f32 %v4392_v13, %v4397_v21 }
 0x1e3   : > { %692 = vmax.xlane.f32.xlu1 %v691_v28  ;;  %v694_v33 = vmax.f32 %v4399_v24, %v4401_v26 }
 0x1e5   : > { %v574_v37 = vpop.f32.mrb[36].mxu0  ;;  %695 = vmax.xlane.f32.xlu0 %v694_v33 }
 0x1e6   : > { %v4416_v42 = vadd.f32 %v574_v37, %v213_v29  ;;  %v576_v43 = vpop.f32.mrb[37].mxu0 }
 0x1e7   : > { %v4421_v47 = vadd.f32 %v576_v43, %v214_v35  ;;  %v578_v49 = vpop.f32.mrb[38].mxu0  ;;  %v221_v35 = vld [vmem:[%s6041_s1 + $0x160] sm:$0xff] }
 0x1e8   : > { %v4423_v50 = vadd.f32 %v578_v49, %v215_v39  ;;  %v580_v52 = vpop.f32.mrb[39].mxu0  ;;  %v222_v39 = vld [vmem:[%s6041_s1 + $0x168] sm:$0xff] }
 0x1e9   : > { %v4425_v53 = vadd.f32 %v580_v52, %v216_v45  ;;  %v697_v56 = vmax.f32 %v4416_v42, %v4421_v47  ;;  %v223_v52 = vld [vmem:[%s6041_s1 + $0x170] sm:$0xff] }
 0x1eb   : > { %698 = vmax.xlane.f32.xlu1 %v697_v56  ;;  %v700_v1 = vmax.f32 %v4423_v50, %v4425_v53  ;;  %v224_v56 = vld [vmem:[%s6041_s1 + $0x178] sm:$0xff] }
 0x1ed   : > { %v584_v5 = vpop.f32.mrb[40].mxu0  ;;  %701 = vmax.xlane.f32.xlu0 %v700_v1 }
 0x1ee   : > { %v4440_v7 = vadd.f32 %v584_v5, %v217_v59  ;;  %v586_v8 = vpop.f32.mrb[41].mxu0 }
 0x1ef   : > { %v4445_v17 = vadd.f32 %v586_v8, %v218_v3  ;;  %v588_v23 = vpop.f32.mrb[42].mxu0 }
 0x1f0   : > { %v4447_v25 = vadd.f32 %v588_v23, %v219_v6  ;;  %v590_v28 = vpop.f32.mrb[43].mxu0  ;;  %v226_v23 = vld [vmem:[%s6041_s1 + $0x188] sm:$0xff] }
 0x1f1   : > { %v4449_v29 = vadd.f32 %v590_v28, %v220_v14  ;;  %v703_v33 = vmax.f32 %v4440_v7, %v4445_v17  ;;  %v225_v14 = vld [vmem:[%s6041_s1 + $0x180] sm:$0xff] }
 0x1f3   : > { %704 = vmax.xlane.f32.xlu1 %v703_v33  ;;  %v706_v37 = vmax.f32 %v4447_v25, %v4449_v29  ;;  %v227_v33 = vld [vmem:[%s6041_s1 + $0x190] sm:$0xff] }
 0x1f5   : > { %v594_v43 = vpop.f32.mrb[44].mxu0  ;;  %707 = vmax.xlane.f32.xlu0 %v706_v37 }
 0x1f6   : > { %v4461_v45 = vadd.f32 %v594_v43, %v221_v35  ;;  %v596_v49 = vpop.f32.mrb[45].mxu0  ;;  %v228_v43 = vld [vmem:[%s6041_s1 + $0x198] sm:$0xff] }
 0x1f7   : > { %v4469_v59 = vadd.f32 %v596_v49, %v222_v39  ;;  %v598_v1 = vpop.f32.mrb[46].mxu0 }
 0x1f8   : > { %v600_v3 = vpop.f32.mrb[47].mxu0  ;;  %v4471_v5 = vadd.f32 %v598_v1, %v223_v52 }
 0x1f9   : > { %v4473_v6 = vadd.f32 %v600_v3, %v224_v56  ;;  %v709_v8 = vmax.f32 %v4461_v45, %v4469_v59 }
 0x1fa   : > { %6103 = vst [vmem:[#allocation2_spill] sm:$0xff] %v4471_v5 }
 0x1fb   : > { %6104 = vst [vmem:[#allocation3_spill] sm:$0xff] %v4473_v6  ;;  %710 = vmax.xlane.f32.xlu0 %v709_v8  ;;  %v712_v35 = vmax.f32 %v4471_v5, %v4473_v6 }
 0x1fd   : > { %v604_v28 = vpop.f32.mrb[48].mxu0 }
 0x1fe   : > { %v4488_v37 = vadd.f32 %v604_v28, %v225_v14  ;;  %v606_v39 = vpop.f32.mrb[49].mxu0  ;;  %v229_v14 = vld [vmem:[%s6041_s1 + $0x1a0] sm:$0xff] }
 0x1ff   : > { %v4493_v49 = vadd.f32 %v606_v39, %v226_v23  ;;  %v608_v52 = vpop.f32.mrb[50].mxu0  ;;  %713 = vmax.xlane.f32.xlu0 %v712_v35  ;;  %v230_v23 = vld [vmem:[%s6041_s1 + $0x1a8] sm:$0xff]  ;;  %v231_v35 = vld [vmem:[%s6041_s1 + $0x1b0] sm:$0xff] }
 0x200   : > { %v4495_v56 = vadd.f32 %v608_v52, %v227_v33  ;;  %v610_v1 = vpop.f32.mrb[51].mxu0  ;;  %v232_v52 = vld [vmem:[%s6041_s1 + $0x1b8] sm:$0xff] }
 0x201   : > { %v4497_v3 = vadd.f32 %v610_v1, %v228_v43  ;;  %v715_v8 = vmax.f32 %v4488_v37, %v4493_v49 }
 0x202   : > { %6105 = vst [vmem:[#allocation4_spill] sm:$0xff] %v4495_v56 }
 0x203   : > { %6106 = vst [vmem:[#allocation5_spill] sm:$0xff] %v4497_v3  ;;  %716 = vmax.xlane.f32.xlu1 %v715_v8  ;;  %v718_v28 = vmax.f32 %v4495_v56, %v4497_v3 }
 0x205   : > { %v614_v33 = vpop.f32.mrb[52].mxu0  ;;  %719 = vmax.xlane.f32.xlu0 %v718_v28 }
 0x206   : > { %v4512_v39 = vadd.f32 %v614_v33, %v229_v14  ;;  %v616_v43 = vpop.f32.mrb[53].mxu0  ;;  %v233_v14 = vld [vmem:[%s6041_s1 + $0x1c0] sm:$0xff] }
 0x207   : > { %v4517_v1 = vadd.f32 %v616_v43, %v230_v23  ;;  %v618_v8 = vpop.f32.mrb[54].mxu0  ;;  %v234_v23 = vld [vmem:[%s6041_s1 + $0x1c8] sm:$0xff] }
 0x208   : > { %6107 = vst [vmem:[#allocation6_spill] sm:$0xff] %v4512_v39  ;;  %v4519_v3 = vadd.f32 %v618_v8, %v231_v35  ;;  %v620_v56 = vpop.f32.mrb[55].mxu0  ;;  %v236_v8 = vld [vmem:[%s6041_s1 + $0x1d8] sm:$0xff] }
 0x209   : > { %6108 = vst [vmem:[#allocation7_spill] sm:$0xff] %v4517_v1  ;;  %v4521_v6 = vadd.f32 %v620_v56, %v232_v52  ;;  %v721_v28 = vmax.f32 %v4512_v39, %v4517_v1  ;;  %v235_v56 = vld [vmem:[%s6041_s1 + $0x1d0] sm:$0xff] }
 0x20a   : > { %6109 = vst [vmem:[#allocation8_spill] sm:$0xff] %v4519_v3 }
 0x20b   : > { %6110 = vst [vmem:[#allocation9_spill] sm:$0xff] %v4521_v6  ;;  %722 = vmax.xlane.f32.xlu1 %v721_v28  ;;  %v724_v33 = vmax.f32 %v4519_v3, %v4521_v6 }
 0x20d   : > { %v624_v35 = vpop.f32.mrb[56].mxu0  ;;  %725 = vmax.xlane.f32.xlu0 %v724_v33 }
 0x20e   : > { %v4536_v43 = vadd.f32 %v624_v35, %v233_v14  ;;  %v626_v52 = vpop.f32.mrb[57].mxu0  ;;  %v237_v14 = vld [vmem:[%s6041_s1 + $0x1e0] sm:$0xff] }
 0x20f   : > { %v4541_v28 = vadd.f32 %v626_v52, %v234_v23  ;;  %v628_v6 = vpop.f32.mrb[58].mxu0  ;;  %v238_v23 = vld [vmem:[%s6041_s1 + $0x1e8] sm:$0xff] }
 0x210   : > { %6111 = vst [vmem:[#allocation10_spill] sm:$0xff] %v4536_v43  ;;  %v4543_v3 = vadd.f32 %v628_v6, %v235_v56  ;;  %v630_v1 = vpop.f32.mrb[59].mxu0  ;;  %v4560_v56 = vpop.permute.xlu1 %1461 }
 0x211   : > { %6112 = vst [vmem:[#allocation11_spill] sm:$0xff] %v4541_v28  ;;  %v4545_v39 = vadd.f32 %v630_v1, %v236_v8  ;;  %v727_v33 = vmax.f32 %v4536_v43, %v4541_v28  ;;  %v239_v1 = vld [vmem:[%s6041_s1 + $0x1f0] sm:$0xff]  ;;  %6115 = vst [vmem:[#allocation14_spill] sm:$0xff] %v4560_v56  ;;  %v4579_v56 = vpop.permute.xlu0 %1479 }
 0x212   : > { %6113 = vst [vmem:[#allocation12_spill] sm:$0xff] %v4543_v3  ;;  %6120 = vst [vmem:[#allocation19_spill] sm:$0xff] %v4579_v56 }
 0x213   : > { %6114 = vst [vmem:[#allocation13_spill] sm:$0xff] %v4545_v39  ;;  %728 = vmax.xlane.f32.xlu1 %v727_v33  ;;  %v730_v35 = vmax.f32 %v4543_v3, %v4545_v39  ;;  %v240_v33 = vld [vmem:[%s6041_s1 + $0x1f8] sm:$0xff] }
 0x215   : > { %v634_v6 = vpop.f32.mrb[60].mxu0  ;;  %731 = vmax.xlane.f32.xlu0 %v730_v35 }
 0x216   : > { %v4562_v52 = vadd.f32 %v634_v6, %v237_v14  ;;  %v636_v8 = vpop.f32.mrb[61].mxu0  ;;  %v4577_v6 = vpop.permute.xlu1 %1463 }
 0x217   : > { %v4567_v39 = vadd.f32 %v636_v8, %v238_v23  ;;  %v638_v3 = vpop.f32.mrb[62].mxu0  ;;  %6119 = vst [vmem:[#allocation18_spill] sm:$0xff] %v4577_v6  ;;  %v4583_v8 = vpop.permute.xlu0 %1481 }
 0x218   : > { %v4569_v28 = vadd.f32 %v638_v3, %v239_v1  ;;  %v640_v43 = vpop.f32.mrb[63].mxu0  ;;  %6122 = vst [vmem:[#allocation21_spill] sm:$0xff] %v4583_v8 }
 0x219   : > { %6116 = vst [vmem:[#allocation15_spill] sm:$0xff] %v4567_v39  ;;  %v4571_v35 = vadd.f32 %v640_v43, %v240_v33  ;;  %v733_v5 = vmax.f32 %v4562_v52, %v4567_v39 }
 0x21a   : > { %6117 = vst [vmem:[#allocation16_spill] sm:$0xff] %v4569_v28  ;;  %v4581_v23 = vpop.permute.xlu1 %1465 }
 0x21b   : > { %6118 = vst [vmem:[#allocation17_spill] sm:$0xff] %v4571_v35  ;;  %734 = vmax.xlane.f32.xlu1 %v733_v5  ;;  %v736_v14 = vmax.f32 %v4569_v28, %v4571_v35  ;;  %6121 = vst [vmem:[#allocation20_spill] sm:$0xff] %v4581_v23  ;;  %v4587_v43 = vpop.permute.xlu0 %1483 }
 0x21c   : > { %6124 = vst [vmem:[#allocation23_spill] sm:$0xff] %v4587_v43 }
 0x21d   : > { %737 = vmax.xlane.f32.xlu0 %v736_v14 }
 0x21e   : > { %v4585_v3 = vpop.permute.xlu1 %1467 }
 0x21f   : > { %6123 = vst [vmem:[#allocation22_spill] sm:$0xff] %v4585_v3 }
 0x222   : > { %v4589_v1 = vpop.permute.xlu1 %1469 }
 0x223   : > { %6125 = vst [vmem:[#allocation24_spill] sm:$0xff] %v4589_v1 }
 0x230   : > { %v645_v33 = vpop.xlane.xlu0 %644 }
 0x231   : > { %v739_v5 = vsub.f32 %v4200_v61, %v645_v33  ;;  %v740_v35 = vsub.f32 %v4205_v0, %v645_v33 }
 0x232   : > { %v648_v28 = vpop.xlane.xlu1 %647 }
 0x233   : > { %v803_v6 = vmul.f32 1.442695, %v739_v5  ;;  %v805_v14 = vmul.f32 1.442695, %v740_v35  ;;  %v741_v56 = vsub.f32 %v4207_v2, %v648_v28  ;;  %v742_v23 = vsub.f32 %v4209_v4, %v648_v28 }
 0x235   : > { %3530 = vpow2.f32 %v803_v6  ;;  %v807_v8 = vmul.f32 1.442695, %v741_v56  ;;  %v809_v39 = vmul.f32 1.442695, %v742_v23 }
 0x236   : > { %3532 = vpow2.f32 %v805_v14 }
 0x237   : > { %3534 = vpow2.f32 %v807_v8 }
 0x238   : > { %3536 = vpow2.f32 %v809_v39  ;;  %v651_v3 = vpop.xlane.xlu0 %650 }
 0x239   : > { %v743_v1 = vsub.f32 %v4221_v12, %v651_v3  ;;  %v744_v61 = vsub.f32 %v4229_v16, %v651_v3 }
 0x23b   : > { %v811_v43 = vmul.f32 1.442695, %v743_v1  ;;  %v813_v0 = vmul.f32 1.442695, %v744_v61 }
 0x23c   : > { %v654_v33 = vpop.xlane.xlu0 %653 }
 0x23d   : > { %3538 = vpow2.f32 %v811_v43  ;;  %v745_v35 = vsub.f32 %v4231_v19, %v654_v33  ;;  %v746_v2 = vsub.f32 %v4233_v20, %v654_v33 }
 0x23e   : > { %3540 = vpow2.f32 %v813_v0 }
 0x23f   : > { %v4599_v4 = vpop.eup %3530  ;;  %v815_v28 = vmul.f32 1.442695, %v745_v35  ;;  %v817_v56 = vmul.f32 1.442695, %v746_v2 }
 0x240   : > { %v4601_v6 = vpop.eup %3532  ;;  %v657_v39 = vpop.xlane.xlu1 %656 }
 0x241   : > { %v4603_v23 = vpop.eup %3534  ;;  %3542 = vpow2.f32 %v815_v28  ;;  %v747_v12 = vsub.f32 %v4248_v27, %v657_v39  ;;  %v748_v16 = vsub.f32 %v4253_v30, %v657_v39  ;;  %v931_v19 = vadd.f32 %v4601_v6, %v4599_v4 }
 0x242   : > { %v4609_v8 = vpop.eup %3536  ;;  %3544 = vpow2.f32 %v817_v56  ;;  %v660_v20 = vpop.xlane.xlu0 %659 }
 0x243   : > { %v819_v3 = vmul.f32 1.442695, %v747_v12  ;;  %v821_v43 = vmul.f32 1.442695, %v748_v16  ;;  %932 = vadd.xlane.f32.xlu1 %v931_v19  ;;  %v749_v1 = vsub.f32 %v4255_v32, %v660_v20  ;;  %v750_v5 = vsub.f32 %v4257_v34, %v660_v20 }
 0x244   : > { %v934_v14 = vadd.f32 %v4609_v8, %v4603_v23 }
 0x245   : > { %3546 = vpow2.f32 %v819_v3  ;;  %v823_v27 = vmul.f32 1.442695, %v749_v1  ;;  %v825_v30 = vmul.f32 1.442695, %v750_v5 }
 0x246   : > { %3548 = vpow2.f32 %v821_v43  ;;  %935 = vadd.xlane.f32.xlu0 %v934_v14 }
 0x247   : > { %v4615_v61 = vpop.eup %3538  ;;  %3550 = vpow2.f32 %v823_v27 }
 0x248   : > { %v4617_v0 = vpop.eup %3540  ;;  %3552 = vpow2.f32 %v825_v30  ;;  %v663_v33 = vpop.xlane.xlu1 %662 }
 0x249   : > { %v751_v35 = vsub.f32 %v4272_v41, %v663_v33  ;;  %v752_v32 = vsub.f32 %v4277_v44, %v663_v33  ;;  %v937_v34 = vadd.f32 %v4617_v0, %v4615_v61 }
 0x24a   : > { %v666_v2 = vpop.xlane.xlu0 %665 }
 0x24b   : > { %v4623_v28 = vpop.eup %3542  ;;  %v827_v56 = vmul.f32 1.442695, %v751_v35  ;;  %v829_v39 = vmul.f32 1.442695, %v752_v32  ;;  %938 = vadd.xlane.f32.xlu0 %v937_v34  ;;  %v753_v12 = vsub.f32 %v4279_v46, %v666_v2  ;;  %v754_v16 = vsub.f32 %v4281_v48, %v666_v2 }
 0x24c   : > { %v4627_v19 = vpop.eup %3544 }
 0x24d   : > { %3554 = vpow2.f32 %v827_v56  ;;  %v831_v20 = vmul.f32 1.442695, %v753_v12  ;;  %v833_v41 = vmul.f32 1.442695, %v754_v16  ;;  %v940_v44 = vadd.f32 %v4627_v19, %v4623_v28 }
 0x24e   : > { %3556 = vpow2.f32 %v829_v39 }
 0x24f   : > { %v4631_v3 = vpop.eup %3546  ;;  %3558 = vpow2.f32 %v831_v20  ;;  %941 = vadd.xlane.f32.xlu0 %v940_v44 }
 0x250   : > { %v4633_v43 = vpop.eup %3548  ;;  %3560 = vpow2.f32 %v833_v41  ;;  %v669_v32 = vpop.xlane.xlu1 %668 }
 0x251   : > { %v4635_v1 = vpop.eup %3550  ;;  %v943_v46 = vadd.f32 %v4633_v43, %v4631_v3  ;;  %v755_v34 = vsub.f32 %v4296_v55, %v669_v32  ;;  %v756_v2 = vsub.f32 %v4301_v58, %v669_v32 }
 0x252   : > { %v4639_v48 = vpop.eup %3552  ;;  %v672_v56 = vpop.xlane.xlu0 %671 }
 0x253   : > { %944 = vadd.xlane.f32.xlu0 %v943_v46  ;;  %v946_v5 = vadd.f32 %v4639_v48, %v4635_v1  ;;  %v835_v39 = vmul.f32 1.442695, %v755_v34  ;;  %v837_v12 = vmul.f32 1.442695, %v756_v2  ;;  %v758_v16 = vsub.f32 %v4305_v63, %v672_v56 }
 0x254   : > { %1471 = vrot.lane.b32.xlu1 %v4031_v10, %s3943_s17 }
 0x255   : > { %3562 = vpow2.f32 %v835_v39  ;;  %v841_v46 = vmul.f32 1.442695, %v758_v16 }
 0x256   : > { %3564 = vpow2.f32 %v837_v12 }
 0x257   : > { %v4645_v14 = vpop.eup %3554  ;;  %947 = vadd.xlane.f32.xlu0 %v946_v5 }
 0x258   : > { %v4647_v27 = vpop.eup %3556  ;;  %1487 = vrot.lane.b32.xlu1 %v4036_v11, %s3943_s17  ;;  %v757_v11 = vsub.f32 %v4303_v60, %v672_v56  ;;  %v675_v20 = vpop.xlane.xlu1 %674 }
 0x259   : > { %v4651_v30 = vpop.eup %3558  ;;  %v949_v33 = vadd.f32 %v4647_v27, %v4645_v14  ;;  %v759_v44 = vsub.f32 %v4320_v9, %v675_v20  ;;  %v760_v5 = vsub.f32 %v4325_v15, %v675_v20 }
 0x25a   : > { %v4655_v35 = vpop.eup %3560  ;;  %v839_v41 = vmul.f32 1.442695, %v757_v11  ;;  %v678_v58 = vpop.xlane.xlu0 %677  ;;  %v4670_v11 = vld [vmem:[%s3978_s14 + $0x60] sm:$0xff]  }
 0x25b   : > { %950 = vadd.xlane.f32.xlu0 %v949_v33  ;;  %v952_v10 = vadd.f32 %v4655_v35, %v4651_v30  ;;  %v843_v55 = vmul.f32 1.442695, %v759_v44  ;;  %v845_v60 = vmul.f32 1.442695, %v760_v5 }
 0x25c   : > { %3566 = vpow2.f32 %v839_v41 }
 0x25d   : > { %3568 = vpow2.f32 %v841_v46  ;;  %v761_v46 = vsub.f32 %v4327_v18, %v678_v58 }
 0x25e   : > { %3570 = vpow2.f32 %v843_v55  ;;  %v762_v55 = vsub.f32 %v4329_v22, %v678_v58 }
 0x25f   : > { %953 = vadd.xlane.f32.xlu0 %v952_v10  ;;  %3572 = vpow2.f32 %v845_v60  ;;  %v847_v18 = vmul.f32 1.442695, %v761_v46 }
 0x260   : > { %v681_v33 = vpop.xlane.xlu1 %680  ;;  %v849_v58 = vmul.f32 1.442695, %v762_v55 }
 0x261   : > { %v763_v10 = vsub.f32 %v4344_v31, %v681_v33  ;;  %v764_v63 = vsub.f32 %v4349_v36, %v681_v33  ;;  %v4674_v31 = vpop.eup %3562 }
 0x262   : > { %v684_v2 = vpop.xlane.xlu0 %683  ;;  %v4676_v12 = vpop.eup %3564 }
 0x263   : > { %v851_v34 = vmul.f32 1.442695, %v763_v10  ;;  %v853_v56 = vmul.f32 1.442695, %v764_v63  ;;  %v955_v5 = vadd.f32 %v4676_v12, %v4674_v31 }
 0x265   : > { %3574 = vpow2.f32 %v851_v34  ;;  %v765_v34 = vsub.f32 %v4351_v38, %v684_v2 }
 0x266   : > { %3576 = vpow2.f32 %v853_v56  ;;  %v4680_v44 = vpop.eup %3566  ;;  %v766_v56 = vsub.f32 %v4353_v40, %v684_v2 }
 0x267   : > { %v4685_v33 = vpop.eup %3568 }
 0x268   : > { %v687_v32 = vpop.xlane.xlu1 %686  ;;  %v857_v40 = vmul.f32 1.442695, %v766_v56 }
 0x269   : > { %v767_v9 = vsub.f32 %v4368_v51, %v687_v32  ;;  %v768_v15 = vsub.f32 %v4373_v54, %v687_v32  ;;  %v4692_v32 = vpop.eup %3570 }
 0x26a   : > { %v690_v16 = vpop.xlane.xlu0 %689  ;;  %v4697_v22 = vpop.eup %3572 }
 0x26b   : > { %v859_v36 = vmul.f32 1.442695, %v767_v9  ;;  %v861_v51 = vmul.f32 1.442695, %v768_v15  ;;  %v958_v9 = vadd.f32 %v4685_v33, %v4680_v44  ;;  %v769_v2 = vsub.f32 %v4375_v57, %v690_v16 }
 0x26c   : > { %v770_v46 = vsub.f32 %v4377_v62, %v690_v16 }
 0x26d   : > { %3578 = vpow2.f32 %v859_v36 }
 0x26e   : > { %3580 = vpow2.f32 %v861_v51  ;;  %v855_v51 = vmul.f32 1.442695, %v765_v34 }
 0x26f   : > { %v4702_v38 = vpop.eup %3574 }
 0x270   : > { %v693_v39 = vpop.xlane.xlu1 %692 }
 0x271   : > { %v771_v20 = vsub.f32 %v4392_v13, %v693_v39  ;;  %v772_v41 = vsub.f32 %v4397_v21, %v693_v39 }
 0x272   : > { %v4688_v60 = vpop.xlane.xlu0 %695 }
 0x273   : > { %v867_v10 = vmul.f32 1.442695, %v771_v20  ;;  %v869_v21 = vmul.f32 1.442695, %v772_v41  ;;  %v961_v41 = vadd.f32 %v4697_v22, %v4692_v32  ;;  %v773_v57 = vsub.f32 %v4399_v24, %v4688_v60 }
 0x274   : > { %v774_v16 = vsub.f32 %v4401_v26, %v4688_v60 }
 0x275   : > { %1485 = vrot.lane.b32.xlu0 %v4670_v11, %s3943_s17  ;;  %3582 = vpow2.f32 %v867_v10  ;;  %v871_v26 = vmul.f32 1.442695, %v773_v57  ;;  %v6127_v57 = vld [vmem:[#allocation2_spill] sm:$0xff] }
 0x276   : > { %3584 = vpow2.f32 %v869_v21  ;;  %v863_v21 = vmul.f32 1.442695, %v769_v2  ;;  %v873_v60 = vmul.f32 1.442695, %v774_v16 }
 0x277   : > { %3586 = vpow2.f32 %v847_v18 }
 0x278   : > { %v699_v54 = vpop.xlane.xlu1 %698  ;;  %3588 = vpow2.f32 %v849_v58 }
 0x279   : > { %v775_v13 = vsub.f32 %v4416_v42, %v699_v54  ;;  %v776_v63 = vsub.f32 %v4421_v47, %v699_v54  ;;  %v4706_v54 = vpop.eup %3576 }
 0x27a   : > { %v702_v15 = vpop.xlane.xlu0 %701  ;;  %v4710_v55 = vpop.eup %3578  ;;  %v967_v10 = vadd.f32 %v4706_v54, %v4702_v38 }
 0x27b   : > { %v875_v42 = vmul.f32 1.442695, %v775_v13  ;;  %v877_v47 = vmul.f32 1.442695, %v776_v63  ;;  %v4714_v13 = vpop.eup %3580  ;;  %v865_v63 = vmul.f32 1.442695, %v770_v46  ;;  %v777_v58 = vsub.f32 %v4423_v50, %v702_v15 }
 0x27c   : > { %956 = vadd.xlane.f32.xlu1 %v955_v5  ;;  %v973_v56 = vadd.f32 %v4714_v13, %v4710_v55 }
 0x27d   : > { %3590 = vpow2.f32 %v875_v42 }
 0x27e   : > { %3592 = vpow2.f32 %v877_v47 }
 0x27f   : > { %3594 = vpow2.f32 %v855_v51 }
 0x280   : > { %959 = vadd.xlane.f32.xlu1 %v958_v9  ;;  %v705_v39 = vpop.xlane.xlu1 %704  ;;  %3596 = vpow2.f32 %v857_v40  ;;  %v4722_v9 = vpop.eup %3582 }
 0x281   : > { %v779_v36 = vsub.f32 %v4440_v7, %v705_v39  ;;  %v780_v20 = vsub.f32 %v4445_v17, %v705_v39  ;;  %v4727_v42 = vpop.eup %3584 }
 0x282   : > { %v708_v7 = vpop.xlane.xlu0 %707  ;;  %v4729_v47 = vpop.eup %3586 }
 0x283   : > { %v883_v5 = vmul.f32 1.442695, %v779_v36  ;;  %v885_v17 = vmul.f32 1.442695, %v780_v20  ;;  %v879_v36 = vmul.f32 1.442695, %v777_v58  ;;  %v979_v20 = vadd.f32 %v4727_v42, %v4722_v9 }
 0x284   : > { %962 = vadd.xlane.f32.xlu1 %v961_v41  ;;  %v781_v41 = vsub.f32 %v4447_v25, %v708_v7 }
 0x285   : > { %3598 = vpow2.f32 %v883_v5 }
 0x286   : > { %3600 = vpow2.f32 %v885_v17 }
 0x287   : > { %3602 = vpow2.f32 %v863_v21 }
 0x288   : > { %968 = vadd.xlane.f32.xlu1 %v967_v10  ;;  %v711_v62 = vpop.xlane.xlu0 %710  ;;  %3604 = vpow2.f32 %v865_v63 }
 0x289   : > { %v783_v18 = vsub.f32 %v4461_v45, %v711_v62  ;;  %v784_v34 = vsub.f32 %v4469_v59, %v711_v62  ;;  %v778_v45 = vsub.f32 %v4425_v53, %v702_v15  ;;  %v4732_v59 = vpop.eup %3588  ;;  %v782_v15 = vsub.f32 %v4449_v29, %v708_v7 }
 0x28a   : > { %v4734_v50 = vpop.eup %3590  ;;  %v964_v63 = vadd.f32 %v4732_v59, %v4729_v47  ;;  %v887_v7 = vmul.f32 1.442695, %v781_v41  ;;  %v6131_v41 = vld [vmem:[#allocation4_spill] sm:$0xff] }
 0x28b   : > { %v891_v24 = vmul.f32 1.442695, %v783_v18  ;;  %v893_v39 = vmul.f32 1.442695, %v784_v34  ;;  %v4738_v51 = vpop.eup %3592  ;;  %v881_v53 = vmul.f32 1.442695, %v778_v45 }
 0x28c   : > { %974 = vadd.xlane.f32.xlu1 %v973_v56  ;;  %v4741_v40 = vpop.eup %3594  ;;  %v714_v2 = vpop.xlane.xlu0 %713  ;;  %v985_v25 = vadd.f32 %v4738_v51, %v4734_v50  ;;  %v6128_v34 = vld [vmem:[#allocation3_spill] sm:$0xff] }
 0x28d   : > { %3606 = vpow2.f32 %v891_v24  ;;  %v4744_v5 = vpop.eup %3596  ;;  %v785_v62 = vsub.f32 %v6127_v57, %v714_v2 }
 0x28e   : > { %3608 = vpow2.f32 %v893_v39 }
 0x28f   : > { %3610 = vpow2.f32 %v871_v26  ;;  %v4748_v21 = vpop.eup %3598  ;;  %v970_v26 = vadd.f32 %v4744_v5, %v4741_v40 }
 0x290   : > { %980 = vadd.xlane.f32.xlu1 %v979_v20  ;;  %v717_v46 = vpop.xlane.xlu1 %716  ;;  %3612 = vpow2.f32 %v873_v60  ;;  %6126 = vst [vmem:[#allocation25_spill] sm:$0xff] %v4748_v21  ;;  %v4754_v29 = vpop.eup %3600  ;;  %v895_v60 = vmul.f32 1.442695, %v785_v62 }
 0x291   : > { %v787_v17 = vsub.f32 %v4488_v37, %v717_v46  ;;  %v788_v10 = vsub.f32 %v4493_v49, %v717_v46  ;;  %3614 = vpow2.f32 %v879_v36  ;;  %v889_v37 = vmul.f32 1.442695, %v782_v15  ;;  %v4758_v58 = vpop.eup %3602 }
 0x292   : > { %3616 = vpow2.f32 %v881_v53  ;;  %v786_v49 = vsub.f32 %v6128_v34, %v714_v2  ;;  %v720_v56 = vpop.xlane.xlu0 %719  ;;  %v4760_v24 = vpop.eup %3604  ;;  %v991_v39 = vadd.f32 %v4754_v29, %v4748_v21  ;;  %v6132_v2 = vld [vmem:[#allocation5_spill] sm:$0xff] }
 0x293   : > { %v899_v16 = vmul.f32 1.442695, %v787_v17  ;;  %v901_v18 = vmul.f32 1.442695, %v788_v10  ;;  %v789_v53 = vsub.f32 %v6131_v41, %v720_v56  ;;  %v790_v46 = vsub.f32 %v6132_v2, %v720_v56  ;;  %v6133_v17 = vld [vmem:[#allocation6_spill] sm:$0xff]  ;;  %v6136_v41 = vld [vmem:[#allocation9_spill] sm:$0xff] }
 0x294   : > { %986 = vadd.xlane.f32.xlu1 %v985_v25  ;;  %965 = vadd.xlane.f32.xlu0 %v964_v63  ;;  %v897_v20 = vmul.f32 1.442695, %v786_v49  ;;  %v6134_v25 = vld [vmem:[#allocation7_spill] sm:$0xff]  ;;  %v6135_v49 = vld [vmem:[#allocation8_spill] sm:$0xff] }
 0x295   : > { %3618 = vpow2.f32 %v899_v16  ;;  %v976_v16 = vadd.f32 %v4760_v24, %v4758_v58  ;;  %v905_v2 = vmul.f32 1.442695, %v790_v46  ;;  %v6139_v46 = vld [vmem:[#allocation10_spill] sm:$0xff] }
 0x296   : > { %3620 = vpow2.f32 %v901_v18 }
 0x297   : > { %v4766_v45 = vpop.eup %3606  ;;  %3622 = vpow2.f32 %v887_v7 }
 0x298   : > { %6129 = vst [vmem:[#allocation2_spill] sm:$0xff] %v4766_v45  ;;  %v4768_v36 = vpop.eup %3608  ;;  %3624 = vpow2.f32 %v889_v37  ;;  %992 = vadd.xlane.f32.xlu1 %v991_v39  ;;  %971 = vadd.xlane.f32.xlu0 %v970_v26  ;;  %v723_v15 = vpop.xlane.xlu1 %722  ;;  %v903_v26 = vmul.f32 1.442695, %v789_v53 }
 0x299   : > { %6130 = vst [vmem:[#allocation3_spill] sm:$0xff] %v4768_v36  ;;  %v791_v10 = vsub.f32 %v6133_v17, %v723_v15  ;;  %v792_v63 = vsub.f32 %v6134_v25, %v723_v15  ;;  %v997_v57 = vadd.f32 %v4768_v36, %v4766_v45  ;;  %v4776_v7 = vpop.eup %3610  ;;  %3626 = vpow2.f32 %v895_v60 }
 0x29a   : > { %v726_v62 = vpop.xlane.xlu0 %725  ;;  %v4780_v18 = vpop.eup %3612  ;;  %3628 = vpow2.f32 %v897_v20 }
 0x29b   : > { %v907_v37 = vmul.f32 1.442695, %v791_v10  ;;  %v909_v34 = vmul.f32 1.442695, %v792_v63  ;;  %v793_v56 = vsub.f32 %v6135_v49, %v726_v62  ;;  %v4783_v39 = vpop.eup %3614  ;;  %v794_v15 = vsub.f32 %v6136_v41, %v726_v62 }
 0x29c   : > { %977 = vadd.xlane.f32.xlu0 %v976_v16  ;;  %998 = vadd.xlane.f32.xlu1 %v997_v57  ;;  %v4786_v17 = vpop.eup %3616  ;;  %v982_v60 = vadd.f32 %v4780_v18, %v4776_v7  ;;  %v6140_v16 = vld [vmem:[#allocation11_spill] sm:$0xff] }
 0x29d   : > { %3630 = vpow2.f32 %v907_v37  ;;  %v911_v25 = vmul.f32 1.442695, %v793_v56  ;;  %v913_v20 = vmul.f32 1.442695, %v794_v15 }
 0x29e   : > { %3632 = vpow2.f32 %v909_v34 }
 0x29f   : > { %v4790_v10 = vpop.eup %3618  ;;  %3634 = vpow2.f32 %v903_v26  ;;  %v988_v26 = vadd.f32 %v4786_v17, %v4783_v39 }
 0x2a0   : > { %6137 = vst [vmem:[#allocation4_spill] sm:$0xff] %v4790_v10  ;;  %v4792_v63 = vpop.eup %3620  ;;  %983 = vadd.xlane.f32.xlu0 %v982_v60  ;;  %v729_v53 = vpop.xlane.xlu1 %728  ;;  %3636 = vpow2.f32 %v905_v2  ;;  %v6141_v60 = vld [vmem:[#allocation12_spill] sm:$0xff]  ;;  %v6142_v2 = vld [vmem:[#allocation13_spill] sm:$0xff] }
 0x2a1   : > { %6138 = vst [vmem:[#allocation5_spill] sm:$0xff] %v4792_v63  ;;  %v4794_v62 = vpop.eup %3622  ;;  %v795_v57 = vsub.f32 %v6139_v46, %v729_v53  ;;  %v796_v37 = vsub.f32 %v6140_v16, %v729_v53  ;;  %v1003_v34 = vadd.f32 %v4792_v63, %v4790_v10  ;;  %3638 = vpow2.f32 %v911_v25 }
 0x2a2   : > { %v4800_v49 = vpop.eup %3624  ;;  %v732_v56 = vpop.xlane.xlu0 %731  ;;  %3640 = vpow2.f32 %v913_v20 }
 0x2a3   : > { %v915_v41 = vmul.f32 1.442695, %v795_v57  ;;  %v917_v15 = vmul.f32 1.442695, %v796_v37  ;;  %1004 = vadd.xlane.f32.xlu1 %v1003_v34  ;;  %v797_v45 = vsub.f32 %v6141_v60, %v732_v56  ;;  %v798_v36 = vsub.f32 %v6142_v2, %v732_v56  ;;  %v4806_v53 = vpop.eup %3626 }
 0x2a4   : > { %989 = vadd.xlane.f32.xlu0 %v988_v26  ;;  %6143 = vst [vmem:[#allocation6_spill] sm:$0xff] %v4806_v53  ;;  %v4808_v10 = vpop.eup %3628  ;;  %v994_v25 = vadd.f32 %v4800_v49, %v4794_v62 }
 0x2a5   : > { %3642 = vpow2.f32 %v915_v41  ;;  %v919_v46 = vmul.f32 1.442695, %v797_v45  ;;  %v921_v16 = vmul.f32 1.442695, %v798_v36  ;;  %6144 = vst [vmem:[#allocation7_spill] sm:$0xff] %v4808_v10  ;;  %v1000_v45 = vadd.f32 %v4808_v10, %v4806_v53 }
 0x2a6   : > { %3644 = vpow2.f32 %v917_v15 }
 0x2a7   : > { %v4812_v57 = vpop.eup %3630  ;;  %3646 = vpow2.f32 %v919_v46 }
 0x2a8   : > { %6145 = vst [vmem:[#allocation8_spill] sm:$0xff] %v4812_v57  ;;  %v4814_v37 = vpop.eup %3632  ;;  %995 = vadd.xlane.f32.xlu0 %v994_v25  ;;  %3648 = vpow2.f32 %v921_v16 }
 0x2a9   : > { %6146 = vst [vmem:[#allocation9_spill] sm:$0xff] %v4814_v37  ;;  %v1009_v20 = vadd.f32 %v4814_v37, %v4812_v57  ;;  %v4818_v34 = vpop.eup %3634 }
 0x2aa   : > { %6147 = vst [vmem:[#allocation10_spill] sm:$0xff] %v4818_v34  ;;  %v4822_v36 = vpop.eup %3636 }
 0x2ab   : > { %6148 = vst [vmem:[#allocation11_spill] sm:$0xff] %v4822_v36  ;;  %1010 = vadd.xlane.f32.xlu1 %v1009_v20  ;;  %v4824_v56 = vpop.eup %3638  ;;  %v1006_v41 = vadd.f32 %v4822_v36, %v4818_v34  ;;  %v6157_v34 = vld [vmem:[#allocation17_spill] sm:$0xff] }
 0x2ac   : > { %6149 = vst [vmem:[#allocation12_spill] sm:$0xff] %v4824_v56  ;;  %1001 = vadd.xlane.f32.xlu0 %v1000_v45  ;;  %v4826_v26 = vpop.eup %3640  ;;  %v4845_v45 = vld [vmem:[%s3978_s14 + $0x70] sm:$0xff]  }
 0x2ad   : > { %6150 = vst [vmem:[#allocation13_spill] sm:$0xff] %v4826_v26  ;;  %v1012_v16 = vadd.f32 %v4826_v26, %v4824_v56 }
 0x2af   : > { %v4830_v15 = vpop.eup %3642 }
 0x2b0   : > { %6151 = vst [vmem:[#allocation26_spill] sm:$0xff] %v4830_v15  ;;  %v4832_v60 = vpop.eup %3644  ;;  %1007 = vadd.xlane.f32.xlu0 %v1006_v41  ;;  %v735_v41 = vpop.xlane.xlu1 %734 }
 0x2b1   : > { %6152 = vst [vmem:[#allocation27_spill] sm:$0xff] %v4832_v60  ;;  %v1015_v2 = vadd.f32 %v4832_v60, %v4830_v15  ;;  %v4836_v46 = vpop.eup %3646  ;;  %v4850_v15 = vld [vmem:[%s3978_s14 + $0x30] sm:$0xff]   ;;  %v738_v60 = vpop.xlane.xlu0 %737  ;;  %v799_v57 = vsub.f32 %v4562_v52, %v735_v41 }
 0x2b2   : > { %6153 = vst [vmem:[#allocation28_spill] sm:$0xff] %v4836_v46  ;;  %v4840_v25 = vpop.eup %3648  ;;  %v802_v63 = vsub.f32 %v6157_v34, %v738_v60 }
 0x2b3   : > { %6154 = vst [vmem:[#allocation29_spill] sm:$0xff] %v4840_v25  ;;  %1016 = vadd.xlane.f32.xlu1 %v1015_v2  ;;  %v1018_v20 = vadd.f32 %v4840_v25, %v4836_v46  ;;  %v6156_v25 = vld [vmem:[#allocation16_spill] sm:$0xff] }
 0x2b4   : > { %1013 = vadd.xlane.f32.xlu0 %v1012_v16  ;;  %v6155_v16 = vld [vmem:[#allocation15_spill] sm:$0xff]  ;;  %v801_v37 = vsub.f32 %v6156_v25, %v738_v60  ;;  %v929_v21 = vmul.f32 1.442695, %v802_v63 }
 0x2b5   : > { %v800_v56 = vsub.f32 %v6155_v16, %v735_v41 }
 0x2b6   : > { %v927_v36 = vmul.f32 1.442695, %v801_v37 }
 0x2b7   : > { %v925_v26 = vmul.f32 1.442695, %v800_v56 }
 0x2b8   : > { %1019 = vadd.xlane.f32.xlu0 %v1018_v20  ;;  %v923_v20 = vmul.f32 1.442695, %v799_v57 }
 0x2c4   : > { %1489 = vrot.lane.b32.xlu1 %v4845_v45, %s3943_s17 }
 0x2ce   : > { %1473 = vrot.lane.b32.xlu0 %v4850_v15, %s3943_s17 }
 0x2d0   : > { %v933_v2 = vpop.xlane.xlu1 %932 }
 0x2d1   : > { %3650 = vrcp.f32 %v933_v2 }
 0x2d3   : > { %v936_v46 = vpop.xlane.xlu0 %935 }
 0x2d4   : > { %3652 = vrcp.f32 %v936_v46 }
 0x2d5   : > { %3654 = vpow2.f32 %v923_v20 }
 0x2d6   : > { %3656 = vpow2.f32 %v925_v26 }
 0x2d8   : > { %v939_v53 = vpop.xlane.xlu0 %938 }
 0x2d9   : > { %3658 = vrcp.f32 %v939_v53  ;;  %v6158_v53 = vld [vmem:[#allocation14_spill] sm:$0xff] }
 0x2da   : > { %3660 = vpow2.f32 %v927_v36 }
 0x2db   : > { %v3651_v10 = vpop.eup %3650 }
 0x2dc   : > { %v942_v52 = vpop.xlane.xlu0 %941  ;;  %v1060_v57 = vmul.f32 %v3651_v10, %v4601_v6  ;;  %v1059_v56 = vmul.f32 %v3651_v10, %v4599_v4 }
 0x2dd   : > { %3662 = vrcp.f32 %v942_v52 }
 0x2de   : > { %v3653_v41 = vpop.eup %3652  ;;  %3664 = vpow2.f32 %v929_v21  ;;  %v1542_v21 = vsel %vm353_vm0, %v6158_v53, 0 }
 0x2df   : > { %v1062_v25 = vmul.f32 %v3653_v41, %v4609_v8  ;;  %v1061_v34 = vmul.f32 %v3653_v41, %v4603_v23  ;;  %v4862_v26 = vpop.eup %3654  ;;  %v6159_v23 = vld [vmem:[#allocation19_spill] sm:$0xff] }
 0x2e0   : > { %v945_v60 = vpop.xlane.xlu0 %944  ;;  %v4864_v63 = vpop.eup %3656 }
 0x2e1   : > { %v1124_v37 = vpack.c.bf16 %v1062_v25, %v1060_v57  ;;  %v1123_v46 = vpack.c.bf16 %v1061_v34, %v1059_v56  ;;  %3666 = vrcp.f32 %v945_v60  ;;  %v1021_v8 = vadd.f32 %v4864_v63, %v4862_v26  ;;  %v6160_v60 = vld [vmem:[#allocation18_spill] sm:$0xff] }
 0x2e3   : > { %1235 = vmatprep.mubr.bf16.mxu1 %v1124_v37  ;;  %v3659_v36 = vpop.eup %3658  ;;  %v1545_v37 = vsel %vm353_vm0, %v6160_v60, 0 }
 0x2e4   : > { %1236 = vmatmul.mubr.bf16.vlgmr.msra.gmra.mrb[0].mxu1 %v1123_v46  ;;  %v948_v6 = vpop.xlane.xlu0 %947  ;;  %v4868_v4 = vpop.eup %3660  ;;  %v1064_v20 = vmul.f32 %v3659_v36, %v4617_v0  ;;  %v1063_v41 = vmul.f32 %v3659_v36, %v4615_v61  ;;  %v6161_v0 = vld [vmem:[#allocation21_spill] sm:$0xff] }
 0x2e5   : > { %3229 = vmatpush3.bf16.xpose.msra.mxu1 %v1542_v21  ;;  %3668 = vrcp.f32 %v948_v6 }
 0x2e6   : > { %3413 = vmatprep.subr.msk.bf16.mxu1 %vm353_vm0, %v6159_v23 }
 0x2e7   : > { %v3663_v10 = vpop.eup %3662 }
 0x2e8   : > { %v4874_v2 = vpop.eup %3664  ;;  %1022 = vadd.xlane.f32.xlu1 %v1021_v8  ;;  %v951_v16 = vpop.xlane.xlu0 %950  ;;  %v1066_v52 = vmul.f32 %v3663_v10, %v4627_v19  ;;  %v1065_v57 = vmul.f32 %v3663_v10, %v4623_v28  ;;  %v6162_v8 = vld [vmem:[#allocation20_spill] sm:$0xff] }
 0x2e9   : > { %3670 = vrcp.f32 %v951_v16  ;;  %v1024_v34 = vadd.f32 %v4874_v2, %v4868_v4  ;;  %v1548_v10 = vsel %vm353_vm0, %v6162_v8, 0 }
 0x2ea   : > { %v1126_v25 = vpack.c.bf16 %v1066_v52, %v1064_v20  ;;  %v1125_v56 = vpack.c.bf16 %v1065_v57, %v1063_v41  ;;  %v6163_v20 = vld [vmem:[#allocation23_spill] sm:$0xff]  ;;  %v3917_v41 = vld [vmem:[%s3978_s14 + $0x78] sm:$0xff]  }
 0x2eb   : > { %v3667_v53 = vpop.eup %3666 }
 0x2ec   : > { %1243 = vmatprep.mubr.bf16.mxu1 %v1126_v25  ;;  %v954_v46 = vpop.xlane.xlu0 %953  ;;  %v1068_v28 = vmul.f32 %v3667_v53, %v4633_v43  ;;  %v1067_v21 = vmul.f32 %v3667_v53, %v4631_v3 }
 0x2ed   : > { %3231 = vmatpush3.bf16.xpose.msra.mxu1 %v1545_v37  ;;  %3672 = vrcp.f32 %v954_v46  ;;  %1025 = vadd.xlane.f32.xlu0 %v1024_v34  ;;  %v6165_v37 = vld [vmem:[#allocation24_spill] sm:$0xff] }
 0x2ee   : > { %3414 = vmatprep.subr.msk.bf16.mxu1 %vm353_vm0, %v6161_v0  ;;  %1244 = vmatmul.mubr.bf16.gmra.mrb[4].mxu1 %v1125_v56  ;;  %v6164_v56 = vld [vmem:[#allocation22_spill] sm:$0xff]  ;;  %v1554_v46 = vsel %vm353_vm0, %v6165_v37, 0  ;;  %v4918_v0 = vld [vmem:[%s3978_s14 + $0x28] sm:$0xff]  }
 0x2ef   : > { %v3669_v61 = vpop.eup %3668  ;;  %v1551_v34 = vsel %vm353_vm0, %v6164_v56, 0 }
 0x2f0   : > { %v1070_v19 = vmul.f32 %v3669_v61, %v4639_v48  ;;  %v1069_v6 = vmul.f32 %v3669_v61, %v4635_v1  ;;  %v1486_v60 = vpop.permute.xlu0 %1485  ;;  %v4924_v61 = vld [vmem:[%s3978_s14] sm:$0xff]  }
 0x2f2   : > { %v1128_v36 = vpack.c.bf16 %v1070_v19, %v1068_v28  ;;  %v1127_v23 = vpack.c.bf16 %v1069_v6, %v1067_v21  ;;  %v4930_v19 = vld [vmem:[%s3978_s14 + $0x10] sm:$0xff]  }
 0x2f3   : > { %v3671_v16 = vpop.eup %3670 }
 0x2f4   : > { %1251 = vmatprep.mubr.bf16.mxu1 %v1128_v36  ;;  %v1072_v48 = vmul.f32 %v3671_v16, %v4647_v27  ;;  %v1071_v1 = vmul.f32 %v3671_v16, %v4645_v14  ;;  %v4903_v27 = vld [vmem:[%s3978_s14 + $0x8] sm:$0xff]   ;;  %v1472_v14 = vpop.permute.xlu1 %1471 }
 0x2f5   : > { %3233 = vmatpush3.bf16.xpose.msra.mxu1 %v1548_v10  ;;  %v1557_v21 = vsel %vm353_vm0, %v1472_v14, 0  ;;  %v4936_v36 = vld [vmem:[%s3978_s14 + $0x48] sm:$0xff]   ;;  %v4946_v10 = vld [vmem:[%s3978_s14 + $0x58] sm:$0xff]  }
 0x2f6   : > { %3415 = vmatprep.subr.msk.bf16.mxu1 %vm353_vm0, %v6163_v20  ;;  %1252 = vmatmul.mubr.bf16.gmra.mrb[8].mxu1 %v1127_v23  ;;  %v4941_v23 = vld [vmem:[%s3978_s14 + $0x20] sm:$0xff]   ;;  %v4953_v16 = vld [vmem:[%s3978_s14 + $0x68] sm:$0xff]  }
 0x2f7   : > { %v3673_v43 = vpop.eup %3672 }
 0x2f8   : > { %v1074_v3 = vmul.f32 %v3673_v43, %v4655_v35  ;;  %v1073_v52 = vmul.f32 %v3673_v43, %v4651_v30  ;;  %v4909_v30 = vld [vmem:[%s3978_s14 + $0x18] sm:$0xff]   ;;  %v1488_v53 = vpop.permute.xlu1 %1487 }
 0x2f9   : > { %1491 = vrot.lane.b32.xlu1 %v3917_v41, %s3943_s17  ;;  %v3920_v35 = vld [vmem:[%s3978_s14 + $0x38] sm:$0xff]  }
 0x2fa   : > { %v1130_v57 = vpack.c.bf16 %v1074_v3, %v1072_v48  ;;  %v1129_v25 = vpack.c.bf16 %v1073_v52, %v1071_v1  ;;  %v4958_v48 = vld [vmem:[%s3978_s14 + $0x40] sm:$0xff]  }
 0x2fc   : > { %1259 = vmatprep.mubr.bf16.mxu1 %v1130_v57 }
 0x2fd   : > { %3235 = vmatpush3.bf16.xpose.msra.mxu1 %v1551_v34  ;;  %1431 = vrot.lane.b32.xlu1 %v4903_v27, %s3944_s3 }
 0x2fe   : > { %3416 = vmatprep.subr.msk.bf16.mxu1 %vm353_vm0, %v1486_v60  ;;  %1260 = vmatmul.mubr.bf16.gmra.mrb[12].mxu1 %v1129_v25  ;;  %v4968_v60 = vld [vmem:[%s3978_s14 + $0x50] sm:$0xff]  }
 0x301   : > { %1435 = vrot.lane.b32.xlu1 %v4909_v30, %s3944_s3 }
 0x303   : > { %1475 = vrot.lane.b32.xlu0 %v3920_v35, %s3943_s17  ;;  %s3945_s17 = smov 48  }
 0x305   : > { %3237 = vmatpush3.bf16.xpose.msra.mxu1 %v1554_v46  ;;  %1439 = vrot.lane.b32.xlu1 %v4918_v0, %s3944_s3 }
 0x306   : > { %3417 = vmatprep.subr.msk.bf16.mxu1 %vm353_vm0, %v1488_v53 }
 0x307   : > { %1429 = vrot.lane.b32.xlu0 %v4924_v61, %s3944_s3 }
 0x309   : > { %v957_v28 = vpop.xlane.xlu1 %956  ;;  %1443 = vrot.lane.b32.xlu1 %v3920_v35, %s3944_s3 }
 0x30a   : > { %3674 = vrcp.f32 %v957_v28 }
 0x30b   : > { %1433 = vrot.lane.b32.xlu0 %v4930_v19, %s3944_s3 }
 0x30d   : > { %3239 = vmatpush3.bf16.xpose.msra.mxu1 %v1557_v21  ;;  %v960_v6 = vpop.xlane.xlu1 %959  ;;  %1447 = vrot.lane.b32.xlu1 %v4936_v36, %s3944_s3 }
 0x30e   : > { %3676 = vrcp.f32 %v960_v6 }
 0x30f   : > { %1437 = vrot.lane.b32.xlu0 %v4941_v23, %s3944_s3 }
 0x311   : > { %v963_v8 = vpop.xlane.xlu1 %962  ;;  %1451 = vrot.lane.b32.xlu1 %v4946_v10, %s3944_s3 }
 0x312   : > { %3678 = vrcp.f32 %v963_v8 }
 0x313   : > { %1441 = vrot.lane.b32.xlu0 %v4850_v15, %s3944_s3 }
 0x314   : > { %v3675_v20 = vpop.eup %3674 }
 0x315   : > { %1455 = vrot.lane.b32.xlu1 %v4953_v16, %s3944_s3  ;;  %v969_v43 = vpop.xlane.xlu1 %968  ;;  %v1076_v1 = vmul.f32 %v3675_v20, %v4676_v12  ;;  %v1075_v57 = vmul.f32 %v3675_v20, %v4674_v31 }
 0x317   : > { %1445 = vrot.lane.b32.xlu0 %v4958_v48, %s3944_s3 }
 0x318   : > { %v3677_v3 = vpop.eup %3676 }
 0x319   : > { %v1078_v52 = vmul.f32 %v3677_v3, %v4685_v33  ;;  %v1077_v25 = vmul.f32 %v3677_v3, %v4680_v44  ;;  %1459 = vrot.lane.b32.xlu1 %v3917_v41, %s3944_s3  ;;  %v975_v14 = vpop.xlane.xlu1 %974 }
 0x31b   : > { %v1132_v56 = vpack.c.bf16 %v1078_v52, %v1076_v1  ;;  %v1131_v34 = vpack.c.bf16 %v1077_v25, %v1075_v57  ;;  %1449 = vrot.lane.b32.xlu0 %v4968_v60, %s3944_s3 }
 0x31c   : > { %v3679_v35 = vpop.eup %3678 }
 0x31d   : > { %1267 = vmatprep.mubr.bf16.mxu1 %v1132_v56  ;;  %v981_v31 = vpop.xlane.xlu1 %980  ;;  %v1079_v21 = vmul.f32 %v3679_v35, %v4692_v32  ;;  %2310 = vrot.lane.b32.xlu1 %v4958_v48, %s3945_s17 }
 0x31e   : > { %1268 = vmatmul.mubr.bf16.gmra.mrb[16].mxu1 %v1131_v34 }
 0x31f   : > { %1453 = vrot.lane.b32.xlu0 %v4670_v11, %s3944_s3  ;;  %v1080_v11 = vmul.f32 %v3679_v35, %v4697_v22 }
 0x321   : > { %v966_v12 = vpop.xlane.xlu0 %965  ;;  %v987_v33 = vpop.xlane.xlu1 %986  ;;  %2312 = vrot.lane.b32.xlu1 %v4936_v36, %s3945_s17 }
 0x322   : > { %3680 = vrcp.f32 %v966_v12 }
 0x323   : > { %1457 = vrot.lane.b32.xlu0 %v4845_v45, %s3944_s3  ;;  %3682 = vrcp.f32 %v969_v43 }
 0x325   : > { %v972_v44 = vpop.xlane.xlu0 %971  ;;  %v993_v53 = vpop.xlane.xlu1 %992  ;;  %2314 = vrot.lane.b32.xlu1 %v4968_v60, %s3945_s17 }
 0x326   : > { %3684 = vrcp.f32 %v972_v44 }
 0x327   : > { %3686 = vrcp.f32 %v975_v14  ;;  %2294 = vrot.lane.b32.xlu0 %v4924_v61, %s3945_s17 }
 0x329   : > { %v978_v41 = vpop.xlane.xlu0 %977  ;;  %v999_v25 = vpop.xlane.xlu1 %998  ;;  %2316 = vrot.lane.b32.xlu1 %v4946_v10, %s3945_s17 }
 0x32a   : > { %3688 = vrcp.f32 %v978_v41 }
 0x32b   : > { %2296 = vrot.lane.b32.xlu0 %v4903_v27, %s3945_s17 }
 0x32c   : > { %v3681_v37 = vpop.eup %3680 }
 0x32d   : > { %v984_v46 = vpop.xlane.xlu0 %983  ;;  %v1082_v28 = vmul.f32 %v3681_v37, %v4732_v59  ;;  %v1081_v6 = vmul.f32 %v3681_v37, %v4729_v47  ;;  %v3683_v8 = vpop.eup %3682  ;;  %2320 = vrot.lane.b32.xlu1 %v4953_v16, %s3945_s17 }
 0x32e   : > { %3690 = vrcp.f32 %v984_v46  ;;  %v1084_v52 = vmul.f32 %v3683_v8, %v4706_v54  ;;  %v1083_v14 = vmul.f32 %v3683_v8, %v4702_v38 }
 0x32f   : > { %v1134_v20 = vpack.c.bf16 %v1082_v28, %v1080_v11  ;;  %v1133_v43 = vpack.c.bf16 %v1081_v6, %v1079_v21  ;;  %3692 = vrcp.f32 %v981_v31  ;;  %2298 = vrot.lane.b32.xlu0 %v4930_v19, %s3945_s17  ;;  %v3930_v19 = vld [vmem:[%s3978_s14 + $0x60] sm:$0xff]  }
 0x330   : > { %v3685_v3 = vpop.eup %3684  ;;  %v1005_v12 = vpop.xlane.xlu1 %1004 }
 0x331   : > { %v990_v1 = vpop.xlane.xlu0 %989  ;;  %1275 = vmatprep.mubr.bf16.mxu1 %v1134_v20  ;;  %v1086_v57 = vmul.f32 %v3685_v3, %v4744_v5  ;;  %v3687_v22 = vpop.eup %3686  ;;  %v1085_v47 = vmul.f32 %v3685_v3, %v4741_v40  ;;  %2306 = vrot.lane.b32.xlu1 %v4850_v15, %s3945_s17 }
 0x332   : > { %1276 = vmatmul.mubr.bf16.gmra.mrb[20].mxu1 %v1133_v43  ;;  %v1088_v44 = vmul.f32 %v3687_v22, %v4714_v13  ;;  %3694 = vrcp.f32 %v990_v1  ;;  %v1087_v38 = vmul.f32 %v3687_v22, %v4710_v55 }
 0x333   : > { %v1136_v59 = vpack.c.bf16 %v1086_v57, %v1084_v52  ;;  %v1135_v5 = vpack.c.bf16 %v1085_v47, %v1083_v14  ;;  %3696 = vrcp.f32 %v987_v33  ;;  %2300 = vrot.lane.b32.xlu0 %v4909_v30, %s3945_s17 }
 0x334   : > { %v3689_v56 = vpop.eup %3688 }
 0x335   : > { %v996_v32 = vpop.xlane.xlu0 %995  ;;  %1283 = vmatprep.mubr.bf16.mxu1 %v1136_v59  ;;  %v1090_v34 = vmul.f32 %v3689_v56, %v4760_v24  ;;  %v1089_v40 = vmul.f32 %v3689_v56, %v4758_v58 }
 0x336   : > { %3698 = vrcp.f32 %v996_v32 }
 0x337   : > { %v1138_v31 = vpack.c.bf16 %v1090_v34, %v1088_v44  ;;  %v1137_v21 = vpack.c.bf16 %v1089_v40, %v1087_v38  ;;  %3700 = vrcp.f32 %v993_v53  ;;  %v6166_v34 = vld [vmem:[#allocation7_spill] sm:$0xff]  ;;  %v6167_v44 = vld [vmem:[#allocation25_spill] sm:$0xff]  ;;  %v6171_v40 = vld [vmem:[#allocation2_spill] sm:$0xff]  ;;  %2318 = vrot.lane.b32.xlu0 %v3930_v19, %s3945_s17 }
 0x338   : > { %v3691_v41 = vpop.eup %3690  ;;  %v1011_v35 = vpop.xlane.xlu1 %1010 }
 0x339   : > { %v1002_v54 = vpop.xlane.xlu0 %1001  ;;  %v3693_v37 = vpop.eup %3692  ;;  %v1094_v24 = vmul.f32 %v3691_v41, %v4780_v18  ;;  %v1093_v18 = vmul.f32 %v3691_v41, %v4776_v7 }
 0x33a   : > { %1284 = vmatmul.mubr.bf16.gmra.mrb[24].mxu1 %v1135_v5  ;;  %v1092_v13 = vmul.f32 %v3693_v37, %v4727_v42  ;;  %v1091_v43 = vmul.f32 %v3693_v37, %v4722_v9  ;;  %3702 = vrcp.f32 %v1002_v54  ;;  %v6168_v54 = vld [vmem:[#allocation3_spill] sm:$0xff] }
 0x33b   : > { %1291 = vmatprep.mubr.bf16.mxu1 %v1138_v31  ;;  %3704 = vrcp.f32 %v999_v25  ;;  %v6170_v37 = vld [vmem:[#allocation11_spill] sm:$0xff]  ;;  %2302 = vrot.lane.b32.xlu0 %v4941_v23, %s3945_s17 }
 0x33c   : > { %v1140_v6 = vpack.c.bf16 %v1094_v24, %v1092_v13  ;;  %v3695_v8 = vpop.eup %3694  ;;  %v1139_v1 = vpack.c.bf16 %v1093_v18, %v1091_v43  ;;  %v6172_v24 = vld [vmem:[#allocation5_spill] sm:$0xff]  ;;  %v6175_v18 = vld [vmem:[#allocation4_spill] sm:$0xff] }
 0x33d   : > { %v1008_v46 = vpop.xlane.xlu0 %1007  ;;  %v3697_v20 = vpop.eup %3696  ;;  %v1098_v55 = vmul.f32 %v3695_v8, %v4786_v17  ;;  %v1097_v7 = vmul.f32 %v3695_v8, %v4783_v39  ;;  %v6176_v43 = vld [vmem:[#allocation9_spill] sm:$0xff] }
 0x33e   : > { %v1096_v42 = vmul.f32 %v3697_v20, %v4738_v51  ;;  %v1095_v9 = vmul.f32 %v3697_v20, %v4734_v50  ;;  %3706 = vrcp.f32 %v1008_v46 }
 0x33f   : > { %3708 = vrcp.f32 %v1005_v12  ;;  %v6169_v12 = vld [vmem:[#allocation6_spill] sm:$0xff]  ;;  %2304 = vrot.lane.b32.xlu0 %v4918_v0, %s3945_s17 }
 0x340   : > { %v1017_v11 = vpop.xlane.xlu1 %1016  ;;  %v1142_v52 = vpack.c.bf16 %v1098_v55, %v1096_v42  ;;  %v3699_v57 = vpop.eup %3698  ;;  %v1141_v59 = vpack.c.bf16 %v1097_v7, %v1095_v9  ;;  %v6179_v7 = vld [vmem:[#allocation8_spill] sm:$0xff]  ;;  %v6180_v9 = vld [vmem:[#allocation27_spill] sm:$0xff] }
 0x341   : > { %v1014_v28 = vpop.xlane.xlu0 %1013  ;;  %v3701_v22 = vpop.eup %3700  ;;  %v1102_v17 = vmul.f32 %v3699_v57, %v4800_v49  ;;  %v1101_v47 = vmul.f32 %v3699_v57, %v4794_v62 }
 0x342   : > { %1292 = vmatmul.mubr.bf16.gmra.mrb[28].mxu1 %v1137_v21  ;;  %v1100_v51 = vmul.f32 %v3701_v22, %v4754_v29  ;;  %v1099_v39 = vmul.f32 %v3701_v22, %v6167_v44  ;;  %3710 = vrcp.f32 %v1014_v28 }
 0x343   : > { %1299 = vmatprep.mubr.bf16.mxu1 %v1140_v6  ;;  %3712 = vrcp.f32 %v1011_v35  ;;  %v6173_v35 = vld [vmem:[#allocation10_spill] sm:$0xff]  ;;  %2322 = vrot.lane.b32.xlu0 %v4845_v45, %s3945_s17 }
 0x344   : > { %v1490_v33 = vpop.permute.xlu1 %1489  ;;  %v1144_v56 = vpack.c.bf16 %v1102_v17, %v1100_v51  ;;  %v3703_v32 = vpop.eup %3702  ;;  %v1143_v50 = vpack.c.bf16 %v1101_v47, %v1099_v39 }
 0x345   : > { %3418 = vmatprep.subr.msk.bf16.mxu1 %vm353_vm0, %v1490_v33  ;;  %v1020_v58 = vpop.xlane.xlu0 %1019  ;;  %v3705_v25 = vpop.eup %3704  ;;  %v1106_v14 = vmul.f32 %v3703_v32, %v6166_v34  ;;  %v1105_v41 = vmul.f32 %v3703_v32, %v6169_v12  ;;  %v6174_v33 = vld [vmem:[#allocation13_spill] sm:$0xff]  ;;  %v6182_v34 = vld [vmem:[#allocation26_spill] sm:$0xff] }
 0x346   : > { %v1104_v49 = vmul.f32 %v3705_v25, %v6168_v54  ;;  %v1103_v62 = vmul.f32 %v3705_v25, %v6171_v40  ;;  %3714 = vrcp.f32 %v1020_v58  ;;  %v6181_v25 = vld [vmem:[#allocation28_spill] sm:$0xff] }
 0x347   : > { %3716 = vrcp.f32 %v1017_v11  ;;  %v6178_v11 = vld [vmem:[#allocation29_spill] sm:$0xff] }
 0x348   : > { %v1146_v5 = vpack.c.bf16 %v1106_v14, %v1104_v49  ;;  %v3707_v29 = vpop.eup %3706  ;;  %v1145_v13 = vpack.c.bf16 %v1105_v41, %v1103_v62 }
 0x349   : > { %v1474_v3 = vpop.permute.xlu0 %1473  ;;  %v3709_v31 = vpop.eup %3708  ;;  %v1110_v46 = vmul.f32 %v3707_v29, %v6170_v37  ;;  %v1109_v8 = vmul.f32 %v3707_v29, %v6173_v35 }
 0x34a   : > { %v1560_v53 = vsel %vm353_vm0, %v1474_v3, 0  ;;  %1300 = vmatmul.mubr.bf16.gmra.mrb[32].mxu1 %v1139_v1  ;;  %v1108_v38 = vmul.f32 %v3709_v31, %v6172_v24  ;;  %v1107_v55 = vmul.f32 %v3709_v31, %v6175_v18 }
 0x34b   : > { %1307 = vmatprep.mubr.bf16.mxu1 %v1142_v52  ;;  %3241 = vmatpush3.bf16.xpose.msra.mxu1 %v1560_v53  ;;  %v6177_v52 = vld [vmem:[#allocation12_spill] sm:$0xff] }
 0x34c   : > { %v1148_v21 = vpack.c.bf16 %v1110_v46, %v1108_v38  ;;  %v3711_v6 = vpop.eup %3710  ;;  %v1147_v3 = vpack.c.bf16 %v1109_v8, %v1107_v55 }
 0x34d   : > { %v3713_v28 = vpop.eup %3712  ;;  %v1114_v20 = vmul.f32 %v3711_v6, %v6174_v33  ;;  %v1113_v57 = vmul.f32 %v3711_v6, %v6177_v52 }
 0x34e   : > { %v1112_v42 = vmul.f32 %v3713_v28, %v6176_v43  ;;  %v1111_v17 = vmul.f32 %v3713_v28, %v6179_v7 }
 0x350   : > { %v1150_v1 = vpack.c.bf16 %v1114_v20, %v1112_v42  ;;  %v3715_v53 = vpop.eup %3714 }
 0x351   : > { %v3717_v58 = vpop.eup %3716  ;;  %v1118_v22 = vmul.f32 %v3715_v53, %v6178_v11  ;;  %v1117_v47 = vmul.f32 %v3715_v53, %v6181_v25 }
 0x352   : > { %1308 = vmatmul.mubr.bf16.gmra.mrb[36].mxu1 %v1141_v59  ;;  %v1116_v51 = vmul.f32 %v3717_v58, %v6180_v9  ;;  %v1149_v59 = vpack.c.bf16 %v1113_v57, %v1111_v17  ;;  %v1115_v14 = vmul.f32 %v3717_v58, %v6182_v34 }
 0x353   : > { %1315 = vmatprep.mubr.bf16.mxu1 %v1144_v56 }
 0x354   : > { %v1152_v56 = vpack.c.bf16 %v1118_v22, %v1116_v51  ;;  %v1151_v44 = vpack.c.bf16 %v1117_v47, %v1115_v14 }
 0x35a   : > { %1316 = vmatmul.mubr.bf16.gmra.mrb[40].mxu1 %v1143_v50 }
 0x35b   : > { %1323 = vmatprep.mubr.bf16.mxu1 %v1146_v5 }
 0x362   : > { %1324 = vmatmul.mubr.bf16.gmra.mrb[44].mxu1 %v1145_v13 }
 0x363   : > { %1331 = vmatprep.mubr.bf16.mxu1 %v1148_v21 }
 0x36a   : > { %1332 = vmatmul.mubr.bf16.gmra.mrb[48].mxu1 %v1147_v3 }
 0x36b   : > { %1339 = vmatprep.mubr.bf16.mxu1 %v1150_v1 }
 0x372   : > { %1340 = vmatmul.mubr.bf16.gmra.mrb[52].mxu1 %v1149_v59 }
 0x373   : > { %1347 = vmatprep.mubr.bf16.mxu1 %v1152_v56 }
 0x375   : > { %v1023_v32 = vpop.xlane.xlu1 %1022 }
 0x376   : > { %3718 = vrcp.f32 %v1023_v32 }
 0x379   : > { %v1492_v39 = vpop.permute.xlu1 %1491 }
 0x37a   : > { %v1026_v54 = vpop.xlane.xlu0 %1025  ;;  %3419 = vmatprep.subr.msk.bf16.mxu1 %vm353_vm0, %v1492_v39  ;;  %1348 = vmatmul.mubr.bf16.gmra.mrb[56].mxu1 %v1151_v44 }
 0x37b   : > { %3720 = vrcp.f32 %v1026_v54 }
 0x37d   : > { %v1432_v24 = vpop.permute.xlu1 %1431 }
 0x37e   : > { %v1476_v49 = vpop.permute.xlu0 %1475 }
 0x37f   : > { %v1563_v50 = vsel %vm353_vm0, %v1476_v49, 0 }
 0x380   : > { %3243 = vmatpush3.bf16.xpose.msra.mxu1 %v1563_v50  ;;  %v3719_v5 = vpop.eup %3718 }
 0x381   : > { %v1120_v31 = vmul.f32 %v3719_v5, %v4864_v63  ;;  %v1119_v41 = vmul.f32 %v3719_v5, %v4862_v26  ;;  %v1436_v26 = vpop.permute.xlu1 %1435 }
 0x382   : > { %v1430_v62 = vpop.permute.xlu0 %1429 }
 0x385   : > { %v3721_v29 = vpop.eup %3720 }
 0x386   : > { %v1122_v12 = vmul.f32 %v3721_v29, %v4874_v2  ;;  %v1121_v37 = vmul.f32 %v3721_v29, %v4868_v4  ;;  %v1434_v38 = vpop.permute.xlu0 %1433  ;;  %v1440_v4 = vpop.permute.xlu1 %1439 }
 0x388   : > { %v1154_v46 = vpack.c.bf16 %v1122_v12, %v1120_v31  ;;  %v1153_v40 = vpack.c.bf16 %v1121_v37, %v1119_v41 }
 0x38a   : > { %1355 = vmatprep.mubr.bf16.mxu1 %v1154_v46  ;;  %v1438_v63 = vpop.permute.xlu0 %1437  ;;  %v1444_v36 = vpop.permute.xlu1 %1443 }
 0x38b   : > { %1356 = vmatmul.mubr.bf16.gmra.mrb[60].mxu1 %v1153_v40 }
 0x38c   : > { %3244 = vmatprep.mubr.msk.bf16.mxu1 %vm353_vm0, %v1430_v62 }
 0x38e   : > { %v1442_v28 = vpop.permute.xlu0 %1441  ;;  %v1448_v23 = vpop.permute.xlu1 %1447 }
 0x392   : > { %v1446_v60 = vpop.permute.xlu0 %1445  ;;  %v1452_v57 = vpop.permute.xlu1 %1451 }
 0x393   : > { %3245 = vmatmul.mubr.msk.bf16.vlgmr.msra.gmra.mrb[64].mxu1 %vm353_vm0, %v1430_v62 }
 0x394   : > { %3246 = vmatprep.mubr.msk.bf16.mxu1 %vm353_vm0, %v1432_v24 }
 0x396   : > { %v1450_v52 = vpop.permute.xlu0 %1449  ;;  %v1456_v22 = vpop.permute.xlu1 %1455 }
 0x39a   : > { %v1454_v45 = vpop.permute.xlu0 %1453  ;;  %v1460_v32 = vpop.permute.xlu1 %1459 }
 0x39b   : > { %3247 = vmatmul.mubr.msk.bf16.gmra.mrb[68].mxu1 %vm353_vm0, %v1432_v24 }
 0x39c   : > { %3248 = vmatprep.mubr.msk.bf16.mxu1 %vm353_vm0, %v1434_v38 }
 0x39e   : > { %v1458_v56 = vpop.permute.xlu0 %1457 }
 0x3a3   : > { %3249 = vmatmul.mubr.msk.bf16.gmra.mrb[72].mxu1 %vm353_vm0, %v1434_v38 }
 0x3a4   : > { %3250 = vmatprep.mubr.msk.bf16.mxu1 %vm353_vm0, %v1436_v26 }
 0x3ab   : > { %3251 = vmatmul.mubr.msk.bf16.gmra.mrb[76].mxu1 %vm353_vm0, %v1436_v26 }
 0x3ac   : > { %3252 = vmatprep.mubr.msk.bf16.mxu1 %vm353_vm0, %v1438_v63 }
 0x3b3   : > { %3253 = vmatmul.mubr.msk.bf16.gmra.mrb[80].mxu1 %vm353_vm0, %v1438_v63 }
 0x3b4   : > { %3254 = vmatprep.mubr.msk.bf16.mxu1 %vm353_vm0, %v1440_v4 }
 0x3b7   : > { %v3132_v2 = vpop.f32.mrb[0].mxu1 }
 0x3b8   : > { %v3133_v13 = vpop.f32.mrb[1].mxu1 }
 0x3b9   : > { %v5043_v21 = vadd.f32 %v3133_v13, %v3132_v2  ;;  %v3135_v6 = vpop.f32.mrb[2].mxu1 }
 0x3ba   : > { %v3136_v35 = vpop.f32.mrb[3].mxu1 }
 0x3bb   : > { %6183 = vst [vmem:[#allocation15_spill] sm:$0xff] %v5043_v21  ;;  %v5045_v61 = vadd.f32 %v3136_v35, %v3135_v6  ;;  %3255 = vmatmul.mubr.msk.bf16.gmra.mrb[84].mxu1 %vm353_vm0, %v1440_v4 }
 0x3bc   : > { %3256 = vmatprep.mubr.msk.bf16.mxu1 %vm353_vm0, %v1442_v28 }
 0x3bd   : > { %6184 = vst [vmem:[#allocation16_spill] sm:$0xff] %v5045_v61 }
 0x3c1   : > { %v3138_v27 = vpop.f32.mrb[4].mxu1 }
 0x3c2   : > { %v3139_v48 = vpop.f32.mrb[5].mxu1 }
 0x3c3   : > { %v5057_v8 = vadd.f32 %v3139_v48, %v3138_v27  ;;  %v3141_v33 = vpop.f32.mrb[6].mxu1  ;;  %3257 = vmatmul.mubr.msk.bf16.gmra.mrb[88].mxu1 %vm353_vm0, %v1442_v28  ;;  %v2311_v48 = vpop.permute.xlu1 %2310 }
 0x3c4   : > { %v3142_v20 = vpop.f32.mrb[7].mxu1  ;;  %3258 = vmatprep.mubr.msk.bf16.mxu1 %vm353_vm0, %v1444_v36  ;;  %3276 = vmatprep.subr.bf16.mxu0 %v2311_v48 }
 0x3c5   : > { %6185 = vst [vmem:[#allocation17_spill] sm:$0xff] %v5057_v8  ;;  %v5065_v30 = vadd.f32 %v3142_v20, %v3141_v33  ;;  %3388 = vmatprep.subr.bf16.mxu1 %v2311_v48  ;;  %v2295_v33 = vpop.permute.xlu0 %2294 }
 0x3c6   : > { %3277 = vmatpush3.bf16.msra.mxu0 %v2295_v33  ;;  %3396 = vmatpush3.bf16.msra.mxu1 %v2295_v33 }
 0x3c7   : > { %6186 = vst [vmem:[#allocation14_spill] sm:$0xff] %v5065_v30  ;;  %v2313_v20 = vpop.permute.xlu1 %2312 }
 0x3c8   : > { %3278 = vmatprep.subr.bf16.mxu0 %v2313_v20  ;;  %3389 = vmatprep.subr.bf16.mxu1 %v2313_v20 }
 0x3c9   : > { %v3144_v10 = vpop.f32.mrb[8].mxu1 }
 0x3ca   : > { %v3145_v18 = vpop.f32.mrb[9].mxu1 }
 0x3cb   : > { %v5071_v55 = vadd.f32 %v3145_v18, %v3144_v10  ;;  %v3147_v43 = vpop.f32.mrb[10].mxu1  ;;  %3259 = vmatmul.mubr.msk.bf16.gmra.mrb[92].mxu1 %vm353_vm0, %v1444_v36 }
 0x3cc   : > { %v3148_v16 = vpop.f32.mrb[11].mxu1  ;;  %3260 = vmatprep.mubr.msk.bf16.mxu1 %vm353_vm0, %v1446_v60 }
 0x3cd   : > { %6187 = vst [vmem:[#allocation19_spill] sm:$0xff] %v5071_v55  ;;  %v5077_v42 = vadd.f32 %v3148_v16, %v3147_v43 }
 0x3cf   : > { %6188 = vst [vmem:[#allocation18_spill] sm:$0xff] %v5077_v42 }
 0x3d1   : > { %v3150_v15 = vpop.f32.mrb[12].mxu1 }
 0x3d2   : > { %v3151_v3 = vpop.f32.mrb[13].mxu1 }
 0x3d3   : > { %v5081_v1 = vadd.f32 %v3151_v3, %v3150_v15  ;;  %v3153_v53 = vpop.f32.mrb[14].mxu1  ;;  %3261 = vmatmul.mubr.msk.bf16.gmra.mrb[96].mxu1 %vm353_vm0, %v1446_v60  ;;  %v2297_v60 = vpop.permute.xlu0 %2296 }
 0x3d4   : > { %v3154_v58 = vpop.f32.mrb[15].mxu1  ;;  %3262 = vmatprep.mubr.msk.bf16.mxu1 %vm353_vm0, %v1448_v23  ;;  %3279 = vmatpush3.bf16.msra.mxu0 %v2297_v60 }
 0x3d5   : > { %6189 = vst [vmem:[#allocation21_spill] sm:$0xff] %v5081_v1  ;;  %v5085_v0 = vadd.f32 %v3154_v58, %v3153_v53  ;;  %3397 = vmatpush3.bf16.msra.mxu1 %v2297_v60 }
 0x3d7   : > { %6190 = vst [vmem:[#allocation20_spill] sm:$0xff] %v5085_v0  ;;  %v2299_v3 = vpop.permute.xlu0 %2298 }
 0x3db   : > { %3263 = vmatmul.mubr.msk.bf16.gmra.mrb[100].mxu1 %vm353_vm0, %v1448_v23  ;;  %v2315_v23 = vpop.permute.xlu1 %2314 }
 0x3dc   : > { %3264 = vmatprep.mubr.msk.bf16.mxu1 %vm353_vm0, %v1450_v52  ;;  %3280 = vmatprep.subr.bf16.mxu0 %v2315_v23 }
 0x3dd   : > { %3390 = vmatprep.subr.bf16.mxu1 %v2315_v23  ;;  %3281 = vmatpush3.bf16.msra.mxu0 %v2299_v3 }
 0x3de   : > { %3398 = vmatpush3.bf16.msra.mxu1 %v2299_v3  ;;  %v2922_v3 = vld [vmem:[%s6041_s1 + $0x210] sm:$0xff] }
 0x3df   : > { %v2317_v58 = vpop.permute.xlu1 %2316 }
 0x3e0   : > { %3282 = vmatprep.subr.bf16.mxu0 %v2317_v58  ;;  %3391 = vmatprep.subr.bf16.mxu1 %v2317_v58 }
 0x3e3   : > { %3265 = vmatmul.mubr.msk.bf16.gmra.mrb[104].mxu1 %vm353_vm0, %v1450_v52 }
 0x3e4   : > { %3266 = vmatprep.mubr.msk.bf16.mxu1 %vm353_vm0, %v1452_v57 }
 0x3eb   : > { %3267 = vmatmul.mubr.msk.bf16.gmra.mrb[108].mxu1 %vm353_vm0, %v1452_v57  ;;  %v2301_v57 = vpop.permute.xlu0 %2300 }
 0x3ec   : > { %3268 = vmatprep.mubr.msk.bf16.mxu1 %vm353_vm0, %v1454_v45  ;;  %3283 = vmatpush3.bf16.msra.mxu0 %v2301_v57 }
 0x3ed   : > { %3399 = vmatpush3.bf16.msra.mxu1 %v2301_v57 }
 0x3f1   : > { %v3156_v11 = vpop.f32.mrb[16].mxu1 }
 0x3f2   : > { %v3157_v7 = vpop.f32.mrb[17].mxu1 }
 0x3f3   : > { %v5093_v17 = vadd.f32 %v3157_v7, %v3156_v11  ;;  %v3159_v9 = vpop.f32.mrb[18].mxu1  ;;  %3269 = vmatmul.mubr.msk.bf16.gmra.mrb[112].mxu1 %vm353_vm0, %v1454_v45 }
 0x3f4   : > { %v3160_v51 = vpop.f32.mrb[19].mxu1  ;;  %3270 = vmatprep.mubr.msk.bf16.mxu1 %vm353_vm0, %v1456_v22 }
 0x3f5   : > { %6191 = vst [vmem:[#allocation23_spill] sm:$0xff] %v5093_v17  ;;  %v5097_v59 = vadd.f32 %v3160_v51, %v3159_v9  ;;  %v2319_v9 = vpop.permute.xlu0 %2318 }
 0x3f6   : > { %3284 = vmatprep.subr.bf16.mxu0 %v2319_v9  ;;  %3392 = vmatprep.subr.bf16.mxu1 %v2319_v9 }
 0x3f7   : > { %6192 = vst [vmem:[#allocation22_spill] sm:$0xff] %v5097_v59 }
 0x3fb   : > { %3271 = vmatmul.mubr.msk.bf16.gmra.mrb[116].mxu1 %vm353_vm0, %v1456_v22 }
 0x3fc   : > { %3272 = vmatprep.mubr.msk.bf16.mxu1 %vm353_vm0, %v1458_v56 }
 0x403   : > { %3273 = vmatmul.mubr.msk.bf16.gmra.mrb[120].mxu1 %vm353_vm0, %v1458_v56 }
 0x404   : > { %3274 = vmatprep.mubr.msk.bf16.mxu1 %vm353_vm0, %v1460_v32 }
 0x405   : > { %v3162_v25 = vpop.f32.mrb[20].mxu1 }
 0x406   : > { %v3163_v47 = vpop.f32.mrb[21].mxu1 }
 0x407   : > { %v5103_v34 = vadd.f32 %v3163_v47, %v3162_v25  ;;  %v3165_v14 = vpop.f32.mrb[22].mxu1 }
 0x408   : > { %v3166_v44 = vpop.f32.mrb[23].mxu1 }
 0x409   : > { %6193 = vst [vmem:[#allocation24_spill] sm:$0xff] %v5103_v34  ;;  %v5105_v39 = vadd.f32 %v3166_v44, %v3165_v14 }
 0x40b   : > { %6194 = vst [vmem:[#allocation7_spill] sm:$0xff] %v5105_v39  ;;  %3275 = vmatmul.mubr.msk.bf16.gmra.mrb[124].mxu1 %vm353_vm0, %v1460_v32  ;;  %v2303_v32 = vpop.permute.xlu0 %2302 }
 0x40c   : > { %3285 = vmatpush3.bf16.msra.mxu0 %v2303_v32  ;;  %3400 = vmatpush3.bf16.msra.mxu1 %v2303_v32 }
 0x40d   : > { %v3168_v54 = vpop.f32.mrb[24].mxu1 }
 0x40e   : > { %v3169_v49 = vpop.f32.mrb[25].mxu1 }
 0x40f   : > { %v5108_v50 = vadd.f32 %v3169_v49, %v3168_v54  ;;  %v3171_v5 = vpop.f32.mrb[26].mxu1  ;;  %v2321_v54 = vpop.permute.xlu1 %2320 }
 0x410   : > { %v3172_v29 = vpop.f32.mrb[27].mxu1  ;;  %3286 = vmatprep.subr.bf16.mxu0 %v2321_v54  ;;  %3393 = vmatprep.subr.bf16.mxu1 %v2321_v54  ;;  %v2305_v49 = vpop.permute.xlu0 %2304 }
 0x411   : > { %6195 = vst [vmem:[#allocation25_spill] sm:$0xff] %v5108_v50  ;;  %v5110_v31 = vadd.f32 %v3172_v29, %v3171_v5  ;;  %3287 = vmatpush3.bf16.msra.mxu0 %v2305_v49  ;;  %3401 = vmatpush3.bf16.msra.mxu1 %v2305_v49 }
 0x413   : > { %6196 = vst [vmem:[#allocation3_spill] sm:$0xff] %v5110_v31 }
 0x415   : > { %v3174_v12 = vpop.f32.mrb[28].mxu1 }
 0x416   : > { %v3175_v41 = vpop.f32.mrb[29].mxu1 }
 0x417   : > { %v5112_v37 = vadd.f32 %v3175_v41, %v3174_v12  ;;  %v3177_v46 = vpop.f32.mrb[30].mxu1  ;;  %v2323_v12 = vpop.permute.xlu0 %2322 }
 0x418   : > { %v3178_v40 = vpop.f32.mrb[31].mxu1  ;;  %3288 = vmatprep.subr.bf16.mxu0 %v2323_v12  ;;  %3394 = vmatprep.subr.bf16.mxu1 %v2323_v12  ;;  %v2927_v12 = vld [vmem:[%s6041_s1 + $0x238] sm:$0xff] }
 0x419   : > { %6197 = vst [vmem:[#allocation6_spill] sm:$0xff] %v5112_v37  ;;  %v5114_v62 = vadd.f32 %v3178_v40, %v3177_v46 }
 0x41b   : > { %6198 = vst [vmem:[#allocation11_spill] sm:$0xff] %v5114_v62 }
 0x41d   : > { %v3180_v24 = vpop.f32.mrb[32].mxu1 }
 0x41e   : > { %v3181_v38 = vpop.f32.mrb[33].mxu1 }
 0x41f   : > { %v5116_v26 = vadd.f32 %v3181_v38, %v3180_v24  ;;  %v3183_v63 = vpop.f32.mrb[34].mxu1  ;;  %v2307_v38 = vpop.permute.xlu1 %2306 }
 0x420   : > { %v3184_v4 = vpop.f32.mrb[35].mxu1  ;;  %3289 = vmatpush3.bf16.msra.mxu0 %v2307_v38  ;;  %3402 = vmatpush3.bf16.msra.mxu1 %v2307_v38 }
 0x421   : > { %6199 = vst [vmem:[#allocation2_spill] sm:$0xff] %v5116_v26  ;;  %v5118_v2 = vadd.f32 %v3184_v4, %v3183_v63 }
 0x423   : > { %6200 = vst [vmem:[#allocation5_spill] sm:$0xff] %v5118_v2 }
 0x425   : > { %v3186_v13 = vpop.f32.mrb[36].mxu1 }
 0x426   : > { %v3187_v6 = vpop.f32.mrb[37].mxu1 }
 0x427   : > { %v5120_v28 = vadd.f32 %v3187_v6, %v3186_v13  ;;  %v3189_v35 = vpop.f32.mrb[38].mxu1 }
 0x428   : > { %v3190_v27 = vpop.f32.mrb[39].mxu1 }
 0x429   : > { %6201 = vst [vmem:[#allocation10_spill] sm:$0xff] %v5120_v28  ;;  %v5122_v36 = vadd.f32 %v3190_v27, %v3189_v35 }
 0x42b   : > { %6202 = vst [vmem:[#allocation13_spill] sm:$0xff] %v5122_v36 }
 0x42d   : > { %v3192_v19 = vpop.f32.mrb[40].mxu1 }
 0x42e   : > { %v3193_v10 = vpop.f32.mrb[41].mxu1 }
 0x42f   : > { %v5124_v18 = vadd.f32 %v3193_v10, %v3192_v19  ;;  %v3195_v43 = vpop.f32.mrb[42].mxu1 }
 0x430   : > { %v3196_v16 = vpop.f32.mrb[43].mxu1 }
 0x431   : > { %6203 = vst [vmem:[#allocation4_spill] sm:$0xff] %v5124_v18  ;;  %v5126_v15 = vadd.f32 %v3196_v16, %v3195_v43  ;;  %v2920_v43 = vld [vmem:[%s6041_s1 + $0x200] sm:$0xff]  ;;  %v2921_v16 = vld [vmem:[%s6041_s1 + $0x208] sm:$0xff] }
 0x433   : > { %6204 = vst [vmem:[#allocation9_spill] sm:$0xff] %v5126_v15 }
 0x435   : > { %v3198_v53 = vpop.f32.mrb[44].mxu1 }
 0x436   : > { %v3199_v52 = vpop.f32.mrb[45].mxu1 }
 0x437   : > { %v5128_v45 = vadd.f32 %v3199_v52, %v3198_v53  ;;  %v3201_v11 = vpop.f32.mrb[46].mxu1  ;;  %v2923_v52 = vld [vmem:[%s6041_s1 + $0x218] sm:$0xff] }
 0x438   : > { %v3202_v22 = vpop.f32.mrb[47].mxu1 }
 0x439   : > { %6205 = vst [vmem:[#allocation12_spill] sm:$0xff] %v5128_v45  ;;  %v5130_v7 = vadd.f32 %v3202_v22, %v3201_v11 }
 0x43b   : > { %6206 = vst [vmem:[#allocation29_spill] sm:$0xff] %v5130_v7 }
 0x43d   : > { %v3204_v51 = vpop.f32.mrb[48].mxu1 }
 0x43e   : > { %v3205_v56 = vpop.f32.mrb[49].mxu1 }
 0x43f   : > { %v5132_v25 = vadd.f32 %v3205_v56, %v3204_v51  ;;  %v3207_v47 = vpop.f32.mrb[50].mxu1 }
 0x440   : > { %v3208_v14 = vpop.f32.mrb[51].mxu1 }
 0x441   : > { %6207 = vst [vmem:[#allocation8_spill] sm:$0xff] %v5132_v25  ;;  %v5134_v44 = vadd.f32 %v3208_v14, %v3207_v47  ;;  %v2924_v47 = vld [vmem:[%s6041_s1 + $0x220] sm:$0xff]  ;;  %v2925_v14 = vld [vmem:[%s6041_s1 + $0x228] sm:$0xff] }
 0x443   : > { %6208 = vst [vmem:[#allocation27_spill] sm:$0xff] %v5134_v44 }
 0x445   : > { %v3210_v5 = vpop.f32.mrb[52].mxu1 }
 0x446   : > { %v3211_v29 = vpop.f32.mrb[53].mxu1 }
 0x447   : > { %v5136_v41 = vadd.f32 %v3211_v29, %v3210_v5  ;;  %v3213_v46 = vpop.f32.mrb[54].mxu1  ;;  %v2926_v29 = vld [vmem:[%s6041_s1 + $0x230] sm:$0xff] }
 0x448   : > { %v3214_v40 = vpop.f32.mrb[55].mxu1 }
 0x449   : > { %6209 = vst [vmem:[#allocation28_spill] sm:$0xff] %v5136_v41  ;;  %v5138_v24 = vadd.f32 %v3214_v40, %v3213_v46 }
 0x44b   : > { %6210 = vst [vmem:[#allocation26_spill] sm:$0xff] %v5138_v24 }
 0x44d   : > { %v3216_v63 = vpop.f32.mrb[56].mxu1 }
 0x44e   : > { %v3217_v4 = vpop.f32.mrb[57].mxu1 }
 0x44f   : > { %v5140_v13 = vadd.f32 %v3217_v4, %v3216_v63  ;;  %v3219_v6 = vpop.f32.mrb[58].mxu1 }
 0x450   : > { %v3220_v35 = vpop.f32.mrb[59].mxu1 }
 0x451   : > { %6211 = vst [vmem:[#allocation30_spill] sm:$0xff] %v5140_v13  ;;  %v5142_v27 = vadd.f32 %v3220_v35, %v3219_v6  ;;  %v2928_v35 = vld [vmem:[%s6041_s1 + $0x240] sm:$0xff] }
 0x453   : > { %6212 = vst [vmem:[#allocation31_spill] sm:$0xff] %v5142_v27 }
 0x45e   : > { %v3222_v48 = vpop.f32.mrb[60].mxu1 }
 0x45f   : > { %v3223_v33 = vpop.f32.mrb[61].mxu1 }
 0x460   : > { %v5144_v19 = vadd.f32 %v3223_v33, %v3222_v48  ;;  %v3225_v20 = vpop.f32.mrb[62].mxu1  ;;  %v2929_v48 = vld [vmem:[%s6041_s1 + $0x248] sm:$0xff] }
 0x461   : > { %v3226_v10 = vpop.f32.mrb[63].mxu1 }
 0x462   : > { %6213 = vst [vmem:[#allocation32_spill] sm:$0xff] %v5144_v19  ;;  %v5146_v60 = vadd.f32 %v3226_v10, %v3225_v20  ;;  %v2930_v10 = vld [vmem:[%s6041_s1 + $0x250] sm:$0xff] }
 0x464   : > { %6214 = vst [vmem:[#allocation33_spill] sm:$0xff] %v5146_v60 }
 0x466   : > { %v1623_v23 = vpop.f32.mrb[64].mxu1 }
 0x467   : > { %v5157_v53 = vadd.f32 %v2920_v43, %v1623_v23  ;;  %v1625_v58 = vpop.f32.mrb[65].mxu1  ;;  %v2931_v23 = vld [vmem:[%s6041_s1 + $0x258] sm:$0xff] }
 0x468   : > { %v5162_v57 = vadd.f32 %v2921_v16, %v1625_v58  ;;  %v1627_v11 = vpop.f32.mrb[66].mxu1 }
 0x469   : > { %v5164_v22 = vadd.f32 %v2922_v3, %v1627_v11  ;;  %v1629_v9 = vpop.f32.mrb[67].mxu1 }
 0x46a   : > { %v1782_v51 = vmax.f32 %v5157_v53, %v5162_v57  ;;  %v5168_v56 = vadd.f32 %v2923_v52, %v1629_v9 }
 0x46c   : > { %v1785_v32 = vmax.f32 %v5164_v22, %v5168_v56  ;;  %1783 = vmax.xlane.f32.xlu0 %v1782_v51 }
 0x46e   : > { %v1633_v54 = vpop.f32.mrb[68].mxu1  ;;  %1786 = vmax.xlane.f32.xlu1 %v1785_v32 }
 0x46f   : > { %v5178_v49 = vadd.f32 %v2924_v47, %v1633_v54  ;;  %v1635_v5 = vpop.f32.mrb[69].mxu1  ;;  %v2932_v47 = vld [vmem:[%s6041_s1 + $0x260] sm:$0xff] }
 0x470   : > { %v5186_v46 = vadd.f32 %v2925_v14, %v1635_v5  ;;  %v1637_v40 = vpop.f32.mrb[70].mxu1  ;;  %v2933_v14 = vld [vmem:[%s6041_s1 + $0x268] sm:$0xff]  ;;  %v2934_v5 = vld [vmem:[%s6041_s1 + $0x270] sm:$0xff] }
 0x471   : > { %v1639_v38 = vpop.f32.mrb[71].mxu1  ;;  %v5190_v4 = vadd.f32 %v2926_v29, %v1637_v40  ;;  %v2935_v40 = vld [vmem:[%s6041_s1 + $0x278] sm:$0xff] }
 0x472   : > { %v1788_v63 = vmax.f32 %v5178_v49, %v5186_v46  ;;  %v5192_v6 = vadd.f32 %v2927_v12, %v1639_v38 }
 0x474   : > { %1789 = vmax.xlane.f32.xlu0 %v1788_v63  ;;  %v1791_v33 = vmax.f32 %v5190_v4, %v5192_v6 }
 0x476   : > { %v1643_v20 = vpop.f32.mrb[72].mxu1 }
 0x477   : > { %v5205_v43 = vadd.f32 %v2928_v35, %v1643_v20  ;;  %v1645_v16 = vpop.f32.mrb[73].mxu1 }
 0x478   : > { %v5210_v3 = vadd.f32 %v2929_v48, %v1645_v16  ;;  %1792 = vmax.xlane.f32.xlu0 %v1791_v33  ;;  %v1647_v58 = vpop.f32.mrb[74].mxu1  ;;  %v2936_v16 = vld [vmem:[%s6041_s1 + $0x280] sm:$0xff] }
 0x479   : > { %v5212_v52 = vadd.f32 %v2930_v10, %v1647_v58  ;;  %v1649_v11 = vpop.f32.mrb[75].mxu1 }
 0x47a   : > { %v1794_v9 = vmax.f32 %v5205_v43, %v5210_v3  ;;  %v5216_v51 = vadd.f32 %v2931_v23, %v1649_v11  ;;  %v2937_v23 = vld [vmem:[%s6041_s1 + $0x288] sm:$0xff]  ;;  %v2938_v11 = vld [vmem:[%s6041_s1 + $0x290] sm:$0xff] }
 0x47c   : > { %v1797_v32 = vmax.f32 %v5212_v52, %v5216_v51  ;;  %1795 = vmax.xlane.f32.xlu1 %v1794_v9 }
 0x47e   : > { %v1653_v54 = vpop.f32.mrb[76].mxu1  ;;  %1798 = vmax.xlane.f32.xlu0 %v1797_v32 }
 0x47f   : > { %v5229_v29 = vadd.f32 %v2932_v47, %v1653_v54  ;;  %v1655_v12 = vpop.f32.mrb[77].mxu1  ;;  %v2939_v47 = vld [vmem:[%s6041_s1 + $0x298] sm:$0xff] }
 0x480   : > { %v5234_v38 = vadd.f32 %v2933_v14, %v1655_v12  ;;  %v1657_v63 = vpop.f32.mrb[78].mxu1 }
 0x481   : > { %v5236_v35 = vadd.f32 %v2934_v5, %v1657_v63  ;;  %v1659_v48 = vpop.f32.mrb[79].mxu1 }
 0x482   : > { %v1800_v33 = vmax.f32 %v5229_v29, %v5234_v38  ;;  %v5240_v20 = vadd.f32 %v2935_v40, %v1659_v48 }
 0x484   : > { %v1803_v10 = vmax.f32 %v5236_v35, %v5240_v20  ;;  %1801 = vmax.xlane.f32.xlu1 %v1800_v33  ;;  %v2940_v33 = vld [vmem:[%s6041_s1 + $0x2a0] sm:$0xff] }
 0x486   : > { %1804 = vmax.xlane.f32.xlu0 %v1803_v10  ;;  %v1663_v58 = vpop.f32.mrb[80].mxu1  ;;  %v2941_v10 = vld [vmem:[%s6041_s1 + $0x2a8] sm:$0xff] }
 0x487   : > { %v5253_v9 = vadd.f32 %v2936_v16, %v1663_v58  ;;  %v1665_v32 = vpop.f32.mrb[81].mxu1 }
 0x488   : > { %v5258_v14 = vadd.f32 %v2937_v23, %v1665_v32  ;;  %v1667_v54 = vpop.f32.mrb[82].mxu1  ;;  %v2942_v23 = vld [vmem:[%s6041_s1 + $0x2b0] sm:$0xff]  ;;  %v2943_v32 = vld [vmem:[%s6041_s1 + $0x2b8] sm:$0xff] }
 0x489   : > { %v5260_v5 = vadd.f32 %v2938_v11, %v1667_v54  ;;  %v1669_v12 = vpop.f32.mrb[83].mxu1 }
 0x48a   : > { %v1806_v40 = vmax.f32 %v5253_v9, %v5258_v14  ;;  %v5264_v63 = vadd.f32 %v2939_v47, %v1669_v12 }
 0x48c   : > { %v1809_v48 = vmax.f32 %v5260_v5, %v5264_v63  ;;  %1807 = vmax.xlane.f32.xlu1 %v1806_v40 }
 0x48e   : > { %v1673_v16 = vpop.f32.mrb[84].mxu1  ;;  %1810 = vmax.xlane.f32.xlu0 %v1809_v48 }
 0x48f   : > { %v5277_v58 = vadd.f32 %v2940_v33, %v1673_v16  ;;  %v1675_v11 = vpop.f32.mrb[85].mxu1  ;;  %v2944_v16 = vld [vmem:[%s6041_s1 + $0x2c0] sm:$0xff] }
 0x490   : > { %v5282_v47 = vadd.f32 %v2941_v10, %v1675_v11  ;;  %v1677_v54 = vpop.f32.mrb[86].mxu1  ;;  %v2945_v10 = vld [vmem:[%s6041_s1 + $0x2c8] sm:$0xff]  ;;  %v2946_v11 = vld [vmem:[%s6041_s1 + $0x2d0] sm:$0xff] }
 0x491   : > { %v5284_v12 = vadd.f32 %v2942_v23, %v1677_v54  ;;  %v1679_v40 = vpop.f32.mrb[87].mxu1 }
 0x492   : > { %v1812_v48 = vmax.f32 %v5277_v58, %v5282_v47  ;;  %v5288_v19 = vadd.f32 %v2943_v32, %v1679_v40  ;;  %v2947_v40 = vld [vmem:[%s6041_s1 + $0x2d8] sm:$0xff] }
 0x494   : > { %v1815_v33 = vmax.f32 %v5284_v12, %v5288_v19  ;;  %1813 = vmax.xlane.f32.xlu1 %v1812_v48 }
 0x496   : > { %1816 = vmax.xlane.f32.xlu0 %v1815_v33  ;;  %v1683_v23 = vpop.f32.mrb[88].mxu1 }
 0x497   : > { %v5301_v32 = vadd.f32 %v2944_v16, %v1683_v23  ;;  %v1685_v54 = vpop.f32.mrb[89].mxu1  ;;  %v2948_v23 = vld [vmem:[%s6041_s1 + $0x2e0] sm:$0xff] }
 0x498   : > { %v5306_v48 = vadd.f32 %v2945_v10, %v1685_v54  ;;  %v1687_v60 = vpop.f32.mrb[90].mxu1  ;;  %v2949_v10 = vld [vmem:[%s6041_s1 + $0x2e8] sm:$0xff] }
 0x499   : > { %v5308_v41 = vadd.f32 %v2946_v11, %v1687_v60  ;;  %v1689_v24 = vpop.f32.mrb[91].mxu1  ;;  %v2950_v11 = vld [vmem:[%s6041_s1 + $0x2f0] sm:$0xff] }
 0x49a   : > { %v1818_v33 = vmax.f32 %v5301_v32, %v5306_v48  ;;  %v5312_v13 = vadd.f32 %v2947_v40, %v1689_v24  ;;  %v2951_v40 = vld [vmem:[%s6041_s1 + $0x2f8] sm:$0xff] }
 0x49c   : > { %v1821_v16 = vmax.f32 %v5308_v41, %v5312_v13  ;;  %1819 = vmax.xlane.f32.xlu1 %v1818_v33 }
 0x49e   : > { %v1693_v60 = vpop.f32.mrb[92].mxu1  ;;  %1822 = vmax.xlane.f32.xlu0 %v1821_v16 }
 0x49f   : > { %v5325_v24 = vadd.f32 %v2948_v23, %v1693_v60  ;;  %v1695_v54 = vpop.f32.mrb[93].mxu1  ;;  %v2952_v60 = vld [vmem:[%s6041_s1 + $0x300] sm:$0xff] }
 0x4a0   : > { %v5330_v33 = vadd.f32 %v2949_v10, %v1695_v54  ;;  %v1697_v27 = vpop.f32.mrb[94].mxu1  ;;  %v2953_v10 = vld [vmem:[%s6041_s1 + $0x308] sm:$0xff] }
 0x4a1   : > { %v5332_v25 = vadd.f32 %v2950_v11, %v1697_v27  ;;  %v1699_v44 = vpop.f32.mrb[95].mxu1  ;;  %v2954_v11 = vld [vmem:[%s6041_s1 + $0x310] sm:$0xff] }
 0x4a2   : > { %v1824_v16 = vmax.f32 %v5325_v24, %v5330_v33  ;;  %v5336_v45 = vadd.f32 %v2951_v40, %v1699_v44  ;;  %v2955_v40 = vld [vmem:[%s6041_s1 + $0x318] sm:$0xff] }
 0x4a4   : > { %v1827_v23 = vmax.f32 %v5332_v25, %v5336_v45  ;;  %1825 = vmax.xlane.f32.xlu1 %v1824_v16 }
 0x4a6   : > { %1828 = vmax.xlane.f32.xlu0 %v1827_v23  ;;  %v1703_v27 = vpop.f32.mrb[96].mxu1 }
 0x4a7   : > { %v5349_v44 = vadd.f32 %v2952_v60, %v1703_v27  ;;  %v1705_v54 = vpop.f32.mrb[97].mxu1  ;;  %v2956_v27 = vld [vmem:[%s6041_s1 + $0x320] sm:$0xff] }
 0x4a8   : > { %v5354_v16 = vadd.f32 %v2953_v10, %v1705_v54  ;;  %v1707_v7 = vpop.f32.mrb[98].mxu1  ;;  %v2957_v10 = vld [vmem:[%s6041_s1 + $0x328] sm:$0xff] }
 0x4a9   : > { %v5356_v18 = vadd.f32 %v2954_v11, %v1707_v7  ;;  %v1709_v15 = vpop.f32.mrb[99].mxu1  ;;  %v2958_v11 = vld [vmem:[%s6041_s1 + $0x330] sm:$0xff] }
 0x4aa   : > { %v1830_v23 = vmax.f32 %v5349_v44, %v5354_v16  ;;  %v5360_v28 = vadd.f32 %v2955_v40, %v1709_v15  ;;  %v2959_v40 = vld [vmem:[%s6041_s1 + $0x338] sm:$0xff] }
 0x4ac   : > { %v1833_v60 = vmax.f32 %v5356_v18, %v5360_v28  ;;  %1831 = vmax.xlane.f32.xlu1 %v1830_v23 }
 0x4ae   : > { %v1713_v7 = vpop.f32.mrb[100].mxu1  ;;  %1834 = vmax.xlane.f32.xlu0 %v1833_v60 }
 0x4af   : > { %v5373_v15 = vadd.f32 %v2956_v27, %v1713_v7  ;;  %v1715_v54 = vpop.f32.mrb[101].mxu1  ;;  %v2960_v7 = vld [vmem:[%s6041_s1 + $0x340] sm:$0xff] }
 0x4b0   : > { %v5378_v23 = vadd.f32 %v2957_v10, %v1715_v54  ;;  %v1717_v36 = vpop.f32.mrb[102].mxu1  ;;  %v2961_v10 = vld [vmem:[%s6041_s1 + $0x348] sm:$0xff] }
 0x4b1   : > { %v5380_v26 = vadd.f32 %v2958_v11, %v1717_v36  ;;  %v1719_v2 = vpop.f32.mrb[103].mxu1  ;;  %v2962_v11 = vld [vmem:[%s6041_s1 + $0x350] sm:$0xff] }
 0x4b2   : > { %v1836_v60 = vmax.f32 %v5373_v15, %v5378_v23  ;;  %v5384_v37 = vadd.f32 %v2959_v40, %v1719_v2  ;;  %v2963_v40 = vld [vmem:[%s6041_s1 + $0x358] sm:$0xff] }
 0x4b4   : > { %v1839_v27 = vmax.f32 %v5380_v26, %v5384_v37  ;;  %1837 = vmax.xlane.f32.xlu1 %v1836_v60 }
 0x4b6   : > { %1840 = vmax.xlane.f32.xlu0 %v1839_v27  ;;  %v1723_v36 = vpop.f32.mrb[104].mxu1 }
 0x4b7   : > { %v5397_v2 = vadd.f32 %v2960_v7, %v1723_v36  ;;  %v1725_v54 = vpop.f32.mrb[105].mxu1  ;;  %v2964_v36 = vld [vmem:[%s6041_s1 + $0x360] sm:$0xff] }
 0x4b8   : > { %v5402_v60 = vadd.f32 %v2961_v10, %v1725_v54  ;;  %v1727_v62 = vpop.f32.mrb[106].mxu1  ;;  %v2965_v10 = vld [vmem:[%s6041_s1 + $0x368] sm:$0xff] }
 0x4b9   : > { %v5404_v50 = vadd.f32 %v2962_v11, %v1727_v62  ;;  %v1729_v31 = vpop.f32.mrb[107].mxu1  ;;  %v2966_v11 = vld [vmem:[%s6041_s1 + $0x370] sm:$0xff] }
 0x4ba   : > { %v1842_v27 = vmax.f32 %v5397_v2, %v5402_v60  ;;  %v5408_v34 = vadd.f32 %v2963_v40, %v1729_v31  ;;  %v2967_v40 = vld [vmem:[%s6041_s1 + $0x378] sm:$0xff] }
 0x4bc   : > { %v1845_v7 = vmax.f32 %v5404_v50, %v5408_v34  ;;  %1843 = vmax.xlane.f32.xlu1 %v1842_v27 }
 0x4be   : > { %v1733_v62 = vpop.f32.mrb[108].mxu1  ;;  %1846 = vmax.xlane.f32.xlu0 %v1845_v7 }
 0x4bf   : > { %v5421_v31 = vadd.f32 %v2964_v36, %v1733_v62  ;;  %v1735_v54 = vpop.f32.mrb[109].mxu1  ;;  %v2968_v62 = vld [vmem:[%s6041_s1 + $0x380] sm:$0xff] }
 0x4c0   : > { %v5426_v27 = vadd.f32 %v2965_v10, %v1735_v54  ;;  %v1737_v39 = vpop.f32.mrb[110].mxu1  ;;  %v2969_v10 = vld [vmem:[%s6041_s1 + $0x388] sm:$0xff] }
 0x4c1   : > { %v5428_v17 = vadd.f32 %v2966_v11, %v1737_v39  ;;  %v1739_v59 = vpop.f32.mrb[111].mxu1  ;;  %v2970_v11 = vld [vmem:[%s6041_s1 + $0x390] sm:$0xff] }
 0x4c2   : > { %v1848_v7 = vmax.f32 %v5421_v31, %v5426_v27  ;;  %v5432_v1 = vadd.f32 %v2967_v40, %v1739_v59  ;;  %v2971_v40 = vld [vmem:[%s6041_s1 + $0x398] sm:$0xff] }
 0x4c4   : > { %6215 = vst [vmem:[#allocation34_spill] sm:$0xff] %v5432_v1  ;;  %v1851_v36 = vmax.f32 %v5428_v17, %v5432_v1  ;;  %1849 = vmax.xlane.f32.xlu0 %v1848_v7 }
 0x4c6   : > { %v1743_v39 = vpop.f32.mrb[112].mxu1 }
 0x4c7   : > { %v5445_v54 = vadd.f32 %v2968_v62, %v1743_v39  ;;  %v1745_v59 = vpop.f32.mrb[113].mxu1  ;;  %v2972_v39 = vld [vmem:[%s6041_s1 + $0x3a0] sm:$0xff] }
 0x4c8   : > { %v5450_v7 = vadd.f32 %v2969_v10, %v1745_v59  ;;  %1852 = vmax.xlane.f32.xlu0 %v1851_v36  ;;  %v1747_v0 = vpop.f32.mrb[114].mxu1  ;;  %v2973_v36 = vld [vmem:[%s6041_s1 + $0x3a8] sm:$0xff]  ;;  %v2974_v10 = vld [vmem:[%s6041_s1 + $0x3b0] sm:$0xff] }
 0x4c9   : > { %v5452_v55 = vadd.f32 %v2970_v11, %v1747_v0  ;;  %v1749_v42 = vpop.f32.mrb[115].mxu1 }
 0x4ca   : > { %6216 = vst [vmem:[#allocation35_spill] sm:$0xff] %v5450_v7  ;;  %v1854_v8 = vmax.f32 %v5445_v54, %v5450_v7  ;;  %v5456_v30 = vadd.f32 %v2971_v40, %v1749_v42 }
 0x4cb   : > { %6217 = vst [vmem:[#allocation36_spill] sm:$0xff] %v5452_v55 }
 0x4cc   : > { %6218 = vst [vmem:[#allocation37_spill] sm:$0xff] %v5456_v30  ;;  %v1857_v62 = vmax.f32 %v5452_v55, %v5456_v30  ;;  %1855 = vmax.xlane.f32.xlu1 %v1854_v8  ;;  %v2975_v8 = vld [vmem:[%s6041_s1 + $0x3b8] sm:$0xff] }
 0x4ce   : > { %v1753_v0 = vpop.f32.mrb[116].mxu1  ;;  %1858 = vmax.xlane.f32.xlu0 %v1857_v62 }
 0x4cf   : > { %v5469_v42 = vadd.f32 %v2972_v39, %v1753_v0  ;;  %v1755_v11 = vpop.f32.mrb[117].mxu1  ;;  %v2976_v0 = vld [vmem:[%s6041_s1 + $0x3c0] sm:$0xff] }
 0x4d0   : > { %v5474_v59 = vadd.f32 %v2973_v36, %v1755_v11  ;;  %v1757_v40 = vpop.f32.mrb[118].mxu1  ;;  %v2977_v36 = vld [vmem:[%s6041_s1 + $0x3c8] sm:$0xff]  ;;  %v2978_v11 = vld [vmem:[%s6041_s1 + $0x3d0] sm:$0xff] }
 0x4d1   : > { %6219 = vst [vmem:[#allocation38_spill] sm:$0xff] %v5469_v42  ;;  %v5476_v21 = vadd.f32 %v2974_v10, %v1757_v40  ;;  %v1759_v61 = vpop.f32.mrb[119].mxu1  ;;  %v2979_v40 = vld [vmem:[%s6041_s1 + $0x3d8] sm:$0xff] }
 0x4d2   : > { %6220 = vst [vmem:[#allocation39_spill] sm:$0xff] %v5474_v59  ;;  %v1860_v62 = vmax.f32 %v5469_v42, %v5474_v59  ;;  %v5480_v30 = vadd.f32 %v2975_v8, %v1759_v61 }
 0x4d3   : > { %6221 = vst [vmem:[#allocation40_spill] sm:$0xff] %v5476_v21 }
 0x4d4   : > { %6222 = vst [vmem:[#allocation41_spill] sm:$0xff] %v5480_v30  ;;  %v1863_v39 = vmax.f32 %v5476_v21, %v5480_v30  ;;  %1861 = vmax.xlane.f32.xlu1 %v1860_v62 }
 0x4d6   : > { %1864 = vmax.xlane.f32.xlu0 %v1863_v39  ;;  %v1763_v10 = vpop.f32.mrb[120].mxu1 }
 0x4d7   : > { %v5493_v61 = vadd.f32 %v2976_v0, %v1763_v10  ;;  %v1765_v8 = vpop.f32.mrb[121].mxu1  ;;  %v2980_v10 = vld [vmem:[%s6041_s1 + $0x3e0] sm:$0xff] }
 0x4d8   : > { %v5498_v62 = vadd.f32 %v2977_v36, %v1765_v8  ;;  %v1767_v30 = vpop.f32.mrb[122].mxu1  ;;  %v2981_v36 = vld [vmem:[%s6041_s1 + $0x3e8] sm:$0xff] }
 0x4d9   : > { %6223 = vst [vmem:[#allocation42_spill] sm:$0xff] %v5493_v61  ;;  %v5500_v21 = vadd.f32 %v2978_v11, %v1767_v30  ;;  %v1769_v59 = vpop.f32.mrb[123].mxu1  ;;  %v2982_v11 = vld [vmem:[%s6041_s1 + $0x3f0] sm:$0xff] }
 0x4da   : > { %6224 = vst [vmem:[#allocation43_spill] sm:$0xff] %v5498_v62  ;;  %v1866_v39 = vmax.f32 %v5493_v61, %v5498_v62  ;;  %v5504_v42 = vadd.f32 %v2979_v40, %v1769_v59  ;;  %v2983_v40 = vld [vmem:[%s6041_s1 + $0x3f8] sm:$0xff] }
 0x4db   : > { %6225 = vst [vmem:[#allocation44_spill] sm:$0xff] %v5500_v21 }
 0x4dc   : > { %6226 = vst [vmem:[#allocation45_spill] sm:$0xff] %v5504_v42  ;;  %v1869_v0 = vmax.f32 %v5500_v21, %v5504_v42  ;;  %1867 = vmax.xlane.f32.xlu1 %v1866_v39 }
 0x4de   : > { %v1773_v30 = vpop.f32.mrb[124].mxu1 }
 0x4df   : > { %v5517_v8 = vadd.f32 %v2980_v10, %v1773_v30  ;;  %v1775_v59 = vpop.f32.mrb[125].mxu1 }
 0x4e0   : > { %v5522_v39 = vadd.f32 %v2981_v36, %v1775_v59  ;;  %v1777_v42 = vpop.f32.mrb[126].mxu1  ;;  %1870 = vmax.xlane.f32.xlu1 %v1869_v0 }
 0x4e1   : > { %v5524_v21 = vadd.f32 %v2982_v11, %v1777_v42  ;;  %v1779_v62 = vpop.f32.mrb[127].mxu1 }
 0x4e2   : > { %v1872_v61 = vmax.f32 %v5517_v8, %v5522_v39  ;;  %v5528_v55 = vadd.f32 %v2983_v40, %v1779_v62 }
 0x4e4   : > { %6227 = vst [vmem:[#allocation46_spill] sm:$0xff] %v5528_v55  ;;  %v1875_v10 = vmax.f32 %v5524_v21, %v5528_v55  ;;  %1873 = vmax.xlane.f32.xlu0 %v1872_v61 }
 0x4e6   : > { %1876 = vmax.xlane.f32.xlu1 %v1875_v10 }
 0x4f9   : > { %v1784_v30 = vpop.xlane.xlu0 %1783 }
 0x4fa   : > { %v1878_v1 = vsub.f32 %v5157_v53, %v1784_v30  ;;  %v1879_v36 = vsub.f32 %v5162_v57, %v1784_v30 }
 0x4fb   : > { %v1787_v59 = vpop.xlane.xlu1 %1786 }
 0x4fc   : > { %v1942_v0 = vmul.f32 1.442695, %v1878_v1  ;;  %v1944_v42 = vmul.f32 1.442695, %v1879_v36  ;;  %v1880_v11 = vsub.f32 %v5164_v22, %v1787_v59  ;;  %v1881_v7 = vsub.f32 %v5168_v56, %v1787_v59 }
 0x4fe   : > { %3722 = vpow2.f32 %v1942_v0  ;;  %v1946_v62 = vmul.f32 1.442695, %v1880_v11  ;;  %v1948_v40 = vmul.f32 1.442695, %v1881_v7 }
 0x4ff   : > { %3724 = vpow2.f32 %v1944_v42 }
 0x500   : > { %3726 = vpow2.f32 %v1946_v62 }
 0x501   : > { %3728 = vpow2.f32 %v1948_v40  ;;  %v1790_v61 = vpop.xlane.xlu0 %1789 }
 0x502   : > { %v1882_v10 = vsub.f32 %v5178_v49, %v1790_v61  ;;  %v1883_v53 = vsub.f32 %v5186_v46, %v1790_v61 }
 0x504   : > { %v1950_v55 = vmul.f32 1.442695, %v1882_v10  ;;  %v1952_v57 = vmul.f32 1.442695, %v1883_v53 }
 0x505   : > { %v1793_v30 = vpop.xlane.xlu0 %1792 }
 0x506   : > { %3730 = vpow2.f32 %v1950_v55  ;;  %v1884_v1 = vsub.f32 %v5190_v4, %v1793_v30  ;;  %v1885_v22 = vsub.f32 %v5192_v6, %v1793_v30 }
 0x507   : > { %3732 = vpow2.f32 %v1952_v57 }
 0x508   : > { %v5540_v56 = vpop.eup %3722  ;;  %v1954_v7 = vmul.f32 1.442695, %v1884_v1  ;;  %v1956_v36 = vmul.f32 1.442695, %v1885_v22 }
 0x509   : > { %v5542_v59 = vpop.eup %3724  ;;  %v1796_v0 = vpop.xlane.xlu1 %1795 }
 0x50a   : > { %v5544_v42 = vpop.eup %3726  ;;  %3734 = vpow2.f32 %v1954_v7  ;;  %v1886_v49 = vsub.f32 %v5205_v43, %v1796_v0  ;;  %v1887_v46 = vsub.f32 %v5210_v3, %v1796_v0  ;;  %v2070_v55 = vadd.f32 %v5542_v59, %v5540_v56 }
 0x50b   : > { %v5550_v4 = vpop.eup %3728  ;;  %3736 = vpow2.f32 %v1956_v36  ;;  %v1799_v6 = vpop.xlane.xlu0 %1798 }
 0x50c   : > { %v1958_v11 = vmul.f32 1.442695, %v1886_v49  ;;  %v1960_v62 = vmul.f32 1.442695, %v1887_v46  ;;  %2071 = vadd.xlane.f32.xlu1 %v2070_v55  ;;  %v1888_v40 = vsub.f32 %v5212_v52, %v1799_v6  ;;  %v1889_v61 = vsub.f32 %v5216_v51, %v1799_v6 }
 0x50d   : > { %v2073_v10 = vadd.f32 %v5550_v4, %v5544_v42 }
 0x50e   : > { %3738 = vpow2.f32 %v1958_v11  ;;  %v1962_v43 = vmul.f32 1.442695, %v1888_v40  ;;  %v1964_v3 = vmul.f32 1.442695, %v1889_v61 }
 0x50f   : > { %3740 = vpow2.f32 %v1960_v62  ;;  %2074 = vadd.xlane.f32.xlu0 %v2073_v10 }
 0x510   : > { %v5556_v53 = vpop.eup %3730  ;;  %3742 = vpow2.f32 %v1962_v43 }
 0x511   : > { %v5558_v57 = vpop.eup %3732  ;;  %3744 = vpow2.f32 %v1964_v3  ;;  %v1802_v30 = vpop.xlane.xlu1 %1801 }
 0x512   : > { %v1890_v1 = vsub.f32 %v5229_v29, %v1802_v30  ;;  %v1891_v52 = vsub.f32 %v5234_v38, %v1802_v30  ;;  %v2076_v51 = vadd.f32 %v5558_v57, %v5556_v53 }
 0x513   : > { %v1805_v22 = vpop.xlane.xlu0 %1804 }
 0x514   : > { %v5564_v7 = vpop.eup %3734  ;;  %v1966_v36 = vmul.f32 1.442695, %v1890_v1  ;;  %v1968_v0 = vmul.f32 1.442695, %v1891_v52  ;;  %2077 = vadd.xlane.f32.xlu1 %v2076_v51  ;;  %v1892_v49 = vsub.f32 %v5236_v35, %v1805_v22  ;;  %v1893_v46 = vsub.f32 %v5240_v20, %v1805_v22  ;;  %v3931_v51 = vld [vmem:[%s3978_s14 + $0x38] sm:$0xff]  }
 0x515   : > { %v5568_v55 = vpop.eup %3736 }
 0x516   : > { %3746 = vpow2.f32 %v1966_v36  ;;  %v1970_v6 = vmul.f32 1.442695, %v1892_v49  ;;  %v1972_v29 = vmul.f32 1.442695, %v1893_v46  ;;  %v2079_v38 = vadd.f32 %v5568_v55, %v5564_v7  ;;  %v3932_v36 = vld [vmem:[%s3978_s14 + $0x78] sm:$0xff]   ;;  %s3946_s14 = smov 16  }
 0x517   : > { %3748 = vpow2.f32 %v1968_v0 }
 0x518   : > { %v5572_v11 = vpop.eup %3738  ;;  %3750 = vpow2.f32 %v1970_v6  ;;  %2080 = vadd.xlane.f32.xlu1 %v2079_v38 }
 0x519   : > { %6228 = vst [vmem:[#allocation47_spill] sm:$0xff] %v5572_v11  ;;  %v5574_v62 = vpop.eup %3740  ;;  %3752 = vpow2.f32 %v1972_v29  ;;  %v1808_v0 = vpop.xlane.xlu1 %1807 }
 0x51a   : > { %v5576_v35 = vpop.eup %3742  ;;  %v2082_v20 = vadd.f32 %v5574_v62, %v5572_v11  ;;  %v1894_v46 = vsub.f32 %v5253_v9, %v1808_v0  ;;  %v1895_v29 = vsub.f32 %v5258_v14, %v1808_v0 }
 0x51b   : > { %v5580_v40 = vpop.eup %3744  ;;  %v1811_v22 = vpop.xlane.xlu0 %1810 }
 0x51c   : > { %2083 = vadd.xlane.f32.xlu1 %v2082_v20  ;;  %v2085_v61 = vadd.f32 %v5580_v40, %v5576_v35  ;;  %v1896_v20 = vsub.f32 %v5260_v5, %v1811_v22 }
 0x520   : > { %v5584_v10 = vpop.eup %3746  ;;  %2086 = vadd.xlane.f32.xlu1 %v2085_v61  ;;  %v1897_v61 = vsub.f32 %v5264_v63, %v1811_v22 }
 0x521   : > { %6229 = vst [vmem:[#allocation48_spill] sm:$0xff] %v5584_v10  ;;  %v5586_v43 = vpop.eup %3748  ;;  %v1814_v6 = vpop.xlane.xlu1 %1813 }
 0x522   : > { %6230 = vst [vmem:[#allocation49_spill] sm:$0xff] %v5586_v43  ;;  %v5588_v3 = vpop.eup %3750  ;;  %v2088_v30 = vadd.f32 %v5586_v43, %v5584_v10  ;;  %v1976_v10 = vmul.f32 1.442695, %v1895_v29  ;;  %v1978_v43 = vmul.f32 1.442695, %v1896_v20 }
 0x523   : > { %6231 = vst [vmem:[#allocation50_spill] sm:$0xff] %v5588_v3  ;;  %v5592_v1 = vpop.eup %3752  ;;  %v1817_v49 = vpop.xlane.xlu0 %1816  ;;  %v1980_v9 = vmul.f32 1.442695, %v1897_v61 }
 0x524   : > { %6232 = vst [vmem:[#allocation51_spill] sm:$0xff] %v5592_v1  ;;  %2089 = vadd.xlane.f32.xlu0 %v2088_v30  ;;  %v2091_v52 = vadd.f32 %v5592_v1, %v5588_v3  ;;  %v1974_v30 = vmul.f32 1.442695, %v1894_v46  ;;  %v1899_v3 = vsub.f32 %v5282_v47, %v1814_v6  ;;  %v1900_v11 = vsub.f32 %v5284_v12, %v1817_v49 }
 0x526   : > { %2092 = vadd.xlane.f32.xlu1 %v2091_v52  ;;  %v1898_v52 = vsub.f32 %v5277_v58, %v1814_v6  ;;  %3754 = vpow2.f32 %v1974_v30  ;;  %v1984_v63 = vmul.f32 1.442695, %v1899_v3  ;;  %v1901_v58 = vsub.f32 %v5288_v19, %v1817_v49 }
 0x527   : > { %3756 = vpow2.f32 %v1976_v10  ;;  %v1986_v47 = vmul.f32 1.442695, %v1900_v11 }
 0x528   : > { %v1982_v14 = vmul.f32 1.442695, %v1898_v52  ;;  %3758 = vpow2.f32 %v1978_v43  ;;  %v1988_v10 = vmul.f32 1.442695, %v1901_v58 }
 0x529   : > { %3760 = vpow2.f32 %v1980_v9 }
 0x52a   : > { %3762 = vpow2.f32 %v1982_v14 }
 0x52b   : > { %v1823_v38 = vpop.xlane.xlu0 %1822  ;;  %3764 = vpow2.f32 %v1984_v63 }
 0x52c   : > { %v1904_v46 = vsub.f32 %v5308_v41, %v1823_v38  ;;  %v1905_v3 = vsub.f32 %v5312_v13, %v1823_v38  ;;  %3766 = vpow2.f32 %v1986_v47 }
 0x52e   : > { %v1994_v43 = vmul.f32 1.442695, %v1904_v46  ;;  %v1996_v20 = vmul.f32 1.442695, %v1905_v3 }
 0x530   : > { %v5624_v38 = vpop.eup %3754 }
 0x531   : > { %v5628_v52 = vpop.eup %3756 }
 0x532   : > { %v2094_v47 = vadd.f32 %v5628_v52, %v5624_v38 }
 0x537   : > { %2308 = vrot.lane.b32.xlu1 %v3931_v51, %s3945_s17  ;;  %v1820_v51 = vpop.xlane.xlu1 %1819 }
 0x538   : > { %v1902_v1 = vsub.f32 %v5301_v32, %v1820_v51  ;;  %v1903_v5 = vsub.f32 %v5306_v48, %v1820_v51  ;;  %v5631_v51 = vpop.eup %3758 }
 0x539   : > { %v5634_v14 = vpop.eup %3760 }
 0x53a   : > { %2324 = vrot.lane.b32.xlu0 %v3932_v36, %s3945_s17  ;;  %v1829_v36 = vpop.xlane.xlu0 %1828  ;;  %v1990_v12 = vmul.f32 1.442695, %v1902_v1  ;;  %v1992_v32 = vmul.f32 1.442695, %v1903_v5  ;;  %v5638_v63 = vpop.eup %3762 }
 0x53b   : > { %v1826_v0 = vpop.xlane.xlu1 %1825  ;;  %v1908_v11 = vsub.f32 %v5332_v25, %v1829_v36  ;;  %v1909_v61 = vsub.f32 %v5336_v45, %v1829_v36 }
 0x53c   : > { %v1906_v6 = vsub.f32 %v5325_v24, %v1826_v0  ;;  %v1907_v29 = vsub.f32 %v5330_v33, %v1826_v0  ;;  %3768 = vpow2.f32 %v1990_v12 }
 0x53d   : > { %3770 = vpow2.f32 %v1992_v32  ;;  %v2002_v30 = vmul.f32 1.442695, %v1908_v11  ;;  %v2004_v5 = vmul.f32 1.442695, %v1909_v61 }
 0x53e   : > { %v5610_v22 = vpop.xlane.xlu0 %1834  ;;  %v1998_v41 = vmul.f32 1.442695, %v1906_v6  ;;  %v2000_v24 = vmul.f32 1.442695, %v1907_v29  ;;  %3772 = vpow2.f32 %v1988_v10 }
 0x53f   : > { %v1832_v48 = vpop.xlane.xlu1 %1831  ;;  %3774 = vpow2.f32 %v1994_v43  ;;  %v1912_v25 = vsub.f32 %v5356_v18, %v5610_v22  ;;  %v1913_v18 = vsub.f32 %v5360_v28, %v5610_v22 }
 0x540   : > { %v1910_v1 = vsub.f32 %v5349_v44, %v1832_v48  ;;  %v1911_v49 = vsub.f32 %v5354_v16, %v1832_v48  ;;  %3776 = vpow2.f32 %v1998_v41  ;;  %v2097_v48 = vadd.f32 %v5634_v14, %v5631_v51 }
 0x541   : > { %3778 = vpow2.f32 %v2000_v24  ;;  %v2010_v58 = vmul.f32 1.442695, %v1912_v25 }
 0x542   : > { %v2006_v44 = vmul.f32 1.442695, %v1910_v1  ;;  %v2008_v9 = vmul.f32 1.442695, %v1911_v49  ;;  %3780 = vpow2.f32 %v1996_v20 }
 0x543   : > { %v5616_v19 = vpop.xlane.xlu0 %1840  ;;  %v1838_v33 = vpop.xlane.xlu1 %1837  ;;  %3782 = vpow2.f32 %v2002_v30 }
 0x544   : > { %v1914_v16 = vsub.f32 %v5373_v15, %v1838_v33  ;;  %v1915_v45 = vsub.f32 %v5378_v23, %v1838_v33  ;;  %v1916_v15 = vsub.f32 %v5380_v26, %v5616_v19  ;;  %v5644_v23 = vpop.eup %3764  ;;  %3784 = vpow2.f32 %v2006_v44 }
 0x545   : > { %v5647_v6 = vpop.eup %3766  ;;  %3786 = vpow2.f32 %v2008_v9  ;;  %v2012_v26 = vmul.f32 1.442695, %v1913_v18  ;;  %v1917_v29 = vsub.f32 %v5384_v37, %v5616_v19 }
 0x546   : > { %v2014_v46 = vmul.f32 1.442695, %v1914_v16  ;;  %v2016_v28 = vmul.f32 1.442695, %v1915_v45  ;;  %v5650_v32 = vpop.eup %3768  ;;  %3788 = vpow2.f32 %v2004_v5 }
 0x547   : > { %v5656_v10 = vpop.eup %3770  ;;  %3790 = vpow2.f32 %v2010_v58  ;;  %v2020_v33 = vmul.f32 1.442695, %v1917_v29 }
 0x548   : > { %v5662_v43 = vpop.eup %3772  ;;  %3792 = vpow2.f32 %v2014_v46 }
 0x549   : > { %v1844_v36 = vpop.xlane.xlu1 %1843  ;;  %v5665_v19 = vpop.eup %3774  ;;  %3794 = vpow2.f32 %v2016_v28 }
 0x54a   : > { %v1918_v12 = vsub.f32 %v5397_v2, %v1844_v36  ;;  %v1919_v22 = vsub.f32 %v5402_v60, %v1844_v36  ;;  %v2018_v2 = vmul.f32 1.442695, %v1916_v15  ;;  %v2100_v60 = vadd.f32 %v5644_v23, %v5638_v63  ;;  %v6233_v36 = vld [vmem:[#allocation35_spill] sm:$0xff] }
 0x54b   : > { %v5622_v13 = vpop.xlane.xlu0 %1846  ;;  %3796 = vpow2.f32 %v2012_v26 }
 0x54c   : > { %v1920_v3 = vsub.f32 %v5404_v50, %v5622_v13  ;;  %v2022_v11 = vmul.f32 1.442695, %v1918_v12  ;;  %v2024_v1 = vmul.f32 1.442695, %v1919_v22  ;;  %v5668_v50 = vpop.eup %3776  ;;  %v1921_v20 = vsub.f32 %v5408_v34, %v5622_v13  ;;  %v6235_v12 = vld [vmem:[#allocation36_spill] sm:$0xff] }
 0x54d   : > { %v5674_v61 = vpop.eup %3778  ;;  %3798 = vpow2.f32 %v2018_v2 }
 0x54e   : > { %v2026_v30 = vmul.f32 1.442695, %v1920_v3  ;;  %v5679_v44 = vpop.eup %3780  ;;  %3800 = vpow2.f32 %v2022_v11  ;;  %v6237_v11 = vld [vmem:[#allocation38_spill] sm:$0xff] }
 0x54f   : > { %v5682_v34 = vpop.eup %3782  ;;  %3802 = vpow2.f32 %v2024_v1  ;;  %v2109_v22 = vadd.f32 %v5679_v44, %v5665_v19 }
 0x550   : > { %v5685_v18 = vpop.eup %3784  ;;  %3804 = vpow2.f32 %v2020_v33 }
 0x551   : > { %v1850_v0 = vpop.xlane.xlu0 %1849  ;;  %3806 = vpow2.f32 %v2026_v30 }
 0x552   : > { %v1922_v41 = vsub.f32 %v5421_v31, %v1850_v0  ;;  %v1923_v24 = vsub.f32 %v5426_v27, %v1850_v0  ;;  %v2106_v31 = vadd.f32 %v5656_v10, %v5650_v32  ;;  %v2103_v27 = vadd.f32 %v5662_v43, %v5647_v6  ;;  %v6234_v0 = vld [vmem:[#allocation34_spill] sm:$0xff] }
 0x554   : > { %v2030_v16 = vmul.f32 1.442695, %v1922_v41  ;;  %v2032_v13 = vmul.f32 1.442695, %v1923_v24 }
 0x555   : > { %v1853_v37 = vpop.xlane.xlu0 %1852 }
 0x556   : > { %v1924_v25 = vsub.f32 %v5428_v17, %v1853_v37  ;;  %v2028_v17 = vmul.f32 1.442695, %v1921_v20  ;;  %v1925_v58 = vsub.f32 %v6234_v0, %v1853_v37  ;;  %3808 = vpow2.f32 %v2030_v16  ;;  %v6240_v0 = vld [vmem:[#allocation42_spill] sm:$0xff] }
 0x557   : > { %3810 = vpow2.f32 %v2032_v13  ;;  %v6239_v13 = vld [vmem:[#allocation40_spill] sm:$0xff] }
 0x558   : > { %v2034_v46 = vmul.f32 1.442695, %v1924_v25  ;;  %3812 = vpow2.f32 %v2028_v17  ;;  %v2036_v1 = vmul.f32 1.442695, %v1925_v58 }
 0x559   : > { %2095 = vadd.xlane.f32.xlu0 %v2094_v47  ;;  %v1856_v49 = vpop.xlane.xlu1 %1855  ;;  %v2112_v47 = vadd.f32 %v5674_v61, %v5668_v50 }
 0x55a   : > { %v1926_v9 = vsub.f32 %v5445_v54, %v1856_v49  ;;  %v1927_v5 = vsub.f32 %v6233_v36, %v1856_v49  ;;  %v5690_v54 = vpop.eup %3786  ;;  %3814 = vpow2.f32 %v2034_v46 }
 0x55b   : > { %2098 = vadd.xlane.f32.xlu1 %v2097_v48  ;;  %v1859_v45 = vpop.xlane.xlu0 %1858  ;;  %v5695_v26 = vpop.eup %3788  ;;  %v6236_v48 = vld [vmem:[#allocation37_spill] sm:$0xff]  ;;  %v2118_v49 = vadd.f32 %v5690_v54, %v5685_v18 }
 0x55c   : > { %v1928_v28 = vsub.f32 %v6235_v12, %v1859_v45  ;;  %v2038_v29 = vmul.f32 1.442695, %v1926_v9  ;;  %v1929_v2 = vsub.f32 %v6236_v48, %v1859_v45  ;;  %v5698_v3 = vpop.eup %3790 }
 0x55d   : > { %2101 = vadd.xlane.f32.xlu0 %v2100_v60  ;;  %v2040_v60 = vmul.f32 1.442695, %v1927_v5  ;;  %v5701_v37 = vpop.eup %3792 }
 0x55e   : > { %v5705_v33 = vpop.eup %3794  ;;  %v2042_v20 = vmul.f32 1.442695, %v1928_v28  ;;  %3816 = vpow2.f32 %v2038_v29  ;;  %v2044_v25 = vmul.f32 1.442695, %v1929_v2 }
 0x55f   : > { %2107 = vadd.xlane.f32.xlu1 %v2106_v31  ;;  %v2115_v31 = vadd.f32 %v5695_v26, %v5682_v34  ;;  %v5709_v30 = vpop.eup %3796  ;;  %3818 = vpow2.f32 %v2040_v60  ;;  %v2124_v12 = vadd.f32 %v5705_v33, %v5701_v37 }
 0x560   : > { %v5712_v9 = vpop.eup %3798  ;;  %3820 = vpow2.f32 %v2036_v1  ;;  %v2121_v28 = vadd.f32 %v5709_v30, %v5698_v3 }
 0x561   : > { %2104 = vadd.xlane.f32.xlu0 %v2103_v27  ;;  %v1862_v15 = vpop.xlane.xlu1 %1861  ;;  %v6238_v27 = vld [vmem:[#allocation39_spill] sm:$0xff]  ;;  %v5715_v17 = vpop.eup %3800  ;;  %3822 = vpow2.f32 %v2042_v20  ;;  %v6244_v20 = vld [vmem:[#allocation44_spill] sm:$0xff] }
 0x562   : > { %v1930_v41 = vsub.f32 %v6237_v11, %v1862_v15  ;;  %v1931_v16 = vsub.f32 %v6238_v27, %v1862_v15  ;;  %v5721_v15 = vpop.eup %3802  ;;  %3824 = vpow2.f32 %v2044_v25  ;;  %v6242_v11 = vld [vmem:[#allocation41_spill] sm:$0xff] }
 0x563   : > { %2113 = vadd.xlane.f32.xlu1 %v2112_v47  ;;  %v1865_v24 = vpop.xlane.xlu0 %1864  ;;  %v6241_v47 = vld [vmem:[#allocation43_spill] sm:$0xff]  ;;  %v2130_v25 = vadd.f32 %v5721_v15, %v5715_v17 }
 0x564   : > { %v2046_v45 = vmul.f32 1.442695, %v1930_v41  ;;  %v1932_v36 = vsub.f32 %v6239_v13, %v1865_v24  ;;  %v2048_v29 = vmul.f32 1.442695, %v1931_v16  ;;  %v1933_v41 = vsub.f32 %v6242_v11, %v1865_v24  ;;  %v6245_v13 = vld [vmem:[#allocation45_spill] sm:$0xff] }
 0x565   : > { %2110 = vadd.xlane.f32.xlu0 %v2109_v22  ;;  %v5725_v22 = vpop.eup %3804 }
 0x566   : > { %v5727_v60 = vpop.eup %3806  ;;  %3826 = vpow2.f32 %v2046_v45  ;;  %v2050_v1 = vmul.f32 1.442695, %v1932_v36  ;;  %v2127_v45 = vadd.f32 %v5725_v22, %v5712_v9 }
 0x567   : > { %2119 = vadd.xlane.f32.xlu1 %v2118_v49 }
 0x569   : > { %2116 = vadd.xlane.f32.xlu0 %v2115_v31  ;;  %v1868_v5 = vpop.xlane.xlu1 %1867  ;;  %v5730_v31 = vpop.eup %3808 }
 0x56a   : > { %v1934_v58 = vsub.f32 %v6240_v0, %v1868_v5  ;;  %v1935_v46 = vsub.f32 %v6241_v47, %v1868_v5  ;;  %6243 = vst [vmem:[#allocation35_spill] sm:$0xff] %v5730_v31  ;;  %v5736_v16 = vpop.eup %3810  ;;  %v2052_v47 = vmul.f32 1.442695, %v1933_v41 }
 0x56b   : > { %2125 = vadd.xlane.f32.xlu1 %v2124_v12  ;;  %v5740_v24 = vpop.eup %3812 }
 0x56c   : > { %v2054_v48 = vmul.f32 1.442695, %v1934_v58  ;;  %v2056_v2 = vmul.f32 1.442695, %v1935_v46  ;;  %v5742_v58 = vpop.eup %3814 }
 0x56d   : > { %2122 = vadd.xlane.f32.xlu0 %v2121_v28  ;;  %v1871_v49 = vpop.xlane.xlu1 %1870  ;;  %6246 = vst [vmem:[#allocation34_spill] sm:$0xff] %v5742_v58  ;;  %v5744_v12 = vpop.eup %3816 }
 0x56e   : > { %3828 = vpow2.f32 %v2054_v48  ;;  %v1936_v27 = vsub.f32 %v6244_v20, %v1871_v49  ;;  %v1937_v5 = vsub.f32 %v6245_v13, %v1871_v49  ;;  %6247 = vst [vmem:[#allocation36_spill] sm:$0xff] %v5744_v12 }
 0x56f   : > { %3830 = vpow2.f32 %v2056_v2  ;;  %2131 = vadd.xlane.f32.xlu1 %v2130_v25  ;;  %v2136_v2 = vadd.f32 %v5736_v16, %v5730_v31 }
 0x570   : > { %3832 = vpow2.f32 %v2048_v29  ;;  %v2058_v36 = vmul.f32 1.442695, %v1936_v27  ;;  %v2060_v0 = vmul.f32 1.442695, %v1937_v5  ;;  %v5750_v29 = vpop.eup %3818 }
 0x571   : > { %3834 = vpow2.f32 %v2050_v1  ;;  %2128 = vadd.xlane.f32.xlu0 %v2127_v45  ;;  %v1874_v46 = vpop.xlane.xlu0 %1873  ;;  %6248 = vst [vmem:[#allocation37_spill] sm:$0xff] %v5750_v29  ;;  %v2133_v1 = vadd.f32 %v5740_v24, %v5727_v60  ;;  %v5754_v41 = vpop.eup %3820 }
 0x572   : > { %3836 = vpow2.f32 %v2058_v36  ;;  %v1938_v28 = vsub.f32 %v5517_v8, %v1874_v46  ;;  %v1939_v48 = vsub.f32 %v5522_v39, %v1874_v46  ;;  %v6249_v8 = vld [vmem:[#allocation46_spill] sm:$0xff]  ;;  %v5758_v39 = vpop.eup %3822  ;;  %v2142_v36 = vadd.f32 %v5750_v29, %v5744_v12 }
 0x573   : > { %3838 = vpow2.f32 %v2060_v0  ;;  %v1877_v11 = vpop.xlane.xlu1 %1876  ;;  %2137 = vadd.xlane.f32.xlu1 %v2136_v2  ;;  %6250 = vst [vmem:[#allocation38_spill] sm:$0xff] %v5758_v39  ;;  %v5760_v5 = vpop.eup %3824 }
 0x574   : > { %v2062_v49 = vmul.f32 1.442695, %v1938_v28  ;;  %v2064_v20 = vmul.f32 1.442695, %v1939_v48  ;;  %v1940_v27 = vsub.f32 %v5524_v21, %v1877_v11  ;;  %v1941_v13 = vsub.f32 %v6249_v8, %v1877_v11  ;;  %6251 = vst [vmem:[#allocation39_spill] sm:$0xff] %v5760_v5  ;;  %v5764_v0 = vpop.eup %3826 }
 0x575   : > { %3840 = vpow2.f32 %v2052_v47  ;;  %2134 = vadd.xlane.f32.xlu0 %v2133_v1  ;;  %6252 = vst [vmem:[#allocation40_spill] sm:$0xff] %v5764_v0  ;;  %v2139_v21 = vadd.f32 %v5754_v41, %v5742_v58  ;;  %v2145_v11 = vadd.f32 %v5760_v5, %v5758_v39 }
 0x576   : > { %3842 = vpow2.f32 %v2062_v49  ;;  %v2066_v25 = vmul.f32 1.442695, %v1940_v27  ;;  %v2068_v45 = vmul.f32 1.442695, %v1941_v13 }
 0x577   : > { %3844 = vpow2.f32 %v2064_v20  ;;  %2143 = vadd.xlane.f32.xlu1 %v2142_v36 }
 0x578   : > { %v5768_v46 = vpop.eup %3828  ;;  %3846 = vpow2.f32 %v2066_v25 }
 0x579   : > { %v5770_v28 = vpop.eup %3830  ;;  %2140 = vadd.xlane.f32.xlu0 %v2139_v21  ;;  %3848 = vpow2.f32 %v2068_v45 }
 0x57a   : > { %v5772_v47 = vpop.eup %3832  ;;  %v2154_v48 = vadd.f32 %v5770_v28, %v5768_v46 }
 0x57b   : > { %6253 = vst [vmem:[#allocation42_spill] sm:$0xff] %v5772_v47  ;;  %v5776_v2 = vpop.eup %3834  ;;  %v2148_v20 = vadd.f32 %v5772_v47, %v5764_v0 }
 0x57c   : > { %6254 = vst [vmem:[#allocation43_spill] sm:$0xff] %v5776_v2  ;;  %v5780_v1 = vpop.eup %3836  ;;  %2155 = vadd.xlane.f32.xlu1 %v2154_v48 }
 0x57d   : > { %v5782_v49 = vpop.eup %3838  ;;  %2146 = vadd.xlane.f32.xlu0 %v2145_v11 }
 0x57e   : > { %v2157_v27 = vadd.f32 %v5782_v49, %v5780_v1 }
 0x57f   : > { %v5788_v8 = vpop.eup %3840 }
 0x580   : > { %6255 = vst [vmem:[#allocation41_spill] sm:$0xff] %v5788_v8  ;;  %v5790_v13 = vpop.eup %3842  ;;  %2149 = vadd.xlane.f32.xlu1 %v2148_v20  ;;  %v2151_v21 = vadd.f32 %v5788_v8, %v5776_v2 }
 0x581   : > { %v5792_v25 = vpop.eup %3844  ;;  %2158 = vadd.xlane.f32.xlu0 %v2157_v27 }
 0x582   : > { %v2160_v45 = vadd.f32 %v5792_v25, %v5790_v13  ;;  %v5796_v36 = vpop.eup %3846 }
 0x583   : > { %v5800_v48 = vpop.eup %3848 }
 0x584   : > { %2161 = vadd.xlane.f32.xlu1 %v2160_v45  ;;  %v2163_v11 = vadd.f32 %v5800_v48, %v5796_v36 }
 0x585   : > { %2152 = vadd.xlane.f32.xlu0 %v2151_v21 }
 0x589   : > { %2164 = vadd.xlane.f32.xlu0 %v2163_v11 }
 0x599   : > { %v2072_v20 = vpop.xlane.xlu1 %2071 }
 0x59a   : > { %3850 = vrcp.f32 %v2072_v20 }
 0x59c   : > { %v2075_v0 = vpop.xlane.xlu0 %2074 }
 0x59d   : > { %3852 = vrcp.f32 %v2075_v0 }
 0x5a1   : > { %v2078_v27 = vpop.xlane.xlu1 %2077 }
 0x5a4   : > { %v3851_v47 = vpop.eup %3850 }
 0x5a5   : > { %v2081_v12 = vpop.xlane.xlu1 %2080  ;;  %v2199_v29 = vmul.f32 %v3851_v47, %v5542_v59 }
 0x5a6   : > { %3854 = vrcp.f32 %v2081_v12 }
 0x5a7   : > { %v3853_v39 = vpop.eup %3852  ;;  %3856 = vrcp.f32 %v2078_v27 }
 0x5a8   : > { %v2201_v2 = vmul.f32 %v3853_v39, %v5550_v4  ;;  %v2200_v58 = vmul.f32 %v3853_v39, %v5544_v42  ;;  %v2198_v4 = vmul.f32 %v3851_v47, %v5540_v56 }
 0x5a9   : > { %v2084_v8 = vpop.xlane.xlu1 %2083 }
 0x5aa   : > { %v2263_v45 = vpack.c.bf16 %v2201_v2, %v2199_v29  ;;  %v2262_v2 = vpack.c.bf16 %v2200_v58, %v2198_v4 }
 0x5ac   : > { %2374 = vmatprep.mubr.bf16.mxu0 %v2263_v45 }
 0x5ad   : > { %v2087_v21 = vpop.xlane.xlu1 %2086 }
 0x5ae   : > { %3858 = vrcp.f32 %v2087_v21 }
 0x5af   : > { %3860 = vrcp.f32 %v2084_v8 }
 0x5b0   : > { %v3855_v11 = vpop.eup %3854 }
 0x5b1   : > { %v2090_v31 = vpop.xlane.xlu0 %2089  ;;  %v3857_v5 = vpop.eup %3856  ;;  %v2205_v59 = vmul.f32 %v3855_v11, %v5568_v55  ;;  %v2204_v42 = vmul.f32 %v3855_v11, %v5564_v7 }
 0x5b2   : > { %v2203_v29 = vmul.f32 %v3857_v5, %v5558_v57  ;;  %v2202_v55 = vmul.f32 %v3857_v5, %v5556_v53  ;;  %v6259_v53 = vld [vmem:[#allocation50_spill] sm:$0xff]  ;;  %v6260_v5 = vld [vmem:[#allocation48_spill] sm:$0xff] }
 0x5b3   : > { %v2093_v20 = vpop.xlane.xlu1 %2092 }
 0x5b4   : > { %3862 = vrcp.f32 %v2093_v20  ;;  %v2265_v27 = vpack.c.bf16 %v2205_v59, %v2203_v29  ;;  %v2264_v47 = vpack.c.bf16 %v2204_v42, %v2202_v55  ;;  %v6257_v59 = vld [vmem:[#allocation47_spill] sm:$0xff] }
 0x5b5   : > { %v2325_v0 = vpop.permute.xlu0 %2324  ;;  %3864 = vrcp.f32 %v2090_v31  ;;  %v6256_v31 = vld [vmem:[#allocation51_spill] sm:$0xff] }
 0x5b6   : > { %3290 = vmatprep.subr.bf16.mxu0 %v2325_v0  ;;  %3395 = vmatprep.subr.bf16.mxu1 %v2325_v0 }
 0x5b7   : > { %v2309_v12 = vpop.permute.xlu1 %2308 }
 0x5b8   : > { %3291 = vmatpush3.bf16.msra.mxu0 %v2309_v12  ;;  %3403 = vmatpush3.bf16.msra.mxu1 %v2309_v12  ;;  %v3859_v8 = vpop.eup %3858  ;;  %v6258_v12 = vld [vmem:[#allocation49_spill] sm:$0xff] }
 0x5b9   : > { %v3861_v45 = vpop.eup %3860  ;;  %v2209_v39 = vmul.f32 %v3859_v8, %v5580_v40  ;;  %v2208_v58 = vmul.f32 %v3859_v8, %v5576_v35 }
 0x5ba   : > { %v2207_v56 = vmul.f32 %v3861_v45, %v5574_v62  ;;  %v2206_v4 = vmul.f32 %v3861_v45, %v6257_v59 }
 0x5bb   : > { %2375 = vmatmul.mubr.bf16.vlgmr.msra.gmra.mrb[64].mxu0 %v2262_v2 }
 0x5bc   : > { %2382 = vmatprep.mubr.bf16.mxu0 %v2265_v27  ;;  %v2267_v21 = vpack.c.bf16 %v2209_v39, %v2207_v56  ;;  %v2266_v11 = vpack.c.bf16 %v2208_v58, %v2206_v4 }
 0x5be   : > { %v3863_v0 = vpop.eup %3862 }
 0x5bf   : > { %v3865_v57 = vpop.eup %3864  ;;  %v2213_v20 = vmul.f32 %v3863_v0, %v6256_v31  ;;  %v2212_v62 = vmul.f32 %v3863_v0, %v6259_v53 }
 0x5c0   : > { %v2211_v7 = vmul.f32 %v3865_v57, %v6258_v12  ;;  %v2210_v29 = vmul.f32 %v3865_v57, %v6260_v5 }
 0x5c2   : > { %v2269_v40 = vpack.c.bf16 %v2213_v20, %v2211_v7  ;;  %v2268_v2 = vpack.c.bf16 %v2212_v62, %v2210_v29 }
 0x5c3   : > { %2383 = vmatmul.mubr.bf16.gmra.mrb[68].mxu0 %v2264_v47 }
 0x5c4   : > { %2390 = vmatprep.mubr.bf16.mxu0 %v2267_v21 }
 0x5cb   : > { %2391 = vmatmul.mubr.bf16.gmra.mrb[72].mxu0 %v2266_v11 }
 0x5cc   : > { %2398 = vmatprep.mubr.bf16.mxu0 %v2269_v40 }
 0x5d3   : > { %2399 = vmatmul.mubr.bf16.gmra.mrb[76].mxu0 %v2268_v2 }
 0x5e6   : > { %v2096_v27 = vpop.xlane.xlu0 %2095 }
 0x5e7   : > { %3866 = vrcp.f32 %v2096_v27 }
 0x5e8   : > { %v2099_v42 = vpop.xlane.xlu1 %2098 }
 0x5e9   : > { %3868 = vrcp.f32 %v2099_v42 }
 0x5ea   : > { %v2102_v35 = vpop.xlane.xlu0 %2101 }
 0x5eb   : > { %3870 = vrcp.f32 %v2102_v35 }
 0x5ec   : > { %v2108_v8 = vpop.xlane.xlu1 %2107 }
 0x5ee   : > { %v2105_v45 = vpop.xlane.xlu0 %2104 }
 0x5ef   : > { %3872 = vrcp.f32 %v2105_v45 }
 0x5f0   : > { %3874 = vrcp.f32 %v2108_v8  ;;  %v2114_v39 = vpop.xlane.xlu1 %2113 }
 0x5f1   : > { %v3867_v55 = vpop.eup %3866 }
 0x5f2   : > { %v2111_v56 = vpop.xlane.xlu0 %2110  ;;  %v2215_v0 = vmul.f32 %v3867_v55, %v5628_v52  ;;  %v2214_v58 = vmul.f32 %v3867_v55, %v5624_v38 }
 0x5f3   : > { %3876 = vrcp.f32 %v2111_v56  ;;  %v3869_v47 = vpop.eup %3868 }
 0x5f4   : > { %v2120_v21 = vpop.xlane.xlu1 %2119  ;;  %v2217_v57 = vmul.f32 %v3869_v47, %v5634_v14  ;;  %v2216_v31 = vmul.f32 %v3869_v47, %v5631_v51 }
 0x5f5   : > { %v3871_v59 = vpop.eup %3870 }
 0x5f6   : > { %v2117_v20 = vpop.xlane.xlu0 %2116  ;;  %v2271_v4 = vpack.c.bf16 %v2217_v57, %v2215_v0  ;;  %v2270_v12 = vpack.c.bf16 %v2216_v31, %v2214_v58  ;;  %v2219_v53 = vmul.f32 %v3871_v59, %v5644_v23  ;;  %v2218_v2 = vmul.f32 %v3871_v59, %v5638_v63 }
 0x5f7   : > { %3878 = vrcp.f32 %v2117_v20 }
 0x5f8   : > { %v2126_v11 = vpop.xlane.xlu1 %2125  ;;  %2406 = vmatprep.mubr.bf16.mxu0 %v2271_v4  ;;  %3880 = vrcp.f32 %v2114_v39 }
 0x5f9   : > { %v3873_v7 = vpop.eup %3872  ;;  %2407 = vmatmul.mubr.bf16.gmra.mrb[80].mxu0 %v2270_v12 }
 0x5fa   : > { %v2123_v40 = vpop.xlane.xlu0 %2122  ;;  %v2221_v52 = vmul.f32 %v3873_v7, %v5662_v43  ;;  %v3875_v14 = vpop.eup %3874  ;;  %v2220_v38 = vmul.f32 %v3873_v7, %v5647_v6 }
 0x5fb   : > { %v2223_v27 = vmul.f32 %v3875_v14, %v5656_v10  ;;  %3882 = vrcp.f32 %v2123_v40  ;;  %v2222_v10 = vmul.f32 %v3875_v14, %v5650_v32 }
 0x5fc   : > { %v2273_v62 = vpack.c.bf16 %v2221_v52, %v2219_v53  ;;  %v2132_v5 = vpop.xlane.xlu1 %2131  ;;  %v2272_v35 = vpack.c.bf16 %v2220_v38, %v2218_v2  ;;  %3884 = vrcp.f32 %v2120_v21 }
 0x5fd   : > { %v3877_v51 = vpop.eup %3876 }
 0x5fe   : > { %2414 = vmatprep.mubr.bf16.mxu0 %v2273_v62  ;;  %v2129_v29 = vpop.xlane.xlu0 %2128  ;;  %v2225_v42 = vmul.f32 %v3877_v51, %v5679_v44  ;;  %v2224_v39 = vmul.f32 %v3877_v51, %v5665_v19 }
 0x5ff   : > { %3886 = vrcp.f32 %v2129_v29 }
 0x600   : > { %v2275_v8 = vpack.c.bf16 %v2225_v42, %v2223_v27  ;;  %v2138_v23 = vpop.xlane.xlu1 %2137  ;;  %v2274_v47 = vpack.c.bf16 %v2224_v39, %v2222_v10  ;;  %3888 = vrcp.f32 %v2126_v11 }
 0x601   : > { %v3879_v45 = vpop.eup %3878  ;;  %2415 = vmatmul.mubr.bf16.gmra.mrb[84].mxu0 %v2272_v35 }
 0x602   : > { %v2135_v43 = vpop.xlane.xlu0 %2134  ;;  %2422 = vmatprep.mubr.bf16.mxu0 %v2275_v8  ;;  %v3881_v6 = vpop.eup %3880  ;;  %v2229_v63 = vmul.f32 %v3879_v45, %v5695_v26  ;;  %v2228_v19 = vmul.f32 %v3879_v45, %v5682_v34 }
 0x603   : > { %v2227_v44 = vmul.f32 %v3881_v6, %v5674_v61  ;;  %v2226_v61 = vmul.f32 %v3881_v6, %v5668_v50 }
 0x604   : > { %v5831_v55 = vpop.xlane.xlu1 %2143 }
 0x605   : > { %v2277_v57 = vpack.c.bf16 %v2229_v63, %v2227_v44  ;;  %v3883_v21 = vpop.eup %3882  ;;  %v2276_v4 = vpack.c.bf16 %v2228_v19, %v2226_v61  ;;  %v6261_v44 = vld [vmem:[#allocation34_spill] sm:$0xff] }
 0x606   : > { %v2141_v56 = vpop.xlane.xlu0 %2140  ;;  %v3885_v31 = vpop.eup %3884  ;;  %v2233_v26 = vmul.f32 %v3883_v21, %v5709_v30  ;;  %v2232_v53 = vmul.f32 %v3883_v21, %v5698_v3  ;;  %v6264_v21 = vld [vmem:[#allocation37_spill] sm:$0xff] }
 0x607   : > { %v2231_v59 = vmul.f32 %v3885_v31, %v5690_v54  ;;  %v2230_v50 = vmul.f32 %v3885_v31, %v5685_v18 }
 0x609   : > { %v2156_v0 = vpop.xlane.xlu1 %2155  ;;  %2423 = vmatmul.mubr.bf16.gmra.mrb[88].mxu0 %v2274_v47  ;;  %v2279_v12 = vpack.c.bf16 %v2233_v26, %v2231_v59  ;;  %v3887_v7 = vpop.eup %3886  ;;  %v2278_v62 = vpack.c.bf16 %v2232_v53, %v2230_v50  ;;  %v6265_v26 = vld [vmem:[#allocation38_spill] sm:$0xff]  ;;  %v6267_v59 = vld [vmem:[#allocation36_spill] sm:$0xff] }
 0x60a   : > { %v2147_v58 = vpop.xlane.xlu0 %2146  ;;  %2430 = vmatprep.mubr.bf16.mxu0 %v2277_v57  ;;  %3890 = vrcp.f32 %v2156_v0  ;;  %v3889_v34 = vpop.eup %3888  ;;  %v2237_v30 = vmul.f32 %v3887_v7, %v5725_v22 }
 0x60b   : > { %v2235_v54 = vmul.f32 %v3889_v34, %v5705_v33  ;;  %v2236_v33 = vmul.f32 %v3887_v7, %v5712_v9  ;;  %v2234_v8 = vmul.f32 %v3889_v34, %v5701_v37  ;;  %v6269_v34 = vld [vmem:[#allocation43_spill] sm:$0xff] }
 0x60d   : > { %v5837_v20 = vpop.xlane.xlu1 %2149  ;;  %v2281_v51 = vpack.c.bf16 %v2237_v30, %v2235_v54  ;;  %v6270_v30 = vld [vmem:[#allocation40_spill] sm:$0xff] }
 0x60e   : > { %v2159_v32 = vpop.xlane.xlu0 %2158 }
 0x60f   : > { %3892 = vrcp.f32 %v2159_v32 }
 0x610   : > { %3894 = vrcp.f32 %v2135_v43 }
 0x611   : > { %3896 = vrcp.f32 %v2132_v5  ;;  %v2162_v11 = vpop.xlane.xlu1 %2161  ;;  %2431 = vmatmul.mubr.bf16.gmra.mrb[92].mxu0 %v2276_v4 }
 0x612   : > { %v2153_v40 = vpop.xlane.xlu0 %2152  ;;  %2438 = vmatprep.mubr.bf16.mxu0 %v2279_v12  ;;  %3898 = vrcp.f32 %v2162_v11  ;;  %v6268_v12 = vld [vmem:[#allocation42_spill] sm:$0xff] }
 0x614   : > { %v3891_v14 = vpop.eup %3890 }
 0x615   : > { %v2254_v29 = vmul.f32 %v3891_v14, %v5768_v46  ;;  %v2255_v22 = vmul.f32 %v3891_v14, %v5770_v28 }
 0x616   : > { %v2165_v52 = vpop.xlane.xlu0 %2164 }
 0x617   : > { %3900 = vrcp.f32 %v2165_v52 }
 0x618   : > { %3902 = vrcp.f32 %v2141_v56 }
 0x619   : > { %v3893_v38 = vpop.eup %3892  ;;  %3904 = vrcp.f32 %v2138_v23  ;;  %2439 = vmatmul.mubr.bf16.gmra.mrb[96].mxu0 %v2278_v62 }
 0x61a   : > { %v3895_v5 = vpop.eup %3894  ;;  %v2256_v3 = vmul.f32 %v3893_v38, %v5780_v1  ;;  %v2257_v2 = vmul.f32 %v3893_v38, %v5782_v49  ;;  %2446 = vmatprep.mubr.bf16.mxu0 %v2281_v51  ;;  %3906 = vrcp.f32 %v2147_v58  ;;  %v2280_v1 = vpack.c.bf16 %v2236_v33, %v2234_v8 }
 0x61b   : > { %v3897_v18 = vpop.eup %3896  ;;  %v2241_v35 = vmul.f32 %v3895_v5, %v5740_v24  ;;  %3908 = vrcp.f32 %v5831_v55  ;;  %v2240_v63 = vmul.f32 %v3895_v5, %v5727_v60  ;;  %v6262_v60 = vld [vmem:[#allocation39_spill] sm:$0xff] }
 0x61c   : > { %v2291_v27 = vpack.c.bf16 %v2257_v2, %v2255_v22  ;;  %v2290_v42 = vpack.c.bf16 %v2256_v3, %v2254_v29  ;;  %v3899_v23 = vpop.eup %3898  ;;  %v2239_v46 = vmul.f32 %v3897_v18, %v5721_v15  ;;  %v2238_v55 = vmul.f32 %v3897_v18, %v5715_v17 }
 0x61d   : > { %v2259_v43 = vmul.f32 %v3899_v23, %v5792_v25  ;;  %v2258_v24 = vmul.f32 %v3899_v23, %v5790_v13  ;;  %3910 = vrcp.f32 %v2153_v40 }
 0x61e   : > { %2486 = vmatprep.mubr.bf16.mxu1 %v2291_v27  ;;  %v2283_v49 = vpack.c.bf16 %v2241_v35, %v2239_v46  ;;  %3912 = vrcp.f32 %v5837_v20  ;;  %v6266_v20 = vld [vmem:[#allocation41_spill] sm:$0xff] }
 0x61f   : > { %2487 = vmatmul.mubr.bf16.vlgmr.msra.gmra.mrb[128].mxu1 %v2290_v42 }
 0x621   : > { %v3901_v28 = vpop.eup %3900  ;;  %2447 = vmatmul.mubr.bf16.gmra.mrb[100].mxu0 %v2280_v1 }
 0x622   : > { %v3903_v45 = vpop.eup %3902  ;;  %v2261_v9 = vmul.f32 %v3901_v28, %v5800_v48  ;;  %v2260_v37 = vmul.f32 %v3901_v28, %v5796_v36  ;;  %2454 = vmatprep.mubr.bf16.mxu0 %v2283_v49  ;;  %v2282_v48 = vpack.c.bf16 %v2240_v63, %v2238_v55 }
 0x623   : > { %v3905_v6 = vpop.eup %3904  ;;  %v2245_v56 = vmul.f32 %v3903_v45, %v5754_v41  ;;  %v2244_v47 = vmul.f32 %v3903_v45, %v6261_v44  ;;  %v6263_v41 = vld [vmem:[#allocation35_spill] sm:$0xff] }
 0x624   : > { %v2293_v39 = vpack.c.bf16 %v2261_v9, %v2259_v43  ;;  %v2292_v15 = vpack.c.bf16 %v2260_v37, %v2258_v24  ;;  %v2243_v25 = vmul.f32 %v3905_v6, %v5736_v16  ;;  %v3907_v13 = vpop.eup %3906  ;;  %v2242_v57 = vmul.f32 %v3905_v6, %v6263_v41 }
 0x625   : > { %v3909_v36 = vpop.eup %3908  ;;  %v2249_v0 = vmul.f32 %v3907_v13, %v6262_v60  ;;  %v2248_v32 = vmul.f32 %v3907_v13, %v6265_v26 }
 0x626   : > { %2494 = vmatprep.mubr.bf16.mxu1 %v2293_v39  ;;  %v2285_v10 = vpack.c.bf16 %v2245_v56, %v2243_v25  ;;  %v2247_v17 = vmul.f32 %v3909_v36, %v6264_v21  ;;  %v2284_v58 = vpack.c.bf16 %v2244_v47, %v2242_v57  ;;  %v2246_v4 = vmul.f32 %v3909_v36, %v6267_v59 }
 0x627   : > { %2495 = vmatmul.mubr.bf16.gmra.mrb[132].mxu1 %v2292_v15  ;;  %v3911_v16 = vpop.eup %3910 }
 0x628   : > { %v2287_v31 = vpack.c.bf16 %v2249_v0, %v2247_v17  ;;  %v3913_v19 = vpop.eup %3912  ;;  %v2253_v61 = vmul.f32 %v3911_v16, %v6266_v20  ;;  %v2286_v11 = vpack.c.bf16 %v2248_v32, %v2246_v4  ;;  %v2252_v53 = vmul.f32 %v3911_v16, %v6269_v34 }
 0x629   : > { %2455 = vmatmul.mubr.bf16.gmra.mrb[104].mxu0 %v2282_v48  ;;  %v2251_v7 = vmul.f32 %v3913_v19, %v6268_v12  ;;  %v2250_v52 = vmul.f32 %v3913_v19, %v6270_v30 }
 0x62a   : > { %2462 = vmatprep.mubr.bf16.mxu0 %v2285_v10 }
 0x62b   : > { %v2289_v40 = vpack.c.bf16 %v2253_v61, %v2251_v7  ;;  %v2288_v50 = vpack.c.bf16 %v2252_v53, %v2250_v52 }
 0x631   : > { %2463 = vmatmul.mubr.bf16.gmra.mrb[108].mxu0 %v2284_v58 }
 0x632   : > { %2470 = vmatprep.mubr.bf16.mxu0 %v2287_v31 }
 0x639   : > { %2471 = vmatmul.mubr.bf16.gmra.mrb[112].mxu0 %v2286_v11 }
 0x63a   : > { %2478 = vmatprep.mubr.bf16.mxu0 %v2289_v40 }
 0x641   : > { %2479 = vmatmul.mubr.bf16.gmra.mrb[116].mxu0 %v2288_v50 }
 0x68e   : > { %v3292_v14 = vpop.f32.mrb[64].mxu0 }
 0x68f   : > { %v3293_v54 = vpop.f32.mrb[65].mxu0 }
 0x690   : > { %v3294_v62 = vadd.f32 %v3293_v54, %v3292_v14  ;;  %v3295_v38 = vpop.f32.mrb[66].mxu0 }
 0x691   : > { %v3296_v51 = vpop.f32.mrb[67].mxu0 }
 0x692   : > { %v3297_v5 = vadd.f32 %v3296_v51, %v3295_v38 }
 0x694   : > { %v3434_v29 = vpack.i.bf16 %v3297_v5, %v3294_v62 }
 0x696   : > { %v3298_v3 = vpop.f32.mrb[68].mxu0  ;;  %3435 = vrot.lane.b32.xlu1 %v3434_v29, %s3946_s14 }
 0x697   : > { %v3299_v22 = vpop.f32.mrb[69].mxu0 }
 0x698   : > { %v3300_v2 = vadd.f32 %v3299_v22, %v3298_v3  ;;  %v3301_v18 = vpop.f32.mrb[70].mxu0 }
 0x699   : > { %v3302_v27 = vpop.f32.mrb[71].mxu0 }
 0x69a   : > { %v3303_v42 = vadd.f32 %v3302_v27, %v3301_v18 }
 0x69c   : > { %v3439_v33 = vpack.i.bf16 %v3303_v42, %v3300_v2 }
 0x69e   : > { %v3304_v35 = vpop.f32.mrb[72].mxu0  ;;  %3440 = vrot.lane.b32.xlu0 %v3439_v33, %s3946_s14 }
 0x69f   : > { %v3305_v8 = vpop.f32.mrb[73].mxu0 }
 0x6a0   : > { %v3306_v23 = vadd.f32 %v3305_v8, %v3304_v35  ;;  %v3307_v46 = vpop.f32.mrb[74].mxu0 }
 0x6a1   : > { %v3308_v1 = vpop.f32.mrb[75].mxu0 }
 0x6a2   : > { %v3309_v28 = vadd.f32 %v3308_v1, %v3307_v46 }
 0x6a4   : > { %v3444_v49 = vpack.i.bf16 %v3309_v28, %v3306_v23 }
 0x6a6   : > { %v3310_v45 = vpop.f32.mrb[76].mxu0  ;;  %3445 = vrot.lane.b32.xlu1 %v3444_v49, %s3946_s14 }
 0x6a7   : > { %v3311_v43 = vpop.f32.mrb[77].mxu0 }
 0x6a8   : > { %v3312_v9 = vadd.f32 %v3311_v43, %v3310_v45  ;;  %v3313_v24 = vpop.f32.mrb[78].mxu0 }
 0x6a9   : > { %v3314_v37 = vpop.f32.mrb[79].mxu0 }
 0x6aa   : > { %v3315_v6 = vadd.f32 %v3314_v37, %v3313_v24 }
 0x6ac   : > { %v3449_v39 = vpack.i.bf16 %v3315_v6, %v3312_v9 }
 0x6ae   : > { %3450 = vrot.lane.b32.xlu1 %v3449_v39, %s3946_s14 }
 0x6cc   : > { %v3316_v15 = vpop.f32.mrb[80].mxu0 }
 0x6cd   : > { %v3317_v63 = vpop.f32.mrb[81].mxu0 }
 0x6ce   : > { %v3318_v56 = vadd.f32 %v3317_v63, %v3316_v15  ;;  %v3319_v55 = vpop.f32.mrb[82].mxu0 }
 0x6cf   : > { %v3320_v25 = vpop.f32.mrb[83].mxu0 }
 0x6d0   : > { %v3321_v48 = vadd.f32 %v3320_v25, %v3319_v55 }
 0x6d2   : > { %v3454_v10 = vpack.i.bf16 %v3321_v48, %v3318_v56 }
 0x6d4   : > { %3455 = vrot.lane.b32.xlu0 %v3454_v10, %s3946_s14  ;;  %v3322_v13 = vpop.f32.mrb[84].mxu0 }
 0x6d5   : > { %v3323_v36 = vpop.f32.mrb[85].mxu0 }
 0x6d6   : > { %v3324_v44 = vadd.f32 %v3323_v36, %v3322_v13  ;;  %v3325_v47 = vpop.f32.mrb[86].mxu0 }
 0x6d7   : > { %v3326_v60 = vpop.f32.mrb[87].mxu0 }
 0x6d8   : > { %v3327_v0 = vadd.f32 %v3326_v60, %v3325_v47  ;;  %v6272_v60 = vld [vmem:[#allocation15_spill] sm:$0xff] }
 0x6da   : > { %v3459_v41 = vpack.i.bf16 %v3327_v0, %v3324_v44  ;;  %v6271_v44 = vld [vmem:[#allocation16_spill] sm:$0xff] }
 0x6dc   : > { %3460 = vrot.lane.b32.xlu1 %v3459_v41, %s3946_s14  ;;  %v3328_v57 = vpop.f32.mrb[88].mxu0 }
 0x6dd   : > { %v3329_v21 = vpop.f32.mrb[89].mxu0 }
 0x6de   : > { %v3330_v17 = vadd.f32 %v3329_v21, %v3328_v57  ;;  %v3331_v58 = vpop.f32.mrb[90].mxu0 }
 0x6df   : > { %v3332_v31 = vpop.f32.mrb[91].mxu0 }
 0x6e0   : > { %v3333_v16 = vadd.f32 %v3332_v31, %v3331_v58 }
 0x6e2   : > { %v3464_v19 = vpack.i.bf16 %v3333_v16, %v3330_v17 }
 0x6e4   : > { %3465 = vrot.lane.b32.xlu0 %v3464_v19, %s3946_s14  ;;  %v3334_v26 = vpop.f32.mrb[92].mxu0 }
 0x6e5   : > { %v3335_v32 = vpop.f32.mrb[93].mxu0 }
 0x6e6   : > { %v3336_v20 = vadd.f32 %v3335_v32, %v3334_v26  ;;  %v3337_v61 = vpop.f32.mrb[94].mxu0 }
 0x6e7   : > { %v3338_v59 = vpop.f32.mrb[95].mxu0 }
 0x6e8   : > { %v3339_v4 = vadd.f32 %v3338_v59, %v3337_v61  ;;  %v6273_v59 = vld [vmem:[#allocation14_spill] sm:$0xff] }
 0x6ea   : > { %v3469_v12 = vpack.i.bf16 %v3339_v4, %v3336_v20 }
 0x6ec   : > { %3470 = vrot.lane.b32.xlu1 %v3469_v12, %s3946_s14  ;;  %v3340_v7 = vpop.f32.mrb[96].mxu0  ;;  %v6274_v12 = vld [vmem:[#allocation17_spill] sm:$0xff] }
 0x6ed   : > { %v3341_v11 = vpop.f32.mrb[97].mxu0 }
 0x6ee   : > { %v3342_v40 = vadd.f32 %v3341_v11, %v3340_v7  ;;  %v3343_v34 = vpop.f32.mrb[98].mxu0 }
 0x6ef   : > { %v3344_v53 = vpop.f32.mrb[99].mxu0 }
 0x6f0   : > { %v3345_v30 = vadd.f32 %v3344_v53, %v3343_v34 }
 0x6f2   : > { %v3376_v52 = vpop.f32.mrb[128].mxu1  ;;  %v3474_v50 = vpack.i.bf16 %v3345_v30, %v3342_v40 }
 0x6f3   : > { %v3377_v14 = vpop.f32.mrb[129].mxu1 }
 0x6f4   : > { %v5882_v54 = vadd.f32 %v3377_v14, %v3376_v52  ;;  %v3379_v62 = vpop.f32.mrb[130].mxu1  ;;  %3475 = vrot.lane.b32.xlu0 %v3474_v50, %s3946_s14  ;;  %v3346_v38 = vpop.f32.mrb[100].mxu0 }
 0x6f5   : > { %v3380_v51 = vpop.f32.mrb[131].mxu1  ;;  %v3347_v5 = vpop.f32.mrb[101].mxu0 }
 0x6f6   : > { %v5885_v29 = vadd.f32 %v3380_v51, %v3379_v62  ;;  %v3348_v3 = vadd.f32 %v3347_v5, %v3346_v38  ;;  %v3349_v22 = vpop.f32.mrb[102].mxu0  ;;  %v6275_v5 = vld [vmem:[#allocation18_spill] sm:$0xff] }
 0x6f7   : > { %v3350_v18 = vpop.f32.mrb[103].mxu0 }
 0x6f8   : > { %v3504_v2 = vpack.i.bf16 %v5885_v29, %v5882_v54  ;;  %v3351_v27 = vadd.f32 %v3350_v18, %v3349_v22 }
 0x6fa   : > { %v3382_v42 = vpop.f32.mrb[132].mxu1  ;;  %v3479_v33 = vpack.i.bf16 %v3351_v27, %v3348_v3  ;;  %v6276_v3 = vld [vmem:[#allocation19_spill] sm:$0xff] }
 0x6fb   : > { %v3383_v35 = vpop.f32.mrb[133].mxu1 }
 0x6fc   : > { %v5889_v8 = vadd.f32 %v3383_v35, %v3382_v42  ;;  %v3385_v23 = vpop.f32.mrb[134].mxu1  ;;  %3480 = vrot.lane.b32.xlu1 %v3479_v33, %s3946_s14  ;;  %v3352_v46 = vpop.f32.mrb[104].mxu0  ;;  %v6277_v35 = vld [vmem:[#allocation20_spill] sm:$0xff] }
 0x6fd   : > { %v3386_v1 = vpop.f32.mrb[135].mxu1  ;;  %v3353_v28 = vpop.f32.mrb[105].mxu0 }
 0x6fe   : > { %v5892_v49 = vadd.f32 %v3386_v1, %v3385_v23  ;;  %v3354_v45 = vadd.f32 %v3353_v28, %v3352_v46  ;;  %v3355_v43 = vpop.f32.mrb[106].mxu0  ;;  %v6278_v23 = vld [vmem:[#allocation21_spill] sm:$0xff] }
 0x6ff   : > { %v3356_v24 = vpop.f32.mrb[107].mxu0 }
 0x700   : > { %v3509_v9 = vpack.i.bf16 %v5892_v49, %v5889_v8  ;;  %v3357_v37 = vadd.f32 %v3356_v24, %v3355_v43 }
 0x702   : > { %v3484_v6 = vpack.i.bf16 %v3357_v37, %v3354_v45  ;;  %v6280_v37 = vld [vmem:[#allocation23_spill] sm:$0xff] }
 0x704   : > { %3485 = vrot.lane.b32.xlu0 %v3484_v6, %s3946_s14  ;;  %v3358_v39 = vpop.f32.mrb[108].mxu0 }
 0x705   : > { %v3359_v15 = vpop.f32.mrb[109].mxu0 }
 0x706   : > { %v3360_v63 = vadd.f32 %v3359_v15, %v3358_v39  ;;  %v3361_v56 = vpop.f32.mrb[110].mxu0 }
 0x707   : > { %v3362_v55 = vpop.f32.mrb[111].mxu0 }
 0x708   : > { %v3363_v25 = vadd.f32 %v3362_v55, %v3361_v56  ;;  %v3436_v48 = vpop.permute.xlu1 %3435 }
 0x709   : > { %v3438_v10 = vunpack.i.h.bf16 %v3436_v48  ;;  %v3437_v13 = vunpack.i.l.bf16 %v3436_v48 }
 0x70a   : > { %v3489_v36 = vpack.i.bf16 %v3363_v25, %v3360_v63  ;;  %v6281_v25 = vld [vmem:[#allocation7_spill] sm:$0xff] }
 0x70b   : > { %v2632_v47 = vsel %vm353_vm0, %v6271_v44, %v3438_v10  ;;  %v2631_v0 = vsel %vm353_vm0, %v6272_v60, %v3437_v13  ;;  %v6282_v10 = vld [vmem:[#allocation24_spill] sm:$0xff] }
 0x70c   : > { %v3037_v41 = vpack.c.bf16 %v2632_v47, %v2632_v47  ;;  %v3036_v57 = vpack.c.bf16 %v2631_v0, %v2631_v0  ;;  %3490 = vrot.lane.b32.xlu1 %v3489_v36, %s3946_s14  ;;  %v3364_v21 = vpop.f32.mrb[112].mxu0 }
 0x70d   : > { %v3365_v17 = vpop.f32.mrb[113].mxu0 }
 0x70e   : > { %2793 = vst.msk [vmem:[%s5902_s23 + $0x4] sm:$0xf] %vm2791_vm1, %v3037_v41  ;;  %2792 = vst.msk [vmem:[%s5902_s23] sm:$0xf] %vm2791_vm1, %v3036_v57  ;;  %v3366_v58 = vadd.f32 %v3365_v17, %v3364_v21  ;;  %v3367_v31 = vpop.f32.mrb[114].mxu0  ;;  %v6283_v41 = vld [vmem:[#allocation3_spill] sm:$0xff] }
 0x70f   : > { %v3368_v16 = vpop.f32.mrb[115].mxu0  ;;  %v6284_v21 = vld [vmem:[#allocation25_spill] sm:$0xff] }
 0x710   : > { %v3369_v19 = vadd.f32 %v3368_v16, %v3367_v31  ;;  %v3441_v26 = vpop.permute.xlu0 %3440 }
 0x711   : > { %v3443_v32 = vunpack.i.h.bf16 %v3441_v26  ;;  %v3442_v20 = vunpack.i.l.bf16 %v3441_v26 }
 0x712   : > { %v3494_v61 = vpack.i.bf16 %v3369_v19, %v3366_v58 }
 0x713   : > { %v2634_v4 = vsel %vm353_vm0, %v6273_v59, %v3443_v32  ;;  %v2633_v7 = vsel %vm353_vm0, %v6274_v12, %v3442_v20  ;;  %v6285_v32 = vld [vmem:[#allocation11_spill] sm:$0xff] }
 0x714   : > { %v3039_v11 = vpack.c.bf16 %v2634_v4, %v2634_v4  ;;  %v3038_v40 = vpack.c.bf16 %v2633_v7, %v2633_v7  ;;  %3495 = vrot.lane.b32.xlu0 %v3494_v61, %s3946_s14  ;;  %v3370_v34 = vpop.f32.mrb[116].mxu0  ;;  %v6286_v61 = vld [vmem:[#allocation6_spill] sm:$0xff] }
 0x715   : > { %v3371_v53 = vpop.f32.mrb[117].mxu0 }
 0x716   : > { %2795 = vst.msk [vmem:[%s5902_s23 + $0xc] sm:$0xf] %vm2791_vm1, %v3039_v11  ;;  %2794 = vst.msk [vmem:[%s5902_s23 + $0x8] sm:$0xf] %vm2791_vm1, %v3038_v40  ;;  %v3372_v30 = vadd.f32 %v3371_v53, %v3370_v34  ;;  %v3373_v52 = vpop.f32.mrb[118].mxu0  ;;  %v6287_v34 = vld [vmem:[#allocation5_spill] sm:$0xff] }
 0x717   : > { %v3374_v50 = vpop.f32.mrb[119].mxu0 }
 0x718   : > { %v3375_v14 = vadd.f32 %v3374_v50, %v3373_v52  ;;  %v3446_v54 = vpop.permute.xlu1 %3445  ;;  %3505 = vrot.lane.b32.xlu0 %v3504_v2, %s3946_s14 }
 0x719   : > { %v3448_v62 = vunpack.i.h.bf16 %v3446_v54  ;;  %v3447_v38 = vunpack.i.l.bf16 %v3446_v54 }
 0x71a   : > { %v3499_v51 = vpack.i.bf16 %v3375_v14, %v3372_v30  ;;  %v6288_v30 = vld [vmem:[#allocation2_spill] sm:$0xff] }
 0x71b   : > { %v2636_v29 = vsel %vm353_vm0, %v6275_v5, %v3448_v62  ;;  %v2635_v22 = vsel %vm353_vm0, %v6276_v3, %v3447_v38 }
 0x71c   : > { %v3041_v18 = vpack.c.bf16 %v2636_v29, %v2636_v29  ;;  %v3040_v27 = vpack.c.bf16 %v2635_v22, %v2635_v22  ;;  %3500 = vrot.lane.b32.xlu1 %v3499_v51, %s3946_s14  ;;  %v6289_v51 = vld [vmem:[#allocation13_spill] sm:$0xff]  ;;  %v6290_v29 = vld [vmem:[#allocation10_spill] sm:$0xff] }
 0x71e   : > { %2797 = vst.msk [vmem:[%s5902_s23 + $0x14] sm:$0xf] %vm2791_vm1, %v3041_v18  ;;  %2796 = vst.msk [vmem:[%s5902_s23 + $0x10] sm:$0xf] %vm2791_vm1, %v3040_v27 }
 0x720   : > { %v3451_v2 = vpop.permute.xlu1 %3450  ;;  %3510 = vrot.lane.b32.xlu1 %v3509_v9, %s3946_s14  ;;  %v6279_v9 = vld [vmem:[#allocation22_spill] sm:$0xff] }
 0x721   : > { %v3453_v42 = vunpack.i.h.bf16 %v3451_v2  ;;  %v3452_v33 = vunpack.i.l.bf16 %v3451_v2 }
 0x723   : > { %v2638_v8 = vsel %vm353_vm0, %v6277_v35, %v3453_v42  ;;  %v2637_v46 = vsel %vm353_vm0, %v6278_v23, %v3452_v33  ;;  %v6291_v33 = vld [vmem:[#allocation9_spill] sm:$0xff] }
 0x724   : > { %v3043_v1 = vpack.c.bf16 %v2638_v8, %v2638_v8  ;;  %v3042_v28 = vpack.c.bf16 %v2637_v46, %v2637_v46  ;;  %v6292_v8 = vld [vmem:[#allocation4_spill] sm:$0xff] }
 0x726   : > { %2799 = vst.msk [vmem:[%s5902_s23 + $0x1c] sm:$0xf] %vm2791_vm1, %v3043_v1  ;;  %2798 = vst.msk [vmem:[%s5902_s23 + $0x18] sm:$0xf] %vm2791_vm1, %v3042_v28 }
 0x746   : > { %v3456_v49 = vpop.permute.xlu0 %3455 }
 0x747   : > { %v3458_v45 = vunpack.i.h.bf16 %v3456_v49  ;;  %v3457_v43 = vunpack.i.l.bf16 %v3456_v49 }
 0x749   : > { %v2640_v24 = vsel %vm353_vm0, %v6279_v9, %v3458_v45  ;;  %v2639_v6 = vsel %vm353_vm0, %v6280_v37, %v3457_v43  ;;  %v6293_v43 = vld [vmem:[#allocation29_spill] sm:$0xff] }
 0x74a   : > { %v3045_v39 = vpack.c.bf16 %v2640_v24, %v2640_v24  ;;  %v3044_v15 = vpack.c.bf16 %v2639_v6, %v2639_v6  ;;  %v6294_v24 = vld [vmem:[#allocation12_spill] sm:$0xff] }
 0x74c   : > { %2801 = vst.msk [vmem:[%s5902_s23 + $0x24] sm:$0xf] %vm2791_vm1, %v3045_v39  ;;  %2800 = vst.msk [vmem:[%s5902_s23 + $0x20] sm:$0xf] %vm2791_vm1, %v3044_v15 }
 0x74e   : > { %v3461_v63 = vpop.permute.xlu1 %3460 }
 0x74f   : > { %v3463_v56 = vunpack.i.h.bf16 %v3461_v63  ;;  %v3462_v55 = vunpack.i.l.bf16 %v3461_v63 }
 0x751   : > { %v2642_v48 = vsel %vm353_vm0, %v6281_v25, %v3463_v56  ;;  %v2641_v13 = vsel %vm353_vm0, %v6282_v10, %v3462_v55  ;;  %v6295_v55 = vld [vmem:[#allocation27_spill] sm:$0xff] }
 0x752   : > { %v3047_v36 = vpack.c.bf16 %v2642_v48, %v2642_v48  ;;  %v3046_v44 = vpack.c.bf16 %v2641_v13, %v2641_v13  ;;  %v6296_v48 = vld [vmem:[#allocation8_spill] sm:$0xff] }
 0x754   : > { %2803 = vst.msk [vmem:[%s5902_s23 + $0x2c] sm:$0xf] %vm2791_vm1, %v3047_v36  ;;  %2802 = vst.msk [vmem:[%s5902_s23 + $0x28] sm:$0xf] %vm2791_vm1, %v3046_v44 }
 0x756   : > { %v3466_v47 = vpop.permute.xlu0 %3465 }
 0x757   : > { %v3468_v60 = vunpack.i.h.bf16 %v3466_v47  ;;  %v3467_v0 = vunpack.i.l.bf16 %v3466_v47 }
 0x759   : > { %v2644_v57 = vsel %vm353_vm0, %v6283_v41, %v3468_v60  ;;  %v2643_v17 = vsel %vm353_vm0, %v6284_v21, %v3467_v0  ;;  %v6297_v0 = vld [vmem:[#allocation31_spill] sm:$0xff] }
 0x75a   : > { %v3049_v58 = vpack.c.bf16 %v2644_v57, %v2644_v57  ;;  %v3048_v31 = vpack.c.bf16 %v2643_v17, %v2643_v17  ;;  %v6298_v57 = vld [vmem:[#allocation30_spill] sm:$0xff] }
 0x75c   : > { %2805 = vst.msk [vmem:[%s5902_s23 + $0x34] sm:$0xf] %vm2791_vm1, %v3049_v58  ;;  %2804 = vst.msk [vmem:[%s5902_s23 + $0x30] sm:$0xf] %vm2791_vm1, %v3048_v31 }
 0x75e   : > { %v3471_v16 = vpop.permute.xlu1 %3470 }
 0x75f   : > { %v3473_v19 = vunpack.i.h.bf16 %v3471_v16  ;;  %v3472_v26 = vunpack.i.l.bf16 %v3471_v16 }
 0x761   : > { %v2646_v20 = vsel %vm353_vm0, %v6285_v32, %v3473_v19  ;;  %v2645_v59 = vsel %vm353_vm0, %v6286_v61, %v3472_v26  ;;  %v6299_v26 = vld [vmem:[#allocation26_spill] sm:$0xff] }
 0x762   : > { %v3051_v4 = vpack.c.bf16 %v2646_v20, %v2646_v20  ;;  %v3050_v12 = vpack.c.bf16 %v2645_v59, %v2645_v59  ;;  %v6300_v20 = vld [vmem:[#allocation28_spill] sm:$0xff] }
 0x764   : > { %2807 = vst.msk [vmem:[%s5902_s23 + $0x3c] sm:$0xf] %vm2791_vm1, %v3051_v4  ;;  %2806 = vst.msk [vmem:[%s5902_s23 + $0x38] sm:$0xf] %vm2791_vm1, %v3050_v12 }
 0x766   : > { %v3476_v7 = vpop.permute.xlu0 %3475 }
 0x767   : > { %v3478_v11 = vunpack.i.h.bf16 %v3476_v7  ;;  %v3477_v40 = vunpack.i.l.bf16 %v3476_v7 }
 0x769   : > { %v2648_v53 = vsel %vm353_vm0, %v6287_v34, %v3478_v11  ;;  %v2647_v52 = vsel %vm353_vm0, %v6288_v30, %v3477_v40  ;;  %v6301_v40 = vld [vmem:[#allocation33_spill] sm:$0xff] }
 0x76a   : > { %v3053_v50 = vpack.c.bf16 %v2648_v53, %v2648_v53  ;;  %v3052_v14 = vpack.c.bf16 %v2647_v52, %v2647_v52  ;;  %v6302_v53 = vld [vmem:[#allocation32_spill] sm:$0xff] }
 0x76c   : > { %2809 = vst.msk [vmem:[%s5902_s23 + $0x44] sm:$0xf] %vm2791_vm1, %v3053_v50  ;;  %2808 = vst.msk [vmem:[%s5902_s23 + $0x40] sm:$0xf] %vm2791_vm1, %v3052_v14 }
 0x76e   : > { %v3481_v54 = vpop.permute.xlu1 %3480 }
 0x76f   : > { %v3483_v62 = vunpack.i.h.bf16 %v3481_v54  ;;  %v3482_v38 = vunpack.i.l.bf16 %v3481_v54 }
 0x771   : > { %v2650_v5 = vsel %vm353_vm0, %v6289_v51, %v3483_v62  ;;  %v2649_v3 = vsel %vm353_vm0, %v6290_v29, %v3482_v38 }
 0x772   : > { %v3055_v22 = vpack.c.bf16 %v2650_v5, %v2650_v5  ;;  %v3054_v18 = vpack.c.bf16 %v2649_v3, %v2649_v3 }
 0x774   : > { %2811 = vst.msk [vmem:[%s5902_s23 + $0x4c] sm:$0xf] %vm2791_vm1, %v3055_v22  ;;  %2810 = vst.msk [vmem:[%s5902_s23 + $0x48] sm:$0xf] %vm2791_vm1, %v3054_v18 }
 0x776   : > { %v3486_v27 = vpop.permute.xlu0 %3485 }
 0x777   : > { %v3488_v2 = vunpack.i.h.bf16 %v3486_v27  ;;  %v3487_v42 = vunpack.i.l.bf16 %v3486_v27 }
 0x779   : > { %v2652_v35 = vsel %vm353_vm0, %v6291_v33, %v3488_v2  ;;  %v2651_v23 = vsel %vm353_vm0, %v6292_v8, %v3487_v42 }
 0x77a   : > { %v3057_v46 = vpack.c.bf16 %v2652_v35, %v2652_v35  ;;  %v3056_v1 = vpack.c.bf16 %v2651_v23, %v2651_v23 }
 0x77c   : > { %2813 = vst.msk [vmem:[%s5902_s23 + $0x54] sm:$0xf] %vm2791_vm1, %v3057_v46  ;;  %2812 = vst.msk [vmem:[%s5902_s23 + $0x50] sm:$0xf] %vm2791_vm1, %v3056_v1 }
 0x77e   : > { %v3491_v28 = vpop.permute.xlu1 %3490 }
 0x77f   : > { %v3493_v49 = vunpack.i.h.bf16 %v3491_v28  ;;  %v3492_v45 = vunpack.i.l.bf16 %v3491_v28 }
 0x781   : > { %v2654_v9 = vsel %vm353_vm0, %v6293_v43, %v3493_v49  ;;  %v2653_v37 = vsel %vm353_vm0, %v6294_v24, %v3492_v45 }
 0x782   : > { %v3059_v6 = vpack.c.bf16 %v2654_v9, %v2654_v9  ;;  %v3058_v39 = vpack.c.bf16 %v2653_v37, %v2653_v37 }
 0x784   : > { %2815 = vst.msk [vmem:[%s5902_s23 + $0x5c] sm:$0xf] %vm2791_vm1, %v3059_v6  ;;  %2814 = vst.msk [vmem:[%s5902_s23 + $0x58] sm:$0xf] %vm2791_vm1, %v3058_v39 }
 0x786   : > { %v3496_v15 = vpop.permute.xlu0 %3495 }
 0x787   : > { %v3498_v63 = vunpack.i.h.bf16 %v3496_v15  ;;  %v3497_v56 = vunpack.i.l.bf16 %v3496_v15 }
 0x789   : > { %v2656_v25 = vsel %vm353_vm0, %v6295_v55, %v3498_v63  ;;  %v2655_v10 = vsel %vm353_vm0, %v6296_v48, %v3497_v56 }
 0x78a   : > { %v3061_v13 = vpack.c.bf16 %v2656_v25, %v2656_v25  ;;  %v3060_v36 = vpack.c.bf16 %v2655_v10, %v2655_v10  ;;  %v3506_v44 = vpop.permute.xlu0 %3505 }
 0x78b   : > { %v3508_v47 = vunpack.i.h.bf16 %v3506_v44  ;;  %v3507_v60 = vunpack.i.l.bf16 %v3506_v44 }
 0x78c   : > { %2817 = vst.msk [vmem:[%s5902_s23 + $0x64] sm:$0xf] %vm2791_vm1, %v3061_v13  ;;  %2816 = vst.msk [vmem:[%s5902_s23 + $0x60] sm:$0xf] %vm2791_vm1, %v3060_v36 }
 0x78d   : > { %v2660_v41 = vsel %vm353_vm0, %v6297_v0, %v3508_v47  ;;  %v2659_v21 = vsel %vm353_vm0, %v6298_v57, %v3507_v60 }
 0x78e   : > { %v3065_v17 = vpack.c.bf16 %v2660_v41, %v2660_v41  ;;  %v3064_v58 = vpack.c.bf16 %v2659_v21, %v2659_v21  ;;  %v3501_v31 = vpop.permute.xlu1 %3500 }
 0x78f   : > { %v3503_v16 = vunpack.i.h.bf16 %v3501_v31  ;;  %v3502_v19 = vunpack.i.l.bf16 %v3501_v31 }
 0x790   : > { %2821 = vst.msk [vmem:[%s5902_s23 + $0x74] sm:$0xf] %vm2791_vm1, %v3065_v17  ;;  %2820 = vst.msk [vmem:[%s5902_s23 + $0x70] sm:$0xf] %vm2791_vm1, %v3064_v58 }
 0x791   : > { %v2658_v32 = vsel %vm353_vm0, %v6299_v26, %v3503_v16  ;;  %v2657_v61 = vsel %vm353_vm0, %v6300_v20, %v3502_v19 }
 0x792   : > { %v3063_v59 = vpack.c.bf16 %v2658_v32, %v2658_v32  ;;  %v3062_v4 = vpack.c.bf16 %v2657_v61, %v2657_v61  ;;  %v3511_v12 = vpop.permute.xlu1 %3510 }
 0x793   : > { %v3513_v7 = vunpack.i.h.bf16 %v3511_v12  ;;  %v3512_v11 = vunpack.i.l.bf16 %v3511_v12 }
 0x794   : > { %2819 = vst.msk [vmem:[%s5902_s23 + $0x6c] sm:$0xf] %vm2791_vm1, %v3063_v59  ;;  %2818 = vst.msk [vmem:[%s5902_s23 + $0x68] sm:$0xf] %vm2791_vm1, %v3062_v4 }
 0x795   : > { %v2662_v34 = vsel %vm353_vm0, %v6301_v40, %v3513_v7  ;;  %v2661_v30 = vsel %vm353_vm0, %v6302_v53, %v3512_v11 }
 0x796   : > { %v3067_v52 = vpack.c.bf16 %v2662_v34, %v2662_v34  ;;  %v3066_v50 = vpack.c.bf16 %v2661_v30, %v2661_v30 }
 0x798   : > { %2823 = vst.msk [vmem:[%s5902_s23 + $0x7c] sm:$0xf] %vm2791_vm1, %v3067_v52  ;;  %2822 = vst.msk [vmem:[%s5902_s23 + $0x78] sm:$0xf] %vm2791_vm1, %v3066_v50 }
 0x799 PF: > { %s12_s9 = sadd.s32 1, %s3939_s9  }
 0x79a   : > { %p9_p4 = scmp.ge.s32.totalorder %s12_s9, 4  }
 0x79c   :  { %11 = sbr.rel (!%p9_p4) target bundleno = 1 (0x1), region = 59 }

// kernel: nat_block.14
= control target key start
LH: loop header
LB: loop body
LE: loop exit
PB: predicated region body
PF: predicated region fallthrough
CT: control target
= control target key end

     0   :  { %s2688_s18 = smov 0   ;;  %s4025_s0 = inlined_call_operand.vmem [shape: bf16[512,32], index: 0, kind: input, shape index: {}]   ;;  %s4026_s1 = inlined_call_operand.vmem [shape: f32[1,32], index: 1, kind: input, shape index: {}]   ;;  %s4027_s2 = inlined_call_operand.vmem [shape: f32[1,32], index: 2, kind: input, shape index: {}]   ;;  %s4028_s3 = inlined_call_operand.vmem [shape: bf16[32,128], index: 3, kind: input, shape index: {}]   ;;  %s4029_s4 = inlined_call_operand.vmem [shape: f32[1,128], index: 4, kind: input, shape index: {}]   ;;  %s4030_s5 = inlined_call_operand.vmem [shape: bf16[512,128], index: 5, kind: output, shape index: {}]  }
   0x1 LB: > { %s2117_s19 = sadd.s32 4294967295, %s2655_s18   ;;  %p2121_p0 = scmp.ge.s32.totalorder %s2655_s18, 1  ;;  %s2655_s18 = sphi %s2688_s18, %s15_s18  }
   0x2   : > { %p188_p1 = scmp.lt.s32.totalorder %s2655_s18, 3 }
   0x4   : > { %p189_p2 = pnand %p2121_p0, %p188_p1 }
   0x6   : > { %192 = sbr.rel (%p189_p2) target bundleno = 803 (0x323), region = 40 }
   0xd   : > { %s2122_s20 = sshll.u32 %s2117_s19, 5  ;;  %vm293_vm0 = vcmask 261120  }
   0xe   : > { %p217_p3 = scmp.lt.s32.totalorder %s2122_s20, 63 }
  0x10   : > { %s4041_s20 = smov (!%p217_p3, %s2122_s20), 63 }
  0x11   : > { %s2123_s21 = sshll.u32 %s4041_s20, 2 }
  0x12   : > { %s2704_s24 = scalar_lea.vmem %s4025_s0, %s2123_s21  ;;  %s3420_s12 = scalar_lea.vmem %s4030_s5, %s2123_s21 }
  0x13   : > { %v2707_v0 = vld [vmem:[%s2704_s24] sm:$0xff]   ;;  %v2717_v6 = vld [vmem:[%s2704_s24 + $0x8] sm:$0xff]   ;;  %v2745_v18 = vld [vmem:[%s2704_s24 + $0x10] sm:$0xff]  }
  0x14   : > { %v2710_v1 = vld [vmem:[%s2704_s24 + $0x40] sm:$0xff]   ;;  %v2215_v2 = vunpack.c.l.bf16 %v2707_v0  ;;  %v2216_v4 = vunpack.c.h.bf16 %v2707_v0  ;;  %v2219_v11 = vunpack.c.l.bf16 %v2717_v6  ;;  %v2220_v12 = vunpack.c.h.bf16 %v2717_v6  ;;  %v2734_v13 = vld [vmem:[%s2704_s24 + $0x48] sm:$0xff]   ;;  %v2756_v23 = vld [vmem:[%s2704_s24 + $0x50] sm:$0xff]  }
  0x15   : > { %v2247_v3 = vunpack.c.l.bf16 %v2710_v1  ;;  %v2248_v5 = vunpack.c.h.bf16 %v2710_v1  ;;  %v2251_v16 = vunpack.c.l.bf16 %v2734_v13  ;;  %v2252_v17 = vunpack.c.h.bf16 %v2734_v13  ;;  %v2767_v28 = vld [vmem:[%s2704_s24 + $0x18] sm:$0xff]   ;;  %v2789_v38 = vld [vmem:[%s2704_s24 + $0x20] sm:$0xff]   ;;  %v2811_v48 = vld [vmem:[%s2704_s24 + $0x28] sm:$0xff]  }
  0x16   : > { %v294_v7 = vsel %vm293_vm0, %v2215_v2, 0.0  ;;  %v297_v9 = vsel %vm293_vm0, %v2216_v4, 0.0  ;;  %v300_v14 = vsel %vm293_vm0, %v2219_v11, 0.0  ;;  %v303_v15 = vsel %vm293_vm0, %v2220_v12, 0.0  ;;  %v2778_v33 = vld [vmem:[%s2704_s24 + $0x58] sm:$0xff]   ;;  %v2800_v43 = vld [vmem:[%s2704_s24 + $0x60] sm:$0xff]  }
  0x17   : > { %v342_v8 = vsel %vm293_vm0, %v2247_v3, 0.0  ;;  %295 = vadd.xlane.f32.xlu0 %v294_v7  ;;  %v345_v10 = vsel %vm293_vm0, %v2248_v5, 0.0  ;;  %v348_v19 = vsel %vm293_vm0, %v2251_v16, 0.0  ;;  %v351_v20 = vsel %vm293_vm0, %v2252_v17, 0.0  ;;  %v2822_v53 = vld [vmem:[%s2704_s24 + $0x68] sm:$0xff]   ;;  %v2833_v58 = vld [vmem:[%s2704_s24 + $0x30] sm:$0xff]  }
  0x18   : > { %343 = vadd.xlane.f32.xlu1 %v342_v8  ;;  %v2223_v21 = vunpack.c.l.bf16 %v2745_v18  ;;  %v2224_v22 = vunpack.c.h.bf16 %v2745_v18  ;;  %v2255_v26 = vunpack.c.l.bf16 %v2756_v23  ;;  %v2256_v27 = vunpack.c.h.bf16 %v2756_v23  ;;  %v2844_v63 = vld [vmem:[%s2704_s24 + $0x70] sm:$0xff]  }
  0x19   : > { %v2227_v31 = vunpack.c.l.bf16 %v2767_v28  ;;  %v2228_v32 = vunpack.c.h.bf16 %v2767_v28  ;;  %v2259_v36 = vunpack.c.l.bf16 %v2778_v33  ;;  %v2260_v37 = vunpack.c.h.bf16 %v2778_v33 }
  0x1a   : > { %v306_v24 = vsel %vm293_vm0, %v2223_v21, 0.0  ;;  %v309_v25 = vsel %vm293_vm0, %v2224_v22, 0.0  ;;  %v354_v29 = vsel %vm293_vm0, %v2255_v26, 0.0  ;;  %v357_v30 = vsel %vm293_vm0, %v2256_v27, 0.0 }
  0x1b   : > { %298 = vadd.xlane.f32.xlu0 %v297_v9  ;;  %v312_v34 = vsel %vm293_vm0, %v2227_v31, 0.0  ;;  %v315_v35 = vsel %vm293_vm0, %v2228_v32, 0.0  ;;  %v360_v39 = vsel %vm293_vm0, %v2259_v36, 0.0  ;;  %v363_v40 = vsel %vm293_vm0, %v2260_v37, 0.0 }
  0x1c   : > { %346 = vadd.xlane.f32.xlu1 %v345_v10  ;;  %v2231_v41 = vunpack.c.l.bf16 %v2789_v38  ;;  %v2232_v42 = vunpack.c.h.bf16 %v2789_v38  ;;  %v2263_v46 = vunpack.c.l.bf16 %v2800_v43  ;;  %v2264_v47 = vunpack.c.h.bf16 %v2800_v43 }
  0x1d   : > { %v2235_v51 = vunpack.c.l.bf16 %v2811_v48  ;;  %v2236_v52 = vunpack.c.h.bf16 %v2811_v48  ;;  %v2267_v56 = vunpack.c.l.bf16 %v2822_v53  ;;  %v2268_v57 = vunpack.c.h.bf16 %v2822_v53 }
  0x1e   : > { %v318_v44 = vsel %vm293_vm0, %v2231_v41, 0.0  ;;  %v321_v45 = vsel %vm293_vm0, %v2232_v42, 0.0  ;;  %v366_v49 = vsel %vm293_vm0, %v2263_v46, 0.0  ;;  %v369_v50 = vsel %vm293_vm0, %v2264_v47, 0.0 }
  0x1f   : > { %301 = vadd.xlane.f32.xlu0 %v300_v14  ;;  %v324_v54 = vsel %vm293_vm0, %v2235_v51, 0.0  ;;  %v327_v55 = vsel %vm293_vm0, %v2236_v52, 0.0  ;;  %v372_v59 = vsel %vm293_vm0, %v2267_v56, 0.0  ;;  %v375_v60 = vsel %vm293_vm0, %v2268_v57, 0.0  ;;  %v2855_v14 = vld [vmem:[%s2704_s24 + $0x38] sm:$0xff]  }
  0x20   : > { %304 = vadd.xlane.f32.xlu1 %v303_v15  ;;  %v2239_v61 = vunpack.c.l.bf16 %v2833_v58  ;;  %v2240_v62 = vunpack.c.h.bf16 %v2833_v58  ;;  %v2271_v9 = vunpack.c.l.bf16 %v2844_v63  ;;  %v2272_v10 = vunpack.c.h.bf16 %v2844_v63 }
  0x22   : > { %v330_v7 = vsel %vm293_vm0, %v2239_v61, 0.0  ;;  %v333_v8 = vsel %vm293_vm0, %v2240_v62, 0.0  ;;  %v378_v15 = vsel %vm293_vm0, %v2271_v9, 0.0 }
  0x23   : > { %349 = vadd.xlane.f32.xlu0 %v348_v19  ;;  %v381_v19 = vsel %vm293_vm0, %v2272_v10, 0.0 }
  0x24   : > { %352 = vadd.xlane.f32.xlu1 %v351_v20  ;;  %v2243_v20 = vunpack.c.l.bf16 %v2855_v14 }
  0x27   : > { %307 = vadd.xlane.f32.xlu0 %v306_v24  ;;  %v2244_v24 = vunpack.c.h.bf16 %v2855_v14 }
  0x28   : > { %310 = vadd.xlane.f32.xlu1 %v309_v25  ;;  %v2866_v25 = vld [vmem:[%s2704_s24 + $0x78] sm:$0xff]  }
  0x2b   : > { %355 = vadd.xlane.f32.xlu0 %v354_v29  ;;  %v336_v29 = vsel %vm293_vm0, %v2243_v20, 0.0 }
  0x2c   : > { %358 = vadd.xlane.f32.xlu1 %v357_v30  ;;  %v339_v30 = vsel %vm293_vm0, %v2244_v24, 0.0 }
  0x2f   : > { %313 = vadd.xlane.f32.xlu0 %v312_v34  ;;  %v2275_v34 = vunpack.c.l.bf16 %v2866_v25 }
  0x30   : > { %316 = vadd.xlane.f32.xlu1 %v315_v35  ;;  %v2276_v35 = vunpack.c.h.bf16 %v2866_v25 }
  0x33   : > { %361 = vadd.xlane.f32.xlu0 %v360_v39  ;;  %v384_v39 = vsel %vm293_vm0, %v2275_v34, 0.0 }
  0x34   : > { %364 = vadd.xlane.f32.xlu1 %v363_v40  ;;  %v387_v40 = vsel %vm293_vm0, %v2276_v35, 0.0 }
  0x37   : > { %319 = vadd.xlane.f32.xlu0 %v318_v44 }
  0x38   : > { %322 = vadd.xlane.f32.xlu1 %v321_v45 }
  0x3b   : > { %367 = vadd.xlane.f32.xlu0 %v366_v49 }
  0x3c   : > { %370 = vadd.xlane.f32.xlu1 %v369_v50 }
  0x3f   : > { %325 = vadd.xlane.f32.xlu0 %v324_v54 }
  0x40   : > { %328 = vadd.xlane.f32.xlu1 %v327_v55 }
  0x43   : > { %373 = vadd.xlane.f32.xlu0 %v372_v59 }
  0x44   : > { %376 = vadd.xlane.f32.xlu1 %v375_v60 }
  0x47   : > { %331 = vadd.xlane.f32.xlu0 %v330_v7 }
  0x48   : > { %334 = vadd.xlane.f32.xlu1 %v333_v8 }
  0x4b   : > { %379 = vadd.xlane.f32.xlu0 %v378_v15 }
  0x4c   : > { %382 = vadd.xlane.f32.xlu1 %v381_v19 }
  0x4f   : > { %337 = vadd.xlane.f32.xlu0 %v336_v29 }
  0x50   : > { %340 = vadd.xlane.f32.xlu1 %v339_v30 }
  0x53   : > { %385 = vadd.xlane.f32.xlu0 %v384_v39 }
  0x54   : > { %388 = vadd.xlane.f32.xlu1 %v387_v40 }
  0xa4   : > { %v296_v44 = vpop.xlane.xlu0 %295 }
  0xa5   : > { %v344_v45 = vpop.xlane.xlu1 %343  ;;  %v391_v49 = vmul.f32 0.03125, %v296_v44 }
  0xa6   : > { %v407_v50 = vmul.f32 0.03125, %v344_v45 }
  0xa7   : > { %v2884_v54 = vsub.f32 %v2215_v2, %v391_v49 }
  0xa8   : > { %v2888_v55 = vsub.f32 %v2247_v3, %v407_v50  ;;  %v299_v59 = vpop.xlane.xlu0 %298 }
  0xa9   : > { %v347_v60 = vpop.xlane.xlu1 %346  ;;  %v392_v7 = vmul.f32 0.03125, %v299_v59  ;;  %v455_v15 = vmul.f32 %v2884_v54, %v2884_v54 }
  0xaa   : > { %v408_v8 = vmul.f32 0.03125, %v347_v60  ;;  %v471_v19 = vmul.f32 %v2888_v55, %v2888_v55 }
  0xab   : > { %v2896_v29 = vsub.f32 %v2216_v4, %v392_v7  ;;  %v487_v3 = vsel %vm293_vm0, %v455_v15, 0.0 }
  0xac   : > { %v2900_v2 = vsub.f32 %v2248_v5, %v408_v8  ;;  %488 = vadd.xlane.f32.xlu0 %v487_v3  ;;  %v302_v30 = vpop.xlane.xlu0 %301  ;;  %v535_v40 = vsel %vm293_vm0, %v471_v19, 0.0 }
  0xad   : > { %v305_v39 = vpop.xlane.xlu1 %304  ;;  %v393_v44 = vmul.f32 0.03125, %v302_v30  ;;  %v456_v49 = vmul.f32 %v2896_v29, %v2896_v29 }
  0xae   : > { %v394_v45 = vmul.f32 0.03125, %v305_v39  ;;  %v472_v0 = vmul.f32 %v2900_v2, %v2900_v2 }
  0xaf   : > { %v2910_v1 = vsub.f32 %v2219_v11, %v393_v44  ;;  %v490_v5 = vsel %vm293_vm0, %v456_v49, 0.0 }
  0xb0   : > { %v2914_v4 = vsub.f32 %v2220_v12, %v394_v45  ;;  %536 = vadd.xlane.f32.xlu0 %v535_v40  ;;  %491 = vadd.xlane.f32.xlu1 %v490_v5  ;;  %v350_v50 = vpop.xlane.xlu0 %349  ;;  %v538_v60 = vsel %vm293_vm0, %v472_v0, 0.0 }
  0xb1   : > { %v353_v59 = vpop.xlane.xlu1 %352  ;;  %v409_v7 = vmul.f32 0.03125, %v350_v50  ;;  %v457_v15 = vmul.f32 %v2910_v1, %v2910_v1 }
  0xb2   : > { %v410_v8 = vmul.f32 0.03125, %v353_v59  ;;  %v458_v11 = vmul.f32 %v2914_v4, %v2914_v4 }
  0xb3   : > { %v2924_v6 = vsub.f32 %v2251_v16, %v409_v7  ;;  %v493_v19 = vsel %vm293_vm0, %v457_v15, 0.0 }
  0xb4   : > { %v2928_v12 = vsub.f32 %v2252_v17, %v410_v8  ;;  %539 = vadd.xlane.f32.xlu1 %v538_v60  ;;  %494 = vadd.xlane.f32.xlu0 %v493_v19  ;;  %v308_v3 = vpop.xlane.xlu0 %307  ;;  %v496_v39 = vsel %vm293_vm0, %v458_v11, 0.0 }
  0xb5   : > { %v311_v30 = vpop.xlane.xlu1 %310  ;;  %v395_v40 = vmul.f32 0.03125, %v308_v3  ;;  %v473_v45 = vmul.f32 %v2924_v6, %v2924_v6 }
  0xb6   : > { %v396_v44 = vmul.f32 0.03125, %v311_v30  ;;  %v474_v16 = vmul.f32 %v2928_v12, %v2928_v12 }
  0xb7   : > { %v2938_v13 = vsub.f32 %v2223_v21, %v395_v40  ;;  %v541_v49 = vsel %vm293_vm0, %v473_v45, 0.0 }
  0xb8   : > { %v2942_v17 = vsub.f32 %v2224_v22, %v396_v44  ;;  %497 = vadd.xlane.f32.xlu1 %v496_v39  ;;  %542 = vadd.xlane.f32.xlu0 %v541_v49  ;;  %v356_v0 = vpop.xlane.xlu0 %355  ;;  %v544_v50 = vsel %vm293_vm0, %v474_v16, 0.0 }
  0xb9   : > { %v359_v5 = vpop.xlane.xlu1 %358  ;;  %v411_v59 = vmul.f32 0.03125, %v356_v0  ;;  %v459_v7 = vmul.f32 %v2938_v13, %v2938_v13 }
  0xba   : > { %v412_v60 = vmul.f32 0.03125, %v359_v5  ;;  %v460_v21 = vmul.f32 %v2942_v17, %v2942_v17 }
  0xbb   : > { %v2952_v18 = vsub.f32 %v2255_v26, %v411_v59  ;;  %v499_v8 = vsel %vm293_vm0, %v459_v7, 0.0 }
  0xbc   : > { %v2956_v22 = vsub.f32 %v2256_v27, %v412_v60  ;;  %545 = vadd.xlane.f32.xlu1 %v544_v50  ;;  %500 = vadd.xlane.f32.xlu0 %v499_v8  ;;  %v314_v15 = vpop.xlane.xlu0 %313  ;;  %v502_v19 = vsel %vm293_vm0, %v460_v21, 0.0 }
  0xbd   : > { %v317_v11 = vpop.xlane.xlu1 %316  ;;  %v397_v3 = vmul.f32 0.03125, %v314_v15  ;;  %v475_v39 = vmul.f32 %v2952_v18, %v2952_v18 }
  0xbe   : > { %v398_v30 = vmul.f32 0.03125, %v317_v11  ;;  %v476_v26 = vmul.f32 %v2956_v22, %v2956_v22 }
  0xbf   : > { %v2966_v23 = vsub.f32 %v2227_v31, %v397_v3  ;;  %v547_v40 = vsel %vm293_vm0, %v475_v39, 0.0 }
  0xc0   : > { %v2970_v27 = vsub.f32 %v2228_v32, %v398_v30  ;;  %503 = vadd.xlane.f32.xlu1 %v502_v19  ;;  %548 = vadd.xlane.f32.xlu0 %v547_v40  ;;  %v362_v44 = vpop.xlane.xlu0 %361  ;;  %v550_v16 = vsel %vm293_vm0, %v476_v26, 0.0 }
  0xc1   : > { %v365_v45 = vpop.xlane.xlu1 %364  ;;  %v413_v49 = vmul.f32 0.03125, %v362_v44  ;;  %v461_v5 = vmul.f32 %v2966_v23, %v2966_v23 }
  0xc2   : > { %v414_v0 = vmul.f32 0.03125, %v365_v45  ;;  %v462_v31 = vmul.f32 %v2970_v27, %v2970_v27 }
  0xc3   : > { %v2980_v28 = vsub.f32 %v2259_v36, %v413_v49  ;;  %v505_v50 = vsel %vm293_vm0, %v461_v5, 0.0 }
  0xc4   : > { %v2984_v32 = vsub.f32 %v2260_v37, %v414_v0  ;;  %551 = vadd.xlane.f32.xlu1 %v550_v16  ;;  %506 = vadd.xlane.f32.xlu0 %v505_v50  ;;  %v320_v59 = vpop.xlane.xlu0 %319  ;;  %v508_v7 = vsel %vm293_vm0, %v462_v31, 0.0 }
  0xc5   : > { %v323_v60 = vpop.xlane.xlu1 %322  ;;  %v399_v21 = vmul.f32 0.03125, %v320_v59  ;;  %v477_v15 = vmul.f32 %v2980_v28, %v2980_v28 }
  0xc6   : > { %v400_v8 = vmul.f32 0.03125, %v323_v60  ;;  %v478_v36 = vmul.f32 %v2984_v32, %v2984_v32 }
  0xc7   : > { %v2994_v33 = vsub.f32 %v2231_v41, %v399_v21  ;;  %v553_v11 = vsel %vm293_vm0, %v477_v15, 0.0 }
  0xc8   : > { %v2998_v37 = vsub.f32 %v2232_v42, %v400_v8  ;;  %509 = vadd.xlane.f32.xlu1 %v508_v7  ;;  %554 = vadd.xlane.f32.xlu0 %v553_v11  ;;  %v368_v19 = vpop.xlane.xlu0 %367  ;;  %v556_v30 = vsel %vm293_vm0, %v478_v36, 0.0 }
  0xc9   : > { %v371_v3 = vpop.xlane.xlu1 %370  ;;  %v415_v39 = vmul.f32 0.03125, %v368_v19  ;;  %v463_v40 = vmul.f32 %v2994_v33, %v2994_v33 }
  0xca   : > { %v416_v26 = vmul.f32 0.03125, %v371_v3  ;;  %v464_v41 = vmul.f32 %v2998_v37, %v2998_v37 }
  0xcb   : > { %v3008_v38 = vsub.f32 %v2263_v46, %v415_v39  ;;  %v511_v44 = vsel %vm293_vm0, %v463_v40, 0.0 }
  0xcc   : > { %v3012_v42 = vsub.f32 %v2264_v47, %v416_v26  ;;  %557 = vadd.xlane.f32.xlu1 %v556_v30  ;;  %512 = vadd.xlane.f32.xlu0 %v511_v44  ;;  %v326_v45 = vpop.xlane.xlu0 %325  ;;  %v514_v49 = vsel %vm293_vm0, %v464_v41, 0.0  ;;  %v2454_v30 = vld [vmem:[%s4028_s3] sm:$0xff]  }
  0xcd   : > { %v329_v16 = vpop.xlane.xlu1 %328  ;;  %v401_v0 = vmul.f32 0.03125, %v326_v45  ;;  %v479_v31 = vmul.f32 %v3008_v38, %v3008_v38  ;;  %2405 = vmatprep.subr.bf16.mxu0 %v2454_v30  ;;  %2441 = vmatprep.subr.bf16.mxu1 %v2454_v30 }
  0xce   : > { %v402_v5 = vmul.f32 0.03125, %v329_v16  ;;  %v480_v46 = vmul.f32 %v3012_v42, %v3012_v42  ;;  %2406 = vmatpush3.bf16.msra.mxu0 %v2454_v30  ;;  %2443 = vmatpush3.bf16.msra.mxu1 %v2454_v30 }
  0xcf   : > { %v3022_v43 = vsub.f32 %v2235_v51, %v401_v0  ;;  %v559_v50 = vsel %vm293_vm0, %v479_v31, 0.0 }
  0xd0   : > { %v3026_v47 = vsub.f32 %v2236_v52, %v402_v5  ;;  %515 = vadd.xlane.f32.xlu1 %v514_v49  ;;  %560 = vadd.xlane.f32.xlu0 %v559_v50  ;;  %v374_v59 = vpop.xlane.xlu0 %373  ;;  %v562_v7 = vsel %vm293_vm0, %v480_v46, 0.0  ;;  %v2455_v49 = vld [vmem:[%s4028_s3 + $0x8] sm:$0xff]  }
  0xd1   : > { %v377_v60 = vpop.xlane.xlu1 %376  ;;  %v417_v21 = vmul.f32 0.03125, %v374_v59  ;;  %v465_v15 = vmul.f32 %v3022_v43, %v3022_v43  ;;  %2407 = vmatprep.subr.bf16.mxu0 %v2455_v49  ;;  %2442 = vmatprep.subr.bf16.mxu1 %v2455_v49 }
  0xd2   : > { %v418_v8 = vmul.f32 0.03125, %v377_v60  ;;  %v466_v51 = vmul.f32 %v3026_v47, %v3026_v47  ;;  %2408 = vmatpush3.bf16.msra.mxu0 %v2455_v49  ;;  %2444 = vmatpush3.bf16.msra.mxu1 %v2455_v49 }
  0xd3   : > { %v3036_v48 = vsub.f32 %v2267_v56, %v417_v21  ;;  %v517_v36 = vsel %vm293_vm0, %v465_v15, 0.0 }
  0xd4   : > { %v3040_v52 = vsub.f32 %v2268_v57, %v418_v8  ;;  %563 = vadd.xlane.f32.xlu1 %v562_v7  ;;  %518 = vadd.xlane.f32.xlu0 %v517_v36  ;;  %v332_v11 = vpop.xlane.xlu0 %331  ;;  %v520_v3 = vsel %vm293_vm0, %v466_v51, 0.0 }
  0xd5   : > { %v335_v19 = vpop.xlane.xlu1 %334  ;;  %v403_v39 = vmul.f32 0.03125, %v332_v11  ;;  %v481_v56 = vmul.f32 %v3036_v48, %v3036_v48 }
  0xd6   : > { %v404_v26 = vmul.f32 0.03125, %v335_v19  ;;  %v482_v53 = vmul.f32 %v3040_v52, %v3040_v52 }
  0xd7   : > { %v3053_v57 = vsub.f32 %v2239_v61, %v403_v39  ;;  %v565_v41 = vsel %vm293_vm0, %v481_v56, 0.0 }
  0xd8   : > { %v3057_v40 = vsub.f32 %v2240_v62, %v404_v26  ;;  %521 = vadd.xlane.f32.xlu1 %v520_v3  ;;  %566 = vadd.xlane.f32.xlu0 %v565_v41  ;;  %v380_v44 = vpop.xlane.xlu0 %379  ;;  %v568_v16 = vsel %vm293_vm0, %v482_v53, 0.0 }
  0xd9   : > { %v383_v45 = vpop.xlane.xlu1 %382  ;;  %v419_v61 = vmul.f32 0.03125, %v380_v44  ;;  %v467_v58 = vmul.f32 %v3053_v57, %v3053_v57 }
  0xda   : > { %v420_v0 = vmul.f32 0.03125, %v383_v45  ;;  %v468_v62 = vmul.f32 %v3057_v40, %v3057_v40 }
  0xdb   : > { %v3070_v5 = vsub.f32 %v2271_v9, %v419_v61  ;;  %v523_v46 = vsel %vm293_vm0, %v467_v58, 0.0 }
  0xdc   : > { %v3074_v31 = vsub.f32 %v2272_v10, %v420_v0  ;;  %569 = vadd.xlane.f32.xlu1 %v568_v16  ;;  %524 = vadd.xlane.f32.xlu0 %v523_v46  ;;  %v338_v50 = vpop.xlane.xlu0 %337  ;;  %v526_v60 = vsel %vm293_vm0, %v468_v62, 0.0 }
  0xdd   : > { %v341_v59 = vpop.xlane.xlu1 %340  ;;  %v405_v7 = vmul.f32 0.03125, %v338_v50  ;;  %v483_v9 = vmul.f32 %v3070_v5, %v3070_v5 }
  0xde   : > { %v406_v21 = vmul.f32 0.03125, %v341_v59  ;;  %v484_v63 = vmul.f32 %v3074_v31, %v3074_v31 }
  0xdf   : > { %v3084_v10 = vsub.f32 %v2243_v20, %v405_v7  ;;  %v571_v15 = vsel %vm293_vm0, %v483_v9, 0.0 }
  0xe0   : > { %v3088_v8 = vsub.f32 %v2244_v24, %v406_v21  ;;  %527 = vadd.xlane.f32.xlu1 %v526_v60  ;;  %572 = vadd.xlane.f32.xlu0 %v571_v15  ;;  %v386_v51 = vpop.xlane.xlu0 %385  ;;  %v574_v11 = vsel %vm293_vm0, %v484_v63, 0.0 }
  0xe1   : > { %v389_v36 = vpop.xlane.xlu1 %388  ;;  %v421_v19 = vmul.f32 0.03125, %v386_v51  ;;  %v469_v30 = vmul.f32 %v3084_v10, %v3084_v10 }
  0xe2   : > { %v422_v3 = vmul.f32 0.03125, %v389_v36  ;;  %v470_v20 = vmul.f32 %v3088_v8, %v3088_v8 }
  0xe3   : > { %v3098_v14 = vsub.f32 %v2275_v34, %v421_v19  ;;  %v529_v39 = vsel %vm293_vm0, %v469_v30, 0.0 }
  0xe4   : > { %v3102_v24 = vsub.f32 %v2276_v35, %v422_v3  ;;  %575 = vadd.xlane.f32.xlu1 %v574_v11  ;;  %530 = vadd.xlane.f32.xlu0 %v529_v39  ;;  %v532_v26 = vsel %vm293_vm0, %v470_v20, 0.0 }
  0xe5   : > { %v485_v56 = vmul.f32 %v3098_v14, %v3098_v14 }
  0xe6   : > { %v486_v53 = vmul.f32 %v3102_v24, %v3102_v24 }
  0xe7   : > { %v577_v41 = vsel %vm293_vm0, %v485_v56, 0.0 }
  0xe8   : > { %533 = vadd.xlane.f32.xlu1 %v532_v26  ;;  %578 = vadd.xlane.f32.xlu0 %v577_v41  ;;  %v580_v25 = vsel %vm293_vm0, %v486_v53, 0.0  ;;  %v3116_v26 = vld [vmem:[%s4026_s1] ss:$0 sm:$0xff] }
  0xec   : > { %581 = vadd.xlane.f32.xlu1 %v580_v25 }
 0x139   : > { %v489_v34 = vpop.xlane.xlu0 %488 }
 0x13a   : > { %v583_v35 = vmul.f32 0.03125, %v489_v34 }
 0x13c   : > { %v615_v44 = vadd.f32 1e-05, %v583_v35 }
 0x13d   : > { %v492_v45 = vpop.xlane.xlu1 %491  ;;  %v537_v16 = vpop.xlane.xlu0 %536 }
 0x13e   : > { %2456 = vrsqrt.f32 %v615_v44  ;;  %v584_v49 = vmul.f32 0.03125, %v492_v45  ;;  %v599_v61 = vmul.f32 0.03125, %v537_v16 }
 0x140   : > { %v616_v0 = vadd.f32 1e-05, %v584_v49  ;;  %v631_v58 = vadd.f32 1e-05, %v599_v61  ;;  %v3123_v49 = vld [vmem:[%s4027_s2] ss:$0 sm:$0xff] }
 0x141   : > { %v540_v62 = vpop.xlane.xlu1 %539  ;;  %v495_v46 = vpop.xlane.xlu0 %494 }
 0x142   : > { %2458 = vrsqrt.f32 %v616_v0  ;;  %v600_v50 = vmul.f32 0.03125, %v540_v62  ;;  %v585_v59 = vmul.f32 0.03125, %v495_v46 }
 0x143   : > { %2460 = vrsqrt.f32 %v631_v58 }
 0x144   : > { %v632_v60 = vadd.f32 1e-05, %v600_v50  ;;  %v617_v7 = vadd.f32 1e-05, %v585_v59 }
 0x145   : > { %v498_v21 = vpop.xlane.xlu1 %497  ;;  %v543_v9 = vpop.xlane.xlu0 %542 }
 0x146   : > { %2462 = vrsqrt.f32 %v632_v60  ;;  %v586_v63 = vmul.f32 0.03125, %v498_v21  ;;  %v601_v15 = vmul.f32 0.03125, %v543_v9 }
 0x147   : > { %2464 = vrsqrt.f32 %v617_v7 }
 0x148   : > { %v2457_v51 = vpop.eup %2456  ;;  %v618_v36 = vadd.f32 1e-05, %v586_v63  ;;  %v633_v11 = vadd.f32 1e-05, %v601_v15 }
 0x149   : > { %v546_v19 = vpop.xlane.xlu1 %545  ;;  %v501_v3 = vpop.xlane.xlu0 %500  ;;  %v679_v30 = vmul.f32 %v2457_v51, %v2884_v54 }
 0x14a   : > { %2466 = vrsqrt.f32 %v618_v36  ;;  %v602_v20 = vmul.f32 0.03125, %v546_v19  ;;  %v587_v39 = vmul.f32 0.03125, %v501_v3 }
 0x14b   : > { %2468 = vrsqrt.f32 %v633_v11  ;;  %v718_v45 = vmul.f32 %v3116_v26, %v679_v30 }
 0x14c   : > { %v2459_v56 = vpop.eup %2458  ;;  %v634_v53 = vadd.f32 1e-05, %v602_v20  ;;  %v619_v41 = vadd.f32 1e-05, %v587_v39 }
 0x14d   : > { %v2461_v25 = vpop.eup %2460  ;;  %v504_v34 = vpop.xlane.xlu1 %503  ;;  %v680_v44 = vmul.f32 %v2459_v56, %v2896_v29  ;;  %v757_v60 = vadd.f32 %v3123_v49, %v718_v45 }
 0x14e   : > { %v549_v35 = vpop.xlane.xlu0 %548  ;;  %2470 = vrsqrt.f32 %v634_v53  ;;  %v588_v54 = vmul.f32 0.03125, %v504_v34  ;;  %v695_v61 = vmul.f32 %v2461_v25, %v2888_v55 }
 0x14f   : > { %v603_v16 = vmul.f32 0.03125, %v549_v35  ;;  %2472 = vrsqrt.f32 %v619_v41  ;;  %v719_v0 = vmul.f32 %v3116_v26, %v680_v44 }
 0x150   : > { %v2463_v58 = vpop.eup %2462  ;;  %v620_v62 = vadd.f32 1e-05, %v588_v54  ;;  %v734_v9 = vmul.f32 %v3116_v26, %v695_v61 }
 0x151   : > { %v635_v46 = vadd.f32 1e-05, %v603_v16  ;;  %v2465_v50 = vpop.eup %2464  ;;  %v552_v29 = vpop.xlane.xlu1 %551  ;;  %v758_v7 = vadd.f32 %v3123_v49, %v719_v0  ;;  %v696_v21 = vmul.f32 %v2463_v58, %v2900_v2 }
 0x152   : > { %v507_v59 = vpop.xlane.xlu0 %506  ;;  %v681_v63 = vmul.f32 %v2465_v50, %v2910_v1  ;;  %2474 = vrsqrt.f32 %v620_v62  ;;  %v604_v55 = vmul.f32 0.03125, %v552_v29  ;;  %v773_v56 = vadd.f32 %v3123_v49, %v734_v9 }
 0x153   : > { %v589_v15 = vmul.f32 0.03125, %v507_v59  ;;  %2476 = vrsqrt.f32 %v635_v46  ;;  %v789_v51 = vpack.c.bf16 %v758_v7, %v757_v60  ;;  %v735_v36 = vmul.f32 %v3116_v26, %v696_v21 }
 0x154   : > { %v2467_v11 = vpop.eup %2466  ;;  %v636_v19 = vadd.f32 1e-05, %v604_v55  ;;  %v720_v53 = vmul.f32 %v3116_v26, %v681_v63 }
 0x155   : > { %v621_v3 = vadd.f32 1e-05, %v589_v15  ;;  %v2469_v30 = vpop.eup %2468  ;;  %v682_v20 = vmul.f32 %v2467_v11, %v2914_v4  ;;  %v510_v39 = vpop.xlane.xlu1 %509  ;;  %2409 = vmatprep.mubr.msk.bf16.mxu0 %vm293_vm0, %v789_v51  ;;  %v774_v1 = vadd.f32 %v3123_v49, %v735_v36 }
 0x156   : > { %v555_v2 = vpop.xlane.xlu0 %554  ;;  %v697_v41 = vmul.f32 %v2469_v30, %v2924_v6  ;;  %2478 = vrsqrt.f32 %v636_v19  ;;  %v590_v25 = vmul.f32 0.03125, %v510_v39  ;;  %v759_v62 = vadd.f32 %v3123_v49, %v720_v53 }
 0x157   : > { %v605_v34 = vmul.f32 0.03125, %v555_v2  ;;  %2480 = vrsqrt.f32 %v621_v3  ;;  %v797_v35 = vpack.c.bf16 %v774_v1, %v773_v56  ;;  %v721_v44 = vmul.f32 %v3116_v26, %v682_v20 }
 0x158   : > { %v2471_v4 = vpop.eup %2470  ;;  %v622_v45 = vadd.f32 1e-05, %v590_v25  ;;  %v736_v46 = vmul.f32 %v3116_v26, %v697_v41 }
 0x159   : > { %v637_v54 = vadd.f32 1e-05, %v605_v34  ;;  %v2473_v16 = vpop.eup %2472  ;;  %v698_v61 = vmul.f32 %v2471_v4, %v2928_v12  ;;  %v558_v0 = vpop.xlane.xlu1 %557  ;;  %2425 = vmatprep.mubr.msk.bf16.mxu1 %vm293_vm0, %v797_v35  ;;  %v760_v6 = vadd.f32 %v3123_v49, %v721_v44 }
 0x15a   : > { %v513_v58 = vpop.xlane.xlu0 %512  ;;  %v683_v50 = vmul.f32 %v2473_v16, %v2938_v13  ;;  %2482 = vrsqrt.f32 %v622_v45  ;;  %v606_v29 = vmul.f32 0.03125, %v558_v0  ;;  %v775_v36 = vadd.f32 %v3123_v49, %v736_v46 }
 0x15b   : > { %v591_v59 = vmul.f32 0.03125, %v513_v58  ;;  %2484 = vrsqrt.f32 %v637_v54  ;;  %v790_v60 = vpack.c.bf16 %v760_v6, %v759_v62  ;;  %v737_v7 = vmul.f32 %v3116_v26, %v698_v61 }
 0x15c   : > { %v2475_v12 = vpop.eup %2474  ;;  %v638_v21 = vadd.f32 1e-05, %v606_v29  ;;  %v722_v11 = vmul.f32 %v3116_v26, %v683_v50 }
 0x15d   : > { %v623_v9 = vadd.f32 1e-05, %v591_v59  ;;  %v2477_v63 = vpop.eup %2476  ;;  %v684_v55 = vmul.f32 %v2475_v12, %v2942_v17  ;;  %v516_v15 = vpop.xlane.xlu1 %515  ;;  %2410 = vmatmul.mubr.msk.bf16.vlgmr.msra.gmra.mrb[0].mxu0 %vm293_vm0, %v790_v60  ;;  %v776_v13 = vadd.f32 %v3123_v49, %v737_v7 }
 0x15e   : > { %v561_v51 = vpop.xlane.xlu0 %560  ;;  %v699_v19 = vmul.f32 %v2477_v63, %v2952_v18  ;;  %2486 = vrsqrt.f32 %v638_v21  ;;  %v592_v3 = vmul.f32 0.03125, %v516_v15  ;;  %v761_v34 = vadd.f32 %v3123_v49, %v722_v11 }
 0x15f   : > { %v607_v30 = vmul.f32 0.03125, %v561_v51  ;;  %2488 = vrsqrt.f32 %v623_v9  ;;  %v798_v20 = vpack.c.bf16 %v776_v13, %v775_v36  ;;  %v723_v39 = vmul.f32 %v3116_v26, %v684_v55 }
 0x160   : > { %v2479_v17 = vpop.eup %2478  ;;  %v624_v2 = vadd.f32 1e-05, %v592_v3  ;;  %v738_v35 = vmul.f32 %v3116_v26, %v699_v19 }
 0x161   : > { %v639_v56 = vadd.f32 1e-05, %v607_v30  ;;  %v2481_v1 = vpop.eup %2480  ;;  %v700_v53 = vmul.f32 %v2479_v17, %v2956_v22  ;;  %v564_v41 = vpop.xlane.xlu1 %563  ;;  %2426 = vmatmul.mubr.msk.bf16.vlgmr.msra.gmra.mrb[0].mxu1 %vm293_vm0, %v798_v20  ;;  %v762_v18 = vadd.f32 %v3123_v49, %v723_v39 }
 0x162   : > { %v519_v25 = vpop.xlane.xlu0 %518  ;;  %v685_v44 = vmul.f32 %v2481_v1, %v2966_v23  ;;  %2490 = vrsqrt.f32 %v624_v2  ;;  %v608_v4 = vmul.f32 0.03125, %v564_v41  ;;  %v777_v50 = vadd.f32 %v3123_v49, %v738_v35 }
 0x163   : > { %v593_v45 = vmul.f32 0.03125, %v519_v25  ;;  %2492 = vrsqrt.f32 %v639_v56  ;;  %v791_v54 = vpack.c.bf16 %v762_v18, %v761_v34  ;;  %v739_v16 = vmul.f32 %v3116_v26, %v700_v53 }
 0x164   : > { %v2483_v22 = vpop.eup %2482  ;;  %v640_v61 = vadd.f32 1e-05, %v608_v4  ;;  %v724_v29 = vmul.f32 %v3116_v26, %v685_v44 }
 0x165   : > { %v625_v0 = vadd.f32 1e-05, %v593_v45  ;;  %v2485_v58 = vpop.eup %2484  ;;  %v686_v62 = vmul.f32 %v2483_v22, %v2970_v27  ;;  %v522_v6 = vpop.xlane.xlu1 %521  ;;  %2413 = vmatprep.mubr.msk.bf16.mxu0 %vm293_vm0, %v791_v54  ;;  %v778_v23 = vadd.f32 %v3123_v49, %v739_v16 }
 0x166   : > { %v567_v46 = vpop.xlane.xlu0 %566  ;;  %v701_v59 = vmul.f32 %v2485_v58, %v2980_v28  ;;  %2494 = vrsqrt.f32 %v640_v61  ;;  %v594_v60 = vmul.f32 0.03125, %v522_v6  ;;  %v763_v13 = vadd.f32 %v3123_v49, %v724_v29 }
 0x167   : > { %v609_v7 = vmul.f32 0.03125, %v567_v46  ;;  %2496 = vrsqrt.f32 %v625_v0  ;;  %v799_v12 = vpack.c.bf16 %v778_v23, %v777_v50  ;;  %v725_v21 = vmul.f32 %v3116_v26, %v686_v62 }
 0x168   : > { %v2487_v27 = vpop.eup %2486  ;;  %v626_v9 = vadd.f32 1e-05, %v594_v60  ;;  %v740_v11 = vmul.f32 %v3116_v26, %v701_v59 }
 0x169   : > { %v641_v63 = vadd.f32 1e-05, %v609_v7  ;;  %v2489_v55 = vpop.eup %2488  ;;  %v702_v15 = vmul.f32 %v2487_v27, %v2984_v32  ;;  %v570_v51 = vpop.xlane.xlu1 %569  ;;  %2429 = vmatprep.mubr.msk.bf16.mxu1 %vm293_vm0, %v799_v12  ;;  %v764_v28 = vadd.f32 %v3123_v49, %v725_v21 }
 0x16a   : > { %v525_v36 = vpop.xlane.xlu0 %524  ;;  %v687_v19 = vmul.f32 %v2489_v55, %v2994_v33  ;;  %2498 = vrsqrt.f32 %v626_v9  ;;  %v610_v3 = vmul.f32 0.03125, %v570_v51  ;;  %v779_v25 = vadd.f32 %v3123_v49, %v740_v11 }
 0x16b   : > { %v595_v30 = vmul.f32 0.03125, %v525_v36  ;;  %2500 = vrsqrt.f32 %v641_v63  ;;  %v792_v20 = vpack.c.bf16 %v764_v28, %v763_v13  ;;  %v741_v39 = vmul.f32 %v3116_v26, %v702_v15 }
 0x16c   : > { %v2491_v32 = vpop.eup %2490  ;;  %v642_v17 = vadd.f32 1e-05, %v610_v3  ;;  %v726_v34 = vmul.f32 %v3116_v26, %v687_v19 }
 0x16d   : > { %v627_v2 = vadd.f32 1e-05, %v595_v30  ;;  %v2493_v56 = vpop.eup %2492  ;;  %v688_v1 = vmul.f32 %v2491_v32, %v2998_v37  ;;  %v528_v53 = vpop.xlane.xlu1 %527  ;;  %2414 = vmatmul.mubr.msk.bf16.gmra.mrb[4].mxu0 %vm293_vm0, %v792_v20  ;;  %v780_v33 = vadd.f32 %v3123_v49, %v741_v39 }
 0x16e   : > { %v573_v41 = vpop.xlane.xlu0 %572  ;;  %v703_v18 = vmul.f32 %v2493_v56, %v3008_v38  ;;  %2502 = vrsqrt.f32 %v642_v17  ;;  %v596_v35 = vmul.f32 0.03125, %v528_v53  ;;  %v765_v62 = vadd.f32 %v3123_v49, %v726_v34 }
 0x16f   : > { %v611_v44 = vmul.f32 0.03125, %v573_v41  ;;  %2504 = vrsqrt.f32 %v627_v2  ;;  %v800_v4 = vpack.c.bf16 %v780_v33, %v779_v25  ;;  %v727_v45 = vmul.f32 %v3116_v26, %v688_v1 }
 0x170   : > { %v2495_v37 = vpop.eup %2494  ;;  %v628_v54 = vadd.f32 1e-05, %v596_v35  ;;  %v742_v6 = vmul.f32 %v3116_v26, %v703_v18 }
 0x171   : > { %v643_v16 = vadd.f32 1e-05, %v611_v44  ;;  %v2497_v22 = vpop.eup %2496  ;;  %v704_v61 = vmul.f32 %v2495_v37, %v3012_v42  ;;  %v576_v0 = vpop.xlane.xlu1 %575  ;;  %2430 = vmatmul.mubr.msk.bf16.gmra.mrb[4].mxu1 %vm293_vm0, %v800_v4  ;;  %v766_v38 = vadd.f32 %v3123_v49, %v727_v45 }
 0x172   : > { %v531_v58 = vpop.xlane.xlu0 %530  ;;  %v689_v46 = vmul.f32 %v2497_v22, %v3022_v43  ;;  %2506 = vrsqrt.f32 %v628_v54  ;;  %v612_v50 = vmul.f32 0.03125, %v576_v0  ;;  %v781_v63 = vadd.f32 %v3123_v49, %v742_v6 }
 0x173   : > { %v597_v23 = vmul.f32 0.03125, %v531_v58  ;;  %2508 = vrsqrt.f32 %v643_v16  ;;  %v793_v29 = vpack.c.bf16 %v766_v38, %v765_v62  ;;  %v743_v59 = vmul.f32 %v3116_v26, %v704_v61 }
 0x174   : > { %v2499_v42 = vpop.eup %2498  ;;  %v644_v60 = vadd.f32 1e-05, %v612_v50  ;;  %v728_v55 = vmul.f32 %v3116_v26, %v689_v46 }
 0x175   : > { %v629_v7 = vadd.f32 1e-05, %v597_v23  ;;  %v2501_v12 = vpop.eup %2500  ;;  %v690_v21 = vmul.f32 %v2499_v42, %v3026_v47  ;;  %v534_v27 = vpop.xlane.xlu1 %533  ;;  %2417 = vmatprep.mubr.msk.bf16.mxu0 %vm293_vm0, %v793_v29  ;;  %v782_v43 = vadd.f32 %v3123_v49, %v743_v59 }
 0x176   : > { %v579_v9 = vpop.xlane.xlu0 %578  ;;  %v705_v15 = vmul.f32 %v2501_v12, %v3036_v48  ;;  %2510 = vrsqrt.f32 %v644_v60  ;;  %v598_v51 = vmul.f32 0.03125, %v534_v27  ;;  %v767_v39 = vadd.f32 %v3123_v49, %v728_v55 }
 0x177   : > { %v613_v36 = vmul.f32 0.03125, %v579_v9  ;;  %2512 = vrsqrt.f32 %v629_v7  ;;  %v801_v13 = vpack.c.bf16 %v782_v43, %v781_v63  ;;  %v729_v28 = vmul.f32 %v3116_v26, %v690_v21 }
 0x178   : > { %v2503_v47 = vpop.eup %2502  ;;  %v630_v11 = vadd.f32 1e-05, %v598_v51  ;;  %v744_v32 = vmul.f32 %v3116_v26, %v705_v15 }
 0x179   : > { %v645_v19 = vadd.f32 1e-05, %v613_v36  ;;  %v2505_v3 = vpop.eup %2504  ;;  %v706_v30 = vmul.f32 %v2503_v47, %v3040_v52  ;;  %v582_v20 = vpop.xlane.xlu1 %581  ;;  %2433 = vmatprep.mubr.msk.bf16.mxu1 %vm293_vm0, %v801_v13  ;;  %v768_v48 = vadd.f32 %v3123_v49, %v729_v28 }
 0x17a   : > { %v691_v17 = vmul.f32 %v2505_v3, %v3053_v57  ;;  %2514 = vrsqrt.f32 %v630_v11  ;;  %v614_v2 = vmul.f32 0.03125, %v582_v20  ;;  %v783_v33 = vadd.f32 %v3123_v49, %v744_v32 }
 0x17b   : > { %2516 = vrsqrt.f32 %v645_v19  ;;  %v794_v56 = vpack.c.bf16 %v768_v48, %v767_v39  ;;  %v745_v1 = vmul.f32 %v3116_v26, %v706_v30 }
 0x17c   : > { %v2507_v53 = vpop.eup %2506  ;;  %v646_v41 = vadd.f32 1e-05, %v614_v2  ;;  %v730_v18 = vmul.f32 %v3116_v26, %v691_v17 }
 0x17d   : > { %v2509_v52 = vpop.eup %2508  ;;  %v692_v25 = vmul.f32 %v2507_v53, %v3057_v40  ;;  %2418 = vmatmul.mubr.msk.bf16.gmra.mrb[8].mxu0 %vm293_vm0, %v794_v56  ;;  %v784_v34 = vadd.f32 %v3123_v49, %v745_v1 }
 0x17e   : > { %v707_v57 = vmul.f32 %v2509_v52, %v3070_v5  ;;  %2518 = vrsqrt.f32 %v646_v41  ;;  %v769_v40 = vadd.f32 %v3123_v49, %v730_v18 }
 0x17f   : > { %v802_v35 = vpack.c.bf16 %v784_v34, %v783_v33  ;;  %v731_v44 = vmul.f32 %v3116_v26, %v692_v25 }
 0x180   : > { %v2511_v4 = vpop.eup %2510  ;;  %v746_v16 = vmul.f32 %v3116_v26, %v707_v57 }
 0x181   : > { %v2513_v45 = vpop.eup %2512  ;;  %v708_v37 = vmul.f32 %v2511_v4, %v3074_v31  ;;  %2434 = vmatmul.mubr.msk.bf16.gmra.mrb[8].mxu1 %vm293_vm0, %v802_v35  ;;  %v770_v54 = vadd.f32 %v3123_v49, %v731_v44 }
 0x182   : > { %v693_v22 = vmul.f32 %v2513_v45, %v3084_v10  ;;  %v785_v31 = vadd.f32 %v3123_v49, %v746_v16 }
 0x183   : > { %v795_v61 = vpack.c.bf16 %v770_v54, %v769_v40  ;;  %v747_v5 = vmul.f32 %v3116_v26, %v708_v37 }
 0x184   : > { %v2515_v0 = vpop.eup %2514  ;;  %v732_v6 = vmul.f32 %v3116_v26, %v693_v22 }
 0x185   : > { %v2517_v58 = vpop.eup %2516  ;;  %v694_v62 = vmul.f32 %v2515_v0, %v3088_v8  ;;  %2421 = vmatprep.mubr.msk.bf16.mxu0 %vm293_vm0, %v795_v61  ;;  %v786_v38 = vadd.f32 %v3123_v49, %v747_v5  ;;  %v4031_v61 = vmov -1.0  }
 0x186   : > { %v709_v46 = vmul.f32 %v2517_v58, %v3098_v14  ;;  %v771_v8 = vadd.f32 %v3123_v49, %v732_v6 }
 0x187   : > { %v803_v50 = vpack.c.bf16 %v786_v38, %v785_v31  ;;  %v733_v10 = vmul.f32 %v3116_v26, %v694_v62 }
 0x188   : > { %v2519_v23 = vpop.eup %2518  ;;  %v748_v42 = vmul.f32 %v3116_v26, %v709_v46 }
 0x189   : > { %v710_v29 = vmul.f32 %v2519_v23, %v3102_v24  ;;  %2437 = vmatprep.mubr.msk.bf16.mxu1 %vm293_vm0, %v803_v50  ;;  %v772_v59 = vadd.f32 %v3123_v49, %v733_v10  ;;  %v3237_v24 = vld [vmem:[%s4029_s4] ss:$0 sm:$0xff] }
 0x18a   : > { %v787_v14 = vadd.f32 %v3123_v49, %v748_v42 }
 0x18b   : > { %v796_v60 = vpack.c.bf16 %v772_v59, %v771_v8  ;;  %v749_v7 = vmul.f32 %v3116_v26, %v710_v29 }
 0x18d   : > { %2422 = vmatmul.mubr.msk.bf16.gmra.mrb[12].mxu0 %vm293_vm0, %v796_v60  ;;  %v788_v12 = vadd.f32 %v3123_v49, %v749_v7 }
 0x18f   : > { %v804_v21 = vpack.c.bf16 %v788_v12, %v787_v14 }
 0x191   : > { %2438 = vmatmul.mubr.msk.bf16.gmra.mrb[12].mxu1 %vm293_vm0, %v804_v21 }
 0x230   : > { %v2411_v27 = vpop.f32.mrb[0].mxu0 }
 0x231   : > { %v919_v9 = vadd.f32 %v2411_v27, %v3237_v24  ;;  %v910_v63 = vpop.f32.mrb[1].mxu0 }
 0x232   : > { %v911_v26 = vadd.f32 %v3237_v24, %v910_v63  ;;  %v2412_v43 = vpop.f32.mrb[2].mxu0 }
 0x233   : > { %v1071_v55 = vmul.f32 0.70710677, %v919_v9  ;;  %v922_v15 = vadd.f32 %v2412_v43, %v3237_v24  ;;  %v913_v51 = vpop.f32.mrb[3].mxu0  ;;  %v3249_v25 = vmul.f32 0.5, %v919_v9 }
 0x234   : > { %v1069_v49 = vmul.f32 0.70710677, %v911_v26  ;;  %v2427_v36 = vpop.f32.mrb[0].mxu1  ;;  %v914_v47 = vadd.f32 %v3237_v24, %v913_v51  ;;  %v3251_v33 = vmul.f32 0.5, %v911_v26 }
 0x235   : > { %v1167_v13 = vand.u32 2147483647, %v1071_v55  ;;  %v1072_v28 = vmul.f32 0.70710677, %v922_v15  ;;  %v974_v19 = vpop.f32.mrb[1].mxu1  ;;  %v3246_v53 = vadd.f32 %v2427_v36, %v3237_v24  ;;  %vm1103_vm1 = vcmp.ge.f32.partialorder %v1071_v55, 0.0 }
 0x236   : > { %v1165_v11 = vand.u32 2147483647, %v1069_v49  ;;  %v2428_v30 = vpop.f32.mrb[2].mxu1  ;;  %v3243_v32 = vmul.f32 0.70710677, %v914_v47  ;;  %vm1101_vm2 = vcmp.ge.f32.partialorder %v1069_v49, 0.0  ;;  %v3257_v45 = vadd.f32 %v3237_v24, %v974_v19 }
 0x237   : > { %v1199_v3 = vmul.f32 0.3275911, %v1167_v13  ;;  %v1168_v39 = vand.u32 2147483647, %v1072_v28  ;;  %v977_v17 = vpop.f32.mrb[3].mxu1  ;;  %v1615_v2 = vsub.f32 0.0, %v1167_v13  ;;  %v3263_v16 = vadd.f32 %v2428_v30, %v3237_v24 }
 0x238   : > { %v1197_v20 = vmul.f32 0.3275911, %v1165_v11  ;;  %v1166_v41 = vand.u32 2147483647, %v3243_v32  ;;  %v1613_v34 = vsub.f32 0.0, %v1165_v11  ;;  %v3259_v37 = vmul.f32 0.5, %v922_v15 }
 0x239   : > { %v1231_v48 = vadd.f32 1.0, %v1199_v3  ;;  %v1200_v1 = vmul.f32 0.3275911, %v1168_v39  ;;  %v1647_v57 = vmul.f32 %v1615_v2, %v1167_v13  ;;  %v3254_v35 = vmul.f32 0.70710677, %v3246_v53 }
 0x23a   : > { %v1229_v56 = vadd.f32 1.0, %v1197_v20  ;;  %v1198_v18 = vmul.f32 0.3275911, %v1166_v41  ;;  %v1616_v44 = vsub.f32 0.0, %v1168_v39  ;;  %v1614_v40 = vsub.f32 0.0, %v1166_v41 }
 0x23b   : > { %2520 = vrcp.f32 %v1231_v48  ;;  %v1232_v52 = vadd.f32 1.0, %v1200_v1  ;;  %v1183_v54 = vand.u32 2147483647, %v3254_v35  ;;  %v3268_v5 = vsel %vm1103_vm1, 1.0, %v4031_v61 }
 0x23c   : > { %2522 = vrcp.f32 %v1229_v56  ;;  %v1230_v4 = vadd.f32 1.0, %v1198_v18  ;;  %v1645_v0 = vmul.f32 %v1613_v34, %v1165_v11  ;;  %vm1104_vm3 = vcmp.ge.f32.partialorder %v1072_v28, 0.0 }
 0x23d   : > { %2524 = vrcp.f32 %v1232_v52  ;;  %v3274_v62 = vsel %vm1101_vm2, 1.0, %v4031_v61  ;;  %v3276_v31 = vmul.f32 0.5, %v914_v47  ;;  %v1215_v38 = vmul.f32 0.3275911, %v1183_v54 }
 0x23e   : > { %2526 = vrcp.f32 %v1230_v4  ;;  %v3279_v6 = vmul.f32 0.70710677, %v3257_v45  ;;  %v1681_v46 = vmul.f32 1.442695, %v1647_v57  ;;  %v1648_v50 = vmul.f32 %v1616_v44, %v1168_v39 }
 0x23f   : > { %v1631_v10 = vsub.f32 0.0, %v1183_v54  ;;  %v3282_v23 = vmul.f32 0.70710677, %v3263_v16  ;;  %v3287_v8 = vsel %vm1104_vm3, 1.0, %v4031_v61  ;;  %v1646_v59 = vmul.f32 %v1614_v40, %v1166_v41 }
 0x240   : > { %v3265_v22 = vpop.f32.mrb[4].mxu0  ;;  %v1247_v42 = vadd.f32 1.0, %v1215_v38  ;;  %v1181_v60 = vand.u32 2147483647, %v3279_v6  ;;  %v1677_v21 = vmul.f32 1.442695, %v1645_v0  ;;  %v3304_v55 = vadd.f32 %v3237_v24, %v977_v17 }
 0x241   : > { %v3270_v58 = vpop.f32.mrb[5].mxu0  ;;  %vm1102_vm4 = vcmp.ge.f32.partialorder %v3243_v32, 0.0  ;;  %v1184_v27 = vand.u32 2147483647, %v3282_v23  ;;  %v1683_v51 = vmul.f32 1.442695, %v1648_v50  ;;  %v1663_v49 = vmul.f32 %v1631_v10, %v1183_v54 }
 0x242   : > { %v3284_v29 = vpop.f32.mrb[6].mxu0  ;;  %2528 = vrcp.f32 %v1247_v42  ;;  %v1213_v43 = vmul.f32 0.3275911, %v1181_v60  ;;  %v1679_v28 = vmul.f32 1.442695, %v1646_v59  ;;  %v1629_v30 = vsub.f32 0.0, %v1181_v60 }
 0x243   : > { %v3290_v7 = vpop.f32.mrb[7].mxu0  ;;  %v1216_v36 = vmul.f32 0.3275911, %v1184_v27  ;;  %2530 = vpow2.f32 %v1681_v46  ;;  %v3316_v2 = vmul.f32 0.70710677, %v3304_v55  ;;  %v1632_v52 = vsub.f32 0.0, %v1184_v27 }
 0x244   : > { %v3292_v14 = vpop.f32.mrb[4].mxu1  ;;  %v1245_v47 = vadd.f32 1.0, %v1213_v43  ;;  %2532 = vpow2.f32 %v1677_v21  ;;  %v1713_v41 = vmul.f32 1.442695, %v1663_v49  ;;  %v3325_v4 = vsel %vm1102_vm4, 1.0, %v4031_v61 }
 0x245   : > { %v3294_v12 = vpop.eup %2520  ;;  %v3298_v9 = vpop.f32.mrb[5].mxu1  ;;  %v1248_v20 = vadd.f32 1.0, %v1216_v36  ;;  %v1661_v40 = vmul.f32 %v1629_v30, %v1181_v60  ;;  %v1182_v46 = vand.u32 2147483647, %v3316_v2  ;;  %v1664_v10 = vmul.f32 %v1632_v52, %v1184_v27 }
 0x246   : > { %v3300_v63 = vpop.eup %2522  ;;  %v1327_v26 = vmul.f32 1.0614054, %v3294_v12  ;;  %v3307_v11 = vpop.f32.mrb[6].mxu1  ;;  %2534 = vrcp.f32 %v1245_v47  ;;  %v3333_v59 = vadd.f32 %v3265_v22, %v3237_v24  ;;  %v3343_v49 = vadd.f32 %v3237_v24, %v3270_v58 }
 0x247   : > { %v1325_v15 = vmul.f32 1.0614054, %v3300_v63  ;;  %v3309_v19 = vpop.eup %2524  ;;  %v3311_v39 = vpop.f32.mrb[7].mxu1  ;;  %2536 = vrcp.f32 %v1248_v20  ;;  %vm1119_vm5 = vcmp.ge.f32.partialorder %v3254_v35, 0.0  ;;  %vm1120_vm6 = vcmp.ge.f32.partialorder %v3282_v23, 0.0 }
 0x248   : > { %v1359_v13 = vadd.f32 -1.4531521, %v1327_v26  ;;  %v1328_v17 = vmul.f32 1.0614054, %v3309_v19  ;;  %v3318_v56 = vpop.eup %2526  ;;  %2538 = vpow2.f32 %v1683_v51  ;;  %v1214_v26 = vmul.f32 0.3275911, %v1182_v46 }
 0x249   : > { %v1357_v3 = vadd.f32 -1.4531521, %v1325_v15  ;;  %v1326_v57 = vmul.f32 1.0614054, %v3318_v56  ;;  %2540 = vpow2.f32 %v1679_v28  ;;  %v3339_v51 = vmul.f32 1.442695, %v1661_v40 }
 0x24a   : > { %v1391_v48 = vmul.f32 %v3294_v12, %v1359_v13  ;;  %v1360_v18 = vadd.f32 -1.4531521, %v1328_v17  ;;  %2542 = vpow2.f32 %v1713_v41  ;;  %v1246_v28 = vadd.f32 1.0, %v1214_v26 }
 0x24b   : > { %v1389_v1 = vmul.f32 %v3300_v63, %v1357_v3  ;;  %v1358_v38 = vadd.f32 -1.4531521, %v1326_v57  ;;  %v1630_v17 = vsub.f32 0.0, %v1182_v46  ;;  %vm1117_vm7 = vcmp.ge.f32.partialorder %v3279_v6, 0.0 }
 0x24c   : > { %v1423_v34 = vadd.f32 1.4214138, %v1391_v48  ;;  %v1392_v0 = vmul.f32 %v3309_v19, %v1360_v18  ;;  %v3335_v32 = vpop.eup %2528  ;;  %v1715_v48 = vmul.f32 1.442695, %v1664_v10  ;;  %2544 = vrcp.f32 %v1246_v28 }
 0x24d   : > { %v1421_v44 = vadd.f32 1.4214138, %v1389_v1  ;;  %v1390_v60 = vmul.f32 %v3318_v56, %v1358_v38  ;;  %v1343_v15 = vmul.f32 1.0614054, %v3335_v32  ;;  %v2531_v27 = vpop.eup %2530  ;;  %v3364_v38 = vmul.f32 0.70710677, %v3333_v59 }
 0x24e   : > { %v1455_v54 = vmul.f32 %v3294_v12, %v1423_v34  ;;  %v1424_v21 = vadd.f32 1.4214138, %v1392_v0  ;;  %v2533_v3 = vpop.eup %2532  ;;  %v1662_v28 = vmul.f32 %v1630_v17, %v1182_v46  ;;  %2546 = vpow2.f32 %v1715_v48 }
 0x24f   : > { %v1453_v50 = vmul.f32 %v3300_v63, %v1421_v44  ;;  %v1422_v13 = vadd.f32 1.4214138, %v1390_v60  ;;  %v1375_v20 = vadd.f32 -1.4531521, %v1343_v15  ;;  %2548 = vpow2.f32 %v3339_v51 }
 0x250   : > { %v1487_v42 = vadd.f32 -0.28449672, %v1455_v54  ;;  %v1456_v36 = vmul.f32 %v3309_v19, %v1424_v21  ;;  %v3347_v47 = vpop.f32.mrb[8].mxu0  ;;  %v3352_v41 = vpop.eup %2534  ;;  %v3464_v23 = vadd.f32 %v3237_v24, %v3290_v7  ;;  %vm1118_vm8 = vcmp.ge.f32.partialorder %v3316_v2, 0.0 }
 0x251   : > { %v1485_v43 = vadd.f32 -0.28449672, %v1453_v50  ;;  %v3350_v1 = vpop.f32.mrb[9].mxu0  ;;  %v1454_v34 = vmul.f32 %v3318_v56, %v1422_v13  ;;  %v3359_v44 = vpop.eup %2536  ;;  %v1407_v54 = vmul.f32 %v3335_v32, %v1375_v20  ;;  %v1341_v0 = vmul.f32 1.0614054, %v3352_v41 }
 0x252   : > { %v1519_v22 = vmul.f32 %v3294_v12, %v1487_v42  ;;  %v1488_v52 = vadd.f32 -0.28449672, %v1456_v36  ;;  %v3355_v18 = vpop.f32.mrb[10].mxu0  ;;  %v2539_v50 = vpop.eup %2538  ;;  %v1344_v60 = vmul.f32 1.0614054, %v3359_v44  ;;  %v3482_v6 = vadd.f32 %v3292_v14, %v3237_v24 }
 0x253   : > { %v1517_v30 = vmul.f32 %v3300_v63, %v1485_v43  ;;  %v1486_v21 = vadd.f32 -0.28449672, %v1454_v34  ;;  %v3369_v26 = vpop.f32.mrb[11].mxu0  ;;  %v2541_v15 = vpop.eup %2540  ;;  %v1439_v36 = vadd.f32 1.4214138, %v1407_v54  ;;  %vm1107_vm9 = vcmp.ge.f32.partialorder %v3364_v38, 0.0 }
 0x254   : > { %v1551_v58 = vadd.f32 0.2548296, %v1519_v22  ;;  %v3357_v57 = vpop.f32.mrb[8].mxu1  ;;  %v1520_v42 = vmul.f32 %v3309_v19, %v1488_v52  ;;  %4034 = vst [vmem:[#allocation3_spill] sm:$0xff] %v3369_v26  ;;  %v1373_v13 = vadd.f32 -1.4531521, %v1341_v0  ;;  %v2543_v34 = vpop.eup %2542 }
 0x255   : > { %4033 = vst [vmem:[#allocation2_spill] sm:$0xff] %v3357_v57  ;;  %v1549_v40 = vadd.f32 0.2548296, %v1517_v30  ;;  %v3371_v43 = vpop.f32.mrb[9].mxu1  ;;  %v1471_v26 = vmul.f32 %v3335_v32, %v1439_v36 }
 0x256   : > { %v1583_v10 = vmul.f32 %v3294_v12, %v1551_v58  ;;  %4035 = vst [vmem:[#allocation4_spill] sm:$0xff] %v3371_v43  ;;  %v3374_v30 = vpop.f32.mrb[10].mxu1  ;;  %v1552_v61 = vadd.f32 0.2548296, %v1520_v42  ;;  %v1518_v12 = vmul.f32 %v3318_v56, %v1486_v21  ;;  %v1376_v58 = vadd.f32 -1.4531521, %v1344_v60 }
 0x257   : > { %v1581_v22 = vmul.f32 %v3300_v63, %v1549_v40  ;;  %v3377_v52 = vpop.f32.mrb[11].mxu1  ;;  %v1405_v43 = vmul.f32 %v3352_v41, %v1373_v13  ;;  %v3382_v63 = vand.u32 2147483647, %v3364_v38  ;;  %v1503_v0 = vadd.f32 -0.28449672, %v1471_v26 }
 0x258   : > { %v1743_v20 = vmul.f32 %v2531_v27, %v1583_v10  ;;  %v1584_v46 = vmul.f32 %v3309_v19, %v1552_v61  ;;  %v1550_v17 = vadd.f32 0.2548296, %v1518_v12  ;;  %v1408_v27 = vmul.f32 %v3359_v44, %v1376_v58  ;;  %v3392_v19 = vpop.eup %2544 }
 0x259   : > { %v1741_v57 = vmul.f32 %v2533_v3, %v1581_v22  ;;  %v1437_v10 = vadd.f32 1.4214138, %v1405_v43  ;;  %v1535_v36 = vmul.f32 %v3335_v32, %v1503_v0  ;;  %v1203_v61 = vmul.f32 0.3275911, %v3382_v63 }
 0x25a   : > { %v1775_v40 = vsub.f32 1.0, %v1743_v20  ;;  %v1744_v3 = vmul.f32 %v2539_v50, %v1584_v46  ;;  %v1582_v21 = vmul.f32 %v3318_v56, %v1550_v17  ;;  %v1440_v60 = vadd.f32 1.4214138, %v1408_v27 }
 0x25b   : > { %v1773_v54 = vsub.f32 1.0, %v1741_v57  ;;  %v1469_v13 = vmul.f32 %v3352_v41, %v1437_v10  ;;  %v1711_v43 = vmul.f32 1.442695, %v1662_v28  ;;  %v1235_v56 = vadd.f32 1.0, %v1203_v61 }
 0x25c   : > { %v1807_v42 = vmul.f32 %v1775_v40, %v3268_v5  ;;  %v1776_v57 = vsub.f32 1.0, %v1744_v3  ;;  %v1742_v26 = vmul.f32 %v2541_v15, %v1582_v21  ;;  %v1472_v48 = vmul.f32 %v3359_v44, %v1440_v60 }
 0x25d   : > { %v1805_v22 = vmul.f32 %v1773_v54, %v3274_v62  ;;  %v1567_v5 = vadd.f32 0.2548296, %v1535_v36  ;;  %v1501_v50 = vadd.f32 -0.28449672, %v1469_v13  ;;  %v1342_v27 = vmul.f32 1.0614054, %v3392_v19 }
 0x25e   : > { %v1839_v20 = vadd.f32 1.0, %v1807_v42  ;;  %v1808_v62 = vmul.f32 %v1776_v57, %v3287_v8  ;;  %v1774_v12 = vsub.f32 1.0, %v1742_v26  ;;  %v1504_v58 = vadd.f32 -0.28449672, %v1472_v48 }
 0x25f   : > { %v1837_v46 = vadd.f32 1.0, %v1805_v22  ;;  %v1599_v17 = vmul.f32 %v3335_v32, %v1567_v5  ;;  %v1533_v15 = vmul.f32 %v3352_v41, %v1501_v50  ;;  %2550 = vrcp.f32 %v1235_v56 }
 0x260   : > { %v3397_v40 = vpop.f32.mrb[12].mxu0  ;;  %v1840_v54 = vadd.f32 1.0, %v1808_v62  ;;  %v1806_v51 = vmul.f32 %v1774_v12, %v3325_v4  ;;  %v1536_v0 = vmul.f32 %v3359_v44, %v1504_v58  ;;  %v1374_v32 = vadd.f32 -1.4531521, %v1342_v27  ;;  %v2547_v4 = vpop.eup %2546 }
 0x261   : > { %v3402_v28 = vpop.f32.mrb[13].mxu0  ;;  %v1759_v10 = vmul.f32 %v2543_v34, %v1599_v17  ;;  %v1565_v42 = vadd.f32 0.2548296, %v1533_v15  ;;  %v1871_v21 = vmul.f32 %v1839_v20, %v3249_v25  ;;  %v1869_v34 = vmul.f32 %v1837_v46, %v3251_v33 }
 0x262   : > { %v3406_v8 = vpop.f32.mrb[14].mxu0  ;;  %v1872_v60 = vmul.f32 %v1840_v54, %v3259_v37  ;;  %v1838_v22 = vadd.f32 1.0, %v1806_v51  ;;  %v1568_v36 = vadd.f32 0.2548296, %v1536_v0  ;;  %v1406_v25 = vmul.f32 %v3392_v19, %v1374_v32 }
 0x263   : > { %v3409_v3 = vpop.f32.mrb[15].mxu0  ;;  %v1791_v61 = vsub.f32 1.0, %v1759_v10  ;;  %v1597_v57 = vmul.f32 %v3352_v41, %v1565_v42  ;;  %v3430_v50 = vmul.f32 0.70710677, %v3343_v49  ;;  %v4036_v56 = vmov -1.0  }
 0x264   : > { %v3413_v13 = vpop.f32.mrb[12].mxu1  ;;  %v2285_v26 = vpack.c.bf16 %v1872_v60, %v1871_v21  ;;  %v1870_v48 = vmul.f32 %v1838_v22, %v3276_v31  ;;  %v1600_v5 = vmul.f32 %v3359_v44, %v1568_v36  ;;  %v1151_v33 = vsel %vm1119_vm5, 1.0, %v4036_v56  ;;  %v2549_v44 = vpop.eup %2548 }
 0x265   : > { %v3425_v37 = vpop.f32.mrb[13].mxu1  ;;  %v1438_v41 = vadd.f32 1.4214138, %v1406_v25  ;;  %2552 = vpow2.f32 %v1711_v43  ;;  %v1823_v62 = vmul.f32 %v1791_v61, %v1151_v33  ;;  %v3438_v58 = vand.u32 2147483647, %v3430_v50 }
 0x266   : > { %2372 = vst [vmem:[%s3420_s12 + $0x8] sm:$0xff] %v2285_v26   ;;  %v2280_v20 = vpack.c.bf16 %v1870_v48, %v1869_v34  ;;  %v1760_v12 = vmul.f32 %v2547_v4, %v1600_v5  ;;  %v3440_v31 = vpop.f32.mrb[14].mxu1  ;;  %v1757_v17 = vmul.f32 %v2549_v44, %v1597_v57  ;;  %v3447_v43 = vadd.f32 %v3284_v29, %v3237_v24 }
 0x267   : > { %v1470_v46 = vmul.f32 %v3392_v19, %v1438_v41  ;;  %v1201_v15 = vmul.f32 0.3275911, %v3438_v58  ;;  %v1055_v27 = vmul.f32 0.5, %v3246_v53  ;;  %v1152_v54 = vsel %vm1120_vm6, 1.0, %v4036_v56  ;;  %v3468_v25 = vpop.f32.mrb[15].mxu1 }
 0x268   : > { %2281 = vst [vmem:[%s3420_s12] sm:$0xff] %v2280_v20   ;;  %v1792_v35 = vsub.f32 1.0, %v1760_v12  ;;  %v1619_v0 = vsub.f32 0.0, %v3382_v63  ;;  %v1855_v42 = vadd.f32 1.0, %v1823_v62  ;;  %v3460_v53 = vmul.f32 0.70710677, %v3447_v43 }
 0x269   : > { %v1502_v51 = vadd.f32 -0.28449672, %v1470_v46  ;;  %v3454_v10 = vpop.eup %2550  ;;  %v1233_v21 = vadd.f32 1.0, %v1201_v15  ;;  %v1789_v22 = vsub.f32 1.0, %v1757_v17  ;;  %v1056_v36 = vmul.f32 0.5, %v3263_v16 }
 0x26a   : > { %v1824_v32 = vmul.f32 %v1792_v35, %v1152_v54  ;;  %v1331_v29 = vmul.f32 1.0614054, %v3454_v10  ;;  %v1651_v57 = vmul.f32 %v1619_v0, %v3382_v63  ;;  %v1887_v26 = vmul.f32 %v1855_v42, %v1055_v27 }
 0x26b   : > { %v1534_v60 = vmul.f32 %v3392_v19, %v1502_v51  ;;  %2554 = vrcp.f32 %v1233_v21  ;;  %v1149_v48 = vsel %vm1117_vm7, 1.0, %v4036_v56  ;;  %v1172_v7 = vand.u32 2147483647, %v3460_v53 }
 0x26c   : > { %v1856_v4 = vadd.f32 1.0, %v1824_v32  ;;  %v1363_v61 = vadd.f32 -1.4531521, %v1331_v29  ;;  %v3478_v63 = vmul.f32 0.70710677, %v3464_v23  ;;  %v1821_v20 = vmul.f32 %v1789_v22, %v1149_v48 }
 0x26d   : > { %v1566_v34 = vadd.f32 0.2548296, %v1534_v60  ;;  %v1204_v12 = vmul.f32 0.3275911, %v1172_v7  ;;  %v1689_v17 = vmul.f32 1.442695, %v1651_v57  ;;  %v3492_v54 = vadd.f32 %v3237_v24, %v3298_v9 }
 0x26e   : > { %v1888_v5 = vmul.f32 %v1856_v4, %v1056_v36  ;;  %v1395_v41 = vmul.f32 %v3454_v10, %v1363_v61  ;;  %v3485_v35 = vand.u32 2147483647, %v3478_v63  ;;  %v1617_v15 = vsub.f32 0.0, %v3438_v58 }
 0x26f   : > { %v2553_v33 = vpop.eup %2552  ;;  %v1598_v16 = vmul.f32 %v3392_v19, %v1566_v34  ;;  %v1053_v19 = vmul.f32 0.5, %v3257_v45  ;;  %v1236_v27 = vadd.f32 1.0, %v1204_v12  ;;  %v1054_v51 = vmul.f32 0.5, %v3304_v55 }
 0x270   : > { %v2325_v62 = vpack.c.bf16 %v1888_v5, %v1887_v26  ;;  %v1427_v46 = vadd.f32 1.4214138, %v1395_v41  ;;  %v1202_v42 = vmul.f32 0.3275911, %v3485_v35  ;;  %v1853_v32 = vadd.f32 1.0, %v1821_v20 }
 0x271   : > { %v1758_v44 = vmul.f32 %v2553_v33, %v1598_v16  ;;  %v1150_v45 = vsel %vm1118_vm8, 1.0, %v4036_v56  ;;  %2556 = vrcp.f32 %v1236_v27  ;;  %v3501_v21 = vmul.f32 0.70710677, %v3482_v6 }
 0x272   : > { %2380 = vst [vmem:[%s3420_s12 + $0x48] sm:$0xff] %v2325_v62   ;;  %v1459_v0 = vmul.f32 %v3454_v10, %v1427_v46  ;;  %2558 = vpow2.f32 %v1689_v17  ;;  %v1234_v9 = vadd.f32 1.0, %v1202_v42  ;;  %v1649_v55 = vmul.f32 %v1617_v15, %v3438_v58 }
 0x273   : > { %v1790_v14 = vsub.f32 1.0, %v1758_v44  ;;  %v1187_v36 = vand.u32 2147483647, %v3501_v21  ;;  %v3509_v4 = vmul.f32 0.70710677, %v3492_v54  ;;  %v1885_v57 = vmul.f32 %v1853_v32, %v1053_v19 }
 0x274   : > { %v1491_v29 = vadd.f32 -0.28449672, %v1459_v0  ;;  %2560 = vrcp.f32 %v1234_v9  ;;  %v3514_v26 = vmul.f32 0.5, %v3333_v59  ;;  %v1620_v33 = vsub.f32 0.0, %v1172_v7 }
 0x275   : > { %v1822_v60 = vmul.f32 %v1790_v14, %v1150_v45  ;;  %v3503_v22 = vpop.eup %2554  ;;  %v1219_v48 = vmul.f32 0.3275911, %v1187_v36  ;;  %v1139_v16 = vsel %vm1107_vm9, 1.0, %v4036_v56  ;;  %v3518_v41 = vmul.f32 0.5, %v3343_v49 }
 0x276   : > { %v1523_v34 = vmul.f32 %v3454_v10, %v1491_v29  ;;  %v1329_v61 = vmul.f32 1.0614054, %v3503_v22  ;;  %vm1105_vm10 = vcmp.ge.f32.partialorder %v3430_v50, 0.0  ;;  %v1685_v44 = vmul.f32 1.442695, %v1649_v55 }
 0x277   : > { %v1854_v2 = vadd.f32 1.0, %v1822_v60  ;;  %v1251_v20 = vadd.f32 1.0, %v1219_v48  ;;  %v1185_v59 = vand.u32 2147483647, %v3509_v4  ;;  %v1618_v17 = vsub.f32 0.0, %v3485_v35 }
 0x278   : > { %v1555_v38 = vadd.f32 0.2548296, %v1523_v34  ;;  %v1361_v58 = vadd.f32 -1.4531521, %v1329_v61  ;;  %v3527_v19 = vadd.f32 %v3307_v11, %v3237_v24  ;;  %v3531_v49 = vsel %vm1105_vm10, 1.0, %v4036_v56 }
 0x279   : > { %v1886_v5 = vmul.f32 %v1854_v2, %v1054_v51  ;;  %2562 = vrcp.f32 %v1251_v20  ;;  %v1652_v15 = vmul.f32 %v1620_v33, %v1172_v7  ;;  %v1217_v27 = vmul.f32 0.3275911, %v1185_v59 }
 0x27a   : > { %v1393_v12 = vmul.f32 %v3503_v22, %v1361_v58  ;;  %v1587_v46 = vmul.f32 %v3454_v10, %v1555_v38  ;;  %v3536_v14 = vmul.f32 0.5, %v3447_v43  ;;  %v1635_v10 = vsub.f32 0.0, %v1187_v36 }
 0x27b   : > { %v2320_v62 = vpack.c.bf16 %v1886_v5, %v1885_v57  ;;  %v3533_v51 = vpop.eup %2556  ;;  %v3539_v0 = vmul.f32 0.70710677, %v3527_v19  ;;  %v3543_v11 = vadd.f32 %v3237_v24, %v3311_v39  ;;  %vm1108_vm11 = vcmp.ge.f32.partialorder %v3460_v53, 0.0 }
 0x27c   : > { %v1425_v50 = vadd.f32 1.4214138, %v1393_v12  ;;  %v2559_v42 = vpop.eup %2558  ;;  %v1332_v7 = vmul.f32 1.0614054, %v3533_v51  ;;  %v1249_v45 = vadd.f32 1.0, %v1217_v27  ;;  %2564 = vpow2.f32 %v1685_v44 }
 0x27d   : > { %2379 = vst [vmem:[%s3420_s12 + $0x40] sm:$0xff] %v2320_v62   ;;  %v1747_v60 = vmul.f32 %v2559_v42, %v1587_v46  ;;  %v1650_v43 = vmul.f32 %v1618_v17, %v3485_v35  ;;  %v1188_v29 = vand.u32 2147483647, %v3539_v0  ;;  %v1691_v39 = vmul.f32 1.442695, %v1652_v15 }
 0x27e   : > { %v1457_v32 = vmul.f32 %v3503_v22, %v1425_v50  ;;  %v3550_v9 = vpop.eup %2560  ;;  %v1364_v2 = vadd.f32 -1.4531521, %v1332_v7  ;;  %2566 = vrcp.f32 %v1249_v45  ;;  %v1667_v61 = vmul.f32 %v1635_v10, %v1187_v36 }
 0x27f   : > { %v1330_v34 = vmul.f32 1.0614054, %v3550_v9  ;;  %v1633_v57 = vsub.f32 0.0, %v1185_v59  ;;  %v3554_v48 = vmul.f32 0.70710677, %v3543_v11  ;;  %v3559_v35 = vmul.f32 0.5, %v3464_v23 }
 0x280   : > { %v1489_v55 = vadd.f32 -0.28449672, %v1457_v32  ;;  %v1396_v38 = vmul.f32 %v3533_v51, %v1364_v2  ;;  %v1220_v58 = vmul.f32 0.3275911, %v1188_v29  ;;  %v1779_v33 = vsub.f32 1.0, %v1747_v60 }
 0x281   : > { %v3564_v20 = vsel %vm1108_vm11, 1.0, %v4036_v56  ;;  %v1362_v62 = vadd.f32 -1.4531521, %v1330_v34  ;;  %v1687_v36 = vmul.f32 1.442695, %v1650_v43  ;;  %2568 = vpow2.f32 %v1691_v39 }
 0x282   : > { %v1521_v5 = vmul.f32 %v3503_v22, %v1489_v55  ;;  %v1428_v44 = vadd.f32 1.4214138, %v1396_v38  ;;  %v1252_v46 = vadd.f32 1.0, %v1220_v58  ;;  %v1721_v15 = vmul.f32 1.442695, %v1667_v61 }
 0x283   : > { %v3566_v17 = vpop.eup %2562  ;;  %v1394_v50 = vmul.f32 %v3550_v9, %v1362_v62  ;;  %v1665_v23 = vmul.f32 %v1633_v57, %v1185_v59  ;;  %v3570_v27 = vand.u32 2147483647, %v3554_v48  ;;  %v1811_v32 = vmul.f32 %v1779_v33, %v1139_v16 }
 0x284   : > { %v1553_v12 = vadd.f32 0.2548296, %v1521_v5  ;;  %v1460_v53 = vmul.f32 %v3533_v51, %v1428_v44  ;;  %v1347_v42 = vmul.f32 1.0614054, %v3566_v17  ;;  %2570 = vrcp.f32 %v1252_v46 }
 0x285   : > { %v1426_v7 = vadd.f32 1.4214138, %v1394_v50  ;;  %2572 = vpow2.f32 %v1687_v36  ;;  %v1218_v45 = vmul.f32 0.3275911, %v3570_v27  ;;  %v1636_v55 = vsub.f32 0.0, %v1188_v29 }
 0x286   : > { %v1585_v10 = vmul.f32 %v3503_v22, %v1553_v12  ;;  %v1492_v60 = vadd.f32 -0.28449672, %v1460_v53  ;;  %v1379_v43 = vadd.f32 -1.4531521, %v1347_v42  ;;  %v3578_v59 = vadd.f32 %v3347_v47, %v3237_v24  ;;  %v2565_v2 = vpop.eup %2564 }
 0x287   : > { %vm1106_vm12 = vcmp.ge.f32.partialorder %v3478_v63, 0.0  ;;  %v1458_v22 = vmul.f32 %v3550_v9, %v1426_v7  ;;  %v1717_v39 = vmul.f32 1.442695, %v1665_v23  ;;  %v1250_v34 = vadd.f32 1.0, %v1218_v45 }
 0x288   : > { %v3582_v61 = vpop.eup %2566  ;;  %v1745_v16 = vmul.f32 %v2565_v2, %v1585_v10  ;;  %v1524_v57 = vmul.f32 %v3533_v51, %v1492_v60  ;;  %v1411_v5 = vmul.f32 %v3566_v17, %v1379_v43  ;;  %2574 = vpow2.f32 %v1721_v15 }
 0x289   : > { %v1843_v38 = vadd.f32 1.0, %v1811_v32  ;;  %v1490_v58 = vadd.f32 -0.28449672, %v1458_v22  ;;  %v1345_v47 = vmul.f32 1.0614054, %v3582_v61  ;;  %2576 = vrcp.f32 %v1250_v34 }
 0x28a   : > { %v1556_v33 = vadd.f32 0.2548296, %v1524_v57  ;;  %v1443_v62 = vadd.f32 1.4214138, %v1411_v5  ;;  %v1668_v36 = vmul.f32 %v1636_v55, %v1188_v29  ;;  %v3588_v12 = vmul.f32 0.70710677, %v3578_v59 }
 0x28b   : > { %v1138_v44 = vsel %vm1106_vm12, 1.0, %v4036_v56  ;;  %v1522_v46 = vmul.f32 %v3550_v9, %v1490_v58  ;;  %v1377_v50 = vadd.f32 -1.4531521, %v1345_v47  ;;  %2578 = vpow2.f32 %v1717_v39  ;;  %v2569_v15 = vpop.eup %2568 }
 0x28c   : > { %v1777_v23 = vsub.f32 1.0, %v1745_v16  ;;  %v1588_v10 = vmul.f32 %v3533_v51, %v1556_v33  ;;  %v1475_v53 = vmul.f32 %v3566_v17, %v1443_v62  ;;  %v3598_v29 = vadd.f32 %v3237_v24, %v3350_v1 }
 0x28d   : > { %v1875_v42 = vmul.f32 %v1843_v38, %v3514_v26  ;;  %v1554_v32 = vadd.f32 0.2548296, %v1522_v46  ;;  %v1409_v63 = vmul.f32 %v3582_v61, %v1377_v50  ;;  %v3603_v7 = vand.u32 2147483647, %v3588_v12 }
 0x28e   : > { %v3605_v45 = vpop.eup %2570  ;;  %v1748_v60 = vmul.f32 %v2569_v15, %v1588_v10  ;;  %v1507_v43 = vadd.f32 -0.28449672, %v1475_v53  ;;  %v1723_v55 = vmul.f32 1.442695, %v1668_v36  ;;  %v1634_v51 = vsub.f32 0.0, %v3570_v27 }
 0x28f   : > { %v2573_v2 = vpop.eup %2572  ;;  %v1586_v22 = vmul.f32 %v3550_v9, %v1554_v32  ;;  %v1441_v1 = vadd.f32 1.4214138, %v1409_v63  ;;  %v1348_v39 = vmul.f32 1.0614054, %v3605_v45  ;;  %v1207_v26 = vmul.f32 0.3275911, %v3603_v7 }
 0x290   : > { %v1809_v34 = vmul.f32 %v1777_v23, %v3531_v49  ;;  %v1780_v16 = vsub.f32 1.0, %v1748_v60  ;;  %v1539_v57 = vmul.f32 %v3566_v17, %v1507_v43  ;;  %v3614_v5 = vmul.f32 0.70710677, %v3598_v29 }
 0x291   : > { %v1746_v38 = vmul.f32 %v2573_v2, %v1586_v22  ;;  %v1473_v58 = vmul.f32 %v3582_v61, %v1441_v1  ;;  %v1380_v47 = vadd.f32 -1.4531521, %v1348_v39  ;;  %v1239_v33 = vadd.f32 1.0, %v1207_v26 }
 0x292   : > { %v2575_v62 = vpop.eup %2574  ;;  %v1812_v9 = vmul.f32 %v1780_v16, %v3564_v20  ;;  %vm1123_vm13 = vcmp.ge.f32.partialorder %v3501_v21, 0.0  ;;  %v1571_v36 = vadd.f32 0.2548296, %v1539_v57  ;;  %vm1121_vm14 = vcmp.ge.f32.partialorder %v3509_v4, 0.0 }
 0x293   : > { %2580 = vpow2.f32 %v1723_v55  ;;  %v1666_v49 = vmul.f32 %v1634_v51, %v3570_v27  ;;  %v3621_v46 = vpop.eup %2576  ;;  %v1778_v50 = vsub.f32 1.0, %v1746_v38  ;;  %v1505_v15 = vadd.f32 -0.28449672, %v1473_v58 }
 0x294   : > { %v1412_v23 = vmul.f32 %v3605_v45, %v1380_v47  ;;  %2582 = vrcp.f32 %v1239_v33  ;;  %v1841_v10 = vadd.f32 1.0, %v1809_v34  ;;  %v1844_v53 = vadd.f32 1.0, %v1812_v9 }
 0x295   : > { %v1603_v32 = vmul.f32 %v3566_v17, %v1571_v36  ;;  %v1346_v20 = vmul.f32 1.0614054, %v3621_v46  ;;  %v2579_v63 = vpop.eup %2578  ;;  %v1810_v60 = vmul.f32 %v1778_v50, %v1138_v44  ;;  %v1537_v43 = vmul.f32 %v3582_v61, %v1505_v15 }
 0x296   : > { %v1444_v55 = vadd.f32 1.4214138, %v1412_v23  ;;  %v3628_v27 = vand.u32 2147483647, %v3614_v5  ;;  %v1876_v51 = vmul.f32 %v1844_v53, %v3536_v14  ;;  %v1719_v1 = vmul.f32 1.442695, %v1666_v49 }
 0x297   : > { %v1763_v2 = vmul.f32 %v2575_v62, %v1603_v32  ;;  %v1378_v22 = vadd.f32 -1.4531521, %v1346_v20  ;;  %v1842_v39 = vadd.f32 1.0, %v1810_v60  ;;  %v1569_v26 = vadd.f32 0.2548296, %v1537_v43  ;;  %v4037_v20 = vld [vmem:[#allocation3_spill] sm:$0xff] }
 0x298   : > { %v1476_v17 = vmul.f32 %v3605_v45, %v1444_v55  ;;  %v1205_v34 = vmul.f32 0.3275911, %v3628_v27  ;;  %v1873_v44 = vmul.f32 %v1841_v10, %v3518_v41  ;;  %v2295_v16 = vpack.c.bf16 %v1876_v51, %v1875_v42 }
 0x299   : > { %v1410_v57 = vmul.f32 %v3621_v46, %v1378_v22  ;;  %v1623_v38 = vsub.f32 0.0, %v3603_v7  ;;  %v1874_v58 = vmul.f32 %v1842_v39, %v3559_v35  ;;  %v1601_v14 = vmul.f32 %v3582_v61, %v1569_v26 }
 0x29a   : > { %v1508_v47 = vadd.f32 -0.28449672, %v1476_v17  ;;  %v1237_v33 = vadd.f32 1.0, %v1205_v34  ;;  %2374 = vst [vmem:[%s3420_s12 + $0x18] sm:$0xff] %v2295_v16   ;;  %v1795_v62 = vsub.f32 1.0, %v1763_v2  ;;  %2584 = vpow2.f32 %v1719_v1 }
 0x29b   : > { %v1442_v9 = vadd.f32 1.4214138, %v1410_v57  ;;  %v3641_v36 = vadd.f32 %v3355_v18, %v3237_v24  ;;  %v2290_v41 = vpack.c.bf16 %v1874_v58, %v1873_v44  ;;  %v1761_v42 = vmul.f32 %v2579_v63, %v1601_v14 }
 0x29c   : > { %v1540_v49 = vmul.f32 %v3605_v45, %v1508_v47  ;;  %2586 = vrcp.f32 %v1237_v33  ;;  %v1059_v35 = vmul.f32 0.5, %v3482_v6  ;;  %v1655_v15 = vmul.f32 %v1623_v38, %v3603_v7 }
 0x29d   : > { %v2581_v50 = vpop.eup %2580  ;;  %v1474_v61 = vmul.f32 %v3621_v46, %v1442_v9  ;;  %2373 = vst [vmem:[%s3420_s12 + $0x10] sm:$0xff] %v2290_v41   ;;  %v1155_v18 = vsel %vm1123_vm13, 1.0, %v4036_v56  ;;  %v1153_v10 = vsel %vm1121_vm14, 1.0, %v4036_v56  ;;  %v3657_v32 = vmul.f32 0.70710677, %v3641_v36  ;;  %v4038_v41 = vld [vmem:[#allocation2_spill] sm:$0xff] }
 0x29e   : > { %v3647_v23 = vpop.eup %2582  ;;  %v1572_v53 = vadd.f32 0.2548296, %v1540_v49  ;;  %vm1124_vm15 = vcmp.ge.f32.partialorder %v3539_v0, 0.0  ;;  %v3663_v63 = vadd.f32 %v3237_v24, %v4037_v20  ;;  %v1827_v60 = vmul.f32 %v1795_v62, %v1155_v18  ;;  %v3686_v9 = vld [vmem:[%s4029_s4] ss:$0 sm:$0xff] }
 0x29f   : > { %v1506_v6 = vadd.f32 -0.28449672, %v1474_v61  ;;  %v1335_v7 = vmul.f32 1.0614054, %v3647_v23  ;;  %v1793_v21 = vsub.f32 1.0, %v1761_v42  ;;  %v1060_v55 = vmul.f32 0.5, %v3527_v19 }
 0x2a0   : > { %v1604_v43 = vmul.f32 %v3605_v45, %v1572_v53  ;;  %v1176_v4 = vand.u32 2147483647, %v3657_v32  ;;  %v1697_v22 = vmul.f32 1.442695, %v1655_v15  ;;  %v1156_v0 = vsel %vm1124_vm15, 1.0, %v4036_v56 }
 0x2a1   : > { %v1538_v51 = vmul.f32 %v3621_v46, %v1506_v6  ;;  %v1367_v2 = vadd.f32 -1.4531521, %v1335_v7  ;;  %vm1122_vm0 = vcmp.ge.f32.partialorder %v3554_v48, 0.0  ;;  %v1621_v17 = vsub.f32 0.0, %v3628_v27 }
 0x2a2   : > { %v1764_v1 = vmul.f32 %v2581_v50, %v1604_v43  ;;  %v1208_v39 = vmul.f32 0.3275911, %v1176_v4  ;;  %v3674_v45 = vmul.f32 0.70710677, %v3663_v63  ;;  %v1859_v34 = vadd.f32 1.0, %v1827_v60 }
 0x2a3   : > { %v1570_v24 = vadd.f32 0.2548296, %v1538_v51  ;;  %v1399_v26 = vmul.f32 %v3647_v23, %v1367_v2  ;;  %v1825_v19 = vmul.f32 %v1793_v21, %v1153_v10  ;;  %2588 = vpow2.f32 %v1697_v22  ;;  %v4039_v51 = vld [vmem:[#allocation4_spill] sm:$0xff] }
 0x2a4   : > { %v1796_v44 = vsub.f32 1.0, %v1764_v1  ;;  %v1240_v16 = vadd.f32 1.0, %v1208_v39  ;;  %v2585_v57 = vpop.eup %2584  ;;  %v1174_v14 = vand.u32 2147483647, %v3674_v45  ;;  %v1154_v62 = vsel %vm1122_vm0, 1.0, %v4036_v56 }
 0x2a5   : > { %v1602_v38 = vmul.f32 %v3621_v46, %v1570_v24  ;;  %v1431_v58 = vadd.f32 1.4214138, %v1399_v26  ;;  %v3690_v46 = vadd.f32 %v3686_v9, %v4038_v41  ;;  %v1891_v15 = vmul.f32 %v1859_v34, %v1059_v35 }
 0x2a6   : > { %v3678_v47 = vpop.eup %2586  ;;  %v1828_v33 = vmul.f32 %v1796_v44, %v1156_v0  ;;  %2590 = vrcp.f32 %v1240_v16  ;;  %v1206_v61 = vmul.f32 0.3275911, %v1174_v14  ;;  %v1857_v18 = vadd.f32 1.0, %v1825_v19 }
 0x2a7   : > { %v1762_v42 = vmul.f32 %v2585_v57, %v1602_v38  ;;  %v1463_v49 = vmul.f32 %v3647_v23, %v1431_v58  ;;  %v1333_v50 = vmul.f32 1.0614054, %v3678_v47  ;;  %v1653_v10 = vmul.f32 %v1621_v17, %v3628_v27 }
 0x2a8   : > { %v1860_v48 = vadd.f32 1.0, %v1828_v33  ;;  %v1238_v20 = vadd.f32 1.0, %v1206_v61  ;;  %v1624_v21 = vsub.f32 0.0, %v1176_v4  ;;  %v3696_v43 = vmul.f32 0.70710677, %v3690_v46 }
 0x2a9   : > { %v1794_v53 = vsub.f32 1.0, %v1762_v42  ;;  %v1495_v6 = vadd.f32 -0.28449672, %v1463_v49  ;;  %v1365_v7 = vadd.f32 -1.4531521, %v1333_v50  ;;  %v3700_v2 = vadd.f32 %v3686_v9, %v4039_v51 }
 0x2aa   : > { %v1892_v60 = vmul.f32 %v1860_v48, %v1060_v55  ;;  %2592 = vrcp.f32 %v1238_v20  ;;  %v1057_v27 = vmul.f32 0.5, %v3492_v54  ;;  %v1693_v39 = vmul.f32 1.442695, %v1653_v10 }
 0x2ab   : > { %v1826_v22 = vmul.f32 %v1794_v53, %v1154_v62  ;;  %v1527_v35 = vmul.f32 %v3647_v23, %v1495_v6  ;;  %v1397_v0 = vmul.f32 %v3678_v47, %v1365_v7  ;;  %v3706_v55 = vand.u32 2147483647, %v3696_v43 }
 0x2ac   : > { %v2335_v1 = vpack.c.bf16 %v1892_v60, %v1891_v15  ;;  %v1058_v24 = vmul.f32 0.5, %v3543_v11  ;;  %v1889_v19 = vmul.f32 %v1857_v18, %v1057_v27  ;;  %v1656_v44 = vmul.f32 %v1624_v21, %v1176_v4 }
 0x2ad   : > { %v1858_v26 = vadd.f32 1.0, %v1826_v22  ;;  %v1559_v17 = vadd.f32 0.2548296, %v1527_v35  ;;  %v1429_v34 = vadd.f32 1.4214138, %v1397_v0  ;;  %v2589_v57 = vpop.eup %2588  ;;  %v1622_v58 = vsub.f32 0.0, %v1174_v14 }
 0x2ae   : > { %2382 = vst [vmem:[%s3420_s12 + $0x58] sm:$0xff] %v2335_v1   ;;  %v1223_v16 = vmul.f32 0.3275911, %v3706_v55  ;;  %v3713_v33 = vmul.f32 0.70710677, %v3700_v2  ;;  %2594 = vpow2.f32 %v1693_v39  ;;  %v3721_v50 = vadd.f32 %v3686_v9, %v3374_v30 }
 0x2af   : > { %v1890_v38 = vmul.f32 %v1858_v26, %v1058_v24  ;;  %v1461_v54 = vmul.f32 %v3678_v47, %v1429_v34  ;;  %v1591_v11 = vmul.f32 %v3647_v23, %v1559_v17  ;;  %v1699_v48 = vmul.f32 1.442695, %v1656_v44 }
 0x2b0   : > { %v3715_v62 = vpop.eup %2590  ;;  %v1255_v41 = vadd.f32 1.0, %v1223_v16  ;;  %v1189_v61 = vand.u32 2147483647, %v3713_v33  ;;  %v1654_v10 = vmul.f32 %v1622_v58, %v1174_v14  ;;  %v3727_v23 = vmul.f32 0.5, %v3578_v59 }
 0x2b1   : > { %v2330_v42 = vpack.c.bf16 %v1890_v38, %v1889_v19  ;;  %v1493_v49 = vadd.f32 -0.28449672, %v1461_v54  ;;  %v1336_v4 = vmul.f32 1.0614054, %v3715_v62  ;;  %vm1111_vm1 = vcmp.ge.f32.partialorder %v3588_v12, 0.0 }
 0x2b2   : > { %2596 = vrcp.f32 %v1255_v41  ;;  %v3731_v53 = vmul.f32 0.5, %v3598_v29  ;;  %v1221_v6 = vmul.f32 0.3275911, %v1189_v61  ;;  %v1751_v7 = vmul.f32 %v2589_v57, %v1591_v11 }
 0x2b3   : > { %2381 = vst [vmem:[%s3420_s12 + $0x50] sm:$0xff] %v2330_v42   ;;  %v1525_v15 = vmul.f32 %v3678_v47, %v1493_v49  ;;  %v1368_v18 = vadd.f32 -1.4531521, %v1336_v4  ;;  %vm1109_vm2 = vcmp.ge.f32.partialorder %v3614_v5, 0.0  ;;  %v3738_v60 = vmul.f32 0.70710677, %v3721_v50 }
 0x2b4   : > { %v3733_v30 = vpop.eup %2592  ;;  %v1253_v21 = vadd.f32 1.0, %v1221_v6  ;;  %v3743_v12 = vadd.f32 %v3686_v9, %v3377_v52  ;;  %v1143_v29 = vsel %vm1111_vm1, 1.0, %v4036_v56  ;;  %2598 = vpow2.f32 %v1699_v48 }
 0x2b5   : > { %v1400_v20 = vmul.f32 %v3715_v62, %v1368_v18  ;;  %v1557_v14 = vadd.f32 0.2548296, %v1525_v15  ;;  %v1334_v59 = vmul.f32 1.0614054, %v3733_v30  ;;  %v1695_v22 = vmul.f32 1.442695, %v1654_v10 }
 0x2b6   : > { %vm1112_vm3 = vcmp.ge.f32.partialorder %v3657_v32, 0.0  ;;  %v1639_v0 = vsub.f32 0.0, %v3706_v55  ;;  %2600 = vrcp.f32 %v1253_v21  ;;  %v1783_v27 = vsub.f32 1.0, %v1751_v7 }
 0x2b7   : > { %v1432_v51 = vadd.f32 1.4214138, %v1400_v20  ;;  %v1366_v35 = vadd.f32 -1.4531521, %v1334_v59  ;;  %v1141_v1 = vsel %vm1109_vm2, 1.0, %v4036_v56  ;;  %v1589_v26 = vmul.f32 %v3678_v47, %v1557_v14 }
 0x2b8   : > { %v3753_v52 = vand.u32 2147483647, %v3738_v60  ;;  %v2595_v24 = vpop.eup %2594  ;;  %v3757_v17 = vmul.f32 0.5, %v3641_v36  ;;  %v3761_v34 = vmul.f32 0.70710677, %v3743_v12  ;;  %v1144_v19 = vsel %vm1112_vm3, 1.0, %v4036_v56 }
 0x2b9   : > { %v1464_v39 = vmul.f32 %v3715_v62, %v1432_v51  ;;  %v1398_v32 = vmul.f32 %v3733_v30, %v1366_v35  ;;  %2602 = vpow2.f32 %v1695_v22  ;;  %v1671_v38 = vmul.f32 %v1639_v0, %v3706_v55 }
 0x2ba   : > { %v1224_v44 = vmul.f32 0.3275911, %v3753_v52  ;;  %v1637_v47 = vsub.f32 0.0, %v1189_v61  ;;  %v3769_v36 = vand.u32 2147483647, %v3761_v34  ;;  %v1815_v54 = vmul.f32 %v1783_v27, %v1143_v29 }
 0x2bb   : > { %v1496_v5 = vadd.f32 -0.28449672, %v1464_v39  ;;  %v1430_v57 = vadd.f32 1.4214138, %v1398_v32  ;;  %v1749_v42 = vmul.f32 %v2595_v24, %v1589_v26  ;;  %v3777_v15 = vadd.f32 %v3686_v9, %v3397_v40 }
 0x2bc   : > { %v3765_v16 = vpop.eup %2596  ;;  %v1256_v41 = vadd.f32 1.0, %v1224_v44  ;;  %v1222_v4 = vmul.f32 0.3275911, %v3769_v36  ;;  %v3780_v18 = vmul.f32 0.5, %v3663_v63  ;;  %vm1110_vm4 = vcmp.ge.f32.partialorder %v3674_v45, 0.0 }
 0x2bd   : > { %v1528_v58 = vmul.f32 %v3715_v62, %v1496_v5  ;;  %v1351_v11 = vmul.f32 1.0614054, %v3765_v16  ;;  %v1462_v49 = vmul.f32 %v3733_v30, %v1430_v57  ;;  %v1669_v6 = vmul.f32 %v1637_v47, %v1189_v61 }
 0x2be   : > { %2604 = vrcp.f32 %v1256_v41  ;;  %v1254_v7 = vadd.f32 1.0, %v1222_v4  ;;  %v2599_v20 = vpop.eup %2598  ;;  %v1847_v14 = vadd.f32 1.0, %v1815_v54  ;;  %v1729_v29 = vmul.f32 1.442695, %v1671_v38 }
 0x2bf   : > { %v1560_v55 = vadd.f32 0.2548296, %v1528_v58  ;;  %v1383_v48 = vadd.f32 -1.4531521, %v1351_v11  ;;  %v1494_v10 = vadd.f32 -0.28449672, %v1462_v49  ;;  %v3793_v35 = vadd.f32 %v3686_v9, %v3402_v28 }
 0x2c0   : > { %v3785_v40 = vpop.eup %2600  ;;  %v1781_v51 = vsub.f32 1.0, %v1749_v42  ;;  %v3789_v22 = vmul.f32 0.70710677, %v3777_v15  ;;  %2606 = vrcp.f32 %v1254_v7  ;;  %v1725_v24 = vmul.f32 1.442695, %v1669_v6 }
 0x2c1   : > { %v1592_v59 = vmul.f32 %v3715_v62, %v1560_v55  ;;  %v1415_v21 = vmul.f32 %v3765_v16, %v1383_v48  ;;  %v1526_v63 = vmul.f32 %v3733_v30, %v1494_v10  ;;  %v1349_v27 = vmul.f32 1.0614054, %v3785_v40 }
 0x2c2   : > { %v1142_v62 = vsel %vm1110_vm4, 1.0, %v4036_v56  ;;  %v1640_v26 = vsub.f32 0.0, %v3753_v52  ;;  %2608 = vpow2.f32 %v1729_v29  ;;  %v1879_v57 = vmul.f32 %v1847_v14, %v3727_v23 }
 0x2c3   : > { %v1752_v61 = vmul.f32 %v2599_v20, %v1592_v59  ;;  %v1447_v0 = vadd.f32 1.4214138, %v1415_v21  ;;  %v1558_v39 = vadd.f32 0.2548296, %v1526_v63  ;;  %v2603_v32 = vpop.eup %2602  ;;  %v1381_v28 = vadd.f32 -1.4531521, %v1349_v27 }
 0x2c4   : > { %v1813_v38 = vmul.f32 %v1781_v51, %v1141_v1  ;;  %v3804_v54 = vand.u32 2147483647, %v3789_v22  ;;  %v3808_v41 = vmul.f32 0.70710677, %v3793_v35  ;;  %2610 = vpow2.f32 %v1725_v24 }
 0x2c5   : > { %v1784_v5 = vsub.f32 1.0, %v1752_v61  ;;  %v1479_v44 = vmul.f32 %v3765_v16, %v1447_v0  ;;  %v1590_v47 = vmul.f32 %v3733_v30, %v1558_v39  ;;  %v1413_v11 = vmul.f32 %v3785_v40, %v1381_v28 }
 0x2c6   : > { %v1672_v49 = vmul.f32 %v1640_v26, %v3753_v52  ;;  %v1211_v4 = vmul.f32 0.3275911, %v3804_v54  ;;  %vm1127_vm5 = vcmp.ge.f32.partialorder %v3696_v43, 0.0  ;;  %v1638_v55 = vsub.f32 0.0, %v3769_v36 }
 0x2c7   : > { %v1816_v45 = vmul.f32 %v1784_v5, %v1144_v19  ;;  %v1511_v58 = vadd.f32 -0.28449672, %v1479_v44  ;;  %v1750_v42 = vmul.f32 %v2603_v32, %v1590_v47  ;;  %v1445_v19 = vadd.f32 1.4214138, %v1413_v11 }
 0x2c8   : > { %v3812_v23 = vpop.eup %2604  ;;  %v1845_v48 = vadd.f32 1.0, %v1813_v38  ;;  %v1243_v7 = vadd.f32 1.0, %v1211_v4  ;;  %v3821_v59 = vand.u32 2147483647, %v3808_v41  ;;  %v1731_v51 = vmul.f32 1.442695, %v1672_v49 }
 0x2c9   : > { %v1848_v1 = vadd.f32 1.0, %v1816_v45  ;;  %v1543_v30 = vmul.f32 %v3765_v16, %v1511_v58  ;;  %v1782_v10 = vsub.f32 1.0, %v1750_v42  ;;  %v1352_v6 = vmul.f32 1.0614054, %v3812_v23 }
 0x2ca   : > { %v1477_v14 = vmul.f32 %v3785_v40, %v1445_v19  ;;  %2612 = vrcp.f32 %v1243_v7  ;;  %v3823_v63 = vpop.eup %2606  ;;  %v1670_v27 = vmul.f32 %v1638_v55, %v3769_v36  ;;  %v1209_v39 = vmul.f32 0.3275911, %v3821_v59 }
 0x2cb   : > { %v1880_v20 = vmul.f32 %v1848_v1, %v3757_v17  ;;  %v1575_v52 = vadd.f32 0.2548296, %v1543_v30  ;;  %v1814_v21 = vmul.f32 %v1782_v10, %v1142_v62  ;;  %v1384_v29 = vadd.f32 -1.4531521, %v1352_v6 }
 0x2cc   : > { %v1509_v0 = vadd.f32 -0.28449672, %v1477_v14  ;;  %v1350_v26 = vmul.f32 1.0614054, %v3823_v63  ;;  %v3831_v32 = vadd.f32 %v3686_v9, %v3406_v8  ;;  %v2609_v62 = vpop.eup %2608  ;;  %v1877_v5 = vmul.f32 %v1845_v48, %v3731_v53 }
 0x2cd   : > { %v2305_v61 = vpack.c.bf16 %v1880_v20, %v1879_v57  ;;  %v1846_v17 = vadd.f32 1.0, %v1814_v21  ;;  %v1416_v24 = vmul.f32 %v3812_v23, %v1384_v29  ;;  %v1607_v44 = vmul.f32 %v3765_v16, %v1575_v52 }
 0x2ce   : > { %v1541_v28 = vmul.f32 %v3785_v40, %v1509_v0  ;;  %v1241_v36 = vadd.f32 1.0, %v1209_v39  ;;  %2614 = vpow2.f32 %v1731_v51  ;;  %v1382_v47 = vadd.f32 -1.4531521, %v1350_v26  ;;  %v2611_v58 = vpop.eup %2610 }
 0x2cf   : > { %2376 = vst [vmem:[%s3420_s12 + $0x28] sm:$0xff] %v2305_v61   ;;  %v1878_v57 = vmul.f32 %v1846_v17, %v3780_v18  ;;  %v1448_v38 = vadd.f32 1.4214138, %v1416_v24  ;;  %vm1125_vm6 = vcmp.ge.f32.partialorder %v3713_v33, 0.0  ;;  %v1727_v8 = vmul.f32 1.442695, %v1670_v27 }
 0x2d0   : > { %v1573_v45 = vadd.f32 0.2548296, %v1541_v28  ;;  %2616 = vrcp.f32 %v1241_v36  ;;  %v1414_v16 = vmul.f32 %v3823_v63, %v1382_v47  ;;  %v3842_v42 = vmul.f32 0.70710677, %v3831_v32 }
 0x2d1   : > { %v2300_v11 = vpack.c.bf16 %v1878_v57, %v1877_v5  ;;  %v1480_v53 = vmul.f32 %v3812_v23, %v1448_v38  ;;  %v3845_v18 = vmul.f32 0.5, %v3690_v46  ;;  %v1767_v49 = vmul.f32 %v2609_v62, %v1607_v44 }
 0x2d2   : > { %v1605_v4 = vmul.f32 %v3785_v40, %v1573_v45  ;;  %v3850_v1 = vadd.f32 %v3686_v9, %v3409_v3  ;;  %v1159_v30 = vsel %vm1127_vm5, 1.0, %v4036_v56  ;;  %v3857_v19 = vmul.f32 0.5, %v3700_v2 }
 0x2d3   : > { %2375 = vst [vmem:[%s3420_s12 + $0x20] sm:$0xff] %v2300_v11   ;;  %v1512_v55 = vadd.f32 -0.28449672, %v1480_v53  ;;  %v1446_v48 = vadd.f32 1.4214138, %v1414_v16  ;;  %v1157_v46 = vsel %vm1125_vm6, 1.0, %v4036_v56  ;;  %2618 = vpow2.f32 %v1727_v8 }
 0x2d4   : > { %vm1128_vm7 = vcmp.ge.f32.partialorder %v3738_v60, 0.0  ;;  %v1627_v3 = vsub.f32 0.0, %v3804_v54  ;;  %v3864_v40 = vpop.eup %2612  ;;  %vm1126_vm8 = vcmp.ge.f32.partialorder %v3761_v34, 0.0  ;;  %v1180_v2 = vand.u32 2147483647, %v3842_v42 }
 0x2d5   : > { %v1544_v10 = vmul.f32 %v3812_v23, %v1512_v55  ;;  %v1478_v43 = vmul.f32 %v3823_v63, %v1446_v48  ;;  %v1799_v6 = vsub.f32 1.0, %v1767_v49  ;;  %v1765_v7 = vmul.f32 %v2611_v58, %v1605_v4 }
 0x2d6   : > { %v1339_v33 = vmul.f32 1.0614054, %v3864_v40  ;;  %v3872_v20 = vmul.f32 0.70710677, %v3850_v1  ;;  %v1212_v21 = vmul.f32 0.3275911, %v1180_v2  ;;  %v1659_v0 = vmul.f32 %v1627_v3, %v3804_v54 }
 0x2d7   : > { %v1576_v52 = vadd.f32 0.2548296, %v1544_v10  ;;  %v1510_v14 = vadd.f32 -0.28449672, %v1478_v43  ;;  %v1064_v29 = vmul.f32 0.5, %v3721_v50  ;;  %v1160_v51 = vsel %vm1128_vm7, 1.0, %v4036_v56 }
 0x2d8   : > { %v1371_v61 = vadd.f32 -1.4531521, %v1339_v33  ;;  %v2615_v27 = vpop.eup %2614  ;;  %v1158_v17 = vsel %vm1126_vm8, 1.0, %v4036_v56  ;;  %v1244_v26 = vadd.f32 1.0, %v1212_v21  ;;  %v1831_v50 = vmul.f32 %v1799_v6, %v1159_v30 }
 0x2d9   : > { %v1608_v39 = vmul.f32 %v3812_v23, %v1576_v52  ;;  %v1542_v24 = vmul.f32 %v3823_v63, %v1510_v14  ;;  %v1797_v5 = vsub.f32 1.0, %v1765_v7  ;;  %v3888_v44 = vand.u32 2147483647, %v3872_v20 }
 0x2da   : > { %v3884_v62 = vpop.eup %2616  ;;  %v1403_v60 = vmul.f32 %v3864_v40, %v1371_v61  ;;  %2620 = vrcp.f32 %v1244_v26  ;;  %v1705_v34 = vmul.f32 1.442695, %v1659_v0  ;;  %v3894_v38 = vadd.f32 %v3686_v9, %v3413_v13 }
 0x2db   : > { %v1768_v54 = vmul.f32 %v2615_v27, %v1608_v39  ;;  %v1574_v28 = vadd.f32 0.2548296, %v1542_v24  ;;  %v1337_v23 = vmul.f32 1.0614054, %v3884_v62  ;;  %v1210_v57 = vmul.f32 0.3275911, %v3888_v44 }
 0x2dc   : > { %v1435_v36 = vadd.f32 1.4214138, %v1403_v60  ;;  %v1625_v58 = vsub.f32 0.0, %v3821_v59  ;;  %v1863_v53 = vadd.f32 1.0, %v1831_v50  ;;  %v1829_v16 = vmul.f32 %v1797_v5, %v1157_v46 }
 0x2dd   : > { %v1800_v47 = vsub.f32 1.0, %v1768_v54  ;;  %v1606_v45 = vmul.f32 %v3823_v63, %v1574_v28  ;;  %v1369_v8 = vadd.f32 -1.4531521, %v1337_v23  ;;  %v2619_v11 = vpop.eup %2618  ;;  %v1242_v4 = vadd.f32 1.0, %v1210_v57 }
 0x2de   : > { %v1467_v49 = vmul.f32 %v3864_v40, %v1435_v36  ;;  %v3902_v13 = vadd.f32 %v3686_v9, %v3425_v37  ;;  %v1628_v10 = vsub.f32 0.0, %v1180_v2  ;;  %v3905_v63 = vmul.f32 0.70710677, %v3894_v38 }
 0x2df   : > { %v1832_v30 = vmul.f32 %v1800_v47, %v1160_v51  ;;  %v1766_v55 = vmul.f32 %v2619_v11, %v1606_v45  ;;  %v1401_v48 = vmul.f32 %v3884_v62, %v1369_v8  ;;  %2622 = vrcp.f32 %v1242_v4 }
 0x2e0   : > { %v1499_v3 = vadd.f32 -0.28449672, %v1467_v49  ;;  %v1657_v7 = vmul.f32 %v1625_v58, %v3821_v59  ;;  %v1895_v33 = vmul.f32 %v1863_v53, %v3845_v18  ;;  %v1861_v52 = vadd.f32 1.0, %v1829_v16 }
 0x2e1   : > { %v1864_v43 = vadd.f32 1.0, %v1832_v30  ;;  %v1798_v6 = vsub.f32 1.0, %v1766_v55  ;;  %v1433_v46 = vadd.f32 1.4214138, %v1401_v48  ;;  %v3911_v21 = vand.u32 2147483647, %v3905_v63 }
 0x2e2   : > { %v1531_v14 = vmul.f32 %v3864_v40, %v1499_v3  ;;  %v3915_v0 = vmul.f32 0.70710677, %v3902_v13  ;;  %v1062_v27 = vmul.f32 0.5, %v3743_v12  ;;  %2624 = vpow2.f32 %v1705_v34 }
 0x2e3   : > { %v1896_v37 = vmul.f32 %v1864_v43, %v1064_v29  ;;  %v1830_v51 = vmul.f32 %v1798_v6, %v1158_v17  ;;  %v1465_v61 = vmul.f32 %v3884_v62, %v1433_v46  ;;  %v1660_v59 = vmul.f32 %v1628_v10, %v1180_v2 }
 0x2e4   : > { %v1227_v18 = vmul.f32 0.3275911, %v3911_v21  ;;  %v3919_v39 = vpop.eup %2620  ;;  %v1701_v5 = vmul.f32 1.442695, %v1657_v7  ;;  %v1626_v17 = vsub.f32 0.0, %v3888_v44  ;;  %v1893_v54 = vmul.f32 %v1861_v52, %v3857_v19 }
 0x2e5   : > { %v2345_v24 = vpack.c.bf16 %v1896_v37, %v1895_v33  ;;  %v1862_v26 = vadd.f32 1.0, %v1830_v51  ;;  %v1497_v50 = vadd.f32 -0.28449672, %v1465_v61  ;;  %v1340_v29 = vmul.f32 1.0614054, %v3919_v39 }
 0x2e6   : > { %v1259_v60 = vadd.f32 1.0, %v1227_v18  ;;  %v1563_v28 = vadd.f32 0.2548296, %v1531_v14  ;;  %v3926_v2 = vand.u32 2147483647, %v3915_v0  ;;  %v1658_v8 = vmul.f32 %v1626_v17, %v3888_v44 }
 0x2e7   : > { %2384 = vst [vmem:[%s3420_s12 + $0x68] sm:$0xff] %v2345_v24   ;;  %v1894_v12 = vmul.f32 %v1862_v26, %v1062_v27  ;;  %v1529_v23 = vmul.f32 %v3884_v62, %v1497_v50  ;;  %v1372_v36 = vadd.f32 -1.4531521, %v1340_v29  ;;  %v1707_v34 = vmul.f32 1.442695, %v1660_v59 }
 0x2e8   : > { %2626 = vrcp.f32 %v1259_v60  ;;  %v1225_v47 = vmul.f32 0.3275911, %v3926_v2  ;;  %v3936_v58 = vadd.f32 %v3686_v9, %v3440_v31  ;;  %v1595_v11 = vmul.f32 %v3864_v40, %v1563_v28 }
 0x2e9   : > { %v2340_v57 = vpack.c.bf16 %v1894_v12, %v1893_v54  ;;  %2628 = vpow2.f32 %v1701_v5  ;;  %v3930_v45 = vpop.eup %2622  ;;  %v1404_v19 = vmul.f32 %v3919_v39, %v1372_v36  ;;  %v1561_v49 = vadd.f32 0.2548296, %v1529_v23 }
 0x2ea   : > { %v1338_v53 = vmul.f32 1.0614054, %v3930_v45  ;;  %v1257_v16 = vadd.f32 1.0, %v1225_v47  ;;  %2630 = vpow2.f32 %v1707_v34  ;;  %v3942_v30 = vmul.f32 0.70710677, %v3936_v58 }
 0x2eb   : > { %2383 = vst [vmem:[%s3420_s12 + $0x60] sm:$0xff] %v2340_v57   ;;  %v1436_v4 = vadd.f32 1.4214138, %v1404_v19  ;;  %vm1115_vm9 = vcmp.ge.f32.partialorder %v3789_v22, 0.0  ;;  %v1703_v44 = vmul.f32 1.442695, %v1658_v8  ;;  %v1593_v6 = vmul.f32 %v3884_v62, %v1561_v49 }
 0x2ec   : > { %v1370_v55 = vadd.f32 -1.4531521, %v1338_v53  ;;  %2632 = vrcp.f32 %v1257_v16  ;;  %v2625_v48 = vpop.eup %2624  ;;  %v3947_v3 = vand.u32 2147483647, %v3942_v30  ;;  %v3951_v43 = vmul.f32 0.5, %v3777_v15 }
 0x2ed   : > { %v1468_v31 = vmul.f32 %v3919_v39, %v1436_v4  ;;  %v1755_v40 = vmul.f32 %v2625_v48, %v1595_v11  ;;  %v1147_v33 = vsel %vm1115_vm9, 1.0, %v4036_v56  ;;  %v1643_v52 = vsub.f32 0.0, %v3911_v21 }
 0x2ee   : > { %v1402_v10 = vmul.f32 %v3930_v45, %v1370_v55  ;;  %v1228_v7 = vmul.f32 0.3275911, %v3947_v3  ;;  %v3959_v14 = vadd.f32 %v3686_v9, %v3468_v25  ;;  %vm1113_vm10 = vcmp.ge.f32.partialorder %v3808_v41, 0.0 }
 0x2ef   : > { %v1500_v46 = vadd.f32 -0.28449672, %v1468_v31  ;;  %2634 = vpow2.f32 %v1703_v44  ;;  %v1787_v61 = vsub.f32 1.0, %v1755_v40  ;;  %vm1116_vm11 = vcmp.ge.f32.partialorder %v3842_v42, 0.0 }
 0x2f0   : > { %v1434_v22 = vadd.f32 1.4214138, %v1402_v10  ;;  %v1260_v62 = vadd.f32 1.0, %v1228_v7  ;;  %v3969_v25 = vmul.f32 0.70710677, %v3959_v14  ;;  %v1145_v9 = vsel %vm1113_vm10, 1.0, %v4036_v56 }
 0x2f1   : > { %v1532_v15 = vmul.f32 %v3919_v39, %v1500_v46  ;;  %v1675_v50 = vmul.f32 %v1643_v52, %v3911_v21  ;;  %v1148_v29 = vsel %vm1116_vm11, 1.0, %v4036_v56  ;;  %vm1114_vm12 = vcmp.ge.f32.partialorder %v3872_v20, 0.0 }
 0x2f2   : > { %v3961_v37 = vpop.eup %2626  ;;  %v1466_v27 = vmul.f32 %v3930_v45, %v1434_v22  ;;  %2636 = vrcp.f32 %v1260_v62  ;;  %v3977_v17 = vand.u32 2147483647, %v3969_v25  ;;  %v1819_v54 = vmul.f32 %v1787_v61, %v1147_v33 }
 0x2f3   : > { %v2629_v51 = vpop.eup %2628  ;;  %v1355_v59 = vmul.f32 1.0614054, %v3961_v37  ;;  %v1564_v24 = vadd.f32 0.2548296, %v1532_v15  ;;  %v1641_v23 = vsub.f32 0.0, %v3926_v2  ;;  %v1644_v53 = vsub.f32 0.0, %v3947_v3 }
 0x2f4   : > { %v1753_v18 = vmul.f32 %v2629_v51, %v1593_v6  ;;  %v1498_v41 = vadd.f32 -0.28449672, %v1466_v27  ;;  %v2631_v5 = vpop.eup %2630  ;;  %v1737_v19 = vmul.f32 1.442695, %v1675_v50  ;;  %v1851_v49 = vadd.f32 1.0, %v1819_v54 }
 0x2f5   : > { %v1387_v26 = vadd.f32 -1.4531521, %v1355_v59  ;;  %v1596_v42 = vmul.f32 %v3919_v39, %v1564_v24  ;;  %v1226_v39 = vmul.f32 0.3275911, %v3977_v17  ;;  %v1673_v48 = vmul.f32 %v1641_v23, %v3926_v2 }
 0x2f6   : > { %v3979_v60 = vpop.eup %2632  ;;  %v1530_v12 = vmul.f32 %v3930_v45, %v1498_v41  ;;  %v1785_v21 = vsub.f32 1.0, %v1753_v18  ;;  %v1052_v6 = vmul.f32 0.5, %v3831_v32  ;;  %v1146_v46 = vsel %vm1114_vm12, 1.0, %v4036_v56 }
 0x2f7   : > { %v1419_v28 = vmul.f32 %v3961_v37, %v1387_v26  ;;  %v1756_v36 = vmul.f32 %v2631_v5, %v1596_v42  ;;  %v1353_v34 = vmul.f32 1.0614054, %v3979_v60  ;;  %v1258_v16 = vadd.f32 1.0, %v1226_v39 }
 0x2f8   : > { %v1562_v57 = vadd.f32 0.2548296, %v1530_v12  ;;  %v1817_v44 = vmul.f32 %v1785_v21, %v1145_v9  ;;  %v1676_v2 = vmul.f32 %v1644_v53, %v3947_v3  ;;  %v1733_v51 = vmul.f32 1.442695, %v1673_v48 }
 0x2f9   : > { %v1451_v47 = vadd.f32 1.4214138, %v1419_v28  ;;  %v1788_v8 = vsub.f32 1.0, %v1756_v36  ;;  %v1385_v11 = vadd.f32 -1.4531521, %v1353_v34  ;;  %v2635_v31 = vpop.eup %2634  ;;  %2638 = vrcp.f32 %v1258_v16 }
 0x2fa   : > { %v1594_v4 = vmul.f32 %v3930_v45, %v1562_v57  ;;  %2640 = vpow2.f32 %v1737_v19  ;;  %v1883_v27 = vmul.f32 %v1851_v49, %v3951_v43  ;;  %v1849_v32 = vadd.f32 1.0, %v1817_v44 }
 0x2fb   : > { %v1483_v55 = vmul.f32 %v3961_v37, %v1451_v47  ;;  %v1820_v40 = vmul.f32 %v1788_v8, %v1148_v29  ;;  %v1417_v10 = vmul.f32 %v3979_v60, %v1385_v11  ;;  %v1049_v18 = vmul.f32 0.5, %v3793_v35 }
 0x2fc   : > { %v1754_v7 = vmul.f32 %v2635_v31, %v1594_v4  ;;  %v2637_v22 = vpop.eup %2636  ;;  %v1739_v3 = vmul.f32 1.442695, %v1676_v2  ;;  %v1642_v5 = vsub.f32 0.0, %v3977_v17  ;;  %v1050_v29 = vmul.f32 0.5, %v3850_v1 }
 0x2fd   : > { %v1515_v33 = vadd.f32 -0.28449672, %v1483_v55  ;;  %v1852_v45 = vadd.f32 1.0, %v1820_v40  ;;  %v1449_v52 = vadd.f32 1.4214138, %v1417_v10  ;;  %v1881_v54 = vmul.f32 %v1849_v32, %v1049_v18 }
 0x2fe   : > { %v1786_v15 = vsub.f32 1.0, %v1754_v7  ;;  %v1356_v61 = vmul.f32 1.0614054, %v2637_v22  ;;  %2642 = vpow2.f32 %v1733_v51  ;;  %v1674_v36 = vmul.f32 %v1642_v5, %v3977_v17 }
 0x2ff   : > { %v1547_v62 = vmul.f32 %v3961_v37, %v1515_v33  ;;  %v1884_v59 = vmul.f32 %v1852_v45, %v1052_v6  ;;  %v1481_v20 = vmul.f32 %v3979_v60, %v1449_v52  ;;  %2644 = vpow2.f32 %v1739_v3 }
 0x300   : > { %v1818_v24 = vmul.f32 %v1786_v15, %v1146_v46  ;;  %v1388_v41 = vadd.f32 -1.4531521, %v1356_v61  ;;  %v1735_v53 = vmul.f32 1.442695, %v1674_v36  ;;  %vm1131_vm13 = vcmp.ge.f32.partialorder %v3905_v63, 0.0 }
 0x301   : > { %v1579_v9 = vadd.f32 0.2548296, %v1547_v62  ;;  %v2315_v26 = vpack.c.bf16 %v1884_v59, %v1883_v27  ;;  %v1513_v50 = vadd.f32 -0.28449672, %v1481_v20  ;;  %v1163_v10 = vsel %vm1131_vm13, 1.0, %v4036_v56 }
 0x302   : > { %v1850_v42 = vadd.f32 1.0, %v1818_v24  ;;  %v1420_v43 = vmul.f32 %v2637_v22, %v1388_v41  ;;  %2646 = vpow2.f32 %v1735_v53  ;;  %vm1132_vm14 = vcmp.ge.f32.partialorder %v3942_v30, 0.0 }
 0x303   : > { %2378 = vst [vmem:[%s3420_s12 + $0x38] sm:$0xff] %v2315_v26   ;;  %v1611_v28 = vmul.f32 %v3961_v37, %v1579_v9  ;;  %v1545_v35 = vmul.f32 %v3979_v60, %v1513_v50  ;;  %v2639_v21 = vpop.eup %2638  ;;  %vm1129_vm15 = vcmp.ge.f32.partialorder %v3915_v0, 0.0  ;;  %v1067_v62 = vmul.f32 0.5, %v3894_v38 }
 0x304   : > { %v1882_v12 = vmul.f32 %v1850_v42, %v1050_v29  ;;  %v1452_v23 = vadd.f32 1.4214138, %v1420_v43  ;;  %v1354_v57 = vmul.f32 1.0614054, %v2639_v21  ;;  %v2641_v1 = vpop.eup %2640  ;;  %v1068_v51 = vmul.f32 0.5, %v3936_v58 }
 0x305   : > { %v1771_v47 = vmul.f32 %v2641_v1, %v1611_v28  ;;  %v1577_v19 = vadd.f32 0.2548296, %v1545_v35  ;;  %v1161_v32 = vsel %vm1129_vm15, 1.0, %v4036_v56  ;;  %vm1130_vm0 = vcmp.ge.f32.partialorder %v3969_v25, 0.0 }
 0x306   : > { %v2310_v34 = vpack.c.bf16 %v1882_v12, %v1881_v54  ;;  %v1484_v39 = vmul.f32 %v2637_v22, %v1452_v23  ;;  %v1386_v11 = vadd.f32 -1.4531521, %v1354_v57  ;;  %v1162_v41 = vsel %vm1130_vm0, 1.0, %v4036_v56 }
 0x307   : > { %v1803_v37 = vsub.f32 1.0, %v1771_v47  ;;  %v1609_v4 = vmul.f32 %v3979_v60, %v1577_v19  ;;  %v1164_v60 = vsel %vm1132_vm14, 1.0, %v4036_v56  ;;  %v1065_v58 = vmul.f32 0.5, %v3902_v13 }
 0x308   : > { %2377 = vst [vmem:[%s3420_s12 + $0x30] sm:$0xff] %v2310_v34   ;;  %v1516_v8 = vadd.f32 -0.28449672, %v1484_v39  ;;  %v1418_v49 = vmul.f32 %v2639_v21, %v1386_v11  ;;  %v2643_v17 = vpop.eup %2642  ;;  %v1066_v50 = vmul.f32 0.5, %v3959_v14 }
 0x309   : > { %v2645_v40 = vpop.eup %2644  ;;  %v1835_v6 = vmul.f32 %v1803_v37, %v1163_v10  ;;  %v1769_v46 = vmul.f32 %v2643_v17, %v1609_v4 }
 0x30a   : > { %v1548_v16 = vmul.f32 %v2637_v22, %v1516_v8  ;;  %v1450_v48 = vadd.f32 1.4214138, %v1418_v49 }
 0x30b   : > { %v1867_v52 = vadd.f32 1.0, %v1835_v6  ;;  %v1801_v2 = vsub.f32 1.0, %v1769_v46 }
 0x30c   : > { %v1580_v55 = vadd.f32 0.2548296, %v1548_v16  ;;  %v1482_v44 = vmul.f32 %v2639_v21, %v1450_v48  ;;  %v2647_v27 = vpop.eup %2646 }
 0x30d   : > { %v1899_v59 = vmul.f32 %v1867_v52, %v1067_v62  ;;  %v1833_v0 = vmul.f32 %v1801_v2, %v1161_v32 }
 0x30e   : > { %v1612_v31 = vmul.f32 %v2637_v22, %v1580_v55  ;;  %v1514_v33 = vadd.f32 -0.28449672, %v1482_v44 }
 0x30f   : > { %v1865_v26 = vadd.f32 1.0, %v1833_v0 }
 0x310   : > { %v1772_v7 = vmul.f32 %v2645_v40, %v1612_v31  ;;  %v1546_v63 = vmul.f32 %v2639_v21, %v1514_v33 }
 0x311   : > { %v1897_v5 = vmul.f32 %v1865_v26, %v1065_v58 }
 0x312   : > { %v1804_v45 = vsub.f32 1.0, %v1772_v7  ;;  %v1578_v22 = vadd.f32 0.2548296, %v1546_v63 }
 0x314   : > { %v1836_v15 = vmul.f32 %v1804_v45, %v1164_v60  ;;  %v1610_v61 = vmul.f32 %v2639_v21, %v1578_v22 }
 0x316   : > { %v1868_v30 = vadd.f32 1.0, %v1836_v15  ;;  %v1770_v18 = vmul.f32 %v2647_v27, %v1610_v61 }
 0x318   : > { %v1900_v20 = vmul.f32 %v1868_v30, %v1068_v51  ;;  %v1802_v9 = vsub.f32 1.0, %v1770_v18 }
 0x31a   : > { %v2355_v24 = vpack.c.bf16 %v1900_v20, %v1899_v59  ;;  %v1834_v38 = vmul.f32 %v1802_v9, %v1162_v41 }
 0x31c   : > { %2386 = vst [vmem:[%s3420_s12 + $0x78] sm:$0xff] %v2355_v24   ;;  %v1866_v3 = vadd.f32 1.0, %v1834_v38 }
 0x31e   : > { %v1898_v29 = vmul.f32 %v1866_v3, %v1066_v50 }
 0x320   : > { %v2350_v25 = vpack.c.bf16 %v1898_v29, %v1897_v5 }
 0x322   : > { %2385 = vst [vmem:[%s3420_s12 + $0x70] sm:$0xff] %v2350_v25  }
 0x323 PF: > { %s15_s18 = sadd.s32 1, %s2655_s18  }
 0x324   : > { %p12_p4 = scmp.ge.s32.totalorder %s15_s18, 4  }
 0x326   :  { %14 = sbr.rel (!%p12_p4) target bundleno = 1 (0x1), region = 70 }

// kernel: nat_block.15
= control target key start
LH: loop header
LB: loop body
LE: loop exit
PB: predicated region body
PF: predicated region fallthrough
CT: control target
= control target key end

     0   :  { %s1243_s15 = smov 0   ;;  %s1431_s0 = inlined_call_operand.vmem [shape: bf16[512,128], index: 0, kind: input, shape index: {}]   ;;  %s1432_s1 = inlined_call_operand.vmem [shape: bf16[128,32], index: 1, kind: input, shape index: {}]   ;;  %s1433_s2 = inlined_call_operand.vmem [shape: f32[1,32], index: 2, kind: input, shape index: {}]   ;;  %s1434_s3 = inlined_call_operand.vmem [shape: bf16[512,32], index: 3, kind: input, shape index: {}]   ;;  %s1435_s4 = inlined_call_operand.vmem [shape: bf16[512,32], index: 4, kind: output, shape index: {}]  }
   0x1 LB: > { %s909_s16 = sadd.s32 4294967295, %s1216_s15   ;;  %p913_p0 = scmp.ge.s32.totalorder %s1216_s15, 1  ;;  %s1216_s15 = sphi %s1243_s15, %s14_s15  }
   0x2   : > { %p174_p1 = scmp.lt.s32.totalorder %s1216_s15, 3 }
   0x4   : > { %p175_p2 = pnand %p913_p0, %p174_p1 }
   0x5   : > { %v1186_v0 = vld [vmem:[%s1432_s1] sm:$0xff] (!%p175_p2)   ;;  %s914_s19 = sshll.u32 (!%p175_p2), %s909_s16, 5  ;;  %v1187_v1 = vld [vmem:[%s1432_s1 + $0x8] sm:$0xff] (!%p175_p2)   ;;  %v1188_v2 = vld [vmem:[%s1432_s1 + $0x10] sm:$0xff] (!%p175_p2)   ;;  %vm808_vm0 = vcmask (!%p175_p2), 257024  }
   0x6   : > { %178 = sbr.rel (%p175_p2) target bundleno = 284 (0x11c), region = 36  ;;  %p206_p3 = scmp.lt.s32.totalorder (!%p175_p2), %s914_s19, 63  ;;  %1114 = vmatprep.subr.bf16.mxu0 (!%p175_p2), %v1186_v0  ;;  %1162 = vmatprep.subr.bf16.mxu1 (!%p175_p2), %v1186_v0  ;;  %v1189_v3 = vld [vmem:[%s1432_s1 + $0x18] sm:$0xff] (!%p175_p2)   ;;  %v1190_v6 = vld [vmem:[%s1432_s1 + $0x20] sm:$0xff] (!%p175_p2)   ;;  %v1191_v7 = vld [vmem:[%s1432_s1 + $0x28] sm:$0xff] (!%p175_p2)  }
   0x7   : > { %1115 = vmatpush3.bf16.msra.mxu0 (!%p175_p2), %v1186_v0  ;;  %1170 = vmatpush3.bf16.msra.mxu1 (!%p175_p2), %v1186_v0  ;;  %v1192_v8 = vld [vmem:[%s1432_s1 + $0x30] sm:$0xff] (!%p175_p2)   ;;  %v1193_v9 = vld [vmem:[%s1432_s1 + $0x38] sm:$0xff] (!%p175_p2)   ;;  %v1312_v28 = vld [vmem:[%s1433_s2] ss:$0 sm:$0xff] (!%p175_p2) }
   0x8   : > { %1116 = vmatprep.subr.bf16.mxu0 (!%p175_p2), %v1187_v1  ;;  %1163 = vmatprep.subr.bf16.mxu1 (!%p175_p2), %v1187_v1 }
   0xb   : > { %1117 = vmatpush3.bf16.msra.mxu0 (!%p175_p2), %v1187_v1  ;;  %1171 = vmatpush3.bf16.msra.mxu1 (!%p175_p2), %v1187_v1 }
   0xc   : > { %1118 = vmatprep.subr.bf16.mxu0 (!%p175_p2), %v1188_v2  ;;  %1164 = vmatprep.subr.bf16.mxu1 (!%p175_p2), %v1188_v2 }
   0xd   : > { %s1437_s19 = smov (!%p206_p3, %s914_s19), 63 }
   0xe   : > { %s1260_s24 = sshll.u32 %s1437_s19, 2 }
   0xf   : > { %s1266_s27 = scalar_lea.vmem %s1431_s0, %s1260_s24  ;;  %1119 = vmatpush3.bf16.msra.mxu0 %v1188_v2  ;;  %1172 = vmatpush3.bf16.msra.mxu1 %v1188_v2  ;;  %s1303_s14 = scalar_lea.vmem %s1434_s3, %s1260_s24 }
  0x10   : > { %v1194_v4 = vld [vmem:[%s1266_s27] sm:$0xff]   ;;  %1120 = vmatprep.subr.bf16.mxu0 %v1189_v3  ;;  %1165 = vmatprep.subr.bf16.mxu1 %v1189_v3  ;;  %v1196_v10 = vld [vmem:[%s1266_s27 + $0x8] sm:$0xff]   ;;  %v1198_v12 = vld [vmem:[%s1266_s27 + $0x10] sm:$0xff]   ;;  %s1324_s20 = scalar_lea.vmem %s1435_s4, %s1260_s24 }
  0x11   : > { %v1195_v5 = vld [vmem:[%s1266_s27 + $0x40] sm:$0xff]   ;;  %1130 = vmatprep.mubr.bf16.mxu0 %v1194_v4  ;;  %v1197_v11 = vld [vmem:[%s1266_s27 + $0x48] sm:$0xff]   ;;  %v1199_v13 = vld [vmem:[%s1266_s27 + $0x50] sm:$0xff]  }
  0x12   : > { %1146 = vmatprep.mubr.bf16.mxu1 %v1195_v5  ;;  %v1200_v14 = vld [vmem:[%s1266_s27 + $0x18] sm:$0xff]   ;;  %v1202_v16 = vld [vmem:[%s1266_s27 + $0x20] sm:$0xff]   ;;  %v1204_v18 = vld [vmem:[%s1266_s27 + $0x28] sm:$0xff]  }
  0x13   : > { %1121 = vmatpush3.bf16.msra.mxu0 %v1189_v3  ;;  %1173 = vmatpush3.bf16.msra.mxu1 %v1189_v3  ;;  %v1201_v15 = vld [vmem:[%s1266_s27 + $0x58] sm:$0xff]   ;;  %v1203_v17 = vld [vmem:[%s1266_s27 + $0x60] sm:$0xff]   ;;  %v1205_v19 = vld [vmem:[%s1266_s27 + $0x68] sm:$0xff]  }
  0x14   : > { %1122 = vmatprep.subr.bf16.mxu0 %v1190_v6  ;;  %1166 = vmatprep.subr.bf16.mxu1 %v1190_v6  ;;  %v1206_v20 = vld [vmem:[%s1266_s27 + $0x30] sm:$0xff]   ;;  %v1208_v22 = vld [vmem:[%s1266_s27 + $0x38] sm:$0xff]   ;;  %v1075_v24 = vld [vmem:[%s1303_s14 + $0x8] sm:$0xff]  }
  0x15   : > { %v1207_v21 = vld [vmem:[%s1266_s27 + $0x70] sm:$0xff]   ;;  %v1209_v23 = vld [vmem:[%s1266_s27 + $0x78] sm:$0xff]   ;;  %v1083_v25 = vld [vmem:[%s1303_s14 + $0x48] sm:$0xff]   ;;  %v1017_v29 = vunpack.c.l.bf16 %v1075_v24  ;;  %v1018_v35 = vunpack.c.h.bf16 %v1075_v24 }
  0x16   : > { %v1012_v26 = vld [vmem:[%s1303_s14] sm:$0xff]   ;;  %v1049_v30 = vunpack.c.l.bf16 %v1083_v25  ;;  %v1050_v40 = vunpack.c.h.bf16 %v1083_v25  ;;  %v1077_v57 = vld [vmem:[%s1303_s14 + $0x18] sm:$0xff]   ;;  %v1076_v63 = vld [vmem:[%s1303_s14 + $0x10] sm:$0xff]  }
  0x17   : > { %1123 = vmatpush3.bf16.msra.mxu0 %v1190_v6  ;;  %1174 = vmatpush3.bf16.msra.mxu1 %v1190_v6  ;;  %v1082_v27 = vld [vmem:[%s1303_s14 + $0x40] sm:$0xff]   ;;  %v1013_v33 = vunpack.c.l.bf16 %v1012_v26  ;;  %v1014_v41 = vunpack.c.h.bf16 %v1012_v26  ;;  %v1085_v58 = vld [vmem:[%s1303_s14 + $0x58] sm:$0xff]   ;;  %v1084_v0 = vld [vmem:[%s1303_s14 + $0x50] sm:$0xff]   ;;  %v1022_v25 = vunpack.c.h.bf16 %v1076_v63 }
  0x18   : > { %1124 = vmatprep.subr.bf16.mxu0 %v1191_v7  ;;  %1167 = vmatprep.subr.bf16.mxu1 %v1191_v7  ;;  %v1045_v34 = vunpack.c.l.bf16 %v1082_v27  ;;  %v1046_v46 = vunpack.c.h.bf16 %v1082_v27  ;;  %v1054_v26 = vunpack.c.h.bf16 %v1084_v0 }
  0x1b   : > { %1125 = vmatpush3.bf16.msra.mxu0 %v1191_v7  ;;  %1175 = vmatpush3.bf16.msra.mxu1 %v1191_v7  ;;  %v1025_v7 = vunpack.c.l.bf16 %v1077_v57 }
  0x1c   : > { %1126 = vmatprep.subr.bf16.mxu0 %v1192_v8  ;;  %1168 = vmatprep.subr.bf16.mxu1 %v1192_v8 }
  0x1f   : > { %1127 = vmatpush3.bf16.msra.mxu0 %v1192_v8  ;;  %1176 = vmatpush3.bf16.msra.mxu1 %v1192_v8  ;;  %v1057_v8 = vunpack.c.l.bf16 %v1085_v58 }
  0x20   : > { %1128 = vmatprep.subr.bf16.mxu0 %v1193_v9  ;;  %1169 = vmatprep.subr.bf16.mxu1 %v1193_v9 }
  0x23   : > { %1129 = vmatpush3.bf16.msra.mxu0 %v1193_v9  ;;  %1177 = vmatpush3.bf16.msra.mxu1 %v1193_v9 }
  0x26   : > { %1131 = vmatmul.mubr.bf16.vlgmr.msra.gmra.mrb[0].mxu0 %v1196_v10  ;;  %1147 = vmatmul.mubr.bf16.vlgmr.msra.gmra.mrb[0].mxu1 %v1197_v11 }
  0x27   : > { %1134 = vmatprep.mubr.bf16.mxu0 %v1198_v12  ;;  %1150 = vmatprep.mubr.bf16.mxu1 %v1199_v13  ;;  %v1021_v13 = vunpack.c.l.bf16 %v1076_v63 }
  0x2e   : > { %1135 = vmatmul.mubr.bf16.gmra.mrb[4].mxu0 %v1200_v14  ;;  %1151 = vmatmul.mubr.bf16.gmra.mrb[4].mxu1 %v1201_v15  ;;  %v1053_v14 = vunpack.c.l.bf16 %v1084_v0 }
  0x2f   : > { %1138 = vmatprep.mubr.bf16.mxu0 %v1202_v16  ;;  %1154 = vmatprep.mubr.bf16.mxu1 %v1203_v17 }
  0x36   : > { %1139 = vmatmul.mubr.bf16.gmra.mrb[8].mxu0 %v1204_v18  ;;  %1155 = vmatmul.mubr.bf16.gmra.mrb[8].mxu1 %v1205_v19  ;;  %v1026_v19 = vunpack.c.h.bf16 %v1077_v57 }
  0x37   : > { %1142 = vmatprep.mubr.bf16.mxu0 %v1206_v20  ;;  %1158 = vmatprep.mubr.bf16.mxu1 %v1207_v21  ;;  %v1058_v20 = vunpack.c.h.bf16 %v1085_v58 }
  0x3e   : > { %1143 = vmatmul.mubr.bf16.gmra.mrb[12].mxu0 %v1208_v22  ;;  %1159 = vmatmul.mubr.bf16.gmra.mrb[12].mxu1 %v1209_v23 }
  0xf9   : > { %v1132_v31 = vpop.f32.mrb[0].mxu0  ;;  %v1148_v32 = vpop.f32.mrb[0].mxu1 }
  0xfa   : > { %v466_v36 = vadd.f32 %v1132_v31, %v1312_v28  ;;  %v530_v37 = vadd.f32 %v1148_v32, %v1312_v28  ;;  %v457_v38 = vpop.f32.mrb[1].mxu0  ;;  %v521_v39 = vpop.f32.mrb[1].mxu1 }
  0xfb   : > { %v458_v42 = vadd.f32 %v1312_v28, %v457_v38  ;;  %v522_v43 = vadd.f32 %v1312_v28, %v521_v39  ;;  %v1133_v44 = vpop.f32.mrb[2].mxu0  ;;  %v1149_v45 = vpop.f32.mrb[2].mxu1  ;;  %v1079_v38 = vld [vmem:[%s1303_s14 + $0x28] sm:$0xff]  }
  0xfc   : > { %v650_v47 = vadd.f32 %v1017_v29, %v466_v36  ;;  %v666_v48 = vadd.f32 %v1049_v30, %v530_v37  ;;  %v469_v49 = vadd.f32 %v1133_v44, %v1312_v28  ;;  %v533_v50 = vadd.f32 %v1149_v45, %v1312_v28  ;;  %v460_v51 = vpop.f32.mrb[3].mxu0  ;;  %v524_v52 = vpop.f32.mrb[3].mxu1  ;;  %v1087_v39 = vld [vmem:[%s1303_s14 + $0x68] sm:$0xff]   ;;  %v1078_v44 = vld [vmem:[%s1303_s14 + $0x20] sm:$0xff]  }
  0xfd   : > { %v648_v53 = vadd.f32 %v1013_v33, %v458_v42  ;;  %v664_v54 = vadd.f32 %v1045_v34, %v522_v43  ;;  %v461_v55 = vadd.f32 %v1312_v28, %v460_v51  ;;  %v525_v56 = vadd.f32 %v1312_v28, %v524_v52  ;;  %v1086_v45 = vld [vmem:[%s1303_s14 + $0x60] sm:$0xff]  }
  0xfe   : > { %v981_v59 = vpack.c.bf16 %v650_v47, %v650_v47  ;;  %v997_v60 = vpack.c.bf16 %v666_v48, %v666_v48  ;;  %v651_v61 = vadd.f32 %v1018_v35, %v469_v49  ;;  %v667_v62 = vadd.f32 %v1050_v40, %v533_v50 }
  0xff   : > { %v979_v1 = vpack.c.bf16 %v648_v53, %v648_v53  ;;  %v995_v2 = vpack.c.bf16 %v664_v54, %v664_v54  ;;  %v649_v3 = vadd.f32 %v1014_v41, %v461_v55  ;;  %v665_v4 = vadd.f32 %v1046_v46, %v525_v56 }
 0x100   : > { %811 = vst.msk [vmem:[%s1324_s20 + $0x8] sm:$0xf] %vm808_vm0, %v981_v59  ;;  %827 = vst.msk [vmem:[%s1324_s20 + $0x48] sm:$0xf] %vm808_vm0, %v997_v60  ;;  %v982_v5 = vpack.c.bf16 %v651_v61, %v651_v61  ;;  %v998_v6 = vpack.c.bf16 %v667_v62, %v667_v62  ;;  %v1033_v52 = vunpack.c.l.bf16 %v1079_v38  ;;  %v1065_v53 = vunpack.c.l.bf16 %v1087_v39 }
 0x101   : > { %809 = vst.msk [vmem:[%s1324_s20] sm:$0xf] %vm808_vm0, %v979_v1  ;;  %825 = vst.msk [vmem:[%s1324_s20 + $0x40] sm:$0xf] %vm808_vm0, %v995_v2  ;;  %v980_v9 = vpack.c.bf16 %v649_v3, %v649_v3  ;;  %v996_v10 = vpack.c.bf16 %v665_v4, %v665_v4  ;;  %v1136_v11 = vpop.f32.mrb[4].mxu0  ;;  %v1152_v12 = vpop.f32.mrb[4].mxu1  ;;  %v1029_v58 = vunpack.c.l.bf16 %v1078_v44  ;;  %v1061_v59 = vunpack.c.l.bf16 %v1086_v45 }
 0x102   : > { %812 = vst.msk [vmem:[%s1324_s20 + $0xc] sm:$0xf] %vm808_vm0, %v982_v5  ;;  %828 = vst.msk [vmem:[%s1324_s20 + $0x4c] sm:$0xf] %vm808_vm0, %v998_v6  ;;  %v482_v15 = vadd.f32 %v1136_v11, %v1312_v28  ;;  %v546_v16 = vadd.f32 %v1152_v12, %v1312_v28  ;;  %v473_v17 = vpop.f32.mrb[5].mxu0  ;;  %v537_v18 = vpop.f32.mrb[5].mxu1  ;;  %v1034_v0 = vunpack.c.h.bf16 %v1079_v38  ;;  %v1066_v1 = vunpack.c.h.bf16 %v1087_v39 }
 0x103   : > { %810 = vst.msk [vmem:[%s1324_s20 + $0x4] sm:$0xf] %vm808_vm0, %v980_v9  ;;  %826 = vst.msk [vmem:[%s1324_s20 + $0x44] sm:$0xf] %vm808_vm0, %v996_v10  ;;  %v474_v21 = vadd.f32 %v1312_v28, %v473_v17  ;;  %v538_v22 = vadd.f32 %v1312_v28, %v537_v18  ;;  %v1137_v23 = vpop.f32.mrb[6].mxu0  ;;  %v1153_v24 = vpop.f32.mrb[6].mxu1  ;;  %v1030_v6 = vunpack.c.h.bf16 %v1078_v44 }
 0x104   : > { %v654_v27 = vadd.f32 %v1025_v7, %v482_v15  ;;  %v670_v29 = vadd.f32 %v1057_v8, %v546_v16  ;;  %v485_v30 = vadd.f32 %v1137_v23, %v1312_v28  ;;  %v549_v31 = vadd.f32 %v1153_v24, %v1312_v28  ;;  %v476_v32 = vpop.f32.mrb[7].mxu0  ;;  %v540_v33 = vpop.f32.mrb[7].mxu1  ;;  %v1081_v18 = vld [vmem:[%s1303_s14 + $0x38] sm:$0xff]   ;;  %v1080_v24 = vld [vmem:[%s1303_s14 + $0x30] sm:$0xff]  }
 0x105   : > { %v652_v34 = vadd.f32 %v1021_v13, %v474_v21  ;;  %v668_v35 = vadd.f32 %v1053_v14, %v538_v22  ;;  %v477_v36 = vadd.f32 %v1312_v28, %v476_v32  ;;  %v541_v37 = vadd.f32 %v1312_v28, %v540_v33 }
 0x106   : > { %v985_v40 = vpack.c.bf16 %v654_v27, %v654_v27  ;;  %v1001_v41 = vpack.c.bf16 %v670_v29, %v670_v29  ;;  %v655_v42 = vadd.f32 %v1026_v19, %v485_v30  ;;  %v671_v43 = vadd.f32 %v1058_v20, %v549_v31  ;;  %v1089_v19 = vld [vmem:[%s1303_s14 + $0x78] sm:$0xff]  }
 0x107   : > { %v983_v46 = vpack.c.bf16 %v652_v34, %v652_v34  ;;  %v999_v47 = vpack.c.bf16 %v668_v35, %v668_v35  ;;  %v653_v48 = vadd.f32 %v1022_v25, %v477_v36  ;;  %v669_v49 = vadd.f32 %v1054_v26, %v541_v37  ;;  %v1088_v25 = vld [vmem:[%s1303_s14 + $0x70] sm:$0xff]  }
 0x108   : > { %815 = vst.msk [vmem:[%s1324_s20 + $0x18] sm:$0xf] %vm808_vm0, %v985_v40  ;;  %831 = vst.msk [vmem:[%s1324_s20 + $0x58] sm:$0xf] %vm808_vm0, %v1001_v41  ;;  %v986_v50 = vpack.c.bf16 %v655_v42, %v655_v42  ;;  %v1002_v51 = vpack.c.bf16 %v671_v43, %v671_v43  ;;  %v1062_v7 = vunpack.c.h.bf16 %v1086_v45  ;;  %v1041_v33 = vunpack.c.l.bf16 %v1081_v18 }
 0x109   : > { %813 = vst.msk [vmem:[%s1324_s20 + $0x10] sm:$0xf] %vm808_vm0, %v983_v46  ;;  %829 = vst.msk [vmem:[%s1324_s20 + $0x50] sm:$0xf] %vm808_vm0, %v999_v47  ;;  %v984_v54 = vpack.c.bf16 %v653_v48, %v653_v48  ;;  %v1000_v55 = vpack.c.bf16 %v669_v49, %v669_v49  ;;  %v1140_v56 = vpop.f32.mrb[8].mxu0  ;;  %v1156_v57 = vpop.f32.mrb[8].mxu1  ;;  %v1073_v34 = vunpack.c.l.bf16 %v1089_v19  ;;  %v1037_v39 = vunpack.c.l.bf16 %v1080_v24 }
 0x10a   : > { %816 = vst.msk [vmem:[%s1324_s20 + $0x1c] sm:$0xf] %vm808_vm0, %v986_v50  ;;  %832 = vst.msk [vmem:[%s1324_s20 + $0x5c] sm:$0xf] %vm808_vm0, %v1002_v51  ;;  %v498_v60 = vadd.f32 %v1140_v56, %v1312_v28  ;;  %v562_v61 = vadd.f32 %v1156_v57, %v1312_v28  ;;  %v489_v62 = vpop.f32.mrb[9].mxu0  ;;  %v553_v63 = vpop.f32.mrb[9].mxu1  ;;  %v1069_v40 = vunpack.c.l.bf16 %v1088_v25  ;;  %v1042_v45 = vunpack.c.h.bf16 %v1081_v18 }
 0x10b   : > { %814 = vst.msk [vmem:[%s1324_s20 + $0x14] sm:$0xf] %vm808_vm0, %v984_v54  ;;  %830 = vst.msk [vmem:[%s1324_s20 + $0x54] sm:$0xf] %vm808_vm0, %v1000_v55  ;;  %v490_v2 = vadd.f32 %v1312_v28, %v489_v62  ;;  %v554_v3 = vadd.f32 %v1312_v28, %v553_v63  ;;  %v1141_v4 = vpop.f32.mrb[10].mxu0  ;;  %v1157_v5 = vpop.f32.mrb[10].mxu1  ;;  %v1074_v46 = vunpack.c.h.bf16 %v1089_v19  ;;  %v1038_v51 = vunpack.c.h.bf16 %v1080_v24 }
 0x10c   : > { %v658_v8 = vadd.f32 %v1033_v52, %v498_v60  ;;  %v674_v9 = vadd.f32 %v1065_v53, %v562_v61  ;;  %v501_v10 = vadd.f32 %v1141_v4, %v1312_v28  ;;  %v565_v11 = vadd.f32 %v1157_v5, %v1312_v28  ;;  %v492_v12 = vpop.f32.mrb[11].mxu0  ;;  %v556_v13 = vpop.f32.mrb[11].mxu1 }
 0x10d   : > { %v656_v14 = vadd.f32 %v1029_v58, %v490_v2  ;;  %v672_v15 = vadd.f32 %v1061_v59, %v554_v3  ;;  %v493_v16 = vadd.f32 %v1312_v28, %v492_v12  ;;  %v557_v17 = vadd.f32 %v1312_v28, %v556_v13 }
 0x10e   : > { %v989_v20 = vpack.c.bf16 %v658_v8, %v658_v8  ;;  %v1005_v21 = vpack.c.bf16 %v674_v9, %v674_v9  ;;  %v659_v22 = vadd.f32 %v1034_v0, %v501_v10  ;;  %v675_v23 = vadd.f32 %v1066_v1, %v565_v11 }
 0x10f   : > { %v987_v26 = vpack.c.bf16 %v656_v14, %v656_v14  ;;  %v1003_v27 = vpack.c.bf16 %v672_v15, %v672_v15  ;;  %v657_v29 = vadd.f32 %v1030_v6, %v493_v16  ;;  %v673_v30 = vadd.f32 %v1062_v7, %v557_v17 }
 0x110   : > { %819 = vst.msk [vmem:[%s1324_s20 + $0x28] sm:$0xf] %vm808_vm0, %v989_v20  ;;  %835 = vst.msk [vmem:[%s1324_s20 + $0x68] sm:$0xf] %vm808_vm0, %v1005_v21  ;;  %v990_v31 = vpack.c.bf16 %v659_v22, %v659_v22  ;;  %v1006_v32 = vpack.c.bf16 %v675_v23, %v675_v23  ;;  %v1070_v52 = vunpack.c.h.bf16 %v1088_v25 }
 0x111   : > { %817 = vst.msk [vmem:[%s1324_s20 + $0x20] sm:$0xf] %vm808_vm0, %v987_v26  ;;  %833 = vst.msk [vmem:[%s1324_s20 + $0x60] sm:$0xf] %vm808_vm0, %v1003_v27  ;;  %v988_v35 = vpack.c.bf16 %v657_v29, %v657_v29  ;;  %v1004_v36 = vpack.c.bf16 %v673_v30, %v673_v30  ;;  %v1144_v37 = vpop.f32.mrb[12].mxu0  ;;  %v1160_v38 = vpop.f32.mrb[12].mxu1 }
 0x112   : > { %820 = vst.msk [vmem:[%s1324_s20 + $0x2c] sm:$0xf] %vm808_vm0, %v990_v31  ;;  %836 = vst.msk [vmem:[%s1324_s20 + $0x6c] sm:$0xf] %vm808_vm0, %v1006_v32  ;;  %v514_v41 = vadd.f32 %v1144_v37, %v1312_v28  ;;  %v578_v42 = vadd.f32 %v1160_v38, %v1312_v28  ;;  %v505_v43 = vpop.f32.mrb[13].mxu0  ;;  %v569_v44 = vpop.f32.mrb[13].mxu1 }
 0x113   : > { %818 = vst.msk [vmem:[%s1324_s20 + $0x24] sm:$0xf] %vm808_vm0, %v988_v35  ;;  %834 = vst.msk [vmem:[%s1324_s20 + $0x64] sm:$0xf] %vm808_vm0, %v1004_v36  ;;  %v506_v47 = vadd.f32 %v1312_v28, %v505_v43  ;;  %v570_v48 = vadd.f32 %v1312_v28, %v569_v44  ;;  %v1145_v49 = vpop.f32.mrb[14].mxu0  ;;  %v1161_v50 = vpop.f32.mrb[14].mxu1 }
 0x114   : > { %v662_v53 = vadd.f32 %v1041_v33, %v514_v41  ;;  %v678_v54 = vadd.f32 %v1073_v34, %v578_v42  ;;  %v517_v55 = vadd.f32 %v1145_v49, %v1312_v28  ;;  %v581_v56 = vadd.f32 %v1161_v50, %v1312_v28  ;;  %v508_v57 = vpop.f32.mrb[15].mxu0  ;;  %v572_v58 = vpop.f32.mrb[15].mxu1 }
 0x115   : > { %v660_v59 = vadd.f32 %v1037_v39, %v506_v47  ;;  %v676_v60 = vadd.f32 %v1069_v40, %v570_v48  ;;  %v509_v61 = vadd.f32 %v1312_v28, %v508_v57  ;;  %v573_v62 = vadd.f32 %v1312_v28, %v572_v58 }
 0x116   : > { %v993_v63 = vpack.c.bf16 %v662_v53, %v662_v53  ;;  %v1009_v0 = vpack.c.bf16 %v678_v54, %v678_v54  ;;  %v663_v1 = vadd.f32 %v1042_v45, %v517_v55  ;;  %v679_v2 = vadd.f32 %v1074_v46, %v581_v56 }
 0x117   : > { %v991_v3 = vpack.c.bf16 %v660_v59, %v660_v59  ;;  %v1007_v4 = vpack.c.bf16 %v676_v60, %v676_v60  ;;  %v661_v5 = vadd.f32 %v1038_v51, %v509_v61  ;;  %v677_v6 = vadd.f32 %v1070_v52, %v573_v62 }
 0x118   : > { %823 = vst.msk [vmem:[%s1324_s20 + $0x38] sm:$0xf] %vm808_vm0, %v993_v63  ;;  %839 = vst.msk [vmem:[%s1324_s20 + $0x78] sm:$0xf] %vm808_vm0, %v1009_v0  ;;  %v994_v7 = vpack.c.bf16 %v663_v1, %v663_v1  ;;  %v1010_v8 = vpack.c.bf16 %v679_v2, %v679_v2 }
 0x119   : > { %821 = vst.msk [vmem:[%s1324_s20 + $0x30] sm:$0xf] %vm808_vm0, %v991_v3  ;;  %837 = vst.msk [vmem:[%s1324_s20 + $0x70] sm:$0xf] %vm808_vm0, %v1007_v4  ;;  %v992_v28 = vpack.c.bf16 %v661_v5, %v661_v5  ;;  %v1008_v9 = vpack.c.bf16 %v677_v6, %v677_v6 }
 0x11a   : > { %824 = vst.msk [vmem:[%s1324_s20 + $0x3c] sm:$0xf] %vm808_vm0, %v994_v7  ;;  %840 = vst.msk [vmem:[%s1324_s20 + $0x7c] sm:$0xf] %vm808_vm0, %v1010_v8 }
 0x11b   : > { %822 = vst.msk [vmem:[%s1324_s20 + $0x34] sm:$0xf] %vm808_vm0, %v992_v28  ;;  %838 = vst.msk [vmem:[%s1324_s20 + $0x74] sm:$0xf] %vm808_vm0, %v1008_v9 }
 0x11c PF: > { %s14_s15 = sadd.s32 1, %s1216_s15  }
 0x11d   : > { %p11_p4 = scmp.ge.s32.totalorder %s14_s15, 4  }
 0x11f   :  { %13 = sbr.rel (!%p11_p4) target bundleno = 1 (0x1), region = 69 }

// kernel: nat_block.16
= control target key start
LH: loop header
LB: loop body
LE: loop exit
PB: predicated region body
PF: predicated region fallthrough
CT: control target
= control target key end

     0   :  { %s1599_s18 = smov 0   ;;  %s2256_s0 = inlined_call_operand.vmem [shape: bf16[512,32], index: 0, kind: input, shape index: {}]   ;;  %s2257_s1 = inlined_call_operand.vmem [shape: f32[1,32], index: 1, kind: input, shape index: {}]   ;;  %s2258_s2 = inlined_call_operand.vmem [shape: f32[1,32], index: 2, kind: input, shape index: {}]   ;;  %s2259_s3 = inlined_call_operand.vmem [shape: bf16[32,96], index: 3, kind: input, shape index: {}]   ;;  %s2260_s4 = inlined_call_operand.vmem [shape: f32[1,96], index: 4, kind: input, shape index: {}]   ;;  %s2261_s5 = inlined_call_operand.vmem [shape: bf16[512,96], index: 5, kind: output, shape index: {}]  }
   0x1 LB: > { %s1254_s19 = sadd.s32 4294967295, %s1567_s18   ;;  %p1258_p0 = scmp.ge.s32.totalorder %s1567_s18, 1  ;;  %s1567_s18 = sphi %s1599_s18, %s15_s18  }
   0x2   : > { %p188_p1 = scmp.lt.s32.totalorder %s1567_s18, 3 }
   0x4   : > { %p189_p2 = pnand %p1258_p0, %p188_p1 }
   0x5   : > { %s1259_s20 = sshll.u32 (!%p189_p2), %s1254_s19, 5  ;;  %vm293_vm0 = vcmask (!%p189_p2), 261120   ;;  %vm1165_vm1 = vcmask (!%p189_p2), 781312  }
   0x6   : > { %192 = sbr.rel (%p189_p2) target bundleno = 618 (0x26a), region = 40  ;;  %p217_p3 = scmp.lt.s32.totalorder (!%p189_p2), %s1259_s20, 63 }
   0xd   : > { %s2263_s20 = smov (!%p217_p3, %s1259_s20), 63 }
   0xe   : > { %s1260_s21 = sshll.u32 %s2263_s20, 2 }
   0xf   : > { %s1615_s24 = scalar_lea.vmem %s2256_s0, %s1260_s21  ;;  %s2156_s12 = scalar_lea.vmem %s2261_s5, %s1260_s21 }
  0x10   : > { %v1618_v0 = vld [vmem:[%s1615_s24] sm:$0xff]   ;;  %v1628_v6 = vld [vmem:[%s1615_s24 + $0x8] sm:$0xff]   ;;  %v1656_v18 = vld [vmem:[%s1615_s24 + $0x10] sm:$0xff]  }
  0x11   : > { %v1621_v1 = vld [vmem:[%s1615_s24 + $0x40] sm:$0xff]   ;;  %v1352_v2 = vunpack.c.l.bf16 %v1618_v0  ;;  %v1353_v4 = vunpack.c.h.bf16 %v1618_v0  ;;  %v1356_v11 = vunpack.c.l.bf16 %v1628_v6  ;;  %v1357_v12 = vunpack.c.h.bf16 %v1628_v6  ;;  %v1645_v13 = vld [vmem:[%s1615_s24 + $0x48] sm:$0xff]   ;;  %v1667_v23 = vld [vmem:[%s1615_s24 + $0x50] sm:$0xff]  }
  0x12   : > { %v1384_v3 = vunpack.c.l.bf16 %v1621_v1  ;;  %v1385_v5 = vunpack.c.h.bf16 %v1621_v1  ;;  %v1388_v16 = vunpack.c.l.bf16 %v1645_v13  ;;  %v1389_v17 = vunpack.c.h.bf16 %v1645_v13  ;;  %v1678_v28 = vld [vmem:[%s1615_s24 + $0x18] sm:$0xff]   ;;  %v1700_v38 = vld [vmem:[%s1615_s24 + $0x20] sm:$0xff]   ;;  %v1722_v48 = vld [vmem:[%s1615_s24 + $0x28] sm:$0xff]  }
  0x13   : > { %v294_v7 = vsel %vm293_vm0, %v1352_v2, 0.0  ;;  %v297_v9 = vsel %vm293_vm0, %v1353_v4, 0.0  ;;  %v300_v14 = vsel %vm293_vm0, %v1356_v11, 0.0  ;;  %v303_v15 = vsel %vm293_vm0, %v1357_v12, 0.0  ;;  %v1689_v33 = vld [vmem:[%s1615_s24 + $0x58] sm:$0xff]   ;;  %v1711_v43 = vld [vmem:[%s1615_s24 + $0x60] sm:$0xff]  }
  0x14   : > { %v342_v8 = vsel %vm293_vm0, %v1384_v3, 0.0  ;;  %295 = vadd.xlane.f32.xlu0 %v294_v7  ;;  %v345_v10 = vsel %vm293_vm0, %v1385_v5, 0.0  ;;  %v348_v19 = vsel %vm293_vm0, %v1388_v16, 0.0  ;;  %v351_v20 = vsel %vm293_vm0, %v1389_v17, 0.0  ;;  %v1733_v53 = vld [vmem:[%s1615_s24 + $0x68] sm:$0xff]   ;;  %v1744_v58 = vld [vmem:[%s1615_s24 + $0x30] sm:$0xff]  }
  0x15   : > { %343 = vadd.xlane.f32.xlu1 %v342_v8  ;;  %v1360_v21 = vunpack.c.l.bf16 %v1656_v18  ;;  %v1361_v22 = vunpack.c.h.bf16 %v1656_v18  ;;  %v1392_v26 = vunpack.c.l.bf16 %v1667_v23  ;;  %v1393_v27 = vunpack.c.h.bf16 %v1667_v23  ;;  %v1755_v63 = vld [vmem:[%s1615_s24 + $0x70] sm:$0xff]  }
  0x16   : > { %v1364_v31 = vunpack.c.l.bf16 %v1678_v28  ;;  %v1365_v32 = vunpack.c.h.bf16 %v1678_v28  ;;  %v1396_v36 = vunpack.c.l.bf16 %v1689_v33  ;;  %v1397_v37 = vunpack.c.h.bf16 %v1689_v33 }
  0x17   : > { %v306_v24 = vsel %vm293_vm0, %v1360_v21, 0.0  ;;  %v309_v25 = vsel %vm293_vm0, %v1361_v22, 0.0  ;;  %v354_v29 = vsel %vm293_vm0, %v1392_v26, 0.0  ;;  %v357_v30 = vsel %vm293_vm0, %v1393_v27, 0.0 }
  0x18   : > { %298 = vadd.xlane.f32.xlu0 %v297_v9  ;;  %v312_v34 = vsel %vm293_vm0, %v1364_v31, 0.0  ;;  %v315_v35 = vsel %vm293_vm0, %v1365_v32, 0.0  ;;  %v360_v39 = vsel %vm293_vm0, %v1396_v36, 0.0  ;;  %v363_v40 = vsel %vm293_vm0, %v1397_v37, 0.0 }
  0x19   : > { %346 = vadd.xlane.f32.xlu1 %v345_v10  ;;  %v1368_v41 = vunpack.c.l.bf16 %v1700_v38  ;;  %v1369_v42 = vunpack.c.h.bf16 %v1700_v38  ;;  %v1400_v46 = vunpack.c.l.bf16 %v1711_v43  ;;  %v1401_v47 = vunpack.c.h.bf16 %v1711_v43 }
  0x1a   : > { %v1372_v51 = vunpack.c.l.bf16 %v1722_v48  ;;  %v1373_v52 = vunpack.c.h.bf16 %v1722_v48  ;;  %v1404_v56 = vunpack.c.l.bf16 %v1733_v53  ;;  %v1405_v57 = vunpack.c.h.bf16 %v1733_v53 }
  0x1b   : > { %v318_v44 = vsel %vm293_vm0, %v1368_v41, 0.0  ;;  %v321_v45 = vsel %vm293_vm0, %v1369_v42, 0.0  ;;  %v366_v49 = vsel %vm293_vm0, %v1400_v46, 0.0  ;;  %v369_v50 = vsel %vm293_vm0, %v1401_v47, 0.0 }
  0x1c   : > { %301 = vadd.xlane.f32.xlu0 %v300_v14  ;;  %v324_v54 = vsel %vm293_vm0, %v1372_v51, 0.0  ;;  %v327_v55 = vsel %vm293_vm0, %v1373_v52, 0.0  ;;  %v372_v59 = vsel %vm293_vm0, %v1404_v56, 0.0  ;;  %v375_v60 = vsel %vm293_vm0, %v1405_v57, 0.0  ;;  %v1766_v14 = vld [vmem:[%s1615_s24 + $0x38] sm:$0xff]  }
  0x1d   : > { %304 = vadd.xlane.f32.xlu1 %v303_v15  ;;  %v1376_v61 = vunpack.c.l.bf16 %v1744_v58  ;;  %v1377_v62 = vunpack.c.h.bf16 %v1744_v58  ;;  %v1408_v9 = vunpack.c.l.bf16 %v1755_v63  ;;  %v1409_v10 = vunpack.c.h.bf16 %v1755_v63 }
  0x1f   : > { %v330_v7 = vsel %vm293_vm0, %v1376_v61, 0.0  ;;  %v333_v8 = vsel %vm293_vm0, %v1377_v62, 0.0  ;;  %v378_v15 = vsel %vm293_vm0, %v1408_v9, 0.0 }
  0x20   : > { %349 = vadd.xlane.f32.xlu0 %v348_v19  ;;  %v381_v19 = vsel %vm293_vm0, %v1409_v10, 0.0 }
  0x21   : > { %352 = vadd.xlane.f32.xlu1 %v351_v20  ;;  %v1380_v20 = vunpack.c.l.bf16 %v1766_v14 }
  0x24   : > { %307 = vadd.xlane.f32.xlu0 %v306_v24  ;;  %v1381_v24 = vunpack.c.h.bf16 %v1766_v14 }
  0x25   : > { %310 = vadd.xlane.f32.xlu1 %v309_v25  ;;  %v1777_v25 = vld [vmem:[%s1615_s24 + $0x78] sm:$0xff]  }
  0x28   : > { %355 = vadd.xlane.f32.xlu0 %v354_v29  ;;  %v336_v29 = vsel %vm293_vm0, %v1380_v20, 0.0 }
  0x29   : > { %358 = vadd.xlane.f32.xlu1 %v357_v30  ;;  %v339_v30 = vsel %vm293_vm0, %v1381_v24, 0.0 }
  0x2c   : > { %313 = vadd.xlane.f32.xlu0 %v312_v34  ;;  %v1412_v34 = vunpack.c.l.bf16 %v1777_v25 }
  0x2d   : > { %316 = vadd.xlane.f32.xlu1 %v315_v35  ;;  %v1413_v35 = vunpack.c.h.bf16 %v1777_v25 }
  0x30   : > { %361 = vadd.xlane.f32.xlu0 %v360_v39  ;;  %v384_v39 = vsel %vm293_vm0, %v1412_v34, 0.0 }
  0x31   : > { %364 = vadd.xlane.f32.xlu1 %v363_v40  ;;  %v387_v40 = vsel %vm293_vm0, %v1413_v35, 0.0 }
  0x34   : > { %319 = vadd.xlane.f32.xlu0 %v318_v44 }
  0x35   : > { %322 = vadd.xlane.f32.xlu1 %v321_v45 }
  0x38   : > { %367 = vadd.xlane.f32.xlu0 %v366_v49 }
  0x39   : > { %370 = vadd.xlane.f32.xlu1 %v369_v50 }
  0x3c   : > { %325 = vadd.xlane.f32.xlu0 %v324_v54 }
  0x3d   : > { %328 = vadd.xlane.f32.xlu1 %v327_v55 }
  0x40   : > { %373 = vadd.xlane.f32.xlu0 %v372_v59 }
  0x41   : > { %376 = vadd.xlane.f32.xlu1 %v375_v60 }
  0x44   : > { %331 = vadd.xlane.f32.xlu0 %v330_v7 }
  0x45   : > { %334 = vadd.xlane.f32.xlu1 %v333_v8 }
  0x48   : > { %379 = vadd.xlane.f32.xlu0 %v378_v15 }
  0x49   : > { %382 = vadd.xlane.f32.xlu1 %v381_v19 }
  0x4c   : > { %337 = vadd.xlane.f32.xlu0 %v336_v29 }
  0x4d   : > { %340 = vadd.xlane.f32.xlu1 %v339_v30 }
  0x50   : > { %385 = vadd.xlane.f32.xlu0 %v384_v39 }
  0x51   : > { %388 = vadd.xlane.f32.xlu1 %v387_v40 }
  0xa1   : > { %v296_v44 = vpop.xlane.xlu0 %295 }
  0xa2   : > { %v344_v45 = vpop.xlane.xlu1 %343  ;;  %v391_v49 = vmul.f32 0.03125, %v296_v44 }
  0xa3   : > { %v407_v50 = vmul.f32 0.03125, %v344_v45 }
  0xa4   : > { %v1795_v54 = vsub.f32 %v1352_v2, %v391_v49 }
  0xa5   : > { %v1799_v55 = vsub.f32 %v1384_v3, %v407_v50  ;;  %v299_v59 = vpop.xlane.xlu0 %298 }
  0xa6   : > { %v347_v60 = vpop.xlane.xlu1 %346  ;;  %v392_v7 = vmul.f32 0.03125, %v299_v59  ;;  %v455_v15 = vmul.f32 %v1795_v54, %v1795_v54 }
  0xa7   : > { %v408_v8 = vmul.f32 0.03125, %v347_v60  ;;  %v471_v19 = vmul.f32 %v1799_v55, %v1799_v55 }
  0xa8   : > { %v1807_v29 = vsub.f32 %v1353_v4, %v392_v7  ;;  %v487_v3 = vsel %vm293_vm0, %v455_v15, 0.0 }
  0xa9   : > { %v1811_v2 = vsub.f32 %v1385_v5, %v408_v8  ;;  %488 = vadd.xlane.f32.xlu0 %v487_v3  ;;  %v302_v30 = vpop.xlane.xlu0 %301  ;;  %v535_v40 = vsel %vm293_vm0, %v471_v19, 0.0 }
  0xaa   : > { %v305_v39 = vpop.xlane.xlu1 %304  ;;  %v393_v44 = vmul.f32 0.03125, %v302_v30  ;;  %v456_v49 = vmul.f32 %v1807_v29, %v1807_v29 }
  0xab   : > { %v394_v45 = vmul.f32 0.03125, %v305_v39  ;;  %v472_v0 = vmul.f32 %v1811_v2, %v1811_v2 }
  0xac   : > { %v1821_v1 = vsub.f32 %v1356_v11, %v393_v44  ;;  %v490_v5 = vsel %vm293_vm0, %v456_v49, 0.0 }
  0xad   : > { %v1825_v4 = vsub.f32 %v1357_v12, %v394_v45  ;;  %536 = vadd.xlane.f32.xlu0 %v535_v40  ;;  %491 = vadd.xlane.f32.xlu1 %v490_v5  ;;  %v350_v50 = vpop.xlane.xlu0 %349  ;;  %v538_v60 = vsel %vm293_vm0, %v472_v0, 0.0 }
  0xae   : > { %v353_v59 = vpop.xlane.xlu1 %352  ;;  %v409_v7 = vmul.f32 0.03125, %v350_v50  ;;  %v457_v15 = vmul.f32 %v1821_v1, %v1821_v1 }
  0xaf   : > { %v410_v8 = vmul.f32 0.03125, %v353_v59  ;;  %v458_v11 = vmul.f32 %v1825_v4, %v1825_v4 }
  0xb0   : > { %v1835_v6 = vsub.f32 %v1388_v16, %v409_v7  ;;  %v493_v19 = vsel %vm293_vm0, %v457_v15, 0.0 }
  0xb1   : > { %v1839_v12 = vsub.f32 %v1389_v17, %v410_v8  ;;  %539 = vadd.xlane.f32.xlu1 %v538_v60  ;;  %494 = vadd.xlane.f32.xlu0 %v493_v19  ;;  %v308_v3 = vpop.xlane.xlu0 %307  ;;  %v496_v39 = vsel %vm293_vm0, %v458_v11, 0.0 }
  0xb2   : > { %v311_v30 = vpop.xlane.xlu1 %310  ;;  %v395_v40 = vmul.f32 0.03125, %v308_v3  ;;  %v473_v45 = vmul.f32 %v1835_v6, %v1835_v6 }
  0xb3   : > { %v396_v44 = vmul.f32 0.03125, %v311_v30  ;;  %v474_v16 = vmul.f32 %v1839_v12, %v1839_v12 }
  0xb4   : > { %v1849_v13 = vsub.f32 %v1360_v21, %v395_v40  ;;  %v541_v49 = vsel %vm293_vm0, %v473_v45, 0.0 }
  0xb5   : > { %v1853_v17 = vsub.f32 %v1361_v22, %v396_v44  ;;  %497 = vadd.xlane.f32.xlu1 %v496_v39  ;;  %542 = vadd.xlane.f32.xlu0 %v541_v49  ;;  %v356_v0 = vpop.xlane.xlu0 %355  ;;  %v544_v50 = vsel %vm293_vm0, %v474_v16, 0.0 }
  0xb6   : > { %v359_v5 = vpop.xlane.xlu1 %358  ;;  %v411_v59 = vmul.f32 0.03125, %v356_v0  ;;  %v459_v7 = vmul.f32 %v1849_v13, %v1849_v13 }
  0xb7   : > { %v412_v60 = vmul.f32 0.03125, %v359_v5  ;;  %v460_v21 = vmul.f32 %v1853_v17, %v1853_v17 }
  0xb8   : > { %v1863_v18 = vsub.f32 %v1392_v26, %v411_v59  ;;  %v499_v8 = vsel %vm293_vm0, %v459_v7, 0.0 }
  0xb9   : > { %v1867_v22 = vsub.f32 %v1393_v27, %v412_v60  ;;  %545 = vadd.xlane.f32.xlu1 %v544_v50  ;;  %500 = vadd.xlane.f32.xlu0 %v499_v8  ;;  %v314_v15 = vpop.xlane.xlu0 %313  ;;  %v502_v19 = vsel %vm293_vm0, %v460_v21, 0.0 }
  0xba   : > { %v317_v11 = vpop.xlane.xlu1 %316  ;;  %v397_v3 = vmul.f32 0.03125, %v314_v15  ;;  %v475_v39 = vmul.f32 %v1863_v18, %v1863_v18 }
  0xbb   : > { %v398_v30 = vmul.f32 0.03125, %v317_v11  ;;  %v476_v26 = vmul.f32 %v1867_v22, %v1867_v22 }
  0xbc   : > { %v1877_v23 = vsub.f32 %v1364_v31, %v397_v3  ;;  %v547_v40 = vsel %vm293_vm0, %v475_v39, 0.0 }
  0xbd   : > { %v1881_v27 = vsub.f32 %v1365_v32, %v398_v30  ;;  %503 = vadd.xlane.f32.xlu1 %v502_v19  ;;  %548 = vadd.xlane.f32.xlu0 %v547_v40  ;;  %v362_v44 = vpop.xlane.xlu0 %361  ;;  %v550_v16 = vsel %vm293_vm0, %v476_v26, 0.0 }
  0xbe   : > { %v365_v45 = vpop.xlane.xlu1 %364  ;;  %v413_v49 = vmul.f32 0.03125, %v362_v44  ;;  %v461_v5 = vmul.f32 %v1877_v23, %v1877_v23 }
  0xbf   : > { %v414_v0 = vmul.f32 0.03125, %v365_v45  ;;  %v462_v31 = vmul.f32 %v1881_v27, %v1881_v27 }
  0xc0   : > { %v1891_v28 = vsub.f32 %v1396_v36, %v413_v49  ;;  %v505_v50 = vsel %vm293_vm0, %v461_v5, 0.0 }
  0xc1   : > { %v1895_v32 = vsub.f32 %v1397_v37, %v414_v0  ;;  %551 = vadd.xlane.f32.xlu1 %v550_v16  ;;  %506 = vadd.xlane.f32.xlu0 %v505_v50  ;;  %v320_v59 = vpop.xlane.xlu0 %319  ;;  %v508_v7 = vsel %vm293_vm0, %v462_v31, 0.0 }
  0xc2   : > { %v323_v60 = vpop.xlane.xlu1 %322  ;;  %v399_v21 = vmul.f32 0.03125, %v320_v59  ;;  %v477_v15 = vmul.f32 %v1891_v28, %v1891_v28 }
  0xc3   : > { %v400_v8 = vmul.f32 0.03125, %v323_v60  ;;  %v478_v36 = vmul.f32 %v1895_v32, %v1895_v32 }
  0xc4   : > { %v1905_v33 = vsub.f32 %v1368_v41, %v399_v21  ;;  %v553_v11 = vsel %vm293_vm0, %v477_v15, 0.0 }
  0xc5   : > { %v1909_v37 = vsub.f32 %v1369_v42, %v400_v8  ;;  %509 = vadd.xlane.f32.xlu1 %v508_v7  ;;  %554 = vadd.xlane.f32.xlu0 %v553_v11  ;;  %v368_v19 = vpop.xlane.xlu0 %367  ;;  %v556_v30 = vsel %vm293_vm0, %v478_v36, 0.0 }
  0xc6   : > { %v371_v3 = vpop.xlane.xlu1 %370  ;;  %v415_v39 = vmul.f32 0.03125, %v368_v19  ;;  %v463_v40 = vmul.f32 %v1905_v33, %v1905_v33 }
  0xc7   : > { %v416_v26 = vmul.f32 0.03125, %v371_v3  ;;  %v464_v41 = vmul.f32 %v1909_v37, %v1909_v37 }
  0xc8   : > { %v1919_v38 = vsub.f32 %v1400_v46, %v415_v39  ;;  %v511_v44 = vsel %vm293_vm0, %v463_v40, 0.0 }
  0xc9   : > { %v1923_v42 = vsub.f32 %v1401_v47, %v416_v26  ;;  %557 = vadd.xlane.f32.xlu1 %v556_v30  ;;  %512 = vadd.xlane.f32.xlu0 %v511_v44  ;;  %v326_v45 = vpop.xlane.xlu0 %325  ;;  %v514_v49 = vsel %vm293_vm0, %v464_v41, 0.0  ;;  %v1495_v30 = vld [vmem:[%s2259_s3] sm:$0xff]  }
  0xca   : > { %v329_v16 = vpop.xlane.xlu1 %328  ;;  %v401_v0 = vmul.f32 0.03125, %v326_v45  ;;  %v479_v31 = vmul.f32 %v1919_v38, %v1919_v38  ;;  %1447 = vmatprep.subr.bf16.mxu0 %v1495_v30  ;;  %1483 = vmatprep.subr.bf16.mxu1 %v1495_v30 }
  0xcb   : > { %v402_v5 = vmul.f32 0.03125, %v329_v16  ;;  %v480_v46 = vmul.f32 %v1923_v42, %v1923_v42  ;;  %1448 = vmatpush3.bf16.msra.mxu0 %v1495_v30  ;;  %1485 = vmatpush3.bf16.msra.mxu1 %v1495_v30 }
  0xcc   : > { %v1933_v43 = vsub.f32 %v1372_v51, %v401_v0  ;;  %v559_v50 = vsel %vm293_vm0, %v479_v31, 0.0 }
  0xcd   : > { %v1937_v47 = vsub.f32 %v1373_v52, %v402_v5  ;;  %515 = vadd.xlane.f32.xlu1 %v514_v49  ;;  %560 = vadd.xlane.f32.xlu0 %v559_v50  ;;  %v374_v59 = vpop.xlane.xlu0 %373  ;;  %v562_v7 = vsel %vm293_vm0, %v480_v46, 0.0  ;;  %v1496_v49 = vld [vmem:[%s2259_s3 + $0x8] sm:$0xff]  }
  0xce   : > { %v377_v60 = vpop.xlane.xlu1 %376  ;;  %v417_v21 = vmul.f32 0.03125, %v374_v59  ;;  %v465_v15 = vmul.f32 %v1933_v43, %v1933_v43  ;;  %1449 = vmatprep.subr.bf16.mxu0 %v1496_v49  ;;  %1484 = vmatprep.subr.bf16.mxu1 %v1496_v49 }
  0xcf   : > { %v418_v8 = vmul.f32 0.03125, %v377_v60  ;;  %v466_v51 = vmul.f32 %v1937_v47, %v1937_v47  ;;  %1450 = vmatpush3.bf16.msra.mxu0 %v1496_v49  ;;  %1486 = vmatpush3.bf16.msra.mxu1 %v1496_v49 }
  0xd0   : > { %v1947_v48 = vsub.f32 %v1404_v56, %v417_v21  ;;  %v517_v36 = vsel %vm293_vm0, %v465_v15, 0.0 }
  0xd1   : > { %v1951_v52 = vsub.f32 %v1405_v57, %v418_v8  ;;  %563 = vadd.xlane.f32.xlu1 %v562_v7  ;;  %518 = vadd.xlane.f32.xlu0 %v517_v36  ;;  %v332_v11 = vpop.xlane.xlu0 %331  ;;  %v520_v3 = vsel %vm293_vm0, %v466_v51, 0.0 }
  0xd2   : > { %v335_v19 = vpop.xlane.xlu1 %334  ;;  %v403_v39 = vmul.f32 0.03125, %v332_v11  ;;  %v481_v56 = vmul.f32 %v1947_v48, %v1947_v48 }
  0xd3   : > { %v404_v26 = vmul.f32 0.03125, %v335_v19  ;;  %v482_v53 = vmul.f32 %v1951_v52, %v1951_v52 }
  0xd4   : > { %v1964_v57 = vsub.f32 %v1376_v61, %v403_v39  ;;  %v565_v41 = vsel %vm293_vm0, %v481_v56, 0.0 }
  0xd5   : > { %v1968_v40 = vsub.f32 %v1377_v62, %v404_v26  ;;  %521 = vadd.xlane.f32.xlu1 %v520_v3  ;;  %566 = vadd.xlane.f32.xlu0 %v565_v41  ;;  %v380_v44 = vpop.xlane.xlu0 %379  ;;  %v568_v16 = vsel %vm293_vm0, %v482_v53, 0.0 }
  0xd6   : > { %v383_v45 = vpop.xlane.xlu1 %382  ;;  %v419_v61 = vmul.f32 0.03125, %v380_v44  ;;  %v467_v58 = vmul.f32 %v1964_v57, %v1964_v57 }
  0xd7   : > { %v420_v0 = vmul.f32 0.03125, %v383_v45  ;;  %v468_v62 = vmul.f32 %v1968_v40, %v1968_v40 }
  0xd8   : > { %v1981_v5 = vsub.f32 %v1408_v9, %v419_v61  ;;  %v523_v46 = vsel %vm293_vm0, %v467_v58, 0.0 }
  0xd9   : > { %v1985_v31 = vsub.f32 %v1409_v10, %v420_v0  ;;  %569 = vadd.xlane.f32.xlu1 %v568_v16  ;;  %524 = vadd.xlane.f32.xlu0 %v523_v46  ;;  %v338_v50 = vpop.xlane.xlu0 %337  ;;  %v526_v60 = vsel %vm293_vm0, %v468_v62, 0.0 }
  0xda   : > { %v341_v59 = vpop.xlane.xlu1 %340  ;;  %v405_v7 = vmul.f32 0.03125, %v338_v50  ;;  %v483_v9 = vmul.f32 %v1981_v5, %v1981_v5 }
  0xdb   : > { %v406_v21 = vmul.f32 0.03125, %v341_v59  ;;  %v484_v63 = vmul.f32 %v1985_v31, %v1985_v31 }
  0xdc   : > { %v1995_v10 = vsub.f32 %v1380_v20, %v405_v7  ;;  %v571_v15 = vsel %vm293_vm0, %v483_v9, 0.0 }
  0xdd   : > { %v1999_v8 = vsub.f32 %v1381_v24, %v406_v21  ;;  %527 = vadd.xlane.f32.xlu1 %v526_v60  ;;  %572 = vadd.xlane.f32.xlu0 %v571_v15  ;;  %v386_v51 = vpop.xlane.xlu0 %385  ;;  %v574_v11 = vsel %vm293_vm0, %v484_v63, 0.0 }
  0xde   : > { %v389_v36 = vpop.xlane.xlu1 %388  ;;  %v421_v19 = vmul.f32 0.03125, %v386_v51  ;;  %v469_v30 = vmul.f32 %v1995_v10, %v1995_v10 }
  0xdf   : > { %v422_v3 = vmul.f32 0.03125, %v389_v36  ;;  %v470_v20 = vmul.f32 %v1999_v8, %v1999_v8 }
  0xe0   : > { %v2009_v14 = vsub.f32 %v1412_v34, %v421_v19  ;;  %v529_v39 = vsel %vm293_vm0, %v469_v30, 0.0 }
  0xe1   : > { %v2013_v24 = vsub.f32 %v1413_v35, %v422_v3  ;;  %575 = vadd.xlane.f32.xlu1 %v574_v11  ;;  %530 = vadd.xlane.f32.xlu0 %v529_v39  ;;  %v532_v26 = vsel %vm293_vm0, %v470_v20, 0.0 }
  0xe2   : > { %v485_v56 = vmul.f32 %v2009_v14, %v2009_v14 }
  0xe3   : > { %v486_v53 = vmul.f32 %v2013_v24, %v2013_v24 }
  0xe4   : > { %v577_v41 = vsel %vm293_vm0, %v485_v56, 0.0 }
  0xe5   : > { %533 = vadd.xlane.f32.xlu1 %v532_v26  ;;  %578 = vadd.xlane.f32.xlu0 %v577_v41  ;;  %v580_v25 = vsel %vm293_vm0, %v486_v53, 0.0  ;;  %v2027_v26 = vld [vmem:[%s2257_s1] ss:$0 sm:$0xff] }
  0xe9   : > { %581 = vadd.xlane.f32.xlu1 %v580_v25 }
 0x136   : > { %v489_v34 = vpop.xlane.xlu0 %488 }
 0x137   : > { %v583_v35 = vmul.f32 0.03125, %v489_v34 }
 0x139   : > { %v615_v44 = vadd.f32 1e-05, %v583_v35 }
 0x13a   : > { %v492_v45 = vpop.xlane.xlu1 %491  ;;  %v537_v16 = vpop.xlane.xlu0 %536 }
 0x13b   : > { %1497 = vrsqrt.f32 %v615_v44  ;;  %v584_v49 = vmul.f32 0.03125, %v492_v45  ;;  %v599_v61 = vmul.f32 0.03125, %v537_v16 }
 0x13d   : > { %v616_v0 = vadd.f32 1e-05, %v584_v49  ;;  %v631_v58 = vadd.f32 1e-05, %v599_v61  ;;  %v2034_v49 = vld [vmem:[%s2258_s2] ss:$0 sm:$0xff] }
 0x13e   : > { %v540_v62 = vpop.xlane.xlu1 %539  ;;  %v495_v46 = vpop.xlane.xlu0 %494 }
 0x13f   : > { %1499 = vrsqrt.f32 %v616_v0  ;;  %v600_v50 = vmul.f32 0.03125, %v540_v62  ;;  %v585_v59 = vmul.f32 0.03125, %v495_v46 }
 0x140   : > { %1501 = vrsqrt.f32 %v631_v58 }
 0x141   : > { %v632_v60 = vadd.f32 1e-05, %v600_v50  ;;  %v617_v7 = vadd.f32 1e-05, %v585_v59 }
 0x142   : > { %v498_v21 = vpop.xlane.xlu1 %497  ;;  %v543_v9 = vpop.xlane.xlu0 %542 }
 0x143   : > { %1503 = vrsqrt.f32 %v632_v60  ;;  %v586_v63 = vmul.f32 0.03125, %v498_v21  ;;  %v601_v15 = vmul.f32 0.03125, %v543_v9 }
 0x144   : > { %1505 = vrsqrt.f32 %v617_v7 }
 0x145   : > { %v1498_v51 = vpop.eup %1497  ;;  %v618_v36 = vadd.f32 1e-05, %v586_v63  ;;  %v633_v11 = vadd.f32 1e-05, %v601_v15 }
 0x146   : > { %v546_v19 = vpop.xlane.xlu1 %545  ;;  %v501_v3 = vpop.xlane.xlu0 %500  ;;  %v679_v30 = vmul.f32 %v1498_v51, %v1795_v54 }
 0x147   : > { %1507 = vrsqrt.f32 %v618_v36  ;;  %v602_v20 = vmul.f32 0.03125, %v546_v19  ;;  %v587_v39 = vmul.f32 0.03125, %v501_v3 }
 0x148   : > { %1509 = vrsqrt.f32 %v633_v11  ;;  %v718_v45 = vmul.f32 %v2027_v26, %v679_v30 }
 0x149   : > { %v1500_v56 = vpop.eup %1499  ;;  %v634_v53 = vadd.f32 1e-05, %v602_v20  ;;  %v619_v41 = vadd.f32 1e-05, %v587_v39 }
 0x14a   : > { %v1502_v25 = vpop.eup %1501  ;;  %v504_v34 = vpop.xlane.xlu1 %503  ;;  %v680_v44 = vmul.f32 %v1500_v56, %v1807_v29  ;;  %v757_v60 = vadd.f32 %v2034_v49, %v718_v45 }
 0x14b   : > { %v549_v35 = vpop.xlane.xlu0 %548  ;;  %1511 = vrsqrt.f32 %v634_v53  ;;  %v588_v54 = vmul.f32 0.03125, %v504_v34  ;;  %v695_v61 = vmul.f32 %v1502_v25, %v1799_v55 }
 0x14c   : > { %v603_v16 = vmul.f32 0.03125, %v549_v35  ;;  %1513 = vrsqrt.f32 %v619_v41  ;;  %v719_v0 = vmul.f32 %v2027_v26, %v680_v44 }
 0x14d   : > { %v1504_v58 = vpop.eup %1503  ;;  %v620_v62 = vadd.f32 1e-05, %v588_v54  ;;  %v734_v9 = vmul.f32 %v2027_v26, %v695_v61 }
 0x14e   : > { %v635_v46 = vadd.f32 1e-05, %v603_v16  ;;  %v1506_v50 = vpop.eup %1505  ;;  %v552_v29 = vpop.xlane.xlu1 %551  ;;  %v758_v7 = vadd.f32 %v2034_v49, %v719_v0  ;;  %v696_v21 = vmul.f32 %v1504_v58, %v1811_v2 }
 0x14f   : > { %v507_v59 = vpop.xlane.xlu0 %506  ;;  %v681_v63 = vmul.f32 %v1506_v50, %v1821_v1  ;;  %1515 = vrsqrt.f32 %v620_v62  ;;  %v604_v55 = vmul.f32 0.03125, %v552_v29  ;;  %v773_v56 = vadd.f32 %v2034_v49, %v734_v9 }
 0x150   : > { %v589_v15 = vmul.f32 0.03125, %v507_v59  ;;  %1517 = vrsqrt.f32 %v635_v46  ;;  %v789_v51 = vpack.c.bf16 %v758_v7, %v757_v60  ;;  %v735_v36 = vmul.f32 %v2027_v26, %v696_v21 }
 0x151   : > { %v1508_v11 = vpop.eup %1507  ;;  %v636_v19 = vadd.f32 1e-05, %v604_v55  ;;  %v720_v53 = vmul.f32 %v2027_v26, %v681_v63 }
 0x152   : > { %v621_v3 = vadd.f32 1e-05, %v589_v15  ;;  %v1510_v30 = vpop.eup %1509  ;;  %v682_v20 = vmul.f32 %v1508_v11, %v1825_v4  ;;  %v510_v39 = vpop.xlane.xlu1 %509  ;;  %1451 = vmatprep.mubr.msk.bf16.mxu0 %vm293_vm0, %v789_v51  ;;  %v774_v1 = vadd.f32 %v2034_v49, %v735_v36 }
 0x153   : > { %v555_v2 = vpop.xlane.xlu0 %554  ;;  %v697_v41 = vmul.f32 %v1510_v30, %v1835_v6  ;;  %1519 = vrsqrt.f32 %v636_v19  ;;  %v590_v25 = vmul.f32 0.03125, %v510_v39  ;;  %v759_v62 = vadd.f32 %v2034_v49, %v720_v53 }
 0x154   : > { %v605_v34 = vmul.f32 0.03125, %v555_v2  ;;  %1521 = vrsqrt.f32 %v621_v3  ;;  %v797_v35 = vpack.c.bf16 %v774_v1, %v773_v56  ;;  %v721_v44 = vmul.f32 %v2027_v26, %v682_v20 }
 0x155   : > { %v1512_v4 = vpop.eup %1511  ;;  %v622_v45 = vadd.f32 1e-05, %v590_v25  ;;  %v736_v46 = vmul.f32 %v2027_v26, %v697_v41 }
 0x156   : > { %v637_v54 = vadd.f32 1e-05, %v605_v34  ;;  %v1514_v16 = vpop.eup %1513  ;;  %v698_v61 = vmul.f32 %v1512_v4, %v1839_v12  ;;  %v558_v0 = vpop.xlane.xlu1 %557  ;;  %1467 = vmatprep.mubr.msk.bf16.mxu1 %vm293_vm0, %v797_v35  ;;  %v760_v6 = vadd.f32 %v2034_v49, %v721_v44 }
 0x157   : > { %v513_v58 = vpop.xlane.xlu0 %512  ;;  %v683_v50 = vmul.f32 %v1514_v16, %v1849_v13  ;;  %1523 = vrsqrt.f32 %v622_v45  ;;  %v606_v29 = vmul.f32 0.03125, %v558_v0  ;;  %v775_v36 = vadd.f32 %v2034_v49, %v736_v46 }
 0x158   : > { %v591_v59 = vmul.f32 0.03125, %v513_v58  ;;  %1525 = vrsqrt.f32 %v637_v54  ;;  %v790_v60 = vpack.c.bf16 %v760_v6, %v759_v62  ;;  %v737_v7 = vmul.f32 %v2027_v26, %v698_v61 }
 0x159   : > { %v1516_v12 = vpop.eup %1515  ;;  %v638_v21 = vadd.f32 1e-05, %v606_v29  ;;  %v722_v11 = vmul.f32 %v2027_v26, %v683_v50 }
 0x15a   : > { %v623_v9 = vadd.f32 1e-05, %v591_v59  ;;  %v1518_v63 = vpop.eup %1517  ;;  %v684_v55 = vmul.f32 %v1516_v12, %v1853_v17  ;;  %v516_v15 = vpop.xlane.xlu1 %515  ;;  %1452 = vmatmul.mubr.msk.bf16.vlgmr.msra.gmra.mrb[0].mxu0 %vm293_vm0, %v790_v60  ;;  %v776_v13 = vadd.f32 %v2034_v49, %v737_v7 }
 0x15b   : > { %v561_v51 = vpop.xlane.xlu0 %560  ;;  %v699_v19 = vmul.f32 %v1518_v63, %v1863_v18  ;;  %1527 = vrsqrt.f32 %v638_v21  ;;  %v592_v3 = vmul.f32 0.03125, %v516_v15  ;;  %v761_v34 = vadd.f32 %v2034_v49, %v722_v11 }
 0x15c   : > { %v607_v30 = vmul.f32 0.03125, %v561_v51  ;;  %1529 = vrsqrt.f32 %v623_v9  ;;  %v798_v20 = vpack.c.bf16 %v776_v13, %v775_v36  ;;  %v723_v39 = vmul.f32 %v2027_v26, %v684_v55 }
 0x15d   : > { %v1520_v17 = vpop.eup %1519  ;;  %v624_v2 = vadd.f32 1e-05, %v592_v3  ;;  %v738_v35 = vmul.f32 %v2027_v26, %v699_v19 }
 0x15e   : > { %v639_v56 = vadd.f32 1e-05, %v607_v30  ;;  %v1522_v1 = vpop.eup %1521  ;;  %v700_v53 = vmul.f32 %v1520_v17, %v1867_v22  ;;  %v564_v41 = vpop.xlane.xlu1 %563  ;;  %1468 = vmatmul.mubr.msk.bf16.vlgmr.msra.gmra.mrb[0].mxu1 %vm293_vm0, %v798_v20  ;;  %v762_v18 = vadd.f32 %v2034_v49, %v723_v39 }
 0x15f   : > { %v519_v25 = vpop.xlane.xlu0 %518  ;;  %v685_v44 = vmul.f32 %v1522_v1, %v1877_v23  ;;  %1531 = vrsqrt.f32 %v624_v2  ;;  %v608_v4 = vmul.f32 0.03125, %v564_v41  ;;  %v777_v50 = vadd.f32 %v2034_v49, %v738_v35 }
 0x160   : > { %v593_v45 = vmul.f32 0.03125, %v519_v25  ;;  %1533 = vrsqrt.f32 %v639_v56  ;;  %v791_v54 = vpack.c.bf16 %v762_v18, %v761_v34  ;;  %v739_v16 = vmul.f32 %v2027_v26, %v700_v53 }
 0x161   : > { %v1524_v22 = vpop.eup %1523  ;;  %v640_v61 = vadd.f32 1e-05, %v608_v4  ;;  %v724_v29 = vmul.f32 %v2027_v26, %v685_v44 }
 0x162   : > { %v625_v0 = vadd.f32 1e-05, %v593_v45  ;;  %v1526_v58 = vpop.eup %1525  ;;  %v686_v62 = vmul.f32 %v1524_v22, %v1881_v27  ;;  %v522_v6 = vpop.xlane.xlu1 %521  ;;  %1455 = vmatprep.mubr.msk.bf16.mxu0 %vm293_vm0, %v791_v54  ;;  %v778_v23 = vadd.f32 %v2034_v49, %v739_v16 }
 0x163   : > { %v567_v46 = vpop.xlane.xlu0 %566  ;;  %v701_v59 = vmul.f32 %v1526_v58, %v1891_v28  ;;  %1535 = vrsqrt.f32 %v640_v61  ;;  %v594_v60 = vmul.f32 0.03125, %v522_v6  ;;  %v763_v13 = vadd.f32 %v2034_v49, %v724_v29 }
 0x164   : > { %v609_v7 = vmul.f32 0.03125, %v567_v46  ;;  %1537 = vrsqrt.f32 %v625_v0  ;;  %v799_v12 = vpack.c.bf16 %v778_v23, %v777_v50  ;;  %v725_v21 = vmul.f32 %v2027_v26, %v686_v62 }
 0x165   : > { %v1528_v27 = vpop.eup %1527  ;;  %v626_v9 = vadd.f32 1e-05, %v594_v60  ;;  %v740_v11 = vmul.f32 %v2027_v26, %v701_v59 }
 0x166   : > { %v641_v63 = vadd.f32 1e-05, %v609_v7  ;;  %v1530_v55 = vpop.eup %1529  ;;  %v702_v15 = vmul.f32 %v1528_v27, %v1895_v32  ;;  %v570_v51 = vpop.xlane.xlu1 %569  ;;  %1471 = vmatprep.mubr.msk.bf16.mxu1 %vm293_vm0, %v799_v12  ;;  %v764_v28 = vadd.f32 %v2034_v49, %v725_v21 }
 0x167   : > { %v525_v36 = vpop.xlane.xlu0 %524  ;;  %v687_v19 = vmul.f32 %v1530_v55, %v1905_v33  ;;  %1539 = vrsqrt.f32 %v626_v9  ;;  %v610_v3 = vmul.f32 0.03125, %v570_v51  ;;  %v779_v25 = vadd.f32 %v2034_v49, %v740_v11 }
 0x168   : > { %v595_v30 = vmul.f32 0.03125, %v525_v36  ;;  %1541 = vrsqrt.f32 %v641_v63  ;;  %v792_v20 = vpack.c.bf16 %v764_v28, %v763_v13  ;;  %v741_v39 = vmul.f32 %v2027_v26, %v702_v15 }
 0x169   : > { %v1532_v32 = vpop.eup %1531  ;;  %v642_v17 = vadd.f32 1e-05, %v610_v3  ;;  %v726_v34 = vmul.f32 %v2027_v26, %v687_v19 }
 0x16a   : > { %v627_v2 = vadd.f32 1e-05, %v595_v30  ;;  %v1534_v56 = vpop.eup %1533  ;;  %v688_v1 = vmul.f32 %v1532_v32, %v1909_v37  ;;  %v528_v53 = vpop.xlane.xlu1 %527  ;;  %1456 = vmatmul.mubr.msk.bf16.gmra.mrb[4].mxu0 %vm293_vm0, %v792_v20  ;;  %v780_v33 = vadd.f32 %v2034_v49, %v741_v39 }
 0x16b   : > { %v573_v41 = vpop.xlane.xlu0 %572  ;;  %v703_v18 = vmul.f32 %v1534_v56, %v1919_v38  ;;  %1543 = vrsqrt.f32 %v642_v17  ;;  %v596_v35 = vmul.f32 0.03125, %v528_v53  ;;  %v765_v62 = vadd.f32 %v2034_v49, %v726_v34 }
 0x16c   : > { %v611_v44 = vmul.f32 0.03125, %v573_v41  ;;  %1545 = vrsqrt.f32 %v627_v2  ;;  %v800_v4 = vpack.c.bf16 %v780_v33, %v779_v25  ;;  %v727_v45 = vmul.f32 %v2027_v26, %v688_v1 }
 0x16d   : > { %v1536_v37 = vpop.eup %1535  ;;  %v628_v54 = vadd.f32 1e-05, %v596_v35  ;;  %v742_v6 = vmul.f32 %v2027_v26, %v703_v18 }
 0x16e   : > { %v643_v16 = vadd.f32 1e-05, %v611_v44  ;;  %v1538_v22 = vpop.eup %1537  ;;  %v704_v61 = vmul.f32 %v1536_v37, %v1923_v42  ;;  %v576_v0 = vpop.xlane.xlu1 %575  ;;  %1472 = vmatmul.mubr.msk.bf16.gmra.mrb[4].mxu1 %vm293_vm0, %v800_v4  ;;  %v766_v38 = vadd.f32 %v2034_v49, %v727_v45 }
 0x16f   : > { %v531_v58 = vpop.xlane.xlu0 %530  ;;  %v689_v46 = vmul.f32 %v1538_v22, %v1933_v43  ;;  %1547 = vrsqrt.f32 %v628_v54  ;;  %v612_v50 = vmul.f32 0.03125, %v576_v0  ;;  %v781_v63 = vadd.f32 %v2034_v49, %v742_v6 }
 0x170   : > { %v597_v23 = vmul.f32 0.03125, %v531_v58  ;;  %1549 = vrsqrt.f32 %v643_v16  ;;  %v793_v29 = vpack.c.bf16 %v766_v38, %v765_v62  ;;  %v743_v59 = vmul.f32 %v2027_v26, %v704_v61 }
 0x171   : > { %v1540_v42 = vpop.eup %1539  ;;  %v644_v60 = vadd.f32 1e-05, %v612_v50  ;;  %v728_v55 = vmul.f32 %v2027_v26, %v689_v46 }
 0x172   : > { %v629_v7 = vadd.f32 1e-05, %v597_v23  ;;  %v1542_v12 = vpop.eup %1541  ;;  %v690_v21 = vmul.f32 %v1540_v42, %v1937_v47  ;;  %v534_v27 = vpop.xlane.xlu1 %533  ;;  %1459 = vmatprep.mubr.msk.bf16.mxu0 %vm293_vm0, %v793_v29  ;;  %v782_v43 = vadd.f32 %v2034_v49, %v743_v59 }
 0x173   : > { %v579_v9 = vpop.xlane.xlu0 %578  ;;  %v705_v15 = vmul.f32 %v1542_v12, %v1947_v48  ;;  %1551 = vrsqrt.f32 %v644_v60  ;;  %v598_v51 = vmul.f32 0.03125, %v534_v27  ;;  %v767_v39 = vadd.f32 %v2034_v49, %v728_v55 }
 0x174   : > { %v613_v36 = vmul.f32 0.03125, %v579_v9  ;;  %1553 = vrsqrt.f32 %v629_v7  ;;  %v801_v13 = vpack.c.bf16 %v782_v43, %v781_v63  ;;  %v729_v28 = vmul.f32 %v2027_v26, %v690_v21 }
 0x175   : > { %v1544_v47 = vpop.eup %1543  ;;  %v630_v11 = vadd.f32 1e-05, %v598_v51  ;;  %v744_v32 = vmul.f32 %v2027_v26, %v705_v15 }
 0x176   : > { %v645_v19 = vadd.f32 1e-05, %v613_v36  ;;  %v1546_v3 = vpop.eup %1545  ;;  %v706_v30 = vmul.f32 %v1544_v47, %v1951_v52  ;;  %v582_v20 = vpop.xlane.xlu1 %581  ;;  %1475 = vmatprep.mubr.msk.bf16.mxu1 %vm293_vm0, %v801_v13  ;;  %v768_v48 = vadd.f32 %v2034_v49, %v729_v28 }
 0x177   : > { %v691_v17 = vmul.f32 %v1546_v3, %v1964_v57  ;;  %1555 = vrsqrt.f32 %v630_v11  ;;  %v614_v2 = vmul.f32 0.03125, %v582_v20  ;;  %v783_v33 = vadd.f32 %v2034_v49, %v744_v32 }
 0x178   : > { %1557 = vrsqrt.f32 %v645_v19  ;;  %v794_v56 = vpack.c.bf16 %v768_v48, %v767_v39  ;;  %v745_v1 = vmul.f32 %v2027_v26, %v706_v30 }
 0x179   : > { %v1548_v53 = vpop.eup %1547  ;;  %v646_v41 = vadd.f32 1e-05, %v614_v2  ;;  %v730_v18 = vmul.f32 %v2027_v26, %v691_v17 }
 0x17a   : > { %v1550_v52 = vpop.eup %1549  ;;  %v692_v25 = vmul.f32 %v1548_v53, %v1968_v40  ;;  %1460 = vmatmul.mubr.msk.bf16.gmra.mrb[8].mxu0 %vm293_vm0, %v794_v56  ;;  %v784_v34 = vadd.f32 %v2034_v49, %v745_v1 }
 0x17b   : > { %v707_v57 = vmul.f32 %v1550_v52, %v1981_v5  ;;  %1559 = vrsqrt.f32 %v646_v41  ;;  %v769_v40 = vadd.f32 %v2034_v49, %v730_v18 }
 0x17c   : > { %v802_v35 = vpack.c.bf16 %v784_v34, %v783_v33  ;;  %v731_v44 = vmul.f32 %v2027_v26, %v692_v25 }
 0x17d   : > { %v1552_v4 = vpop.eup %1551  ;;  %v746_v16 = vmul.f32 %v2027_v26, %v707_v57 }
 0x17e   : > { %v1554_v45 = vpop.eup %1553  ;;  %v708_v37 = vmul.f32 %v1552_v4, %v1985_v31  ;;  %1476 = vmatmul.mubr.msk.bf16.gmra.mrb[8].mxu1 %vm293_vm0, %v802_v35  ;;  %v770_v54 = vadd.f32 %v2034_v49, %v731_v44 }
 0x17f   : > { %v693_v22 = vmul.f32 %v1554_v45, %v1995_v10  ;;  %v785_v31 = vadd.f32 %v2034_v49, %v746_v16 }
 0x180   : > { %v795_v61 = vpack.c.bf16 %v770_v54, %v769_v40  ;;  %v747_v5 = vmul.f32 %v2027_v26, %v708_v37 }
 0x181   : > { %v1556_v0 = vpop.eup %1555  ;;  %v732_v6 = vmul.f32 %v2027_v26, %v693_v22 }
 0x182   : > { %v1558_v58 = vpop.eup %1557  ;;  %v694_v62 = vmul.f32 %v1556_v0, %v1999_v8  ;;  %1463 = vmatprep.mubr.msk.bf16.mxu0 %vm293_vm0, %v795_v61  ;;  %v786_v38 = vadd.f32 %v2034_v49, %v747_v5 }
 0x183   : > { %v709_v46 = vmul.f32 %v1558_v58, %v2009_v14  ;;  %v771_v8 = vadd.f32 %v2034_v49, %v732_v6 }
 0x184   : > { %v803_v50 = vpack.c.bf16 %v786_v38, %v785_v31  ;;  %v733_v10 = vmul.f32 %v2027_v26, %v694_v62 }
 0x185   : > { %v1560_v23 = vpop.eup %1559  ;;  %v748_v42 = vmul.f32 %v2027_v26, %v709_v46 }
 0x186   : > { %v710_v29 = vmul.f32 %v1560_v23, %v2013_v24  ;;  %1479 = vmatprep.mubr.msk.bf16.mxu1 %vm293_vm0, %v803_v50  ;;  %v772_v59 = vadd.f32 %v2034_v49, %v733_v10  ;;  %v2148_v24 = vld [vmem:[%s2260_s4] ss:$0 sm:$0xff] }
 0x187   : > { %v787_v14 = vadd.f32 %v2034_v49, %v748_v42 }
 0x188   : > { %v796_v60 = vpack.c.bf16 %v772_v59, %v771_v8  ;;  %v749_v7 = vmul.f32 %v2027_v26, %v710_v29 }
 0x18a   : > { %1464 = vmatmul.mubr.msk.bf16.gmra.mrb[12].mxu0 %vm293_vm0, %v796_v60  ;;  %v788_v12 = vadd.f32 %v2034_v49, %v749_v7 }
 0x18c   : > { %v804_v21 = vpack.c.bf16 %v788_v12, %v787_v14 }
 0x18e   : > { %1480 = vmatmul.mubr.msk.bf16.gmra.mrb[12].mxu1 %vm293_vm0, %v804_v21 }
 0x22d   : > { %v1453_v27 = vpop.f32.mrb[0].mxu0 }
 0x22e   : > { %v919_v9 = vadd.f32 %v1453_v27, %v2148_v24  ;;  %v910_v63 = vpop.f32.mrb[1].mxu0 }
 0x22f   : > { %v911_v26 = vadd.f32 %v2148_v24, %v910_v63  ;;  %v1454_v49 = vpop.f32.mrb[2].mxu0 }
 0x230   : > { %v1320_v43 = vpack.c.bf16 %v919_v9, %v919_v9  ;;  %v922_v55 = vadd.f32 %v1454_v49, %v2148_v24  ;;  %v913_v15 = vpop.f32.mrb[3].mxu0 }
 0x231   : > { %v1318_v51 = vpack.c.bf16 %v911_v26, %v911_v26  ;;  %v914_v36 = vadd.f32 %v2148_v24, %v913_v15  ;;  %v1469_v13 = vpop.f32.mrb[0].mxu1 }
 0x232   : > { %1168 = vst.msk [vmem:[%s2156_s12 + $0x8] sm:$0xf] %vm1165_vm1, %v1320_v43  ;;  %v1321_v28 = vpack.c.bf16 %v922_v55, %v922_v55  ;;  %v983_v47 = vadd.f32 %v1469_v13, %v2148_v24  ;;  %v974_v11 = vpop.f32.mrb[1].mxu1 }
 0x233   : > { %1166 = vst.msk [vmem:[%s2156_s12] sm:$0xf] %vm1165_vm1, %v1318_v51  ;;  %v1319_v19 = vpack.c.bf16 %v914_v36, %v914_v36  ;;  %v975_v3 = vadd.f32 %v2148_v24, %v974_v11  ;;  %v1470_v30 = vpop.f32.mrb[2].mxu1 }
 0x234   : > { %1169 = vst.msk [vmem:[%s2156_s12 + $0xc] sm:$0xf] %vm1165_vm1, %v1321_v28  ;;  %v1336_v20 = vpack.c.bf16 %v983_v47, %v983_v47  ;;  %v986_v39 = vadd.f32 %v1470_v30, %v2148_v24  ;;  %v977_v48 = vpop.f32.mrb[3].mxu1 }
 0x235   : > { %1167 = vst.msk [vmem:[%s2156_s12 + $0x4] sm:$0xf] %vm1165_vm1, %v1319_v19  ;;  %v1334_v32 = vpack.c.bf16 %v975_v3, %v975_v3  ;;  %v978_v17 = vadd.f32 %v2148_v24, %v977_v48 }
 0x236   : > { %1184 = vst.msk [vmem:[%s2156_s12 + $0x48] sm:$0xf] %vm1165_vm1, %v1336_v20  ;;  %v1337_v2 = vpack.c.bf16 %v986_v39, %v986_v39 }
 0x237   : > { %1182 = vst.msk [vmem:[%s2156_s12 + $0x40] sm:$0xf] %vm1165_vm1, %v1334_v32  ;;  %v1335_v56 = vpack.c.bf16 %v978_v17, %v978_v17 }
 0x238   : > { %1185 = vst.msk [vmem:[%s2156_s12 + $0x4c] sm:$0xf] %vm1165_vm1, %v1337_v2 }
 0x239   : > { %1183 = vst.msk [vmem:[%s2156_s12 + $0x44] sm:$0xf] %vm1165_vm1, %v1335_v56 }
 0x23d   : > { %v1457_v1 = vpop.f32.mrb[4].mxu0 }
 0x23e   : > { %v935_v53 = vadd.f32 %v1457_v1, %v2148_v24  ;;  %v926_v41 = vpop.f32.mrb[5].mxu0 }
 0x23f   : > { %v927_v52 = vadd.f32 %v2148_v24, %v926_v41  ;;  %v1458_v25 = vpop.f32.mrb[6].mxu0 }
 0x240   : > { %v1324_v33 = vpack.c.bf16 %v935_v53, %v935_v53  ;;  %v938_v34 = vadd.f32 %v1458_v25, %v2148_v24  ;;  %v929_v18 = vpop.f32.mrb[7].mxu0 }
 0x241   : > { %v1322_v57 = vpack.c.bf16 %v927_v52, %v927_v52  ;;  %v930_v35 = vadd.f32 %v2148_v24, %v929_v18  ;;  %v1473_v44 = vpop.f32.mrb[4].mxu1 }
 0x242   : > { %1172 = vst.msk [vmem:[%s2156_s12 + $0x18] sm:$0xf] %vm1165_vm1, %v1324_v33  ;;  %v1325_v4 = vpack.c.bf16 %v938_v34, %v938_v34  ;;  %v999_v45 = vadd.f32 %v1473_v44, %v2148_v24  ;;  %v990_v37 = vpop.f32.mrb[5].mxu1 }
 0x243   : > { %1170 = vst.msk [vmem:[%s2156_s12 + $0x10] sm:$0xf] %vm1165_vm1, %v1322_v57  ;;  %v1323_v40 = vpack.c.bf16 %v930_v35, %v930_v35  ;;  %v991_v54 = vadd.f32 %v2148_v24, %v990_v37  ;;  %v1474_v16 = vpop.f32.mrb[6].mxu1 }
 0x244   : > { %1173 = vst.msk [vmem:[%s2156_s12 + $0x1c] sm:$0xf] %vm1165_vm1, %v1325_v4  ;;  %v1340_v22 = vpack.c.bf16 %v999_v45, %v999_v45  ;;  %v1002_v61 = vadd.f32 %v1474_v16, %v2148_v24  ;;  %v993_v5 = vpop.f32.mrb[7].mxu1 }
 0x245   : > { %1171 = vst.msk [vmem:[%s2156_s12 + $0x14] sm:$0xf] %vm1165_vm1, %v1323_v40  ;;  %v1338_v0 = vpack.c.bf16 %v991_v54, %v991_v54  ;;  %v994_v58 = vadd.f32 %v2148_v24, %v993_v5 }
 0x246   : > { %1188 = vst.msk [vmem:[%s2156_s12 + $0x58] sm:$0xf] %vm1165_vm1, %v1340_v22  ;;  %v1341_v62 = vpack.c.bf16 %v1002_v61, %v1002_v61 }
 0x247   : > { %1186 = vst.msk [vmem:[%s2156_s12 + $0x50] sm:$0xf] %vm1165_vm1, %v1338_v0  ;;  %v1339_v31 = vpack.c.bf16 %v994_v58, %v994_v58 }
 0x248   : > { %1189 = vst.msk [vmem:[%s2156_s12 + $0x5c] sm:$0xf] %vm1165_vm1, %v1341_v62 }
 0x249   : > { %1187 = vst.msk [vmem:[%s2156_s12 + $0x54] sm:$0xf] %vm1165_vm1, %v1339_v31 }
 0x24d   : > { %v1461_v38 = vpop.f32.mrb[8].mxu0 }
 0x24e   : > { %v951_v6 = vadd.f32 %v1461_v38, %v2148_v24  ;;  %v942_v46 = vpop.f32.mrb[9].mxu0 }
 0x24f   : > { %v943_v50 = vadd.f32 %v2148_v24, %v942_v46  ;;  %v1462_v10 = vpop.f32.mrb[10].mxu0 }
 0x250   : > { %v1328_v23 = vpack.c.bf16 %v951_v6, %v951_v6  ;;  %v954_v29 = vadd.f32 %v1462_v10, %v2148_v24  ;;  %v945_v8 = vpop.f32.mrb[11].mxu0 }
 0x251   : > { %v1326_v59 = vpack.c.bf16 %v943_v50, %v943_v50  ;;  %v946_v42 = vadd.f32 %v2148_v24, %v945_v8  ;;  %v1477_v60 = vpop.f32.mrb[8].mxu1 }
 0x252   : > { %1176 = vst.msk [vmem:[%s2156_s12 + $0x28] sm:$0xf] %vm1165_vm1, %v1328_v23  ;;  %v1329_v7 = vpack.c.bf16 %v954_v29, %v954_v29  ;;  %v1015_v14 = vadd.f32 %v1477_v60, %v2148_v24  ;;  %v1006_v12 = vpop.f32.mrb[9].mxu1 }
 0x253   : > { %1174 = vst.msk [vmem:[%s2156_s12 + $0x20] sm:$0xf] %vm1165_vm1, %v1326_v59  ;;  %v1327_v21 = vpack.c.bf16 %v946_v42, %v946_v42  ;;  %v1007_v27 = vadd.f32 %v2148_v24, %v1006_v12  ;;  %v1478_v9 = vpop.f32.mrb[10].mxu1 }
 0x254   : > { %1177 = vst.msk [vmem:[%s2156_s12 + $0x2c] sm:$0xf] %vm1165_vm1, %v1329_v7  ;;  %v1344_v63 = vpack.c.bf16 %v1015_v14, %v1015_v14  ;;  %v1018_v26 = vadd.f32 %v1478_v9, %v2148_v24  ;;  %v1009_v49 = vpop.f32.mrb[11].mxu1 }
 0x255   : > { %1175 = vst.msk [vmem:[%s2156_s12 + $0x24] sm:$0xf] %vm1165_vm1, %v1327_v21  ;;  %v1342_v43 = vpack.c.bf16 %v1007_v27, %v1007_v27  ;;  %v1010_v55 = vadd.f32 %v2148_v24, %v1009_v49 }
 0x256   : > { %1192 = vst.msk [vmem:[%s2156_s12 + $0x68] sm:$0xf] %vm1165_vm1, %v1344_v63  ;;  %v1345_v15 = vpack.c.bf16 %v1018_v26, %v1018_v26 }
 0x257   : > { %1190 = vst.msk [vmem:[%s2156_s12 + $0x60] sm:$0xf] %vm1165_vm1, %v1342_v43  ;;  %v1343_v51 = vpack.c.bf16 %v1010_v55, %v1010_v55 }
 0x258   : > { %1193 = vst.msk [vmem:[%s2156_s12 + $0x6c] sm:$0xf] %vm1165_vm1, %v1345_v15 }
 0x259   : > { %1191 = vst.msk [vmem:[%s2156_s12 + $0x64] sm:$0xf] %vm1165_vm1, %v1343_v51 }
 0x25d   : > { %v1465_v36 = vpop.f32.mrb[12].mxu0 }
 0x25e   : > { %v967_v13 = vadd.f32 %v1465_v36, %v2148_v24  ;;  %v958_v28 = vpop.f32.mrb[13].mxu0 }
 0x25f   : > { %v959_v47 = vadd.f32 %v2148_v24, %v958_v28  ;;  %v1466_v11 = vpop.f32.mrb[14].mxu0 }
 0x260   : > { %v1332_v19 = vpack.c.bf16 %v967_v13, %v967_v13  ;;  %v970_v3 = vadd.f32 %v1466_v11, %v2148_v24  ;;  %v961_v30 = vpop.f32.mrb[15].mxu0 }
 0x261   : > { %v1330_v20 = vpack.c.bf16 %v959_v47, %v959_v47  ;;  %v962_v39 = vadd.f32 %v2148_v24, %v961_v30  ;;  %v1481_v48 = vpop.f32.mrb[12].mxu1 }
 0x262   : > { %1180 = vst.msk [vmem:[%s2156_s12 + $0x38] sm:$0xf] %vm1165_vm1, %v1332_v19  ;;  %v1333_v32 = vpack.c.bf16 %v970_v3, %v970_v3  ;;  %v1031_v17 = vadd.f32 %v1481_v48, %v2148_v24  ;;  %v1022_v2 = vpop.f32.mrb[13].mxu1 }
 0x263   : > { %1178 = vst.msk [vmem:[%s2156_s12 + $0x30] sm:$0xf] %vm1165_vm1, %v1330_v20  ;;  %v1331_v56 = vpack.c.bf16 %v962_v39, %v962_v39  ;;  %v1023_v1 = vadd.f32 %v2148_v24, %v1022_v2  ;;  %v1482_v53 = vpop.f32.mrb[14].mxu1 }
 0x264   : > { %1181 = vst.msk [vmem:[%s2156_s12 + $0x3c] sm:$0xf] %vm1165_vm1, %v1333_v32  ;;  %v1348_v41 = vpack.c.bf16 %v1031_v17, %v1031_v17  ;;  %v1034_v52 = vadd.f32 %v1482_v53, %v2148_v24  ;;  %v1025_v25 = vpop.f32.mrb[15].mxu1 }
 0x265   : > { %1179 = vst.msk [vmem:[%s2156_s12 + $0x34] sm:$0xf] %vm1165_vm1, %v1331_v56  ;;  %v1346_v33 = vpack.c.bf16 %v1023_v1, %v1023_v1  ;;  %v1026_v34 = vadd.f32 %v2148_v24, %v1025_v25 }
 0x266   : > { %1196 = vst.msk [vmem:[%s2156_s12 + $0x78] sm:$0xf] %vm1165_vm1, %v1348_v41  ;;  %v1349_v18 = vpack.c.bf16 %v1034_v52, %v1034_v52 }
 0x267   : > { %1194 = vst.msk [vmem:[%s2156_s12 + $0x70] sm:$0xf] %vm1165_vm1, %v1346_v33  ;;  %v1347_v57 = vpack.c.bf16 %v1026_v34, %v1026_v34 }
 0x268   : > { %1197 = vst.msk [vmem:[%s2156_s12 + $0x7c] sm:$0xf] %vm1165_vm1, %v1349_v18 }
 0x269   : > { %1195 = vst.msk [vmem:[%s2156_s12 + $0x74] sm:$0xf] %vm1165_vm1, %v1347_v57 }
 0x26a PF: > { %s15_s18 = sadd.s32 1, %s1567_s18  }
 0x26b   : > { %p12_p4 = scmp.ge.s32.totalorder %s15_s18, 4  }
 0x26d   :  { %14 = sbr.rel (!%p12_p4) target bundleno = 1 (0x1), region = 70 }

// kernel: nat_block.21
= control target key start
LH: loop header
LB: loop body
LE: loop exit
PB: predicated region body
PF: predicated region fallthrough
CT: control target
= control target key end

     0   :  { %vm314_vm0 = vcmask 261120   ;;  %vm533_vm1 = vcmask 523264   ;;  %vm853_vm2 = vcmask 519168   ;;  %s1603_s1 = inlined_call_operand.vmem [shape: bf16[288,64], index: 1, kind: input, shape index: {}]   ;;  %s1604_s0 = inlined_call_operand.vmem [shape: bf16[128,288], index: 0, kind: input, shape index: {}]   ;;  %s1605_s2 = inlined_call_operand.vmem [shape: f32[1,64], index: 2, kind: input, shape index: {}]   ;;  %s1606_s3 = inlined_call_operand.vmem [shape: f32[1,64], index: 3, kind: input, shape index: {}]   ;;  %s1607_s4 = inlined_call_operand.vmem [shape: bf16[128,64], index: 4, kind: output, shape index: {}]  }
   0x1   :  { %v1068_v0 = vld [vmem:[%s1603_s1 + $0x40] sm:$0xff]   ;;  %v1070_v2 = vld [vmem:[%s1603_s1 + $0x48] sm:$0xff]   ;;  %v1072_v4 = vld [vmem:[%s1603_s1 + $0x50] sm:$0xff]  }
   0x2   :  { %v1069_v1 = vld [vmem:[%s1603_s1] sm:$0xff]   ;;  %958 = vmatprep.subr.bf16.mxu0 %v1068_v0  ;;  %1052 = vmatprep.subr.bf16.mxu1 %v1068_v0  ;;  %v1071_v3 = vld [vmem:[%s1603_s1 + $0x8] sm:$0xff]   ;;  %v1073_v5 = vld [vmem:[%s1603_s1 + $0x10] sm:$0xff]  }
   0x3   :  { %959 = vmatpush3.bf16.msra.mxu0 %v1069_v1  ;;  %1060 = vmatpush3.bf16.msra.mxu1 %v1069_v1  ;;  %v1074_v6 = vld [vmem:[%s1603_s1 + $0x58] sm:$0xff]   ;;  %v1076_v8 = vld [vmem:[%s1603_s1 + $0x60] sm:$0xff]   ;;  %v1078_v10 = vld [vmem:[%s1603_s1 + $0x68] sm:$0xff]  }
   0x4   :  { %960 = vmatprep.subr.bf16.mxu0 %v1070_v2  ;;  %1053 = vmatprep.subr.bf16.mxu1 %v1070_v2  ;;  %v1075_v7 = vld [vmem:[%s1603_s1 + $0x18] sm:$0xff]   ;;  %v1077_v9 = vld [vmem:[%s1603_s1 + $0x20] sm:$0xff]   ;;  %v1079_v13 = vld [vmem:[%s1603_s1 + $0x28] sm:$0xff]  }
   0x5   :  { %v1086_v11 = vld [vmem:[%s1604_s0 + $0x4] ss:$12 sps:$4 sm:$0xff]   ;;  %v1089_v12 = vld [vmem:[%s1604_s0 + $0x94] ss:$12 sps:$4 sm:$0xff]   ;;  %v1082_v16 = vld [vmem:[%s1603_s1 + $0x78] sm:$0xff]  }
   0x6   :  { %v1080_v14 = vld [vmem:[%s1603_s1 + $0x70] sm:$0xff]   ;;  %371 = vmatprep.mubr.bf16.mxu0 %v1086_v11  ;;  %419 = vmatprep.mubr.bf16.mxu1 %v1089_v12  ;;  %v1083_v17 = vld [vmem:[%s1603_s1 + $0x38] sm:$0xff]   ;;  %v1084_v18 = vld [vmem:[%s1604_s0] ss:$12 sps:$4 sm:$0xff]  }
   0x7   :  { %961 = vmatpush3.bf16.msra.mxu0 %v1071_v3  ;;  %1061 = vmatpush3.bf16.msra.mxu1 %v1071_v3  ;;  %v1081_v15 = vld [vmem:[%s1603_s1 + $0x30] sm:$0xff]   ;;  %v1090_v19 = vld [vmem:[%s1603_s1 + $0x80] sm:$0xff]   ;;  %v1091_v21 = vld [vmem:[%s1604_s0 + $0x1c] ss:$12 sps:$4 sm:$0xff]  }
   0x8   :  { %962 = vmatprep.subr.bf16.mxu0 %v1072_v4  ;;  %1054 = vmatprep.subr.bf16.mxu1 %v1072_v4  ;;  %v1087_v20 = vld [vmem:[%s1604_s0 + $0x90] ss:$12 sps:$4 sm:$0xff]   ;;  %v1093_v22 = vld [vmem:[%s1604_s0 + $0xac] ss:$12 sps:$4 sm:$0xff]   ;;  %v1096_v25 = vld [vmem:[%s1604_s0 + $0xa8] ss:$12 sps:$4 sm:$0xff]  }
   0x9   :  { %v1097_v23 = vld [vmem:[%s1603_s1 + $0x88] sm:$0xff]   ;;  %v1095_v24 = vld [vmem:[%s1604_s0 + $0x18] ss:$12 sps:$4 sm:$0xff]   ;;  %v1098_v26 = vld [vmem:[%s1604_s0 + $0x34] ss:$12 sps:$4 sm:$0xff]  }
   0xa   :  { %v1100_v27 = vld [vmem:[%s1604_s0 + $0x8] ss:$12 sps:$4 sm:$0xff]   ;;  %v1101_v28 = vld [vmem:[%s1604_s0 + $0x30] ss:$12 sps:$4 sm:$0xff]   ;;  %v1102_v29 = vld [vmem:[%s1604_s0 + $0x20] ss:$12 sps:$4 sm:$0xff]  }
   0xb   :  { %963 = vmatpush3.bf16.msra.mxu0 %v1073_v5  ;;  %1062 = vmatpush3.bf16.msra.mxu1 %v1073_v5  ;;  %v1103_v30 = vld [vmem:[%s1604_s0 + $0x4c] ss:$12 sps:$4 sm:$0xff]   ;;  %v1106_v32 = vld [vmem:[%s1604_s0 + $0x48] ss:$12 sps:$4 sm:$0xff]   ;;  %v1107_v33 = vld [vmem:[%s1604_s0 + $0x50] ss:$12 sps:$4 sm:$0xff]  }
   0xc   :  { %964 = vmatprep.subr.bf16.mxu0 %v1074_v6  ;;  %1055 = vmatprep.subr.bf16.mxu1 %v1074_v6  ;;  %v1105_v31 = vld [vmem:[%s1604_s0 + $0x38] ss:$12 sps:$4 sm:$0xff]   ;;  %v1110_v35 = vld [vmem:[%s1604_s0 + $0x68] ss:$12 sps:$4 sm:$0xff]   ;;  %v1111_v36 = vld [vmem:[%s1604_s0 + $0x60] ss:$12 sps:$4 sm:$0xff]  }
   0xd   :  { %v1108_v34 = vld [vmem:[%s1604_s0 + $0x64] ss:$12 sps:$4 sm:$0xff]   ;;  %v1112_v37 = vld [vmem:[%s1604_s0 + $0x80] ss:$12 sps:$4 sm:$0xff]   ;;  %v1113_v38 = vld [vmem:[%s1604_s0 + $0x7c] ss:$12 sps:$4 sm:$0xff]  }
   0xe   :  { %v1115_v39 = vld [vmem:[%s1604_s0 + $0x98] ss:$12 sps:$4 sm:$0xff]   ;;  %v1117_v41 = vld [vmem:[%s1604_s0 + $0xb0] ss:$12 sps:$4 sm:$0xff]  }
   0xf   :  { %965 = vmatpush3.bf16.msra.mxu0 %v1075_v7  ;;  %1063 = vmatpush3.bf16.msra.mxu1 %v1075_v7  ;;  %v1116_v40 = vld [vmem:[%s1604_s0 + $0x78] ss:$12 sps:$4 sm:$0xff]  }
  0x10   :  { %966 = vmatprep.subr.bf16.mxu0 %v1076_v8  ;;  %1056 = vmatprep.subr.bf16.mxu1 %v1076_v8 }
  0x13   :  { %967 = vmatpush3.bf16.msra.mxu0 %v1077_v9  ;;  %1064 = vmatpush3.bf16.msra.mxu1 %v1077_v9 }
  0x14   :  { %968 = vmatprep.subr.bf16.mxu0 %v1078_v10  ;;  %1057 = vmatprep.subr.bf16.mxu1 %v1078_v10 }
  0x17   :  { %969 = vmatpush3.bf16.msra.mxu0 %v1079_v13  ;;  %1065 = vmatpush3.bf16.msra.mxu1 %v1079_v13 }
  0x18   :  { %970 = vmatprep.subr.bf16.mxu0 %v1080_v14  ;;  %1058 = vmatprep.subr.bf16.mxu1 %v1080_v14 }
  0x1b   :  { %971 = vmatpush3.bf16.msra.mxu0 %v1081_v15  ;;  %1066 = vmatpush3.bf16.msra.mxu1 %v1081_v15 }
  0x1c   :  { %972 = vmatprep.subr.bf16.mxu0 %v1082_v16  ;;  %1059 = vmatprep.subr.bf16.mxu1 %v1082_v16 }
  0x1f   :  { %973 = vmatpush3.bf16.msra.mxu0 %v1083_v17  ;;  %1067 = vmatpush3.bf16.msra.mxu1 %v1083_v17 }
  0x20   :  { %1032 = vmatprep.subr.bf16.mxu1 %v1090_v19 }
  0x22   :  { %372 = vmatmul.mubr.bf16.vlgmr.msra.gmra.mrb[0].mxu0 %v1084_v18  ;;  %420 = vmatmul.mubr.bf16.vlgmr.msra.gmra.mrb[0].mxu1 %v1087_v20 }
  0x23   :  { %1033 = vmatpush3.bf16.msra.mxu1 %v1090_v19  ;;  %379 = vmatprep.mubr.bf16.mxu0 %v1091_v21 }
  0x24   :  { %427 = vmatprep.mubr.bf16.mxu1 %v1093_v22  ;;  %1034 = vmatprep.subr.bf16.mxu1 %v1097_v23 }
  0x27   :  { %1035 = vmatpush3.bf16.msra.mxu1 %v1097_v23 }
  0x2a   :  { %380 = vmatmul.mubr.bf16.gmra.mrb[4].mxu0 %v1095_v24  ;;  %428 = vmatmul.mubr.bf16.gmra.mrb[4].mxu1 %v1096_v25 }
  0x2b   :  { %387 = vmatprep.mubr.bf16.mxu0 %v1098_v26  ;;  %1036 = vmatprep.mubr.msk.bf16.mxu1 %vm314_vm0, %v1100_v27 }
  0x32   :  { %388 = vmatmul.mubr.bf16.gmra.mrb[8].mxu0 %v1101_v28  ;;  %1037 = vmatmul.mubr.msk.bf16.vlgmr.msra.gmra.mrb[8].mxu1 %vm314_vm0, %v1102_v29 }
  0x33   :  { %395 = vmatprep.mubr.bf16.mxu0 %v1103_v30  ;;  %1040 = vmatprep.mubr.msk.bf16.mxu1 %vm314_vm0, %v1105_v31 }
  0x3a   :  { %396 = vmatmul.mubr.bf16.gmra.mrb[12].mxu0 %v1106_v32  ;;  %1041 = vmatmul.mubr.msk.bf16.gmra.mrb[12].mxu1 %vm314_vm0, %v1107_v33 }
  0x3b   :  { %403 = vmatprep.mubr.bf16.mxu0 %v1108_v34  ;;  %1044 = vmatprep.mubr.msk.bf16.mxu1 %vm314_vm0, %v1110_v35 }
  0x42   :  { %404 = vmatmul.mubr.bf16.gmra.mrb[16].mxu0 %v1111_v36  ;;  %1045 = vmatmul.mubr.msk.bf16.gmra.mrb[16].mxu1 %vm314_vm0, %v1112_v37 }
  0x43   :  { %411 = vmatprep.mubr.bf16.mxu0 %v1113_v38  ;;  %1048 = vmatprep.mubr.msk.bf16.mxu1 %vm314_vm0, %v1115_v39 }
  0x4a   :  { %412 = vmatmul.mubr.bf16.gmra.mrb[20].mxu0 %v1116_v40  ;;  %1049 = vmatmul.mubr.msk.bf16.gmra.mrb[20].mxu1 %vm314_vm0, %v1117_v41 }
  0xf5   :  { %v974_v42 = vpop.f32.mrb[0].mxu0  ;;  %v1010_v43 = vpop.f32.mrb[0].mxu1 }
  0xf6   :  { %v975_v44 = vpop.f32.mrb[1].mxu0  ;;  %v1011_v45 = vpop.f32.mrb[1].mxu1 }
  0xf7   :  { %v976_v46 = vadd.f32 %v975_v44, %v974_v42  ;;  %v1309_v47 = vadd.f32 %v1011_v45, %v1010_v43  ;;  %v977_v48 = vpop.f32.mrb[2].mxu0  ;;  %v1013_v49 = vpop.f32.mrb[2].mxu1 }
  0xf8   :  { %v978_v50 = vpop.f32.mrb[3].mxu0  ;;  %v1014_v51 = vpop.f32.mrb[3].mxu1 }
  0xf9   :  { %v979_v52 = vadd.f32 %v978_v50, %v977_v48  ;;  %v1311_v53 = vadd.f32 %v1014_v51, %v1013_v49 }
  0xfd   :  { %v980_v54 = vpop.f32.mrb[4].mxu0  ;;  %v1016_v55 = vpop.f32.mrb[4].mxu1 }
  0xfe   :  { %v981_v56 = vpop.f32.mrb[5].mxu0  ;;  %v1017_v57 = vpop.f32.mrb[5].mxu1 }
  0xff   :  { %v982_v58 = vadd.f32 %v981_v56, %v980_v54  ;;  %v1313_v59 = vadd.f32 %v1017_v57, %v1016_v55  ;;  %v983_v60 = vpop.f32.mrb[6].mxu0  ;;  %v1019_v61 = vpop.f32.mrb[6].mxu1 }
 0x100   :  { %v984_v62 = vpop.f32.mrb[7].mxu0  ;;  %v1020_v63 = vpop.f32.mrb[7].mxu1 }
 0x101   :  { %v985_v0 = vadd.f32 %v984_v62, %v983_v60  ;;  %v1315_v1 = vadd.f32 %v1020_v63, %v1019_v61 }
 0x105   :  { %v986_v2 = vpop.f32.mrb[8].mxu0  ;;  %v1038_v3 = vpop.f32.mrb[8].mxu1 }
 0x106   :  { %v1317_v4 = vadd.f32 %v1038_v3, %v982_v58  ;;  %v987_v5 = vpop.f32.mrb[9].mxu0  ;;  %v470_v6 = vpop.f32.mrb[9].mxu1 }
 0x107   :  { %v988_v7 = vadd.f32 %v987_v5, %v986_v2  ;;  %v1319_v8 = vadd.f32 %v976_v46, %v470_v6  ;;  %v989_v9 = vpop.f32.mrb[10].mxu0  ;;  %v1039_v10 = vpop.f32.mrb[10].mxu1 }
 0x108   :  { %v1321_v11 = vadd.f32 %v1039_v10, %v985_v0  ;;  %v990_v12 = vpop.f32.mrb[11].mxu0  ;;  %v473_v13 = vpop.f32.mrb[11].mxu1  ;;  %v540_v14 = vsel %vm533_vm1, %v1317_v4, 0.0 }
 0x109   :  { %v991_v15 = vadd.f32 %v990_v12, %v989_v9  ;;  %v1325_v16 = vadd.f32 %v979_v52, %v473_v13  ;;  %541 = vadd.xlane.f32.xlu1 %v540_v14  ;;  %v534_v17 = vsel %vm533_vm1, %v1319_v8, 0.0 }
 0x10a   :  { %535 = vadd.xlane.f32.xlu0 %v534_v17  ;;  %v543_v18 = vsel %vm533_vm1, %v1321_v11, 0.0 }
 0x10b   :  { %v537_v21 = vsel %vm533_vm1, %v1325_v16, 0.0 }
 0x10d   :  { %v992_v19 = vpop.f32.mrb[12].mxu0  ;;  %v1042_v20 = vpop.f32.mrb[12].mxu1  ;;  %544 = vadd.xlane.f32.xlu1 %v543_v18 }
 0x10e   :  { %v993_v22 = vpop.f32.mrb[13].mxu0  ;;  %v486_v23 = vpop.f32.mrb[13].mxu1  ;;  %538 = vadd.xlane.f32.xlu0 %v537_v21 }
 0x10f   :  { %v994_v24 = vadd.f32 %v993_v22, %v992_v19  ;;  %v1333_v25 = vadd.f32 %v988_v7, %v486_v23  ;;  %v995_v26 = vpop.f32.mrb[14].mxu0  ;;  %v1043_v27 = vpop.f32.mrb[14].mxu1 }
 0x110   :  { %v996_v28 = vpop.f32.mrb[15].mxu0  ;;  %v489_v29 = vpop.f32.mrb[15].mxu1 }
 0x111   :  { %v997_v30 = vadd.f32 %v996_v28, %v995_v26  ;;  %v1335_v31 = vadd.f32 %v991_v15, %v489_v29  ;;  %v546_v32 = vsel %vm533_vm1, %v1333_v25, 0.0  ;;  %v1339_v33 = vadd.f32 %v1042_v20, %v994_v24 }
 0x112   :  { %547 = vadd.xlane.f32.xlu0 %v546_v32 }
 0x113   :  { %v549_v34 = vsel %vm533_vm1, %v1335_v31, 0.0  ;;  %v1343_v35 = vadd.f32 %v1043_v27, %v997_v30  ;;  %v552_v38 = vsel %vm533_vm1, %v1339_v33, 0.0 }
 0x114   :  { %550 = vadd.xlane.f32.xlu1 %v549_v34 }
 0x115   :  { %v998_v36 = vpop.f32.mrb[16].mxu0  ;;  %v1046_v37 = vpop.f32.mrb[16].mxu1  ;;  %v555_v44 = vsel %vm533_vm1, %v1343_v35, 0.0 }
 0x116   :  { %v999_v39 = vpop.f32.mrb[17].mxu0  ;;  %v502_v40 = vpop.f32.mrb[17].mxu1  ;;  %553 = vadd.xlane.f32.xlu0 %v552_v38 }
 0x117   :  { %v1000_v41 = vadd.f32 %v999_v39, %v998_v36  ;;  %v1001_v42 = vpop.f32.mrb[18].mxu0  ;;  %v1047_v43 = vpop.f32.mrb[18].mxu1 }
 0x118   :  { %v1002_v45 = vpop.f32.mrb[19].mxu0  ;;  %v505_v46 = vpop.f32.mrb[19].mxu1  ;;  %556 = vadd.xlane.f32.xlu1 %v555_v44 }
 0x119   :  { %v1349_v48 = vadd.f32 %v1000_v41, %v502_v40  ;;  %v1003_v49 = vadd.f32 %v1002_v45, %v1001_v42 }
 0x11b   :  { %v1351_v50 = vadd.f32 %v1003_v49, %v505_v46  ;;  %v558_v51 = vsel %vm533_vm1, %v1349_v48, 0.0 }
 0x11c   :  { %559 = vadd.xlane.f32.xlu0 %v558_v51 }
 0x11d   :  { %v1004_v52 = vpop.f32.mrb[20].mxu0  ;;  %v1050_v54 = vpop.f32.mrb[20].mxu1  ;;  %v561_v55 = vsel %vm533_vm1, %v1351_v50, 0.0 }
 0x11e   :  { %v1358_v56 = vadd.f32 %v1050_v54, %v1313_v59  ;;  %v1005_v57 = vpop.f32.mrb[21].mxu0  ;;  %v518_v58 = vpop.f32.mrb[21].mxu1  ;;  %562 = vadd.xlane.f32.xlu1 %v561_v55 }
 0x11f   :  { %v1006_v60 = vadd.f32 %v1005_v57, %v1004_v52  ;;  %v1361_v61 = vadd.f32 %v1309_v47, %v518_v58  ;;  %v1007_v62 = vpop.f32.mrb[22].mxu0  ;;  %v1051_v63 = vpop.f32.mrb[22].mxu1 }
 0x120   :  { %v1364_v0 = vadd.f32 %v1051_v63, %v1315_v1  ;;  %v1008_v2 = vpop.f32.mrb[23].mxu0  ;;  %v521_v3 = vpop.f32.mrb[23].mxu1  ;;  %v576_v10 = vsel %vm533_vm1, %v1358_v56, 0.0 }
 0x121   :  { %v1009_v5 = vadd.f32 %v1008_v2, %v1007_v62  ;;  %v1367_v6 = vadd.f32 %v1311_v53, %v521_v3  ;;  %v570_v59 = vsel %vm533_vm1, %v1361_v61, 0.0  ;;  %v1371_v7 = vadd.f32 %v1046_v37, %v1006_v60 }
 0x122   :  { %571 = vadd.xlane.f32.xlu0 %v570_v59  ;;  %v579_v12 = vsel %vm533_vm1, %v1364_v0, 0.0 }
 0x123   :  { %v573_v47 = vsel %vm533_vm1, %v1367_v6, 0.0  ;;  %v1375_v9 = vadd.f32 %v1047_v43, %v1009_v5  ;;  %v564_v1 = vsel %vm533_vm1, %v1371_v7, 0.0 }
 0x124   :  { %574 = vadd.xlane.f32.xlu1 %v573_v47 }
 0x125   :  { %v567_v53 = vsel %vm533_vm1, %v1375_v9, 0.0 }
 0x126   :  { %565 = vadd.xlane.f32.xlu0 %v564_v1 }
 0x128   :  { %568 = vadd.xlane.f32.xlu1 %v567_v53 }
 0x12a   :  { %577 = vadd.xlane.f32.xlu0 %v576_v10 }
 0x12c   :  { %580 = vadd.xlane.f32.xlu1 %v579_v12 }
 0x196   :  { %v542_v13 = vpop.xlane.xlu1 %541 }
 0x197   :  { %v585_v14 = vmul.f32 0.015625, %v542_v13  ;;  %v536_v15 = vpop.xlane.xlu0 %535 }
 0x198   :  { %v583_v17 = vmul.f32 0.015625, %v536_v15 }
 0x199   :  { %v1386_v18 = vsub.f32 %v1317_v4, %v585_v14 }
 0x19a   :  { %v1389_v19 = vsub.f32 %v1319_v8, %v583_v17  ;;  %v545_v20 = vpop.xlane.xlu1 %544 }
 0x19b   :  { %v586_v21 = vmul.f32 0.015625, %v545_v20  ;;  %v539_v22 = vpop.xlane.xlu0 %538  ;;  %v617_v23 = vmul.f32 %v1386_v18, %v1386_v18 }
 0x19c   :  { %v584_v24 = vmul.f32 0.015625, %v539_v22  ;;  %v615_v28 = vmul.f32 %v1389_v19, %v1389_v19 }
 0x19d   :  { %v1394_v26 = vsub.f32 %v1321_v11, %v586_v21  ;;  %v637_v27 = vsel %vm533_vm1, %v617_v23, 0.0 }
 0x19e   :  { %v1400_v4 = vsub.f32 %v1325_v16, %v584_v24  ;;  %638 = vadd.xlane.f32.xlu0 %v637_v27  ;;  %v631_v11 = vsel %vm533_vm1, %v615_v28, 0.0 }
 0x19f   :  { %v548_v8 = vpop.xlane.xlu0 %547  ;;  %v618_v29 = vmul.f32 %v1394_v26, %v1394_v26 }
 0x1a0   :  { %v587_v30 = vmul.f32 0.015625, %v548_v8  ;;  %v616_v36 = vmul.f32 %v1400_v4, %v1400_v4 }
 0x1a1   :  { %v551_v32 = vpop.xlane.xlu1 %550  ;;  %v640_v34 = vsel %vm533_vm1, %v618_v29, 0.0 }
 0x1a2   :  { %v1409_v37 = vsub.f32 %v1333_v25, %v587_v30  ;;  %v588_v38 = vmul.f32 0.015625, %v551_v32  ;;  %641 = vadd.xlane.f32.xlu1 %v640_v34  ;;  %632 = vadd.xlane.f32.xlu0 %v631_v11  ;;  %v634_v43 = vsel %vm533_vm1, %v616_v36, 0.0 }
 0x1a3   :  { %v554_v16 = vpop.xlane.xlu0 %553 }
 0x1a4   :  { %v1412_v39 = vsub.f32 %v1335_v31, %v588_v38  ;;  %v589_v40 = vmul.f32 0.015625, %v554_v16  ;;  %v619_v41 = vmul.f32 %v1409_v37, %v1409_v37 }
 0x1a5   :  { %v557_v42 = vpop.xlane.xlu1 %556 }
 0x1a6   :  { %v1418_v44 = vsub.f32 %v1339_v33, %v589_v40  ;;  %v590_v45 = vmul.f32 0.015625, %v557_v42  ;;  %635 = vadd.xlane.f32.xlu1 %v634_v43  ;;  %v643_v25 = vsel %vm533_vm1, %v619_v41, 0.0  ;;  %v620_v46 = vmul.f32 %v1412_v39, %v1412_v39 }
 0x1a7   :  { %644 = vadd.xlane.f32.xlu0 %v643_v25 }
 0x1a8   :  { %v1424_v31 = vsub.f32 %v1343_v35, %v590_v45  ;;  %v646_v49 = vsel %vm533_vm1, %v620_v46, 0.0  ;;  %v621_v51 = vmul.f32 %v1418_v44, %v1418_v44 }
 0x1a9   :  { %v560_v52 = vpop.xlane.xlu0 %559 }
 0x1aa   :  { %v591_v54 = vmul.f32 0.015625, %v560_v52  ;;  %647 = vadd.xlane.f32.xlu1 %v646_v49  ;;  %v649_v33 = vsel %vm533_vm1, %v621_v51, 0.0  ;;  %v622_v55 = vmul.f32 %v1424_v31, %v1424_v31 }
 0x1ab   :  { %v563_v57 = vpop.xlane.xlu1 %562  ;;  %650 = vadd.xlane.f32.xlu0 %v649_v33 }
 0x1ac   :  { %v1433_v58 = vsub.f32 %v1349_v48, %v591_v54  ;;  %v592_v35 = vmul.f32 0.015625, %v563_v57  ;;  %v652_v60 = vsel %vm533_vm1, %v622_v55, 0.0 }
 0x1ae   :  { %v1437_v62 = vsub.f32 %v1351_v50, %v592_v35  ;;  %653 = vadd.xlane.f32.xlu1 %v652_v60  ;;  %v623_v63 = vmul.f32 %v1433_v58, %v1433_v58 }
 0x1af   :  { %v572_v2 = vpop.xlane.xlu0 %571 }
 0x1b0   :  { %v595_v3 = vmul.f32 0.015625, %v572_v2  ;;  %v655_v5 = vsel %vm533_vm1, %v623_v63, 0.0  ;;  %v624_v59 = vmul.f32 %v1437_v62, %v1437_v62  ;;  %v1484_v63 = vld [vmem:[%s1605_s2] ss:$0 sm:$0xff] }
 0x1b1   :  { %v575_v47 = vpop.xlane.xlu1 %574  ;;  %656 = vadd.xlane.f32.xlu0 %v655_v5 }
 0x1b2   :  { %v1445_v48 = vsub.f32 %v1361_v61, %v595_v3  ;;  %v596_v1 = vmul.f32 0.015625, %v575_v47  ;;  %v658_v50 = vsel %vm533_vm1, %v624_v59, 0.0  ;;  %v1490_v47 = vld [vmem:[%s1606_s3] ss:$0 sm:$0xff] }
 0x1b3   :  { %659 = vadd.xlane.f32.xlu1 %v658_v50  ;;  %v566_v53 = vpop.xlane.xlu0 %565 }
 0x1b4   :  { %v1449_v10 = vsub.f32 %v1367_v6, %v596_v1  ;;  %v593_v12 = vmul.f32 0.015625, %v566_v53  ;;  %v627_v13 = vmul.f32 %v1445_v48, %v1445_v48 }
 0x1b5   :  { %v569_v14 = vpop.xlane.xlu1 %568 }
 0x1b6   :  { %v1454_v15 = vsub.f32 %v1371_v7, %v593_v12  ;;  %v594_v17 = vmul.f32 0.015625, %v569_v14  ;;  %v667_v61 = vsel %vm533_vm1, %v627_v13, 0.0  ;;  %v628_v20 = vmul.f32 %v1449_v10, %v1449_v10 }
 0x1b7   :  { %668 = vadd.xlane.f32.xlu0 %v667_v61  ;;  %v578_v21 = vpop.xlane.xlu0 %577 }
 0x1b8   :  { %v1460_v22 = vsub.f32 %v1375_v9, %v594_v17  ;;  %v597_v6 = vmul.f32 0.015625, %v578_v21  ;;  %v670_v23 = vsel %vm533_vm1, %v628_v20, 0.0  ;;  %v625_v24 = vmul.f32 %v1454_v15, %v1454_v15 }
 0x1b9   :  { %v581_v27 = vpop.xlane.xlu1 %580  ;;  %671 = vadd.xlane.f32.xlu1 %v670_v23 }
 0x1ba   :  { %v1466_v7 = vsub.f32 %v1358_v56, %v597_v6  ;;  %v598_v28 = vmul.f32 0.015625, %v581_v27  ;;  %v661_v8 = vsel %vm533_vm1, %v625_v24, 0.0  ;;  %v626_v29 = vmul.f32 %v1460_v22, %v1460_v22 }
 0x1bb   :  { %662 = vadd.xlane.f32.xlu0 %v661_v8 }
 0x1bc   :  { %v1472_v9 = vsub.f32 %v1364_v0, %v598_v28  ;;  %v664_v30 = vsel %vm533_vm1, %v626_v29, 0.0  ;;  %v629_v32 = vmul.f32 %v1466_v7, %v1466_v7 }
 0x1bd   :  { %665 = vadd.xlane.f32.xlu1 %v664_v30 }
 0x1be   :  { %v673_v34 = vsel %vm533_vm1, %v629_v32, 0.0  ;;  %v630_v56 = vmul.f32 %v1472_v9, %v1472_v9 }
 0x1bf   :  { %674 = vadd.xlane.f32.xlu0 %v673_v34 }
 0x1c0   :  { %v676_v11 = vsel %vm533_vm1, %v630_v56, 0.0 }
 0x1c1   :  { %677 = vadd.xlane.f32.xlu1 %v676_v11 }
 0x22b   :  { %v639_v36 = vpop.xlane.xlu0 %638 }
 0x22c   :  { %v681_v38 = vmul.f32 0.015625, %v639_v36 }
 0x22e   :  { %v697_v16 = vadd.f32 1e-05, %v681_v38 }
 0x22f   :  { %v642_v0 = vpop.xlane.xlu1 %641  ;;  %v633_v40 = vpop.xlane.xlu0 %632 }
 0x230   :  { %1118 = vrsqrt.f32 %v697_v16  ;;  %v682_v41 = vmul.f32 0.015625, %v642_v0  ;;  %v679_v42 = vmul.f32 0.015625, %v633_v40 }
 0x232   :  { %v698_v43 = vadd.f32 1e-05, %v682_v41  ;;  %v695_v45 = vadd.f32 1e-05, %v679_v42 }
 0x233   :  { %v636_v25 = vpop.xlane.xlu1 %635 }
 0x234   :  { %1120 = vrsqrt.f32 %v698_v43  ;;  %v680_v46 = vmul.f32 0.015625, %v636_v25  ;;  %v645_v49 = vpop.xlane.xlu0 %644 }
 0x235   :  { %1122 = vrsqrt.f32 %v695_v45  ;;  %v683_v51 = vmul.f32 0.015625, %v645_v49 }
 0x236   :  { %v696_v52 = vadd.f32 1e-05, %v680_v46 }
 0x237   :  { %v699_v54 = vadd.f32 1e-05, %v683_v51  ;;  %v648_v33 = vpop.xlane.xlu1 %647 }
 0x238   :  { %1124 = vrsqrt.f32 %v696_v52  ;;  %v684_v55 = vmul.f32 0.015625, %v648_v33  ;;  %v651_v57 = vpop.xlane.xlu0 %650 }
 0x239   :  { %1126 = vrsqrt.f32 %v699_v54  ;;  %v685_v35 = vmul.f32 0.015625, %v651_v57 }
 0x23a   :  { %v1119_v60 = vpop.eup %1118  ;;  %v700_v2 = vadd.f32 1e-05, %v684_v55 }
 0x23b   :  { %v729_v3 = vmul.f32 %v1119_v60, %v1386_v18  ;;  %v701_v5 = vadd.f32 1e-05, %v685_v35  ;;  %v654_v59 = vpop.xlane.xlu1 %653 }
 0x23c   :  { %1128 = vrsqrt.f32 %v700_v2  ;;  %v686_v1 = vmul.f32 0.015625, %v654_v59 }
 0x23d   :  { %v752_v50 = vmul.f32 %v1484_v63, %v729_v3  ;;  %1130 = vrsqrt.f32 %v701_v5 }
 0x23e   :  { %v1121_v53 = vpop.eup %1120  ;;  %v702_v12 = vadd.f32 1e-05, %v686_v1  ;;  %v657_v13 = vpop.xlane.xlu0 %656 }
 0x23f   :  { %v1123_v14 = vpop.eup %1122  ;;  %v775_v17 = vadd.f32 %v1490_v47, %v752_v50  ;;  %v730_v18 = vmul.f32 %v1121_v53, %v1394_v26  ;;  %v687_v61 = vmul.f32 0.015625, %v657_v13 }
 0x240   :  { %v727_v20 = vmul.f32 %v1123_v14, %v1389_v19  ;;  %1132 = vrsqrt.f32 %v702_v12  ;;  %v660_v21 = vpop.xlane.xlu1 %659 }
 0x241   :  { %v944_v6 = vpack.c.bf16 %v775_v17, %v775_v17  ;;  %v753_v23 = vmul.f32 %v1484_v63, %v730_v18  ;;  %v703_v24 = vadd.f32 1e-05, %v687_v61  ;;  %v688_v27 = vmul.f32 0.015625, %v660_v21 }
 0x242   :  { %v1125_v28 = vpop.eup %1124  ;;  %v750_v8 = vmul.f32 %v1484_v63, %v727_v20 }
 0x243   :  { %v1127_v29 = vpop.eup %1126  ;;  %856 = vst.msk [vmem:[%s1607_s4 + $0x8] sm:$0xf] %vm853_vm2, %v944_v6  ;;  %v776_v26 = vadd.f32 %v1490_v47, %v753_v23  ;;  %v728_v19 = vmul.f32 %v1125_v28, %v1400_v4  ;;  %1134 = vrsqrt.f32 %v703_v24  ;;  %v704_v30 = vadd.f32 1e-05, %v688_v27 }
 0x244   :  { %v773_v32 = vadd.f32 %v1490_v47, %v750_v8  ;;  %v731_v34 = vmul.f32 %v1127_v29, %v1409_v37  ;;  %v669_v56 = vpop.xlane.xlu0 %668 }
 0x245   :  { %v945_v11 = vpack.c.bf16 %v776_v26, %v776_v26  ;;  %v751_v36 = vmul.f32 %v1484_v63, %v728_v19  ;;  %1136 = vrsqrt.f32 %v704_v30  ;;  %v691_v38 = vmul.f32 0.015625, %v669_v56 }
 0x246   :  { %v1129_v16 = vpop.eup %1128  ;;  %v942_v0 = vpack.c.bf16 %v773_v32, %v773_v32  ;;  %v754_v40 = vmul.f32 %v1484_v63, %v731_v34  ;;  %v672_v41 = vpop.xlane.xlu1 %671 }
 0x247   :  { %v1131_v42 = vpop.eup %1130  ;;  %857 = vst.msk [vmem:[%s1607_s4 + $0xc] sm:$0xf] %vm853_vm2, %v945_v11  ;;  %v774_v4 = vadd.f32 %v1490_v47, %v751_v36  ;;  %v732_v37 = vmul.f32 %v1129_v16, %v1412_v39  ;;  %v707_v43 = vadd.f32 1e-05, %v691_v38  ;;  %v692_v45 = vmul.f32 0.015625, %v672_v41 }
 0x248   :  { %854 = vst.msk [vmem:[%s1607_s4] sm:$0xf] %vm853_vm2, %v942_v0  ;;  %v777_v25 = vadd.f32 %v1490_v47, %v754_v40  ;;  %v733_v46 = vmul.f32 %v1131_v42, %v1418_v44  ;;  %v663_v49 = vpop.xlane.xlu0 %662 }
 0x249   :  { %v943_v51 = vpack.c.bf16 %v774_v4, %v774_v4  ;;  %v755_v52 = vmul.f32 %v1484_v63, %v732_v37  ;;  %1138 = vrsqrt.f32 %v707_v43  ;;  %v708_v54 = vadd.f32 1e-05, %v692_v45 }
 0x24a   :  { %v1133_v33 = vpop.eup %1132  ;;  %v946_v55 = vpack.c.bf16 %v777_v25, %v777_v25  ;;  %v756_v39 = vmul.f32 %v1484_v63, %v733_v46  ;;  %v689_v57 = vmul.f32 0.015625, %v663_v49  ;;  %v666_v35 = vpop.xlane.xlu1 %665 }
 0x24b   :  { %855 = vst.msk [vmem:[%s1607_s4 + $0x4] sm:$0xf] %vm853_vm2, %v943_v51  ;;  %v778_v60 = vadd.f32 %v1490_v47, %v755_v52  ;;  %v734_v44 = vmul.f32 %v1133_v33, %v1424_v31  ;;  %1140 = vrsqrt.f32 %v708_v54  ;;  %v690_v2 = vmul.f32 0.015625, %v666_v35 }
 0x24c   :  { %858 = vst.msk [vmem:[%s1607_s4 + $0x10] sm:$0xf] %vm853_vm2, %v946_v55  ;;  %v779_v3 = vadd.f32 %v1490_v47, %v756_v39  ;;  %v705_v5 = vadd.f32 1e-05, %v689_v57  ;;  %v675_v59 = vpop.xlane.xlu0 %674 }
 0x24d   :  { %v1135_v1 = vpop.eup %1134  ;;  %v947_v50 = vpack.c.bf16 %v778_v60, %v778_v60  ;;  %v757_v53 = vmul.f32 %v1484_v63, %v734_v44  ;;  %v706_v12 = vadd.f32 1e-05, %v690_v2  ;;  %v693_v13 = vmul.f32 0.015625, %v675_v59 }
 0x24e   :  { %v948_v14 = vpack.c.bf16 %v779_v3, %v779_v3  ;;  %v735_v31 = vmul.f32 %v1135_v1, %v1433_v58  ;;  %1142 = vrsqrt.f32 %v705_v5  ;;  %v678_v17 = vpop.xlane.xlu1 %677 }
 0x24f   :  { %v1137_v18 = vpop.eup %1136  ;;  %859 = vst.msk [vmem:[%s1607_s4 + $0x14] sm:$0xf] %vm853_vm2, %v947_v50  ;;  %v780_v61 = vadd.f32 %v1490_v47, %v757_v53  ;;  %1144 = vrsqrt.f32 %v706_v12  ;;  %v709_v20 = vadd.f32 1e-05, %v693_v13  ;;  %v694_v21 = vmul.f32 0.015625, %v678_v17 }
 0x250   :  { %860 = vst.msk [vmem:[%s1607_s4 + $0x18] sm:$0xf] %vm853_vm2, %v948_v14  ;;  %v758_v58 = vmul.f32 %v1484_v63, %v735_v31  ;;  %v736_v6 = vmul.f32 %v1137_v18, %v1437_v62 }
 0x251   :  { %v949_v23 = vpack.c.bf16 %v780_v61, %v780_v61  ;;  %1146 = vrsqrt.f32 %v709_v20  ;;  %v710_v24 = vadd.f32 1e-05, %v694_v21 }
 0x252   :  { %v781_v27 = vadd.f32 %v1490_v47, %v758_v58  ;;  %v759_v28 = vmul.f32 %v1484_v63, %v736_v6 }
 0x253   :  { %v1139_v8 = vpop.eup %1138  ;;  %861 = vst.msk [vmem:[%s1607_s4 + $0x1c] sm:$0xf] %vm853_vm2, %v949_v23  ;;  %1148 = vrsqrt.f32 %v710_v24 }
 0x254   :  { %v950_v29 = vpack.c.bf16 %v781_v27, %v781_v27  ;;  %v782_v26 = vadd.f32 %v1490_v47, %v759_v28  ;;  %v739_v19 = vmul.f32 %v1139_v8, %v1445_v48 }
 0x255   :  { %v1141_v62 = vpop.eup %1140 }
 0x256   :  { %862 = vst.msk [vmem:[%s1607_s4 + $0x20] sm:$0xf] %vm853_vm2, %v950_v29  ;;  %v951_v30 = vpack.c.bf16 %v782_v26, %v782_v26  ;;  %v762_v32 = vmul.f32 %v1484_v63, %v739_v19  ;;  %v740_v34 = vmul.f32 %v1141_v62, %v1449_v10 }
 0x258   :  { %v1143_v56 = vpop.eup %1142  ;;  %863 = vst.msk [vmem:[%s1607_s4 + $0x24] sm:$0xf] %vm853_vm2, %v951_v30  ;;  %v785_v11 = vadd.f32 %v1490_v47, %v762_v32  ;;  %v763_v48 = vmul.f32 %v1484_v63, %v740_v34 }
 0x259   :  { %v1145_v36 = vpop.eup %1144  ;;  %v737_v38 = vmul.f32 %v1143_v56, %v1454_v15 }
 0x25a   :  { %v954_v16 = vpack.c.bf16 %v785_v11, %v785_v11  ;;  %v786_v0 = vadd.f32 %v1490_v47, %v763_v48  ;;  %v738_v40 = vmul.f32 %v1145_v36, %v1460_v22 }
 0x25b   :  { %v1147_v41 = vpop.eup %1146  ;;  %v760_v10 = vmul.f32 %v1484_v63, %v737_v38 }
 0x25c   :  { %866 = vst.msk [vmem:[%s1607_s4 + $0x30] sm:$0xf] %vm853_vm2, %v954_v16  ;;  %v955_v42 = vpack.c.bf16 %v786_v0, %v786_v0  ;;  %v761_v4 = vmul.f32 %v1484_v63, %v738_v40  ;;  %v741_v37 = vmul.f32 %v1147_v41, %v1466_v7 }
 0x25d   :  { %v1149_v43 = vpop.eup %1148  ;;  %v783_v15 = vadd.f32 %v1490_v47, %v760_v10 }
 0x25e   :  { %867 = vst.msk [vmem:[%s1607_s4 + $0x34] sm:$0xf] %vm853_vm2, %v955_v42  ;;  %v784_v22 = vadd.f32 %v1490_v47, %v761_v4  ;;  %v764_v45 = vmul.f32 %v1484_v63, %v741_v37  ;;  %v742_v25 = vmul.f32 %v1149_v43, %v1472_v9 }
 0x25f   :  { %v952_v46 = vpack.c.bf16 %v783_v15, %v783_v15 }
 0x260   :  { %v953_v49 = vpack.c.bf16 %v784_v22, %v784_v22  ;;  %v787_v51 = vadd.f32 %v1490_v47, %v764_v45  ;;  %v765_v7 = vmul.f32 %v1484_v63, %v742_v25 }
 0x261   :  { %864 = vst.msk [vmem:[%s1607_s4 + $0x28] sm:$0xf] %vm853_vm2, %v952_v46 }
 0x262   :  { %865 = vst.msk [vmem:[%s1607_s4 + $0x2c] sm:$0xf] %vm853_vm2, %v953_v49  ;;  %v956_v52 = vpack.c.bf16 %v787_v51, %v787_v51  ;;  %v788_v54 = vadd.f32 %v1490_v47, %v765_v7 }
 0x264   :  { %868 = vst.msk [vmem:[%s1607_s4 + $0x38] sm:$0xf] %vm853_vm2, %v956_v52  ;;  %v957_v9 = vpack.c.bf16 %v788_v54, %v788_v54 }
 0x266   :  { %869 = vst.msk [vmem:[%s1607_s4 + $0x3c] sm:$0xf] %vm853_vm2, %v957_v9 }

</bundles_post_ra>
